<compile_context>
chip_gen: v7x
topology: tpu7x:2x2x1
jax: 0.10.0
libtpu: 0.0.40
codegen_flags: <defaults>
</compile_context>

<pallas_src>
import jax
import jax.numpy as jnp
from jax.experimental import pallas as pl
from jax.experimental.pallas import tpu as pltpu

NC = 3
NDF = 64
BN_EPS = 1e-5
LRELU_SLOPE = 0.2
CDT = jnp.bfloat16                      # MXU input dtype
TM_MAX = 256                            # GEMM row-tile cap (v6e/v7x MXU height)
VMEM_LIMIT = 48 * 1024 * 1024           # < v7x 64 MiB physical; plenty on v5e/v6e


def _lrelu(x):
    return jnp.where(x >= 0.0, x, LRELU_SLOPE * x)


# ----------------------------------------------------------------------------
# Pallas kernels
# ----------------------------------------------------------------------------
def _conv_kernel_l0(x_ref, w_ref, y_ref):
    """Layer 0: single full-im2col MXU dot + fused LeakyReLU (no BN)."""
    acc = jnp.dot(x_ref[...], w_ref[...], preferred_element_type=jnp.float32)
    y_ref[...] = _lrelu(acc).astype(y_ref.dtype)


def _conv_kernel_mom(x_ref, w_ref, y_ref, mom_ref):
    """Layers 1-3: full-im2col MXU dot + per-tile partial BN moments.

    x_ref : (TM, 16*Cin)  packed input rows (batch folded into M)
    w_ref : (16*Cin, K)   packed weights
    y_ref : (TM, K)       raw conv output (bf16)
    mom_ref : (1, 2, K)   per-tile [sum, sum-of-squares] in f32
    """
    acc = jnp.dot(x_ref[...], w_ref[...], preferred_element_type=jnp.float32)
    mom_ref[0, 0:1, :] = jnp.sum(acc, axis=0, keepdims=True)
    mom_ref[0, 1:2, :] = jnp.sum(acc * acc, axis=0, keepdims=True)
    y_ref[...] = acc.astype(y_ref.dtype)


def _tail_kernel(y_ref, s_ref, t_ref, w_ref, o_ref):
    """Fused, batch-blocked tail: BN3 fold + LeakyReLU + 4x4 valid conv
    (512->1, VPU reduce) + Sigmoid for a whole block of samples."""
    a = y_ref[...].astype(jnp.float32)                    # (NB, 16, 512)
    a = _lrelu(a * s_ref[...] + t_ref[...])               # (1,512) broadcasts
    prod = a * w_ref[...]                                  # (16,512) broadcasts
    r = jnp.sum(prod, axis=-1)                             # (NB, 16) lane reduce
    r = jnp.sum(r, axis=-1, keepdims=True)                 # (NB, 1)
    o_ref[...] = jax.nn.sigmoid(r)


# ----------------------------------------------------------------------------
# pallas_call wrappers
# ----------------------------------------------------------------------------
def _pick_tm(nr):
    """Largest power-of-two M tile <= TM_MAX that divides NR (NR % 16 == 0)."""
    tm = 16
    while tm * 2 <= TM_MAX and nr % (tm * 2) == 0:
        tm *= 2
    return tm


def _conv_gemm(xc, w_packed, *, with_moments):
    """Batch-folded GEMM for a 4x4/s2/p1 conv.

    xc       : (NR, Kc) bf16   full-im2col rows, NR = N * Ho * Wo
    w_packed : (Kc, K)  bf16
    Returns y (NR, K) bf16 and, if with_moments, per-tile partial moments
    (num_tiles, 2, K) f32.
    """
    NR, Kc = xc.shape
    K = w_packed.shape[-1]
    tm = _pick_tm(NR)
    num_tiles = NR // tm

    in_specs = [pl.BlockSpec((tm, Kc), lambda t: (t, 0)),
                pl.BlockSpec((Kc, K), lambda t: (0, 0))]   # weights resident
    y_shape = jax.ShapeDtypeStruct((NR, K), CDT)
    y_spec = pl.BlockSpec((tm, K), lambda t: (t, 0))

    if with_moments:
        out_shape = (y_shape, jax.ShapeDtypeStruct((num_tiles, 2, K), jnp.float32))
        out_specs = (y_spec, pl.BlockSpec((1, 2, K), lambda t: (t, 0, 0)))
        kernel = _conv_kernel_mom
    else:
        out_shape = y_shape
        out_specs = y_spec
        kernel = _conv_kernel_l0

    flops = 2 * NR * Kc * K
    bytes_accessed = (xc.size + w_packed.size + NR * K) * 2
    return pl.pallas_call(
        kernel,
        out_shape=out_shape,
        grid=(num_tiles,),
        in_specs=in_specs,
        out_specs=out_specs,
        compiler_params=pltpu.CompilerParams(
            dimension_semantics=("parallel",),
            vmem_limit_bytes=VMEM_LIMIT),
        cost_estimate=pl.CostEstimate(flops=flops, transcendentals=0,
                                      bytes_accessed=bytes_accessed),
    )(xc, w_packed)


def _tail(y3, scale, shift, w4p):
    """y3: (N, 16, 512) raw conv3 output; returns (N, 1) sigmoid scores."""
    N, M4, K = y3.shape
    nb = 1
    while nb * 2 <= min(N, 256) and N % (nb * 2) == 0:
        nb *= 2
    if nb != N and nb % 8 != 0:
        nb = N   # keep the output block (nb,1) legal (nb == full dim or mult of 8)
    grid = (N // nb,)
    return pl.pallas_call(
        _tail_kernel,
        out_shape=jax.ShapeDtypeStruct((N, 1), jnp.float32),
        grid=grid,
        in_specs=[pl.BlockSpec((nb, M4, K), lambda t: (t, 0, 0)),
                  pl.BlockSpec((1, K), lambda t: (0, 0)),
                  pl.BlockSpec((1, K), lambda t: (0, 0)),
                  pl.BlockSpec((M4, K), lambda t: (0, 0))],
        out_specs=pl.BlockSpec((nb, 1), lambda t: (t, 0)),
        compiler_params=pltpu.CompilerParams(
            dimension_semantics=("parallel",),
            vmem_limit_bytes=VMEM_LIMIT),
        cost_estimate=pl.CostEstimate(
            flops=4 * N * M4 * K, transcendentals=N,
            bytes_accessed=y3.size * 2 + (2 * K + M4 * K + N) * 4),
    )(y3, scale, shift, w4p)


# ----------------------------------------------------------------------------
# JAX glue: packed-input construction, BN fold, weight packing
# ----------------------------------------------------------------------------
def _build_im2col(a):
    """NHWC activation -> full-im2col rows for a 4x4/s2/p1 conv.

    Returns xc (N*Ho*Wo, 16*C) bf16 and (Ho, Wo). Row r = (n*Ho + oh)*Wo + ow.
    Channel index = ((dh*2 + dw)*4 + p*2 + q)*C + c with kh = 2*dh + p,
    kw = 2*dw + q (space-to-depth(2) + 2x2 window shifts folded to channels).
    This pad/space-to-depth/concat (and the upstream BN fold + LeakyReLU) is
    pure elementwise/layout work that XLA fuses into one producer fusion, so
    each activation hits HBM once, already in GEMM layout.
    """
    N, H, W, C = a.shape
    Ho, Wo = H // 2, W // 2
    ap = jnp.pad(a, ((0, 0), (1, 1), (1, 1), (0, 0)))
    xd = ap.reshape(N, Ho + 1, 2, Wo + 1, 2, C)
    xd = xd.transpose(0, 1, 3, 2, 4, 5).reshape(N, Ho + 1, Wo + 1, 4 * C)
    xc = jnp.concatenate(
        [xd[:, dh:dh + Ho, dw:dw + Wo, :] for dh in (0, 1) for dw in (0, 1)],
        axis=-1)
    return xc.reshape(N * Ho * Wo, 16 * C).astype(CDT), (Ho, Wo)


def _bn_fold(mom, count, gamma, beta):
    """mom: (num_tiles, 2, K) partial [sum, sumsq] -> folded (scale, shift)."""
    s = jnp.sum(mom[:, 0, :], axis=0)
    ss = jnp.sum(mom[:, 1, :], axis=0)
    mean = s / count
    var = jnp.maximum(ss / count - mean * mean, 0.0)    # biased var (training BN)
    scale = gamma * jax.lax.rsqrt(var + BN_EPS)
    shift = beta - mean * scale
    return scale.reshape(1, -1), shift.reshape(1, -1)


def _bn_lrelu_apply(y, scale, shift):
    # Elementwise fold + activation; XLA fuses this into the next _build_im2col.
    return _lrelu(y.astype(jnp.float32) * scale + shift).astype(CDT)


def _pack_conv_weight(w_oihw):
    """(K, C, 4, 4) OIHW -> (16*C, K) matching the _build_im2col channel order."""
    K, C, _, _ = w_oihw.shape
    w = w_oihw.reshape(K, C, 2, 2, 2, 2)        # (k, c, dh, p, dw, q)
    w = w.transpose(2, 4, 3, 5, 1, 0)           # (dh, dw, p, q, c, k)
    return w.reshape(16 * C, K).astype(CDT)


def _pack_final_weight(w_oihw):
    """(1, C, 4, 4) -> (16, C) f32; row index = h*4 + w (matches y3 rows)."""
    C = w_oihw.shape[1]
    return w_oihw[0].transpose(1, 2, 0).reshape(16, C).astype(jnp.float32)


def make_raw_params(key):
    ks = jax.random.split(key, 5)
    return {
        "w0": jax.random.normal(ks[0], (NDF, NC, 4, 4), jnp.float32) * 0.05,
        "w1": jax.random.normal(ks[1], (NDF * 2, NDF, 4, 4), jnp.float32) * 0.05,
        "w2": jax.random.normal(ks[2], (NDF * 4, NDF * 2, 4, 4), jnp.float32) * 0.05,
        "w3": jax.random.normal(ks[3], (NDF * 8, NDF * 4, 4, 4), jnp.float32) * 0.05,
        "w4": jax.random.normal(ks[4], (1, NDF * 8, 4, 4), jnp.float32) * 0.05,
        # BatchNorm2d default affine init
        "g1": jnp.ones((NDF * 2,), jnp.float32), "b1": jnp.zeros((NDF * 2,), jnp.float32),
        "g2": jnp.ones((NDF * 4,), jnp.float32), "b2": jnp.zeros((NDF * 4,), jnp.float32),
        "g3": jnp.ones((NDF * 8,), jnp.float32), "b3": jnp.zeros((NDF * 8,), jnp.float32),
    }


def pack_params(raw):
    # Weights are reshaped/transposed to the GEMM layout + bf16 ONCE, outside jit.
    p = {k: raw[k] for k in ("g1", "b1", "g2", "b2", "g3", "b3")}
    p["w0"] = _pack_conv_weight(raw["w0"])
    p["w1"] = _pack_conv_weight(raw["w1"])
    p["w2"] = _pack_conv_weight(raw["w2"])
    p["w3"] = _pack_conv_weight(raw["w3"])
    p["w4"] = _pack_final_weight(raw["w4"])
    return p


# ----------------------------------------------------------------------------
# Full _netD forward
# ----------------------------------------------------------------------------
@jax.jit
def netD_forward(params, x_nchw):
    """x_nchw: (N, 3, 64, 64) float32 -> (N,) sigmoid scores (matches _netD)."""
    x = jnp.transpose(x_nchw, (0, 2, 3, 1)).astype(CDT)         # NHWC, once
    N = x.shape[0]

    # conv0 (3->64, k4 s2 p1) + LeakyReLU (fused in kernel; no BN)
    xc, (Ho, Wo) = _build_im2col(x)
    a = _conv_gemm(xc, params["w0"], with_moments=False)         # (N*32*32, 64)
    a = a.reshape(N, Ho, Wo, NDF)

    # conv1 (64->128) + BN + LeakyReLU
    xc, (Ho, Wo) = _build_im2col(a)
    y, mom = _conv_gemm(xc, params["w1"], with_moments=True)
    s, t = _bn_fold(mom, N * Ho * Wo, params["g1"], params["b1"])
    a = _bn_lrelu_apply(y, s, t).reshape(N, Ho, Wo, NDF * 2)

    # conv2 (128->256) + BN + LeakyReLU
    xc, (Ho, Wo) = _build_im2col(a)
    y, mom = _conv_gemm(xc, params["w2"], with_moments=True)
    s, t = _bn_fold(mom, N * Ho * Wo, params["g2"], params["b2"])
    a = _bn_lrelu_apply(y, s, t).reshape(N, Ho, Wo, NDF * 4)

    # conv3 (256->512): raw GEMM + moments; BN/activation fold moves to the tail
    xc, (Ho, Wo) = _build_im2col(a)
    y3, mom = _conv_gemm(xc, params["w3"], with_moments=True)
    s3, t3 = _bn_fold(mom, N * Ho * Wo, params["g3"], params["b3"])

    # fused, batch-blocked tail: BN3 + LeakyReLU + conv4 (512->1, 4x4 valid) + Sigmoid
    y3 = y3.reshape(N, Ho * Wo, NDF * 8)                         # (N, 16, 512)
    out = _tail(y3, s3, t3, params["w4"])                        # (N, 1)
    # output.view(-1, 1).squeeze(1) -> (N,)
    return out.reshape(-1)


# ----------------------------------------------------------------------------
# Pure-JAX reference (f32, NCHW) for a correctness cross-check
# ----------------------------------------------------------------------------
def reference_forward(raw, x):
    def conv(h, w, stride, pad):
        return jax.lax.conv_general_dilated(
            h, w, (stride, stride), ((pad, pad), (pad, pad)),
            dimension_numbers=("NCHW", "OIHW", "NCHW"))

    def bn(h, g, b):
        mean = jnp.mean(h, axis=(0, 2, 3), keepdims=True)
        var = jnp.mean((h - mean) ** 2, axis=(0, 2, 3), keepdims=True)
        hn = (h - mean) * jax.lax.rsqrt(var + BN_EPS)
        return hn * g.reshape(1, -1, 1, 1) + b.reshape(1, -1, 1, 1)

    h = _lrelu(conv(x, raw["w0"], 2, 1))
    h = _lrelu(bn(conv(h, raw["w1"], 2, 1), raw["g1"], raw["b1"]))
    h = _lrelu(bn(conv(h, raw["w2"], 2, 1), raw["g2"], raw["b2"]))
    h = _lrelu(bn(conv(h, raw["w3"], 2, 1), raw["g3"], raw["b3"]))
    h = jax.nn.sigmoid(conv(h, raw["w4"], 1, 0))
    return h.reshape(-1)


if __name__ == "__main__":
    key = jax.random.PRNGKey(0)
    kparam, kx = jax.random.split(key)
    raw = make_raw_params(kparam)
    params = pack_params(raw)
    # Architecture requires 64x64 spatial input (final 4x4 valid conv); batch=2.
    x = jax.random.normal(kx, (2, NC, 64, 64), jnp.float32)

    out = jax.block_until_ready(netD_forward(params, x))
    ref = jax.block_until_ready(jax.jit(reference_forward)(raw, x))

    assert out.shape == (2,), out.shape
    assert bool(jnp.all(jnp.isfinite(out)))
    assert bool(jnp.all((out >= 0.0) & (out <= 1.0)))          # sigmoid range
    # bf16 MXU inputs / f32 accumulation vs f32 reference: loose tolerance.
    assert bool(jnp.max(jnp.abs(out - ref)) < 0.1), (out, ref)
    print("KERNEL_OK")
</pallas_src>

<mosaic_0001>
module attributes {stable_mosaic.version = 11 : i64} {
  func.func @_conv_kernel_l0(%arg0: i32, %arg1: memref<256x48xbf16, #tpu.memory_space<vmem>>, %arg2: memref<48x64xbf16, #tpu.memory_space<vmem>>, %arg3: memref<256x64xbf16, #tpu.memory_space<vmem>>) attributes {dimension_semantics = [#tpu.dimension_semantics<parallel>], iteration_bounds = array<i64: 8>, scalar_prefetch = 0 : i64, scratch_operands = 0 : i64, tpu.core_type = #tpu.core_type<tc>, window_params = [{transform_indices = @transform_0, window_bounds = array<i64: 256, 48>}, {pipeline_mode = #tpu.pipeline_mode<synchronous>, transform_indices = @transform_1, window_bounds = array<i64: 48, 64>}, {transform_indices = @transform_2, window_bounds = array<i64: 256, 64>}]} {
    %c0 = arith.constant 0 : index
    %c0_0 = arith.constant 0 : index
    %0 = vector.load %arg1[%c0, %c0_0] : memref<256x48xbf16, #tpu.memory_space<vmem>>, vector<256x48xbf16>
    %c0_1 = arith.constant 0 : index
    %c0_2 = arith.constant 0 : index
    %1 = vector.load %arg2[%c0_1, %c0_2] : memref<48x64xbf16, #tpu.memory_space<vmem>>, vector<48x64xbf16>
    %cst = arith.constant dense<0.000000e+00> : vector<256x64xf32>
    %2 = tpu.matmul %0, %1, %cst {dimension_numbers = #tpu.dot_dimension_numbers<[1], [0], [0], [1], [0, 0, 1, 1], [], []>} : vector<256x48xbf16>, vector<48x64xbf16>, vector<256x64xf32> -> vector<256x64xf32>
    %cst_3 = arith.constant 0.000000e+00 : f32
    %3 = vector.broadcast %cst_3 : f32 to vector<256x64xf32>
    %4 = arith.cmpf oge, %2, %3 : vector<256x64xf32>
    %cst_4 = arith.constant 2.000000e-01 : f32
    %5 = vector.broadcast %cst_4 : f32 to vector<256x64xf32>
    %6 = arith.mulf %5, %2 : vector<256x64xf32>
    %7 = arith.select %4, %2, %6 : vector<256x64xi1>, vector<256x64xf32>
    %8 = arith.truncf %7 : vector<256x64xf32> to vector<256x64xbf16>
    %c0_5 = arith.constant 0 : index
    %c0_6 = arith.constant 0 : index
    %9 = vector.load %arg3[%c0_5, %c0_6] : memref<256x64xbf16, #tpu.memory_space<vmem>>, vector<256x64xbf16>
    tpu.vector_store %arg3[%c0_5, %c0_6], %8 {strides = array<i32>} : memref<256x64xbf16, #tpu.memory_space<vmem>>, vector<256x64xbf16>,
    return
  }
  func.func @transform_0(%arg0: i32) -> (i32, i32) {
    %c0_i32 = arith.constant 0 : i32
    %c0_i32_0 = arith.constant 0 : i32
    return %arg0, %c0_i32 : i32, i32
  }
  func.func @transform_1(%arg0: i32) -> (i32, i32) {
    %c0_i32 = arith.constant 0 : i32
    %c0_i32_0 = arith.constant 0 : i32
    %c0_i32_1 = arith.constant 0 : i32
    return %c0_i32, %c0_i32_0 : i32, i32
  }
  func.func @transform_2(%arg0: i32) -> (i32, i32) {
    %c0_i32 = arith.constant 0 : i32
    %c0_i32_0 = arith.constant 0 : i32
    return %arg0, %c0_i32 : i32, i32
  }
}

module attributes {stable_mosaic.version = 11 : i64} {
  func.func @_conv_kernel_mom(%arg0: i32, %arg1: memref<256x1024xbf16, #tpu.memory_space<vmem>>, %arg2: memref<1024x128xbf16, #tpu.memory_space<vmem>>, %arg3: memref<256x128xbf16, #tpu.memory_space<vmem>>, %arg4: memref<1x2x128xf32, #tpu.memory_space<vmem>>) attributes {dimension_semantics = [#tpu.dimension_semantics<parallel>], iteration_bounds = array<i64: 2>, scalar_prefetch = 0 : i64, scratch_operands = 0 : i64, tpu.core_type = #tpu.core_type<tc>, window_params = [{transform_indices = @transform_0, window_bounds = array<i64: 256, 1024>}, {pipeline_mode = #tpu.pipeline_mode<synchronous>, transform_indices = @transform_1, window_bounds = array<i64: 1024, 128>}, {transform_indices = @transform_2, window_bounds = array<i64: 256, 128>}, {transform_indices = @transform_3, window_bounds = array<i64: 1, 2, 128>}]} {
    %c0 = arith.constant 0 : index
    %c0_0 = arith.constant 0 : index
    %0 = vector.load %arg1[%c0, %c0_0] : memref<256x1024xbf16, #tpu.memory_space<vmem>>, vector<256x1024xbf16>
    %c0_1 = arith.constant 0 : index
    %c0_2 = arith.constant 0 : index
    %1 = vector.load %arg2[%c0_1, %c0_2] : memref<1024x128xbf16, #tpu.memory_space<vmem>>, vector<1024x128xbf16>
    %cst = arith.constant dense<0.000000e+00> : vector<256x128xf32>
    %2 = tpu.matmul %0, %1, %cst {dimension_numbers = #tpu.dot_dimension_numbers<[1], [0], [0], [1], [0, 0, 1, 1], [], []>} : vector<256x1024xbf16>, vector<1024x128xbf16>, vector<256x128xf32> -> vector<256x128xf32>
    %cst_3 = arith.constant dense<0.000000e+00> : vector<128xf32>
    %3 = vector.multi_reduction <add>, %2, %cst_3 [0] : vector<256x128xf32> to vector<128xf32>
    %4 = vector.shape_cast %3 : vector<128xf32> to vector<1x128xf32>
    %c0_4 = arith.constant 0 : index
    %c0_5 = arith.constant 0 : index
    %c0_6 = arith.constant 0 : index
    %5 = vector.load %arg4[%c0_4, %c0_5, %c0_6] : memref<1x2x128xf32, #tpu.memory_space<vmem>>, vector<1x1x128xf32>
    %6 = vector.shape_cast %5 : vector<1x1x128xf32> to vector<1x128xf32>
    %7 = vector.shape_cast %4 : vector<1x128xf32> to vector<1x1x128xf32>
    tpu.vector_store %arg4[%c0_4, %c0_5, %c0_6], %7 {strides = array<i32>} : memref<1x2x128xf32, #tpu.memory_space<vmem>>, vector<1x1x128xf32>,
    %8 = arith.mulf %2, %2 : vector<256x128xf32>
    %cst_7 = arith.constant dense<0.000000e+00> : vector<128xf32>
    %9 = vector.multi_reduction <add>, %8, %cst_7 [0] : vector<256x128xf32> to vector<128xf32>
    %10 = vector.shape_cast %9 : vector<128xf32> to vector<1x128xf32>
    %c0_8 = arith.constant 0 : index
    %c1 = arith.constant 1 : index
    %c0_9 = arith.constant 0 : index
    %11 = vector.load %arg4[%c0_8, %c1, %c0_9] : memref<1x2x128xf32, #tpu.memory_space<vmem>>, vector<1x1x128xf32>
    %12 = vector.shape_cast %11 : vector<1x1x128xf32> to vector<1x128xf32>
    %13 = vector.shape_cast %10 : vector<1x128xf32> to vector<1x1x128xf32>
    tpu.vector_store %arg4[%c0_8, %c1, %c0_9], %13 {strides = array<i32>} : memref<1x2x128xf32, #tpu.memory_space<vmem>>, vector<1x1x128xf32>,
    %14 = arith.truncf %2 : vector<256x128xf32> to vector<256x128xbf16>
    %c0_10 = arith.constant 0 : index
    %c0_11 = arith.constant 0 : index
    %15 = vector.load %arg3[%c0_10, %c0_11] : memref<256x128xbf16, #tpu.memory_space<vmem>>, vector<256x128xbf16>
    tpu.vector_store %arg3[%c0_10, %c0_11], %14 {strides = array<i32>} : memref<256x128xbf16, #tpu.memory_space<vmem>>, vector<256x128xbf16>,
    return
  }
  func.func @transform_0(%arg0: i32) -> (i32, i32) {
    %c0_i32 = arith.constant 0 : i32
    %c0_i32_0 = arith.constant 0 : i32
    return %arg0, %c0_i32 : i32, i32
  }
  func.func @transform_1(%arg0: i32) -> (i32, i32) {
    %c0_i32 = arith.constant 0 : i32
    %c0_i32_0 = arith.constant 0 : i32
    %c0_i32_1 = arith.constant 0 : i32
    return %c0_i32, %c0_i32_0 : i32, i32
  }
  func.func @transform_2(%arg0: i32) -> (i32, i32) {
    %c0_i32 = arith.constant 0 : i32
    %c0_i32_0 = arith.constant 0 : i32
    return %arg0, %c0_i32 : i32, i32
  }
  func.func @transform_3(%arg0: i32) -> (i32, i32, i32) {
    %c0_i32 = arith.constant 0 : i32
    %c0_i32_0 = arith.constant 0 : i32
    %c0_i32_1 = arith.constant 0 : i32
    return %arg0, %c0_i32, %c0_i32_0 : i32, i32, i32
  }
}

module attributes {stable_mosaic.version = 11 : i64} {
  func.func @_conv_kernel_mom(%arg0: i32, %arg1: memref<128x2048xbf16, #tpu.memory_space<vmem>>, %arg2: memref<2048x256xbf16, #tpu.memory_space<vmem>>, %arg3: memref<128x256xbf16, #tpu.memory_space<vmem>>, %arg4: memref<1x2x256xf32, #tpu.memory_space<vmem>>) attributes {dimension_semantics = [#tpu.dimension_semantics<parallel>], iteration_bounds = array<i64: 1>, scalar_prefetch = 0 : i64, scratch_operands = 0 : i64, tpu.core_type = #tpu.core_type<tc>, window_params = [{transform_indices = @transform_0, window_bounds = array<i64: 128, 2048>}, {pipeline_mode = #tpu.pipeline_mode<synchronous>, transform_indices = @transform_1, window_bounds = array<i64: 2048, 256>}, {transform_indices = @transform_2, window_bounds = array<i64: 128, 256>}, {transform_indices = @transform_3, window_bounds = array<i64: 1, 2, 256>}]} {
    %c0 = arith.constant 0 : index
    %c0_0 = arith.constant 0 : index
    %0 = vector.load %arg1[%c0, %c0_0] : memref<128x2048xbf16, #tpu.memory_space<vmem>>, vector<128x2048xbf16>
    %c0_1 = arith.constant 0 : index
    %c0_2 = arith.constant 0 : index
    %1 = vector.load %arg2[%c0_1, %c0_2] : memref<2048x256xbf16, #tpu.memory_space<vmem>>, vector<2048x256xbf16>
    %cst = arith.constant dense<0.000000e+00> : vector<128x256xf32>
    %2 = tpu.matmul %0, %1, %cst {dimension_numbers = #tpu.dot_dimension_numbers<[1], [0], [0], [1], [0, 0, 1, 1], [], []>} : vector<128x2048xbf16>, vector<2048x256xbf16>, vector<128x256xf32> -> vector<128x256xf32>
    %cst_3 = arith.constant dense<0.000000e+00> : vector<256xf32>
    %3 = vector.multi_reduction <add>, %2, %cst_3 [0] : vector<128x256xf32> to vector<256xf32>
    %4 = vector.shape_cast %3 : vector<256xf32> to vector<1x256xf32>
    %c0_4 = arith.constant 0 : index
    %c0_5 = arith.constant 0 : index
    %c0_6 = arith.constant 0 : index
    %5 = vector.load %arg4[%c0_4, %c0_5, %c0_6] : memref<1x2x256xf32, #tpu.memory_space<vmem>>, vector<1x1x256xf32>
    %6 = vector.shape_cast %5 : vector<1x1x256xf32> to vector<1x256xf32>
    %7 = vector.shape_cast %4 : vector<1x256xf32> to vector<1x1x256xf32>
    tpu.vector_store %arg4[%c0_4, %c0_5, %c0_6], %7 {strides = array<i32>} : memref<1x2x256xf32, #tpu.memory_space<vmem>>, vector<1x1x256xf32>,
    %8 = arith.mulf %2, %2 : vector<128x256xf32>
    %cst_7 = arith.constant dense<0.000000e+00> : vector<256xf32>
    %9 = vector.multi_reduction <add>, %8, %cst_7 [0] : vector<128x256xf32> to vector<256xf32>
    %10 = vector.shape_cast %9 : vector<256xf32> to vector<1x256xf32>
    %c0_8 = arith.constant 0 : index
    %c1 = arith.constant 1 : index
    %c0_9 = arith.constant 0 : index
    %11 = vector.load %arg4[%c0_8, %c1, %c0_9] : memref<1x2x256xf32, #tpu.memory_space<vmem>>, vector<1x1x256xf32>
    %12 = vector.shape_cast %11 : vector<1x1x256xf32> to vector<1x256xf32>
    %13 = vector.shape_cast %10 : vector<1x256xf32> to vector<1x1x256xf32>
    tpu.vector_store %arg4[%c0_8, %c1, %c0_9], %13 {strides = array<i32>} : memref<1x2x256xf32, #tpu.memory_space<vmem>>, vector<1x1x256xf32>,
    %14 = arith.truncf %2 : vector<128x256xf32> to vector<128x256xbf16>
    %c0_10 = arith.constant 0 : index
    %c0_11 = arith.constant 0 : index
    %15 = vector.load %arg3[%c0_10, %c0_11] : memref<128x256xbf16, #tpu.memory_space<vmem>>, vector<128x256xbf16>
    tpu.vector_store %arg3[%c0_10, %c0_11], %14 {strides = array<i32>} : memref<128x256xbf16, #tpu.memory_space<vmem>>, vector<128x256xbf16>,
    return
  }
  func.func @transform_0(%arg0: i32) -> (i32, i32) {
    %c0_i32 = arith.constant 0 : i32
    %c0_i32_0 = arith.constant 0 : i32
    return %arg0, %c0_i32 : i32, i32
  }
  func.func @transform_1(%arg0: i32) -> (i32, i32) {
    %c0_i32 = arith.constant 0 : i32
    %c0_i32_0 = arith.constant 0 : i32
    %c0_i32_1 = arith.constant 0 : i32
    return %c0_i32, %c0_i32_0 : i32, i32
  }
  func.func @transform_2(%arg0: i32) -> (i32, i32) {
    %c0_i32 = arith.constant 0 : i32
    %c0_i32_0 = arith.constant 0 : i32
    return %arg0, %c0_i32 : i32, i32
  }
  func.func @transform_3(%arg0: i32) -> (i32, i32, i32) {
    %c0_i32 = arith.constant 0 : i32
    %c0_i32_0 = arith.constant 0 : i32
    %c0_i32_1 = arith.constant 0 : i32
    return %arg0, %c0_i32, %c0_i32_0 : i32, i32, i32
  }
}

module attributes {stable_mosaic.version = 11 : i64} {
  func.func @_conv_kernel_mom(%arg0: i32, %arg1: memref<32x4096xbf16, #tpu.memory_space<vmem>>, %arg2: memref<4096x512xbf16, #tpu.memory_space<vmem>>, %arg3: memref<32x512xbf16, #tpu.memory_space<vmem>>, %arg4: memref<1x2x512xf32, #tpu.memory_space<vmem>>) attributes {dimension_semantics = [#tpu.dimension_semantics<parallel>], iteration_bounds = array<i64: 1>, scalar_prefetch = 0 : i64, scratch_operands = 0 : i64, tpu.core_type = #tpu.core_type<tc>, window_params = [{transform_indices = @transform_0, window_bounds = array<i64: 32, 4096>}, {pipeline_mode = #tpu.pipeline_mode<synchronous>, transform_indices = @transform_1, window_bounds = array<i64: 4096, 512>}, {transform_indices = @transform_2, window_bounds = array<i64: 32, 512>}, {transform_indices = @transform_3, window_bounds = array<i64: 1, 2, 512>}]} {
    %c0 = arith.constant 0 : index
    %c0_0 = arith.constant 0 : index
    %0 = vector.load %arg1[%c0, %c0_0] : memref<32x4096xbf16, #tpu.memory_space<vmem>>, vector<32x4096xbf16>
    %c0_1 = arith.constant 0 : index
    %c0_2 = arith.constant 0 : index
    %1 = vector.load %arg2[%c0_1, %c0_2] : memref<4096x512xbf16, #tpu.memory_space<vmem>>, vector<4096x512xbf16>
    %cst = arith.constant dense<0.000000e+00> : vector<32x512xf32>
    %2 = tpu.matmul %0, %1, %cst {dimension_numbers = #tpu.dot_dimension_numbers<[1], [0], [0], [1], [0, 0, 1, 1], [], []>} : vector<32x4096xbf16>, vector<4096x512xbf16>, vector<32x512xf32> -> vector<32x512xf32>
    %cst_3 = arith.constant dense<0.000000e+00> : vector<512xf32>
    %3 = vector.multi_reduction <add>, %2, %cst_3 [0] : vector<32x512xf32> to vector<512xf32>
    %4 = vector.shape_cast %3 : vector<512xf32> to vector<1x512xf32>
    %c0_4 = arith.constant 0 : index
    %c0_5 = arith.constant 0 : index
    %c0_6 = arith.constant 0 : index
    %5 = vector.load %arg4[%c0_4, %c0_5, %c0_6] : memref<1x2x512xf32, #tpu.memory_space<vmem>>, vector<1x1x512xf32>
    %6 = vector.shape_cast %5 : vector<1x1x512xf32> to vector<1x512xf32>
    %7 = vector.shape_cast %4 : vector<1x512xf32> to vector<1x1x512xf32>
    tpu.vector_store %arg4[%c0_4, %c0_5, %c0_6], %7 {strides = array<i32>} : memref<1x2x512xf32, #tpu.memory_space<vmem>>, vector<1x1x512xf32>,
    %8 = arith.mulf %2, %2 : vector<32x512xf32>
    %cst_7 = arith.constant dense<0.000000e+00> : vector<512xf32>
    %9 = vector.multi_reduction <add>, %8, %cst_7 [0] : vector<32x512xf32> to vector<512xf32>
    %10 = vector.shape_cast %9 : vector<512xf32> to vector<1x512xf32>
    %c0_8 = arith.constant 0 : index
    %c1 = arith.constant 1 : index
    %c0_9 = arith.constant 0 : index
    %11 = vector.load %arg4[%c0_8, %c1, %c0_9] : memref<1x2x512xf32, #tpu.memory_space<vmem>>, vector<1x1x512xf32>
    %12 = vector.shape_cast %11 : vector<1x1x512xf32> to vector<1x512xf32>
    %13 = vector.shape_cast %10 : vector<1x512xf32> to vector<1x1x512xf32>
    tpu.vector_store %arg4[%c0_8, %c1, %c0_9], %13 {strides = array<i32>} : memref<1x2x512xf32, #tpu.memory_space<vmem>>, vector<1x1x512xf32>,
    %14 = arith.truncf %2 : vector<32x512xf32> to vector<32x512xbf16>
    %c0_10 = arith.constant 0 : index
    %c0_11 = arith.constant 0 : index
    %15 = vector.load %arg3[%c0_10, %c0_11] : memref<32x512xbf16, #tpu.memory_space<vmem>>, vector<32x512xbf16>
    tpu.vector_store %arg3[%c0_10, %c0_11], %14 {strides = array<i32>} : memref<32x512xbf16, #tpu.memory_space<vmem>>, vector<32x512xbf16>,
    return
  }
  func.func @transform_0(%arg0: i32) -> (i32, i32) {
    %c0_i32 = arith.constant 0 : i32
    %c0_i32_0 = arith.constant 0 : i32
    return %arg0, %c0_i32 : i32, i32
  }
  func.func @transform_1(%arg0: i32) -> (i32, i32) {
    %c0_i32 = arith.constant 0 : i32
    %c0_i32_0 = arith.constant 0 : i32
    %c0_i32_1 = arith.constant 0 : i32
    return %c0_i32, %c0_i32_0 : i32, i32
  }
  func.func @transform_2(%arg0: i32) -> (i32, i32) {
    %c0_i32 = arith.constant 0 : i32
    %c0_i32_0 = arith.constant 0 : i32
    return %arg0, %c0_i32 : i32, i32
  }
  func.func @transform_3(%arg0: i32) -> (i32, i32, i32) {
    %c0_i32 = arith.constant 0 : i32
    %c0_i32_0 = arith.constant 0 : i32
    %c0_i32_1 = arith.constant 0 : i32
    return %arg0, %c0_i32, %c0_i32_0 : i32, i32, i32
  }
}

module attributes {stable_mosaic.version = 11 : i64} {
  func.func @_tail_kernel(%arg0: i32, %arg1: memref<2x16x512xbf16, #tpu.memory_space<vmem>>, %arg2: memref<1x512xf32, #tpu.memory_space<vmem>>, %arg3: memref<1x512xf32, #tpu.memory_space<vmem>>, %arg4: memref<16x512xf32, #tpu.memory_space<vmem>>, %arg5: memref<2x1xf32, #tpu.memory_space<vmem>>) attributes {dimension_semantics = [#tpu.dimension_semantics<parallel>], iteration_bounds = array<i64: 1>, scalar_prefetch = 0 : i64, scratch_operands = 0 : i64, tpu.core_type = #tpu.core_type<tc>, window_params = [{transform_indices = @transform_0, window_bounds = array<i64: 2, 16, 512>}, {pipeline_mode = #tpu.pipeline_mode<synchronous>, transform_indices = @transform_1, window_bounds = array<i64: 1, 512>}, {pipeline_mode = #tpu.pipeline_mode<synchronous>, transform_indices = @transform_2, window_bounds = array<i64: 1, 512>}, {pipeline_mode = #tpu.pipeline_mode<synchronous>, transform_indices = @transform_3, window_bounds = array<i64: 16, 512>}, {transform_indices = @transform_4, window_bounds = array<i64: 2, 1>}]} {
    %c0 = arith.constant 0 : index
    %c0_0 = arith.constant 0 : index
    %c0_1 = arith.constant 0 : index
    %0 = vector.load %arg1[%c0, %c0_0, %c0_1] : memref<2x16x512xbf16, #tpu.memory_space<vmem>>, vector<2x16x512xbf16>
    %1 = arith.extf %0 : vector<2x16x512xbf16> to vector<2x16x512xf32>
    %c0_2 = arith.constant 0 : index
    %c0_3 = arith.constant 0 : index
    %2 = vector.load %arg2[%c0_2, %c0_3] : memref<1x512xf32, #tpu.memory_space<vmem>>, vector<1x512xf32>
    %3 = vector.shape_cast %2 : vector<1x512xf32> to vector<1x1x512xf32>
    %4 = vector.broadcast %3 : vector<1x1x512xf32> to vector<2x16x512xf32>
    %5 = arith.mulf %1, %4 : vector<2x16x512xf32>
    %c0_4 = arith.constant 0 : index
    %c0_5 = arith.constant 0 : index
    %6 = vector.load %arg3[%c0_4, %c0_5] : memref<1x512xf32, #tpu.memory_space<vmem>>, vector<1x512xf32>
    %7 = vector.shape_cast %6 : vector<1x512xf32> to vector<1x1x512xf32>
    %8 = vector.broadcast %7 : vector<1x1x512xf32> to vector<2x16x512xf32>
    %9 = arith.addf %5, %8 : vector<2x16x512xf32>
    %cst = arith.constant 0.000000e+00 : f32
    %10 = vector.broadcast %cst : f32 to vector<2x16x512xf32>
    %11 = arith.cmpf oge, %9, %10 : vector<2x16x512xf32>
    %cst_6 = arith.constant 2.000000e-01 : f32
    %12 = vector.broadcast %cst_6 : f32 to vector<2x16x512xf32>
    %13 = arith.mulf %12, %9 : vector<2x16x512xf32>
    %14 = arith.select %11, %9, %13 : vector<2x16x512xi1>, vector<2x16x512xf32>
    %c0_7 = arith.constant 0 : index
    %c0_8 = arith.constant 0 : index
    %15 = vector.load %arg4[%c0_7, %c0_8] : memref<16x512xf32, #tpu.memory_space<vmem>>, vector<16x512xf32>
    %16 = vector.shape_cast %15 : vector<16x512xf32> to vector<1x16x512xf32>
    %17 = vector.broadcast %16 : vector<1x16x512xf32> to vector<2x16x512xf32>
    %18 = arith.mulf %14, %17 : vector<2x16x512xf32>
    %cst_9 = arith.constant dense<0.000000e+00> : vector<2x16xf32>
    %19 = vector.multi_reduction <add>, %18, %cst_9 [2] : vector<2x16x512xf32> to vector<2x16xf32>
    %cst_10 = arith.constant dense<0.000000e+00> : vector<2xf32>
    %20 = vector.multi_reduction <add>, %19, %cst_10 [1] : vector<2x16xf32> to vector<2xf32>
    %21 = vector.shape_cast %20 : vector<2xf32> to vector<2x1xf32>
    %22 = arith.negf %21 : vector<2x1xf32>
    %23 = math.exp %22 : vector<2x1xf32>
    %cst_11 = arith.constant 1.000000e+00 : f32
    %24 = vector.broadcast %cst_11 : f32 to vector<2x1xf32>
    %25 = arith.addf %24, %23 : vector<2x1xf32>
    %26 = arith.divf %24, %25 : vector<2x1xf32>
    %c0_12 = arith.constant 0 : index
    %c0_13 = arith.constant 0 : index
    %27 = vector.load %arg5[%c0_12, %c0_13] : memref<2x1xf32, #tpu.memory_space<vmem>>, vector<2x1xf32>
    tpu.vector_store %arg5[%c0_12, %c0_13], %26 {strides = array<i32>} : memref<2x1xf32, #tpu.memory_space<vmem>>, vector<2x1xf32>,
    return
  }
  func.func @transform_0(%arg0: i32) -> (i32, i32, i32) {
    %c0_i32 = arith.constant 0 : i32
    %c0_i32_0 = arith.constant 0 : i32
    %c0_i32_1 = arith.constant 0 : i32
    return %arg0, %c0_i32, %c0_i32_0 : i32, i32, i32
  }
  func.func @transform_1(%arg0: i32) -> (i32, i32) {
    %c0_i32 = arith.constant 0 : i32
    %c0_i32_0 = arith.constant 0 : i32
    %c0_i32_1 = arith.constant 0 : i32
    return %c0_i32, %c0_i32_0 : i32, i32
  }
  func.func @transform_2(%arg0: i32) -> (i32, i32) {
    %c0_i32 = arith.constant 0 : i32
    %c0_i32_0 = arith.constant 0 : i32
    %c0_i32_1 = arith.constant 0 : i32
    return %c0_i32, %c0_i32_0 : i32, i32
  }
  func.func @transform_3(%arg0: i32) -> (i32, i32) {
    %c0_i32 = arith.constant 0 : i32
    %c0_i32_0 = arith.constant 0 : i32
    %c0_i32_1 = arith.constant 0 : i32
    return %c0_i32, %c0_i32_0 : i32, i32
  }
  func.func @transform_4(%arg0: i32) -> (i32, i32) {
    %c0_i32 = arith.constant 0 : i32
    %c0_i32_0 = arith.constant 0 : i32
    return %arg0, %c0_i32 : i32, i32
  }
}

</mosaic_0001>

<bundles_post_ra>
// kernel: netD_forward.5
= control target key start
LH: loop header
LB: loop body
LE: loop exit
PB: predicated region body
PF: predicated region fallthrough
CT: control target
= control target key end

     0   :  { %s1030_s9 = smov 0   ;;  %s1164_s0 = inlined_call_operand.vmem [shape: bf16[2048,48], index: 0, kind: input, shape index: {}]   ;;  %s1165_s1 = inlined_call_operand.vmem [shape: bf16[48,64], index: 1, kind: input, shape index: {}]   ;;  %s1166_s2 = inlined_call_operand.vmem [shape: bf16[2048,64], index: 2, kind: output, shape index: {}]  }
   0x1 LB: > { %s807_s10 = sadd.s32 4294967295, %s1013_s9   ;;  %p811_p0 = scmp.ge.s32.totalorder %s1013_s9, 1  ;;  %s1013_s9 = sphi %s1030_s9, %s12_s9  }
   0x2   : > { %p113_p1 = scmp.lt.s32.totalorder %s1013_s9, 9 }
   0x4   : > { %p114_p2 = pnand %p811_p0, %p113_p1 }
   0x5   : > { %v988_v0 = vld [vmem:[%s1165_s1] sm:$0xff] (!%p114_p2)   ;;  %s812_s13 = sshll.u32 (!%p114_p2), %s807_s10, 5  ;;  %v989_v1 = vld [vmem:[%s1165_s1 + $0x8] sm:$0xff] (!%p114_p2)   ;;  %v990_v2 = vld [vmem:[%s1165_s1 + $0x10] sm:$0xff] (!%p114_p2)   ;;  %vm284_vm0 = vcmask (!%p114_p2), 392192   ;;  %vm718_vm3 = vcmask (!%p114_p2), 519168  }
   0x6   : > { %117 = sbr.rel (%p114_p2) target bundleno = 269 (0x10d), region = 28  ;;  %p136_p3 = scmp.lt.s32.totalorder (!%p114_p2), %s812_s13, 255  ;;  %936 = vmatprep.subr.bf16.mxu0 (!%p114_p2), %v988_v0  ;;  %974 = vmatprep.subr.bf16.mxu1 (!%p114_p2), %v988_v0 }
   0x7   : > { %937 = vmatpush3.bf16.msra.mxu0 (!%p114_p2), %v988_v0  ;;  %977 = vmatpush3.bf16.msra.mxu1 (!%p114_p2), %v988_v0 }
   0x8   : > { %938 = vmatprep.subr.bf16.mxu0 (!%p114_p2), %v989_v1  ;;  %975 = vmatprep.subr.bf16.mxu1 (!%p114_p2), %v989_v1 }
   0xb   : > { %939 = vmatpush3.bf16.msra.mxu0 (!%p114_p2), %v989_v1  ;;  %978 = vmatpush3.bf16.msra.mxu1 (!%p114_p2), %v989_v1 }
   0xc   : > { %940 = vmatprep.subr.bf16.mxu0 (!%p114_p2), %v990_v2  ;;  %976 = vmatprep.subr.bf16.mxu1 (!%p114_p2), %v990_v2 }
   0xd   : > { %s1168_s13 = smov (!%p136_p3, %s812_s13), 255 }
   0xe   : > { %s813_s18 = sshll.u32 %s1168_s13, 2 }
   0xf   : > { %s1055_s21 = scalar_lea.vmem %s1164_s0, %s813_s18  ;;  %941 = vmatpush3.bf16.msra.mxu0 %v990_v2  ;;  %979 = vmatpush3.bf16.msra.mxu1 %v990_v2  ;;  %s1094_s24 = scalar_lea.vmem %s1166_s2, %s813_s18 }
  0x10   : > { %v991_v3 = vld [vmem:[%s1055_s21] sm:$0xff]   ;;  %v993_v5 = vld [vmem:[%s1055_s21 + $0x8] sm:$0xff]   ;;  %v995_v7 = vld [vmem:[%s1055_s21 + $0x10] sm:$0xff]  }
  0x11   : > { %v992_v4 = vld [vmem:[%s1055_s21 + $0x40] sm:$0xff]   ;;  %942 = vmatprep.mubr.msk.bf16.mxu0 %vm284_vm0, %v991_v3  ;;  %v994_v6 = vld [vmem:[%s1055_s21 + $0x48] sm:$0xff]   ;;  %v996_v8 = vld [vmem:[%s1055_s21 + $0x50] sm:$0xff]  }
  0x12   : > { %958 = vmatprep.mubr.msk.bf16.mxu1 %vm284_vm0, %v992_v4  ;;  %943 = vmatmul.mubr.msk.bf16.vlgmr.msra.gmra.mrb[0].mxu0 %vm284_vm0, %v993_v5  ;;  %v997_v9 = vld [vmem:[%s1055_s21 + $0x18] sm:$0xff]   ;;  %v999_v11 = vld [vmem:[%s1055_s21 + $0x20] sm:$0xff]   ;;  %v1001_v13 = vld [vmem:[%s1055_s21 + $0x28] sm:$0xff]  }
  0x13   : > { %959 = vmatmul.mubr.msk.bf16.vlgmr.msra.gmra.mrb[0].mxu1 %vm284_vm0, %v994_v6  ;;  %946 = vmatprep.mubr.msk.bf16.mxu0 %vm284_vm0, %v995_v7  ;;  %v998_v10 = vld [vmem:[%s1055_s21 + $0x58] sm:$0xff]   ;;  %v1000_v12 = vld [vmem:[%s1055_s21 + $0x60] sm:$0xff]   ;;  %v1002_v14 = vld [vmem:[%s1055_s21 + $0x68] sm:$0xff]  }
  0x14   : > { %962 = vmatprep.mubr.msk.bf16.mxu1 %vm284_vm0, %v996_v8  ;;  %v1003_v15 = vld [vmem:[%s1055_s21 + $0x30] sm:$0xff]   ;;  %v1005_v17 = vld [vmem:[%s1055_s21 + $0x38] sm:$0xff]  }
  0x15   : > { %v1004_v16 = vld [vmem:[%s1055_s21 + $0x70] sm:$0xff]   ;;  %v1006_v18 = vld [vmem:[%s1055_s21 + $0x78] sm:$0xff]  }
  0x1a   : > { %947 = vmatmul.mubr.msk.bf16.gmra.mrb[4].mxu0 %vm284_vm0, %v997_v9 }
  0x1b   : > { %963 = vmatmul.mubr.msk.bf16.gmra.mrb[4].mxu1 %vm284_vm0, %v998_v10  ;;  %950 = vmatprep.mubr.msk.bf16.mxu0 %vm284_vm0, %v999_v11 }
  0x1c   : > { %966 = vmatprep.mubr.msk.bf16.mxu1 %vm284_vm0, %v1000_v12 }
  0x22   : > { %951 = vmatmul.mubr.msk.bf16.gmra.mrb[8].mxu0 %vm284_vm0, %v1001_v13 }
  0x23   : > { %967 = vmatmul.mubr.msk.bf16.gmra.mrb[8].mxu1 %vm284_vm0, %v1002_v14  ;;  %954 = vmatprep.mubr.msk.bf16.mxu0 %vm284_vm0, %v1003_v15 }
  0x24   : > { %970 = vmatprep.mubr.msk.bf16.mxu1 %vm284_vm0, %v1004_v16 }
  0x2a   : > { %955 = vmatmul.mubr.msk.bf16.gmra.mrb[12].mxu0 %vm284_vm0, %v1005_v17 }
  0x2b   : > { %971 = vmatmul.mubr.msk.bf16.gmra.mrb[12].mxu1 %vm284_vm0, %v1006_v18 }
  0xe5   : > { %v944_v19 = vpop.f32.mrb[0].mxu0 }
  0xe6   : > { %v960_v20 = vpop.f32.mrb[0].mxu1  ;;  %vm496_vm1 = vcmp.ge.f32.partialorder %v944_v19, 0.0  ;;  %v528_v21 = vmul.f32 0.2, %v944_v19  ;;  %v367_v23 = vpop.f32.mrb[1].mxu0 }
  0xe7   : > { %vm512_vm2 = vcmp.ge.f32.partialorder %v960_v20, 0.0  ;;  %v544_v22 = vmul.f32 0.2, %v960_v20  ;;  %v431_v24 = vpop.f32.mrb[1].mxu1  ;;  %vm494_vm4 = vcmp.ge.f32.partialorder %v367_v23, 0.0  ;;  %v945_v28 = vpop.f32.mrb[2].mxu0 }
  0xe8   : > { %v560_v25 = vsel %vm496_vm1, %v944_v19, %v528_v21  ;;  %v526_v27 = vmul.f32 0.2, %v367_v23  ;;  %v961_v29 = vpop.f32.mrb[2].mxu1  ;;  %vm510_vm5 = vcmp.ge.f32.partialorder %v431_v24, 0.0  ;;  %v542_v32 = vmul.f32 0.2, %v431_v24 }
  0xe9   : > { %v576_v26 = vsel %vm512_vm2, %v960_v20, %v544_v22  ;;  %v887_v30 = vpack.c.bf16 %v560_v25, %v560_v25  ;;  %v370_v33 = vpop.f32.mrb[3].mxu0  ;;  %v434_v34 = vpop.f32.mrb[3].mxu1  ;;  %vm497_vm6 = vcmp.ge.f32.partialorder %v945_v28, 0.0  ;;  %v529_v36 = vmul.f32 0.2, %v945_v28 }
  0xea   : > { %v903_v31 = vpack.c.bf16 %v576_v26, %v576_v26  ;;  %v558_v35 = vsel %vm494_vm4, %v367_v23, %v526_v27  ;;  %vm513_vm7 = vcmp.ge.f32.partialorder %v961_v29, 0.0  ;;  %v574_v38 = vsel %vm510_vm5, %v431_v24, %v542_v32 }
  0xeb   : > { %721 = vst.msk [vmem:[%s1094_s24 + $0x8] sm:$0xf] %vm718_vm3, %v887_v30  ;;  %v885_v37 = vpack.c.bf16 %v558_v35, %v558_v35  ;;  %v545_v39 = vmul.f32 0.2, %v961_v29  ;;  %vm495_vm8 = vcmp.ge.f32.partialorder %v370_v33, 0.0  ;;  %v901_v40 = vpack.c.bf16 %v574_v38, %v574_v38 }
  0xec   : > { %737 = vst.msk [vmem:[%s1094_s24 + $0x48] sm:$0xf] %vm718_vm3, %v903_v31  ;;  %v561_v41 = vsel %vm497_vm6, %v945_v28, %v529_v36  ;;  %v527_v42 = vmul.f32 0.2, %v370_v33  ;;  %vm511_vm9 = vcmp.ge.f32.partialorder %v434_v34, 0.0 }
  0xed   : > { %719 = vst.msk [vmem:[%s1094_s24] sm:$0xf] %vm718_vm3, %v885_v37  ;;  %v888_v43 = vpack.c.bf16 %v561_v41, %v561_v41  ;;  %v577_v44 = vsel %vm513_vm7, %v961_v29, %v545_v39  ;;  %v543_v45 = vmul.f32 0.2, %v434_v34  ;;  %v948_v46 = vpop.f32.mrb[4].mxu0 }
  0xee   : > { %v964_v47 = vpop.f32.mrb[4].mxu1  ;;  %735 = vst.msk [vmem:[%s1094_s24 + $0x40] sm:$0xf] %vm718_vm3, %v901_v40  ;;  %v904_v48 = vpack.c.bf16 %v577_v44, %v577_v44  ;;  %v559_v49 = vsel %vm495_vm8, %v370_v33, %v527_v42  ;;  %vm500_vm10 = vcmp.ge.f32.partialorder %v948_v46, 0.0  ;;  %v532_v50 = vmul.f32 0.2, %v948_v46 }
  0xef   : > { %v383_v51 = vpop.f32.mrb[5].mxu0  ;;  %v447_v52 = vpop.f32.mrb[5].mxu1  ;;  %722 = vst.msk [vmem:[%s1094_s24 + $0xc] sm:$0xf] %vm718_vm3, %v888_v43  ;;  %v886_v53 = vpack.c.bf16 %v559_v49, %v559_v49  ;;  %v575_v54 = vsel %vm511_vm9, %v434_v34, %v543_v45  ;;  %vm516_vm11 = vcmp.ge.f32.partialorder %v964_v47, 0.0 }
  0xf0   : > { %v548_v55 = vmul.f32 0.2, %v964_v47  ;;  %v949_v56 = vpop.f32.mrb[6].mxu0  ;;  %v965_v57 = vpop.f32.mrb[6].mxu1  ;;  %738 = vst.msk [vmem:[%s1094_s24 + $0x4c] sm:$0xf] %vm718_vm3, %v904_v48  ;;  %v902_v58 = vpack.c.bf16 %v575_v54, %v575_v54  ;;  %v564_v59 = vsel %vm500_vm10, %v948_v46, %v532_v50 }
  0xf1   : > { %vm498_vm12 = vcmp.ge.f32.partialorder %v383_v51, 0.0  ;;  %v530_v60 = vmul.f32 0.2, %v383_v51  ;;  %v386_v61 = vpop.f32.mrb[7].mxu0  ;;  %v450_v62 = vpop.f32.mrb[7].mxu1  ;;  %v891_v63 = vpack.c.bf16 %v564_v59, %v564_v59  ;;  %vm514_vm13 = vcmp.ge.f32.partialorder %v447_v52, 0.0 }
  0xf2   : > { %720 = vst.msk [vmem:[%s1094_s24 + $0x4] sm:$0xf] %vm718_vm3, %v886_v53  ;;  %v580_v0 = vsel %vm516_vm11, %v964_v47, %v548_v55  ;;  %v546_v1 = vmul.f32 0.2, %v447_v52  ;;  %736 = vst.msk [vmem:[%s1094_s24 + $0x44] sm:$0xf] %vm718_vm3, %v902_v58 }
  0xf3   : > { %v907_v2 = vpack.c.bf16 %v580_v0, %v580_v0  ;;  %v562_v3 = vsel %vm498_vm12, %v383_v51, %v530_v60  ;;  %vm501_vm14 = vcmp.ge.f32.partialorder %v949_v56, 0.0  ;;  %v533_v4 = vmul.f32 0.2, %v949_v56  ;;  %725 = vst.msk [vmem:[%s1094_s24 + $0x18] sm:$0xf] %vm718_vm3, %v891_v63 }
  0xf4   : > { %v889_v5 = vpack.c.bf16 %v562_v3, %v562_v3  ;;  %v578_v6 = vsel %vm514_vm13, %v447_v52, %v546_v1  ;;  %vm517_vm15 = vcmp.ge.f32.partialorder %v965_v57, 0.0  ;;  %v549_v7 = vmul.f32 0.2, %v965_v57 }
  0xf5   : > { %741 = vst.msk [vmem:[%s1094_s24 + $0x58] sm:$0xf] %vm718_vm3, %v907_v2  ;;  %v905_v8 = vpack.c.bf16 %v578_v6, %v578_v6  ;;  %v565_v9 = vsel %vm501_vm14, %v949_v56, %v533_v4  ;;  %vm499_vm0 = vcmp.ge.f32.partialorder %v386_v61, 0.0  ;;  %v531_v10 = vmul.f32 0.2, %v386_v61  ;;  %v952_v14 = vpop.f32.mrb[8].mxu0 }
  0xf6   : > { %723 = vst.msk [vmem:[%s1094_s24 + $0x10] sm:$0xf] %vm718_vm3, %v889_v5  ;;  %v892_v11 = vpack.c.bf16 %v565_v9, %v565_v9  ;;  %v581_v12 = vsel %vm517_vm15, %v965_v57, %v549_v7  ;;  %vm515_vm1 = vcmp.ge.f32.partialorder %v450_v62, 0.0  ;;  %v547_v13 = vmul.f32 0.2, %v450_v62  ;;  %v968_v15 = vpop.f32.mrb[8].mxu1 }
  0xf7   : > { %739 = vst.msk [vmem:[%s1094_s24 + $0x50] sm:$0xf] %vm718_vm3, %v905_v8  ;;  %v908_v16 = vpack.c.bf16 %v581_v12, %v581_v12  ;;  %v563_v17 = vsel %vm499_vm0, %v386_v61, %v531_v10  ;;  %vm504_vm2 = vcmp.ge.f32.partialorder %v952_v14, 0.0  ;;  %v536_v18 = vmul.f32 0.2, %v952_v14  ;;  %v399_v19 = vpop.f32.mrb[9].mxu0 }
  0xf8   : > { %v463_v20 = vpop.f32.mrb[9].mxu1  ;;  %726 = vst.msk [vmem:[%s1094_s24 + $0x1c] sm:$0xf] %vm718_vm3, %v892_v11  ;;  %v890_v21 = vpack.c.bf16 %v563_v17, %v563_v17  ;;  %v579_v22 = vsel %vm515_vm1, %v450_v62, %v547_v13  ;;  %vm520_vm4 = vcmp.ge.f32.partialorder %v968_v15, 0.0  ;;  %v552_v23 = vmul.f32 0.2, %v968_v15 }
  0xf9   : > { %v953_v24 = vpop.f32.mrb[10].mxu0  ;;  %v969_v25 = vpop.f32.mrb[10].mxu1  ;;  %742 = vst.msk [vmem:[%s1094_s24 + $0x5c] sm:$0xf] %vm718_vm3, %v908_v16  ;;  %v906_v26 = vpack.c.bf16 %v579_v22, %v579_v22  ;;  %v568_v27 = vsel %vm504_vm2, %v952_v14, %v536_v18  ;;  %vm502_vm5 = vcmp.ge.f32.partialorder %v399_v19, 0.0  ;;  %vm518_vm6 = vcmp.ge.f32.partialorder %v463_v20, 0.0 }
  0xfa   : > { %v534_v28 = vmul.f32 0.2, %v399_v19  ;;  %v402_v29 = vpop.f32.mrb[11].mxu0  ;;  %v466_v30 = vpop.f32.mrb[11].mxu1  ;;  %724 = vst.msk [vmem:[%s1094_s24 + $0x14] sm:$0xf] %vm718_vm3, %v890_v21  ;;  %v895_v31 = vpack.c.bf16 %v568_v27, %v568_v27  ;;  %v584_v32 = vsel %vm520_vm4, %v968_v15, %v552_v23 }
  0xfb   : > { %v550_v33 = vmul.f32 0.2, %v463_v20  ;;  %740 = vst.msk [vmem:[%s1094_s24 + $0x54] sm:$0xf] %vm718_vm3, %v906_v26  ;;  %v911_v34 = vpack.c.bf16 %v584_v32, %v584_v32  ;;  %vm505_vm7 = vcmp.ge.f32.partialorder %v953_v24, 0.0  ;;  %vm521_vm8 = vcmp.ge.f32.partialorder %v969_v25, 0.0 }
  0xfc   : > { %v566_v35 = vsel %vm502_vm5, %v399_v19, %v534_v28  ;;  %v537_v36 = vmul.f32 0.2, %v953_v24  ;;  %729 = vst.msk [vmem:[%s1094_s24 + $0x28] sm:$0xf] %vm718_vm3, %v895_v31  ;;  %v553_v39 = vmul.f32 0.2, %v969_v25 }
  0xfd   : > { %v893_v37 = vpack.c.bf16 %v566_v35, %v566_v35  ;;  %v582_v38 = vsel %vm518_vm6, %v463_v20, %v550_v33  ;;  %745 = vst.msk [vmem:[%s1094_s24 + $0x68] sm:$0xf] %vm718_vm3, %v911_v34  ;;  %vm503_vm9 = vcmp.ge.f32.partialorder %v402_v29, 0.0  ;;  %v535_v42 = vmul.f32 0.2, %v402_v29  ;;  %v956_v46 = vpop.f32.mrb[12].mxu0 }
  0xfe   : > { %v909_v40 = vpack.c.bf16 %v582_v38, %v582_v38  ;;  %v569_v41 = vsel %vm505_vm7, %v953_v24, %v537_v36  ;;  %v585_v44 = vsel %vm521_vm8, %v969_v25, %v553_v39  ;;  %vm519_vm10 = vcmp.ge.f32.partialorder %v466_v30, 0.0  ;;  %v972_v47 = vpop.f32.mrb[12].mxu1  ;;  %v415_v51 = vpop.f32.mrb[13].mxu0 }
  0xff   : > { %727 = vst.msk [vmem:[%s1094_s24 + $0x20] sm:$0xf] %vm718_vm3, %v893_v37  ;;  %v896_v43 = vpack.c.bf16 %v569_v41, %v569_v41  ;;  %v551_v45 = vmul.f32 0.2, %v466_v30  ;;  %v912_v48 = vpack.c.bf16 %v585_v44, %v585_v44  ;;  %v567_v49 = vsel %vm503_vm9, %v402_v29, %v535_v42  ;;  %v479_v52 = vpop.f32.mrb[13].mxu1  ;;  %v957_v56 = vpop.f32.mrb[14].mxu0 }
 0x100   : > { %743 = vst.msk [vmem:[%s1094_s24 + $0x60] sm:$0xf] %vm718_vm3, %v909_v40  ;;  %vm508_vm11 = vcmp.ge.f32.partialorder %v956_v46, 0.0  ;;  %v540_v50 = vmul.f32 0.2, %v956_v46  ;;  %v894_v53 = vpack.c.bf16 %v567_v49, %v567_v49  ;;  %vm524_vm12 = vcmp.ge.f32.partialorder %v972_v47, 0.0 }
 0x101   : > { %730 = vst.msk [vmem:[%s1094_s24 + $0x2c] sm:$0xf] %vm718_vm3, %v896_v43  ;;  %v583_v54 = vsel %vm519_vm10, %v466_v30, %v551_v45  ;;  %v556_v55 = vmul.f32 0.2, %v972_v47  ;;  %v973_v57 = vpop.f32.mrb[14].mxu1  ;;  %vm506_vm13 = vcmp.ge.f32.partialorder %v415_v51, 0.0 }
 0x102   : > { %746 = vst.msk [vmem:[%s1094_s24 + $0x6c] sm:$0xf] %vm718_vm3, %v912_v48  ;;  %v910_v58 = vpack.c.bf16 %v583_v54, %v583_v54  ;;  %v572_v59 = vsel %vm508_vm11, %v956_v46, %v540_v50  ;;  %v538_v60 = vmul.f32 0.2, %v415_v51  ;;  %v418_v61 = vpop.f32.mrb[15].mxu0  ;;  %v482_v62 = vpop.f32.mrb[15].mxu1 }
 0x103   : > { %728 = vst.msk [vmem:[%s1094_s24 + $0x24] sm:$0xf] %vm718_vm3, %v894_v53  ;;  %v899_v63 = vpack.c.bf16 %v572_v59, %v572_v59  ;;  %v588_v0 = vsel %vm524_vm12, %v972_v47, %v556_v55  ;;  %vm522_vm14 = vcmp.ge.f32.partialorder %v479_v52, 0.0  ;;  %v554_v1 = vmul.f32 0.2, %v479_v52 }
 0x104   : > { %744 = vst.msk [vmem:[%s1094_s24 + $0x64] sm:$0xf] %vm718_vm3, %v910_v58  ;;  %v915_v2 = vpack.c.bf16 %v588_v0, %v588_v0  ;;  %v570_v3 = vsel %vm506_vm13, %v415_v51, %v538_v60  ;;  %vm509_vm15 = vcmp.ge.f32.partialorder %v957_v56, 0.0  ;;  %v541_v4 = vmul.f32 0.2, %v957_v56 }
 0x105   : > { %733 = vst.msk [vmem:[%s1094_s24 + $0x38] sm:$0xf] %vm718_vm3, %v899_v63  ;;  %v897_v5 = vpack.c.bf16 %v570_v3, %v570_v3  ;;  %v586_v6 = vsel %vm522_vm14, %v479_v52, %v554_v1  ;;  %vm525_vm0 = vcmp.ge.f32.partialorder %v973_v57, 0.0  ;;  %v557_v7 = vmul.f32 0.2, %v973_v57 }
 0x106   : > { %749 = vst.msk [vmem:[%s1094_s24 + $0x78] sm:$0xf] %vm718_vm3, %v915_v2  ;;  %v913_v8 = vpack.c.bf16 %v586_v6, %v586_v6  ;;  %v573_v9 = vsel %vm509_vm15, %v957_v56, %v541_v4  ;;  %vm507_vm1 = vcmp.ge.f32.partialorder %v418_v61, 0.0  ;;  %v539_v10 = vmul.f32 0.2, %v418_v61 }
 0x107   : > { %731 = vst.msk [vmem:[%s1094_s24 + $0x30] sm:$0xf] %vm718_vm3, %v897_v5  ;;  %v900_v11 = vpack.c.bf16 %v573_v9, %v573_v9  ;;  %v589_v12 = vsel %vm525_vm0, %v973_v57, %v557_v7  ;;  %vm523_vm2 = vcmp.ge.f32.partialorder %v482_v62, 0.0  ;;  %v555_v13 = vmul.f32 0.2, %v482_v62 }
 0x108   : > { %747 = vst.msk [vmem:[%s1094_s24 + $0x70] sm:$0xf] %vm718_vm3, %v913_v8  ;;  %v916_v14 = vpack.c.bf16 %v589_v12, %v589_v12  ;;  %v571_v15 = vsel %vm507_vm1, %v418_v61, %v539_v10 }
 0x109   : > { %734 = vst.msk [vmem:[%s1094_s24 + $0x3c] sm:$0xf] %vm718_vm3, %v900_v11  ;;  %v898_v16 = vpack.c.bf16 %v571_v15, %v571_v15  ;;  %v587_v17 = vsel %vm523_vm2, %v482_v62, %v555_v13 }
 0x10a   : > { %750 = vst.msk [vmem:[%s1094_s24 + $0x7c] sm:$0xf] %vm718_vm3, %v916_v14  ;;  %v914_v18 = vpack.c.bf16 %v587_v17, %v587_v17 }
 0x10b   : > { %732 = vst.msk [vmem:[%s1094_s24 + $0x34] sm:$0xf] %vm718_vm3, %v898_v16 }
 0x10c   : > { %748 = vst.msk [vmem:[%s1094_s24 + $0x74] sm:$0xf] %vm718_vm3, %v914_v18 }
 0x10d PF: > { %s12_s9 = sadd.s32 1, %s1013_s9  }
 0x10e   : > { %p9_p4 = scmp.ge.s32.totalorder %s12_s9, 10  }
 0x110   :  { %11 = sbr.rel (!%p9_p4) target bundleno = 1 (0x1), region = 58 }

// kernel: netD_forward.6
= control target key start
LH: loop header
LB: loop body
LE: loop exit
PB: predicated region body
PF: predicated region fallthrough
CT: control target
= control target key end

     0   :  { %s3381_s12 = smov 0   ;;  %s3846_s0 = inlined_call_operand.vmem [shape: bf16[512,1024], index: 0, kind: input, shape index: {}]   ;;  %s3847_s1 = inlined_call_operand.vmem [shape: bf16[1024,128], index: 1, kind: input, shape index: {}]   ;;  %s3848_s2 = inlined_call_operand.vmem [shape: bf16[512,128], index: 2, kind: output, shape index: {0}]   ;;  %s3849_s3 = inlined_call_operand.vmem [shape: f32[2,2,128], index: 3, kind: output, shape index: {1}]  }
   0x1 LB: > { %s3387_s13 = sadd.s32 4294967295, %s3359_s12   ;;  %p2472_p0 = scmp.ge.s32.totalorder %s3359_s12, 1  ;;  %s3359_s12 = sphi %s3381_s12, %s14_s12  }
   0x2   : > { %p142_p1 = scmp.lt.s32.totalorder %s3359_s12, 3 }
   0x4   : > { %p143_p2 = pnand %p2472_p0, %p142_p1 }
   0x5   : > { %v3289_v0 = vld [vmem:[%s3847_s1 + $0x40] sm:$0xff] (!%p143_p2)   ;;  %v3293_v4 = vld [vmem:[%s3847_s1 + $0x48] sm:$0xff] (!%p143_p2)   ;;  %v3297_v8 = vld [vmem:[%s3847_s1 + $0x50] sm:$0xff] (!%p143_p2)   ;;  %s2473_s21 = sshll.u32 (!%p143_p2), %s3387_s13, 5  ;;  %p184_p4 = scmp.lt.s32.totalorder (!%p143_p2), %s3387_s13, 1 }
   0x6   : > { %146 = sbr.rel (%p143_p2) target bundleno = 525 (0x20d), region = 28  ;;  %v3290_v1 = vld [vmem:[%s3847_s1 + $0xc0] sm:$0xff] (!%p143_p2)   ;;  %2833 = vmatprep.subr.bf16.mxu0 (!%p143_p2), %v3289_v0  ;;  %v3294_v5 = vld [vmem:[%s3847_s1 + $0xc8] sm:$0xff] (!%p143_p2)   ;;  %v3298_v9 = vld [vmem:[%s3847_s1 + $0xd0] sm:$0xff] (!%p143_p2)   ;;  %p172_p3 = scmp.lt.s32.totalorder (!%p143_p2), %s2473_s21, 63 }
   0x7   : > { %v3291_v2 = vld [vmem:[%s3847_s1] sm:$0xff] (!%p143_p2)   ;;  %2945 = vmatprep.subr.bf16.mxu1 (!%p143_p2), %v3290_v1  ;;  %v3295_v6 = vld [vmem:[%s3847_s1 + $0x8] sm:$0xff] (!%p143_p2)   ;;  %v3299_v10 = vld [vmem:[%s3847_s1 + $0x10] sm:$0xff] (!%p143_p2)  }
   0x8   : > { %v3292_v3 = vld [vmem:[%s3847_s1 + $0x80] sm:$0xff] (!%p143_p2)   ;;  %2834 = vmatpush3.bf16.msra.mxu0 (!%p143_p2), %v3291_v2  ;;  %v3296_v7 = vld [vmem:[%s3847_s1 + $0x88] sm:$0xff] (!%p143_p2)   ;;  %v3300_v11 = vld [vmem:[%s3847_s1 + $0x90] sm:$0xff] (!%p143_p2)  }
   0x9   : > { %2946 = vmatpush3.bf16.msra.mxu1 (!%p143_p2), %v3292_v3  ;;  %2835 = vmatprep.subr.bf16.mxu0 (!%p143_p2), %v3293_v4  ;;  %v3301_v12 = vld [vmem:[%s3847_s1 + $0x58] sm:$0xff] (!%p143_p2)   ;;  %v3305_v16 = vld [vmem:[%s3847_s1 + $0x60] sm:$0xff] (!%p143_p2)   ;;  %v3309_v20 = vld [vmem:[%s3847_s1 + $0x68] sm:$0xff] (!%p143_p2)  }
   0xa   : > { %2947 = vmatprep.subr.bf16.mxu1 (!%p143_p2), %v3294_v5  ;;  %v3302_v13 = vld [vmem:[%s3847_s1 + $0xd8] sm:$0xff] (!%p143_p2)   ;;  %v3306_v17 = vld [vmem:[%s3847_s1 + $0xe0] sm:$0xff] (!%p143_p2)   ;;  %v3310_v21 = vld [vmem:[%s3847_s1 + $0xe8] sm:$0xff] (!%p143_p2)  }
   0xb   : > { %v3303_v14 = vld [vmem:[%s3847_s1 + $0x18] sm:$0xff] (!%p143_p2)   ;;  %v3307_v18 = vld [vmem:[%s3847_s1 + $0x20] sm:$0xff] (!%p143_p2)   ;;  %v3311_v22 = vld [vmem:[%s3847_s1 + $0x28] sm:$0xff] (!%p143_p2)  }
   0xc   : > { %2836 = vmatpush3.bf16.msra.mxu0 (!%p143_p2), %v3295_v6  ;;  %v3304_v15 = vld [vmem:[%s3847_s1 + $0x98] sm:$0xff] (!%p143_p2)   ;;  %v3308_v19 = vld [vmem:[%s3847_s1 + $0xa0] sm:$0xff] (!%p143_p2)   ;;  %v3312_v23 = vld [vmem:[%s3847_s1 + $0xa8] sm:$0xff] (!%p143_p2)  }
   0xd   : > { %2948 = vmatpush3.bf16.msra.mxu1 %v3296_v7  ;;  %2837 = vmatprep.subr.bf16.mxu0 %v3297_v8  ;;  %s3851_s21 = smov (!%p172_p3, %s2473_s21), 63  ;;  %v3313_v24 = vld [vmem:[%s3847_s1 + $0x70] sm:$0xff]   ;;  %v3317_v28 = vld [vmem:[%s3847_s1 + $0x78] sm:$0xff]   ;;  %v3321_v40 = vld [vmem:[%s3847_s1 + $0x140] sm:$0xff]   ;;  %s3853_s13 = smov (!%p184_p4, %s3387_s13), 1 }
   0xe   : > { %2949 = vmatprep.subr.bf16.mxu1 %v3298_v9  ;;  %v3314_v25 = vld [vmem:[%s3847_s1 + $0xf0] sm:$0xff]   ;;  %s2705_s19 = sshll.u32 %s3851_s21, 5  ;;  %v3318_v29 = vld [vmem:[%s3847_s1 + $0xf8] sm:$0xff]   ;;  %v3322_v41 = vld [vmem:[%s3847_s1 + $0x100] sm:$0xff]  }
   0xf   : > { %v3315_v26 = vld [vmem:[%s3847_s1 + $0x30] sm:$0xff]   ;;  %s3488_s29 = scalar_lea.vmem %s3846_s0, %s2705_s19  ;;  %v3319_v30 = vld [vmem:[%s3847_s1 + $0x38] sm:$0xff]   ;;  %v3323_v42 = vld [vmem:[%s3847_s1 + $0x1c0] sm:$0xff]  }
  0x10   : > { %2838 = vmatpush3.bf16.msra.mxu0 %v3299_v10  ;;  %v3316_v27 = vld [vmem:[%s3847_s1 + $0xb0] sm:$0xff]   ;;  %v3320_v31 = vld [vmem:[%s3847_s1 + $0xb8] sm:$0xff]   ;;  %v189_v32 = vld [vmem:[%s3488_s29] sm:$0xff] }
  0x11   : > { %2950 = vmatpush3.bf16.msra.mxu1 %v3300_v11  ;;  %2839 = vmatprep.subr.bf16.mxu0 %v3301_v12  ;;  %v193_v33 = vld [vmem:[%s3488_s29 + $0x20] sm:$0xff]  ;;  %v190_v34 = vld [vmem:[%s3488_s29 + $0x8] sm:$0xff]  ;;  %v3329_v2 = vld [vmem:[%s3847_s1 + $0x150] sm:$0xff]  }
  0x12   : > { %2951 = vmatprep.subr.bf16.mxu1 %v3302_v13  ;;  %v2479_v35 = vcombine.low %v189_v32, %v193_v33  ;;  %v2480_v36 = vcombine.high %v189_v32, %v193_v33  ;;  %v194_v37 = vld [vmem:[%s3488_s29 + $0x28] sm:$0xff]  ;;  %v3324_v43 = vld [vmem:[%s3847_s1 + $0x180] sm:$0xff]   ;;  %v3330_v4 = vld [vmem:[%s3847_s1 + $0x110] sm:$0xff]  }
  0x13   : > { %v2481_v38 = vcombine.low %v190_v34, %v194_v37  ;;  %v2482_v39 = vcombine.high %v190_v34, %v194_v37  ;;  %v197_v44 = vld [vmem:[%s3488_s29 + $0x40] sm:$0xff]  ;;  %v198_v47 = vld [vmem:[%s3488_s29 + $0x48] sm:$0xff]  ;;  %v3331_v7 = vld [vmem:[%s3847_s1 + $0x1d0] sm:$0xff]  }
  0x14   : > { %2840 = vmatpush3.bf16.msra.mxu0 %v3303_v14  ;;  %1501 = vmatprep.mubr.bf16.mxu0 %v2480_v36  ;;  %v201_v45 = vld [vmem:[%s3488_s29 + $0x60] sm:$0xff]  ;;  %v202_v48 = vld [vmem:[%s3488_s29 + $0x68] sm:$0xff]  ;;  %v3332_v9 = vld [vmem:[%s3847_s1 + $0x190] sm:$0xff]  }
  0x15   : > { %2952 = vmatpush3.bf16.msra.mxu1 %v3304_v15  ;;  %2841 = vmatprep.subr.bf16.mxu0 %v3305_v16  ;;  %v2488_v46 = vcombine.high %v197_v44, %v201_v45  ;;  %v205_v49 = vld [vmem:[%s3488_s29 + $0x80] sm:$0xff]  ;;  %v2490_v50 = vcombine.high %v198_v47, %v202_v48  ;;  %v206_v52 = vld [vmem:[%s3488_s29 + $0x88] sm:$0xff]  ;;  %v2487_v54 = vcombine.low %v197_v44, %v201_v45  ;;  %v3333_v14 = vld [vmem:[%s3847_s1 + $0x158] sm:$0xff]  }
  0x16   : > { %2953 = vmatprep.subr.bf16.mxu1 %v3306_v17  ;;  %1662 = vmatprep.mubr.bf16.mxu1 %v2482_v39  ;;  %v209_v51 = vld [vmem:[%s3488_s29 + $0xa0] sm:$0xff]  ;;  %v210_v53 = vld [vmem:[%s3488_s29 + $0xa8] sm:$0xff]  ;;  %v2489_v56 = vcombine.low %v198_v47, %v202_v48  ;;  %v3334_v15 = vld [vmem:[%s3847_s1 + $0x118] sm:$0xff]  }
  0x17   : > { %v3325_v55 = vld [vmem:[%s3847_s1 + $0x148] sm:$0xff]   ;;  %v2496_v57 = vcombine.high %v205_v49, %v209_v51  ;;  %v2498_v59 = vcombine.high %v206_v52, %v210_v53  ;;  %v213_v62 = vld [vmem:[%s3488_s29 + $0xc0] sm:$0xff]  ;;  %v2495_v3 = vcombine.low %v205_v49, %v209_v51  ;;  %v2497_v5 = vcombine.low %v206_v52, %v210_v53  ;;  %v3335_v17 = vld [vmem:[%s3847_s1 + $0x1d8] sm:$0xff]  }
  0x18   : > { %2842 = vmatpush3.bf16.msra.mxu0 %v3307_v18  ;;  %v3326_v58 = vld [vmem:[%s3847_s1 + $0x108] sm:$0xff]   ;;  %v217_v63 = vld [vmem:[%s3488_s29 + $0xe0] sm:$0xff]  ;;  %v3346_v47 = vld [vmem:[%s3847_s1 + $0x130] sm:$0xff]  }
  0x19   : > { %2954 = vmatpush3.bf16.msra.mxu1 %v3308_v19  ;;  %2843 = vmatprep.subr.bf16.mxu0 %v3309_v20  ;;  %v3327_v60 = vld [vmem:[%s3847_s1 + $0x1c8] sm:$0xff]   ;;  %v2504_v6 = vcombine.high %v213_v62, %v217_v63  ;;  %v221_v10 = vld [vmem:[%s3488_s29 + $0x100] sm:$0xff]  ;;  %v2503_v16 = vcombine.low %v213_v62, %v217_v63  ;;  %v3336_v20 = vld [vmem:[%s3847_s1 + $0x198] sm:$0xff]  }
  0x1a   : > { %2955 = vmatprep.subr.bf16.mxu1 %v3310_v21  ;;  %v3328_v61 = vld [vmem:[%s3847_s1 + $0x188] sm:$0xff]   ;;  %v225_v11 = vld [vmem:[%s3488_s29 + $0x120] sm:$0xff]  ;;  %v3347_v48 = vld [vmem:[%s3847_s1 + $0x1f0] sm:$0xff]  }
  0x1b   : > { %v214_v0 = vld [vmem:[%s3488_s29 + $0xc8] sm:$0xff]  ;;  %v2512_v19 = vcombine.high %v221_v10, %v225_v11  ;;  %v3348_v49 = vld [vmem:[%s3847_s1 + $0x1b0] sm:$0xff]   ;;  %v249_v51 = vld [vmem:[%s3488_s29 + $0x1e0] sm:$0xff] }
  0x1c   : > { %2844 = vmatpush3.bf16.msra.mxu0 %v3311_v22  ;;  %v218_v1 = vld [vmem:[%s3488_s29 + $0xe8] sm:$0xff]  ;;  %v229_v22 = vld [vmem:[%s3488_s29 + $0x140] sm:$0xff] }
  0x1d   : > { %2956 = vmatpush3.bf16.msra.mxu1 %v3312_v23  ;;  %2845 = vmatprep.subr.bf16.mxu0 %v3313_v24  ;;  %v2506_v8 = vcombine.high %v214_v0, %v218_v1  ;;  %v222_v12 = vld [vmem:[%s3488_s29 + $0x108] sm:$0xff]  ;;  %v2505_v18 = vcombine.low %v214_v0, %v218_v1  ;;  %v233_v23 = vld [vmem:[%s3488_s29 + $0x160] sm:$0xff] }
  0x1e   : > { %2957 = vmatprep.subr.bf16.mxu1 %v3314_v25  ;;  %v226_v13 = vld [vmem:[%s3488_s29 + $0x128] sm:$0xff]  ;;  %v3337_v24 = vld [vmem:[%s3847_s1 + $0x160] sm:$0xff]   ;;  %v2520_v32 = vcombine.high %v229_v22, %v233_v23 }
  0x1f   : > { %v2514_v21 = vcombine.high %v222_v12, %v226_v13  ;;  %v230_v25 = vld [vmem:[%s3488_s29 + $0x148] sm:$0xff]  ;;  %v253_v62 = vld [vmem:[%s3488_s29 + $0x200] sm:$0xff] }
  0x20   : > { %2846 = vmatpush3.bf16.msra.mxu0 %v3315_v26  ;;  %v234_v26 = vld [vmem:[%s3488_s29 + $0x168] sm:$0xff]  ;;  %v257_v63 = vld [vmem:[%s3488_s29 + $0x220] sm:$0xff] }
  0x21   : > { %2958 = vmatpush3.bf16.msra.mxu1 %v3316_v27  ;;  %2847 = vmatprep.subr.bf16.mxu0 %v3317_v28  ;;  %v3338_v27 = vld [vmem:[%s3847_s1 + $0x120] sm:$0xff]   ;;  %v2522_v33 = vcombine.high %v230_v25, %v234_v26  ;;  %v3341_v34 = vld [vmem:[%s3847_s1 + $0x168] sm:$0xff]  }
  0x22   : > { %2959 = vmatprep.subr.bf16.mxu1 %v3318_v29  ;;  %v3339_v28 = vld [vmem:[%s3847_s1 + $0x1e0] sm:$0xff]   ;;  %v3342_v36 = vld [vmem:[%s3847_s1 + $0x128] sm:$0xff]  }
  0x23   : > { %v3340_v29 = vld [vmem:[%s3847_s1 + $0x1a0] sm:$0xff]   ;;  %v3343_v37 = vld [vmem:[%s3847_s1 + $0x1e8] sm:$0xff]  }
  0x24   : > { %2848 = vmatpush3.bf16.msra.mxu0 %v3319_v30  ;;  %v2511_v30 = vcombine.low %v221_v10, %v225_v11  ;;  %v3344_v39 = vld [vmem:[%s3847_s1 + $0x1a8] sm:$0xff]   ;;  %v2543_v10 = vcombine.low %v253_v62, %v257_v63 }
  0x25   : > { %2960 = vmatpush3.bf16.msra.mxu1 %v3320_v31  ;;  %3057 = vmatprep.subr.bf16.mxu0 %v3321_v40  ;;  %v2513_v31 = vcombine.low %v222_v12, %v226_v13  ;;  %v238_v40 = vld [vmem:[%s3488_s29 + $0x188] sm:$0xff] }
  0x26   : > { %3169 = vmatprep.subr.bf16.mxu1 %v3323_v42  ;;  %v2519_v42 = vcombine.low %v229_v22, %v233_v23  ;;  %v246_v52 = vld [vmem:[%s3488_s29 + $0x1c8] sm:$0xff]  ;;  %v277_v22 = vld [vmem:[%s3488_s29 + $0x2c0] sm:$0xff] }
  0x27   : > { %1502 = vmatmul.mubr.bf16.vlgmr.msra.gmra.mrb[0].mxu0 %v2479_v35  ;;  %v237_v35 = vld [vmem:[%s3488_s29 + $0x180] sm:$0xff]  ;;  %v250_v53 = vld [vmem:[%s3488_s29 + $0x1e8] sm:$0xff] }
  0x28   : > { %1663 = vmatmul.mubr.bf16.vlgmr.msra.gmra.mrb[0].mxu1 %v2481_v38  ;;  %3058 = vmatpush3.bf16.msra.mxu0 %v3322_v41  ;;  %v241_v38 = vld [vmem:[%s3488_s29 + $0x1a0] sm:$0xff]  ;;  %v242_v41 = vld [vmem:[%s3488_s29 + $0x1a8] sm:$0xff] }
  0x29   : > { %3170 = vmatpush3.bf16.msra.mxu1 %v3324_v43  ;;  %1509 = vmatprep.mubr.bf16.mxu0 %v2488_v46  ;;  %v2521_v43 = vcombine.low %v230_v25, %v234_v26  ;;  %v2528_v44 = vcombine.high %v237_v35, %v241_v38  ;;  %v2530_v45 = vcombine.high %v238_v40, %v242_v41  ;;  %v3345_v46 = vld [vmem:[%s3847_s1 + $0x170] sm:$0xff]   ;;  %v254_v0 = vld [vmem:[%s3488_s29 + $0x208] sm:$0xff]  ;;  %v281_v23 = vld [vmem:[%s3488_s29 + $0x2e0] sm:$0xff] }
  0x2a   : > { %1670 = vmatprep.mubr.bf16.mxu1 %v2490_v50  ;;  %3059 = vmatprep.subr.bf16.mxu0 %v3325_v55  ;;  %v245_v50 = vld [vmem:[%s3488_s29 + $0x1c0] sm:$0xff]  ;;  %v3349_v55 = vld [vmem:[%s3847_s1 + $0x178] sm:$0xff]   ;;  %v258_v1 = vld [vmem:[%s3488_s29 + $0x228] sm:$0xff] }
  0x2b   : > { %3171 = vmatprep.subr.bf16.mxu1 %v3327_v60  ;;  %v3351_v60 = vld [vmem:[%s3847_s1 + $0x1f8] sm:$0xff]   ;;  %v2545_v11 = vcombine.low %v254_v0, %v258_v1  ;;  %v282_v25 = vld [vmem:[%s3488_s29 + $0x2e8] sm:$0xff] }
  0x2c   : > { %3060 = vmatpush3.bf16.msra.mxu0 %v3326_v58  ;;  %v3350_v58 = vld [vmem:[%s3847_s1 + $0x138] sm:$0xff]  }
  0x2d   : > { %3172 = vmatpush3.bf16.msra.mxu1 %v3328_v61  ;;  %3061 = vmatprep.subr.bf16.mxu0 %v3329_v2  ;;  %v3352_v61 = vld [vmem:[%s3847_s1 + $0x1b8] sm:$0xff]   ;;  %v2535_v2 = vcombine.low %v245_v50, %v249_v51 }
  0x2e   : > { %3173 = vmatprep.subr.bf16.mxu1 %v3331_v7  ;;  %v265_v7 = vld [vmem:[%s3488_s29 + $0x260] sm:$0xff] }
  0x2f   : > { %1510 = vmatmul.mubr.bf16.gmra.mrb[4].mxu0 %v2487_v54  ;;  %v2527_v54 = vcombine.low %v237_v35, %v241_v38  ;;  %v293_v38 = vld [vmem:[%s3488_s29 + $0x340] sm:$0xff] }
  0x30   : > { %1671 = vmatmul.mubr.bf16.gmra.mrb[4].mxu1 %v2489_v56  ;;  %1517 = vmatprep.mubr.bf16.mxu0 %v2496_v57  ;;  %v2529_v56 = vcombine.low %v238_v40, %v242_v41  ;;  %v2536_v57 = vcombine.high %v245_v50, %v249_v51  ;;  %v294_v40 = vld [vmem:[%s3488_s29 + $0x348] sm:$0xff] }
  0x31   : > { %1678 = vmatprep.mubr.bf16.mxu1 %v2498_v59  ;;  %3062 = vmatpush3.bf16.msra.mxu0 %v3330_v4  ;;  %v2538_v59 = vcombine.high %v246_v52, %v250_v53  ;;  %v2544_v4 = vcombine.high %v253_v62, %v257_v63  ;;  %v298_v41 = vld [vmem:[%s3488_s29 + $0x368] sm:$0xff]  ;;  %v191_v62 = vld [vmem:[%s3488_s29 + $0x10] sm:$0xff] }
  0x32   : > { %3174 = vmatpush3.bf16.msra.mxu1 %v3332_v9  ;;  %3063 = vmatprep.subr.bf16.mxu0 %v3333_v14  ;;  %v266_v9 = vld [vmem:[%s3488_s29 + $0x268] sm:$0xff]  ;;  %v269_v14 = vld [vmem:[%s3488_s29 + $0x280] sm:$0xff]  ;;  %v2585_v51 = vcombine.low %v294_v40, %v298_v41  ;;  %v195_v63 = vld [vmem:[%s3488_s29 + $0x30] sm:$0xff] }
  0x33   : > { %3175 = vmatprep.subr.bf16.mxu1 %v3335_v17  ;;  %v274_v17 = vld [vmem:[%s3488_s29 + $0x2a8] sm:$0xff] }
  0x35   : > { %3064 = vmatpush3.bf16.msra.mxu0 %v3334_v15  ;;  %v273_v15 = vld [vmem:[%s3488_s29 + $0x2a0] sm:$0xff] }
  0x36   : > { %3176 = vmatpush3.bf16.msra.mxu1 %v3336_v20  ;;  %3065 = vmatprep.subr.bf16.mxu0 %v3337_v24  ;;  %v2560_v20 = vcombine.high %v269_v14, %v273_v15  ;;  %v278_v24 = vld [vmem:[%s3488_s29 + $0x2c8] sm:$0xff]  ;;  %v2559_v26 = vcombine.low %v269_v14, %v273_v15  ;;  %v207_v14 = vld [vmem:[%s3488_s29 + $0x90] sm:$0xff] }
  0x37   : > { %1518 = vmatmul.mubr.bf16.gmra.mrb[8].mxu0 %v2495_v3  ;;  %3177 = vmatprep.subr.bf16.mxu1 %v3339_v28  ;;  %v2537_v3 = vcombine.low %v246_v52, %v250_v53  ;;  %v2568_v28 = vcombine.high %v277_v22, %v281_v23  ;;  %v2569_v35 = vcombine.low %v278_v24, %v282_v25  ;;  %v211_v15 = vld [vmem:[%s3488_s29 + $0xb0] sm:$0xff] }
  0x38   : > { %1679 = vmatmul.mubr.bf16.gmra.mrb[8].mxu1 %v2497_v5  ;;  %1525 = vmatprep.mubr.bf16.mxu0 %v2504_v6  ;;  %v2546_v5 = vcombine.high %v254_v0, %v258_v1  ;;  %v261_v6 = vld [vmem:[%s3488_s29 + $0x240] sm:$0xff]  ;;  %v192_v0 = vld [vmem:[%s3488_s29 + $0x18] sm:$0xff] }
  0x39   : > { %1686 = vmatprep.mubr.bf16.mxu1 %v2506_v8  ;;  %3066 = vmatpush3.bf16.msra.mxu0 %v3338_v27  ;;  %v262_v8 = vld [vmem:[%s3488_s29 + $0x248] sm:$0xff]  ;;  %v2552_v12 = vcombine.high %v261_v6, %v265_v7  ;;  %v196_v1 = vld [vmem:[%s3488_s29 + $0x38] sm:$0xff] }
  0x3a   : > { %3178 = vmatpush3.bf16.msra.mxu1 %v3340_v29  ;;  %3067 = vmatprep.subr.bf16.mxu0 %v3341_v34  ;;  %v2554_v13 = vcombine.high %v262_v8, %v266_v9  ;;  %v2570_v29 = vcombine.high %v278_v24, %v282_v25  ;;  %v2567_v34 = vcombine.low %v277_v22, %v281_v23  ;;  %v215_v22 = vld [vmem:[%s3488_s29 + $0xd0] sm:$0xff]  ;;  %v216_v24 = vld [vmem:[%s3488_s29 + $0xd8] sm:$0xff] }
  0x3b   : > { %3179 = vmatprep.subr.bf16.mxu1 %v3343_v37  ;;  %v219_v23 = vld [vmem:[%s3488_s29 + $0xf0] sm:$0xff]  ;;  %v220_v25 = vld [vmem:[%s3488_s29 + $0xf8] sm:$0xff] }
  0x3d   : > { %3068 = vmatpush3.bf16.msra.mxu0 %v3342_v36 }
  0x3e   : > { %3180 = vmatpush3.bf16.msra.mxu1 %v3344_v39  ;;  %3069 = vmatprep.subr.bf16.mxu0 %v3345_v46  ;;  %v297_v39 = vld [vmem:[%s3488_s29 + $0x360] sm:$0xff] }
  0x3f   : > { %1526 = vmatmul.mubr.bf16.gmra.mrb[12].mxu0 %v2503_v16  ;;  %3181 = vmatprep.subr.bf16.mxu1 %v3347_v48  ;;  %v270_v16 = vld [vmem:[%s3488_s29 + $0x288] sm:$0xff]  ;;  %v301_v46 = vld [vmem:[%s3488_s29 + $0x380] sm:$0xff]  ;;  %v2583_v50 = vcombine.low %v293_v38, %v297_v39 }
  0x40   : > { %1687 = vmatmul.mubr.bf16.gmra.mrb[12].mxu1 %v2505_v18  ;;  %1533 = vmatprep.mubr.bf16.mxu0 %v2512_v19  ;;  %v2551_v18 = vcombine.low %v261_v6, %v265_v7  ;;  %v2553_v19 = vcombine.low %v262_v8, %v266_v9  ;;  %v2561_v27 = vcombine.low %v270_v16, %v274_v17  ;;  %v302_v48 = vld [vmem:[%s3488_s29 + $0x388] sm:$0xff]  ;;  %v199_v6 = vld [vmem:[%s3488_s29 + $0x50] sm:$0xff]  ;;  %v200_v8 = vld [vmem:[%s3488_s29 + $0x58] sm:$0xff] }
  0x41   : > { %1694 = vmatprep.mubr.bf16.mxu1 %v2514_v21  ;;  %3070 = vmatpush3.bf16.msra.mxu0 %v3346_v47  ;;  %v2562_v21 = vcombine.high %v270_v16, %v274_v17  ;;  %v305_v47 = vld [vmem:[%s3488_s29 + $0x3a0] sm:$0xff]  ;;  %v203_v7 = vld [vmem:[%s3488_s29 + $0x70] sm:$0xff]  ;;  %v204_v9 = vld [vmem:[%s3488_s29 + $0x78] sm:$0xff] }
  0x42   : > { %3182 = vmatpush3.bf16.msra.mxu1 %v3348_v49  ;;  %3071 = vmatprep.subr.bf16.mxu0 %v3349_v55  ;;  %v306_v49 = vld [vmem:[%s3488_s29 + $0x3a8] sm:$0xff]  ;;  %v2592_v52 = vcombine.high %v301_v46, %v305_v47  ;;  %v313_v55 = vld [vmem:[%s3488_s29 + $0x3e0] sm:$0xff]  ;;  %v208_v16 = vld [vmem:[%s3488_s29 + $0x98] sm:$0xff] }
  0x43   : > { %3183 = vmatprep.subr.bf16.mxu1 %v3351_v60  ;;  %v2594_v53 = vcombine.high %v302_v48, %v306_v49  ;;  %v212_v17 = vld [vmem:[%s3488_s29 + $0xb8] sm:$0xff] }
  0x45   : > { %3072 = vmatpush3.bf16.msra.mxu0 %v3350_v58  ;;  %v2591_v58 = vcombine.low %v301_v46, %v305_v47  ;;  %v239_v46 = vld [vmem:[%s3488_s29 + $0x190] sm:$0xff] }
  0x46   : > { %3184 = vmatpush3.bf16.msra.mxu1 %v3352_v61  ;;  %v243_v47 = vld [vmem:[%s3488_s29 + $0x1b0] sm:$0xff] }
  0x47   : > { %1534 = vmatmul.mubr.bf16.gmra.mrb[16].mxu0 %v2511_v30  ;;  %v285_v30 = vld [vmem:[%s3488_s29 + $0x300] sm:$0xff] }
  0x48   : > { %1695 = vmatmul.mubr.bf16.gmra.mrb[16].mxu1 %v2513_v31  ;;  %1541 = vmatprep.mubr.bf16.mxu0 %v2520_v32  ;;  %v289_v31 = vld [vmem:[%s3488_s29 + $0x320] sm:$0xff]  ;;  %v286_v32 = vld [vmem:[%s3488_s29 + $0x308] sm:$0xff] }
  0x49   : > { %1702 = vmatprep.mubr.bf16.mxu1 %v2522_v33  ;;  %v290_v33 = vld [vmem:[%s3488_s29 + $0x328] sm:$0xff]  ;;  %v2576_v36 = vcombine.high %v285_v30, %v289_v31 }
  0x4a   : > { %v2578_v37 = vcombine.high %v286_v32, %v290_v33 }
  0x4f   : > { %1542 = vmatmul.mubr.bf16.gmra.mrb[20].mxu0 %v2519_v42  ;;  %v2575_v42 = vcombine.low %v285_v30, %v289_v31  ;;  %v223_v30 = vld [vmem:[%s3488_s29 + $0x110] sm:$0xff] }
  0x50   : > { %1703 = vmatmul.mubr.bf16.gmra.mrb[20].mxu1 %v2521_v43  ;;  %1549 = vmatprep.mubr.bf16.mxu0 %v2528_v44  ;;  %v2577_v43 = vcombine.low %v286_v32, %v290_v33  ;;  %v2584_v44 = vcombine.high %v293_v38, %v297_v39  ;;  %v227_v31 = vld [vmem:[%s3488_s29 + $0x130] sm:$0xff]  ;;  %v224_v32 = vld [vmem:[%s3488_s29 + $0x118] sm:$0xff] }
  0x51   : > { %1710 = vmatprep.mubr.bf16.mxu1 %v2530_v45  ;;  %v2586_v45 = vcombine.high %v294_v40, %v298_v41  ;;  %v228_v33 = vld [vmem:[%s3488_s29 + $0x138] sm:$0xff]  ;;  %v231_v38 = vld [vmem:[%s3488_s29 + $0x150] sm:$0xff] }
  0x52   : > { %v235_v39 = vld [vmem:[%s3488_s29 + $0x170] sm:$0xff]  ;;  %v232_v40 = vld [vmem:[%s3488_s29 + $0x158] sm:$0xff] }
  0x53   : > { %v236_v41 = vld [vmem:[%s3488_s29 + $0x178] sm:$0xff] }
  0x57   : > { %1550 = vmatmul.mubr.bf16.gmra.mrb[24].mxu0 %v2527_v54  ;;  %v309_v54 = vld [vmem:[%s3488_s29 + $0x3c0] sm:$0xff] }
  0x58   : > { %1711 = vmatmul.mubr.bf16.gmra.mrb[24].mxu1 %v2529_v56  ;;  %1557 = vmatprep.mubr.bf16.mxu0 %v2536_v57  ;;  %v310_v56 = vld [vmem:[%s3488_s29 + $0x3c8] sm:$0xff]  ;;  %v2600_v60 = vcombine.high %v309_v54, %v313_v55 }
  0x59   : > { %1718 = vmatprep.mubr.bf16.mxu1 %v2538_v59  ;;  %v314_v57 = vld [vmem:[%s3488_s29 + $0x3e8] sm:$0xff]  ;;  %v2593_v59 = vcombine.low %v302_v48, %v306_v49  ;;  %v240_v48 = vld [vmem:[%s3488_s29 + $0x198] sm:$0xff] }
  0x5a   : > { %v2602_v61 = vcombine.high %v310_v56, %v314_v57  ;;  %v244_v49 = vld [vmem:[%s3488_s29 + $0x1b8] sm:$0xff] }
  0x5f   : > { %1558 = vmatmul.mubr.bf16.gmra.mrb[28].mxu0 %v2535_v2  ;;  %v2599_v2 = vcombine.low %v309_v54, %v313_v55  ;;  %v247_v54 = vld [vmem:[%s3488_s29 + $0x1d0] sm:$0xff] }
  0x60   : > { %1719 = vmatmul.mubr.bf16.gmra.mrb[28].mxu1 %v2537_v3  ;;  %1565 = vmatprep.mubr.bf16.mxu0 %v2544_v4  ;;  %v2601_v3 = vcombine.low %v310_v56, %v314_v57  ;;  %v2484_v4 = vcombine.high %v191_v62, %v195_v63  ;;  %v251_v55 = vld [vmem:[%s3488_s29 + $0x1f0] sm:$0xff]  ;;  %v248_v56 = vld [vmem:[%s3488_s29 + $0x1d8] sm:$0xff] }
  0x61   : > { %1726 = vmatprep.mubr.bf16.mxu1 %v2546_v5  ;;  %v2486_v5 = vcombine.high %v192_v0, %v196_v1  ;;  %v252_v57 = vld [vmem:[%s3488_s29 + $0x1f8] sm:$0xff] }
  0x67   : > { %1566 = vmatmul.mubr.bf16.gmra.mrb[32].mxu0 %v2543_v10  ;;  %v2483_v10 = vcombine.low %v191_v62, %v195_v63  ;;  %v255_v62 = vld [vmem:[%s3488_s29 + $0x210] sm:$0xff] }
  0x68   : > { %1727 = vmatmul.mubr.bf16.gmra.mrb[32].mxu1 %v2545_v11  ;;  %1573 = vmatprep.mubr.bf16.mxu0 %v2552_v12  ;;  %v2485_v11 = vcombine.low %v192_v0, %v196_v1  ;;  %v2492_v12 = vcombine.high %v199_v6, %v203_v7  ;;  %v259_v63 = vld [vmem:[%s3488_s29 + $0x230] sm:$0xff]  ;;  %v256_v0 = vld [vmem:[%s3488_s29 + $0x218] sm:$0xff] }
  0x69   : > { %1734 = vmatprep.mubr.bf16.mxu1 %v2554_v13  ;;  %v2494_v13 = vcombine.high %v200_v8, %v204_v9  ;;  %v260_v1 = vld [vmem:[%s3488_s29 + $0x238] sm:$0xff] }
  0x6f   : > { %1574 = vmatmul.mubr.bf16.gmra.mrb[36].mxu0 %v2551_v18  ;;  %v2491_v18 = vcombine.low %v199_v6, %v203_v7  ;;  %v263_v6 = vld [vmem:[%s3488_s29 + $0x250] sm:$0xff] }
  0x70   : > { %1735 = vmatmul.mubr.bf16.gmra.mrb[36].mxu1 %v2553_v19  ;;  %1581 = vmatprep.mubr.bf16.mxu0 %v2560_v20  ;;  %v2493_v19 = vcombine.low %v200_v8, %v204_v9  ;;  %v2500_v20 = vcombine.high %v207_v14, %v211_v15  ;;  %v267_v7 = vld [vmem:[%s3488_s29 + $0x270] sm:$0xff]  ;;  %v264_v8 = vld [vmem:[%s3488_s29 + $0x258] sm:$0xff] }
  0x71   : > { %1742 = vmatprep.mubr.bf16.mxu1 %v2562_v21  ;;  %v2502_v21 = vcombine.high %v208_v16, %v212_v17  ;;  %v268_v9 = vld [vmem:[%s3488_s29 + $0x278] sm:$0xff] }
  0x77   : > { %1582 = vmatmul.mubr.bf16.gmra.mrb[40].mxu0 %v2559_v26  ;;  %v2499_v26 = vcombine.low %v207_v14, %v211_v15  ;;  %v271_v14 = vld [vmem:[%s3488_s29 + $0x290] sm:$0xff] }
  0x78   : > { %1743 = vmatmul.mubr.bf16.gmra.mrb[40].mxu1 %v2561_v27  ;;  %1589 = vmatprep.mubr.bf16.mxu0 %v2568_v28  ;;  %v2501_v27 = vcombine.low %v208_v16, %v212_v17  ;;  %v2508_v28 = vcombine.high %v215_v22, %v219_v23  ;;  %v275_v15 = vld [vmem:[%s3488_s29 + $0x2b0] sm:$0xff]  ;;  %v272_v16 = vld [vmem:[%s3488_s29 + $0x298] sm:$0xff] }
  0x79   : > { %1750 = vmatprep.mubr.bf16.mxu1 %v2570_v29  ;;  %v2510_v29 = vcombine.high %v216_v24, %v220_v25  ;;  %v276_v17 = vld [vmem:[%s3488_s29 + $0x2b8] sm:$0xff] }
  0x7f   : > { %1590 = vmatmul.mubr.bf16.gmra.mrb[44].mxu0 %v2567_v34  ;;  %v2507_v34 = vcombine.low %v215_v22, %v219_v23  ;;  %v279_v22 = vld [vmem:[%s3488_s29 + $0x2d0] sm:$0xff] }
  0x80   : > { %1751 = vmatmul.mubr.bf16.gmra.mrb[44].mxu1 %v2569_v35  ;;  %1597 = vmatprep.mubr.bf16.mxu0 %v2576_v36  ;;  %v2509_v35 = vcombine.low %v216_v24, %v220_v25  ;;  %v2516_v36 = vcombine.high %v223_v30, %v227_v31  ;;  %v283_v23 = vld [vmem:[%s3488_s29 + $0x2f0] sm:$0xff]  ;;  %v280_v24 = vld [vmem:[%s3488_s29 + $0x2d8] sm:$0xff] }
  0x81   : > { %1758 = vmatprep.mubr.bf16.mxu1 %v2578_v37  ;;  %v2518_v37 = vcombine.high %v224_v32, %v228_v33  ;;  %v284_v25 = vld [vmem:[%s3488_s29 + $0x2f8] sm:$0xff] }
  0x87   : > { %1598 = vmatmul.mubr.bf16.gmra.mrb[48].mxu0 %v2575_v42  ;;  %v2515_v42 = vcombine.low %v223_v30, %v227_v31  ;;  %v287_v30 = vld [vmem:[%s3488_s29 + $0x310] sm:$0xff] }
  0x88   : > { %1759 = vmatmul.mubr.bf16.gmra.mrb[48].mxu1 %v2577_v43  ;;  %1605 = vmatprep.mubr.bf16.mxu0 %v2584_v44  ;;  %v2517_v43 = vcombine.low %v224_v32, %v228_v33  ;;  %v2524_v44 = vcombine.high %v231_v38, %v235_v39  ;;  %v291_v31 = vld [vmem:[%s3488_s29 + $0x330] sm:$0xff]  ;;  %v288_v33 = vld [vmem:[%s3488_s29 + $0x318] sm:$0xff] }
  0x89   : > { %1766 = vmatprep.mubr.bf16.mxu1 %v2586_v45  ;;  %v2526_v45 = vcombine.high %v232_v40, %v236_v41 }
  0x8f   : > { %1606 = vmatmul.mubr.bf16.gmra.mrb[52].mxu0 %v2583_v50  ;;  %v2523_v50 = vcombine.low %v231_v38, %v235_v39 }
  0x90   : > { %1767 = vmatmul.mubr.bf16.gmra.mrb[52].mxu1 %v2585_v51  ;;  %1613 = vmatprep.mubr.bf16.mxu0 %v2592_v52  ;;  %v2525_v51 = vcombine.low %v232_v40, %v236_v41  ;;  %v2532_v52 = vcombine.high %v239_v46, %v243_v47  ;;  %v2573_v41 = vcombine.low %v280_v24, %v284_v25 }
  0x91   : > { %1774 = vmatprep.mubr.bf16.mxu1 %v2594_v53  ;;  %v2534_v53 = vcombine.high %v240_v48, %v244_v49 }
  0x97   : > { %1614 = vmatmul.mubr.bf16.gmra.mrb[56].mxu0 %v2591_v58  ;;  %v2531_v58 = vcombine.low %v239_v46, %v243_v47 }
  0x98   : > { %1775 = vmatmul.mubr.bf16.gmra.mrb[56].mxu1 %v2593_v59  ;;  %1621 = vmatprep.mubr.bf16.mxu0 %v2600_v60  ;;  %v2533_v59 = vcombine.low %v240_v48, %v244_v49  ;;  %v2540_v60 = vcombine.high %v247_v54, %v251_v55 }
  0x99   : > { %1782 = vmatprep.mubr.bf16.mxu1 %v2602_v61  ;;  %v2542_v61 = vcombine.high %v248_v56, %v252_v57 }
  0x9f   : > { %1622 = vmatmul.mubr.bf16.gmra.mrb[60].mxu0 %v2599_v2  ;;  %v2539_v2 = vcombine.low %v247_v54, %v251_v55  ;;  %v296_v55 = vld [vmem:[%s3488_s29 + $0x358] sm:$0xff] }
  0xa0   : > { %1783 = vmatmul.mubr.bf16.gmra.mrb[60].mxu1 %v2601_v3  ;;  %1823 = vmatprep.mubr.bf16.mxu0 %v2484_v4  ;;  %v2541_v3 = vcombine.low %v248_v56, %v252_v57  ;;  %v2548_v4 = vcombine.high %v255_v62, %v259_v63  ;;  %v300_v56 = vld [vmem:[%s3488_s29 + $0x378] sm:$0xff] }
  0xa1   : > { %1984 = vmatprep.mubr.bf16.mxu1 %v2486_v5  ;;  %v2550_v5 = vcombine.high %v256_v0, %v260_v1 }
  0xa7   : > { %1824 = vmatmul.mubr.bf16.vlgmr.msra.gmra.mrb[64].mxu0 %v2483_v10  ;;  %v2547_v10 = vcombine.low %v255_v62, %v259_v63 }
  0xa8   : > { %1985 = vmatmul.mubr.bf16.vlgmr.msra.gmra.mrb[64].mxu1 %v2485_v11  ;;  %1831 = vmatprep.mubr.bf16.mxu0 %v2492_v12  ;;  %v2549_v11 = vcombine.low %v256_v0, %v260_v1  ;;  %v2556_v12 = vcombine.high %v263_v6, %v267_v7 }
  0xa9   : > { %1992 = vmatprep.mubr.bf16.mxu1 %v2494_v13  ;;  %v2558_v13 = vcombine.high %v264_v8, %v268_v9 }
  0xaf   : > { %1832 = vmatmul.mubr.bf16.gmra.mrb[68].mxu0 %v2491_v18  ;;  %v2555_v18 = vcombine.low %v263_v6, %v267_v7 }
  0xb0   : > { %1993 = vmatmul.mubr.bf16.gmra.mrb[68].mxu1 %v2493_v19  ;;  %1839 = vmatprep.mubr.bf16.mxu0 %v2500_v20  ;;  %v2557_v19 = vcombine.low %v264_v8, %v268_v9  ;;  %v2564_v20 = vcombine.high %v271_v14, %v275_v15 }
  0xb1   : > { %2000 = vmatprep.mubr.bf16.mxu1 %v2502_v21  ;;  %v2566_v21 = vcombine.high %v272_v16, %v276_v17 }
  0xb7   : > { %1840 = vmatmul.mubr.bf16.gmra.mrb[72].mxu0 %v2499_v26  ;;  %v2563_v26 = vcombine.low %v271_v14, %v275_v15  ;;  %v308_v14 = vld [vmem:[%s3488_s29 + $0x3b8] sm:$0xff] }
  0xb8   : > { %2001 = vmatmul.mubr.bf16.gmra.mrb[72].mxu1 %v2501_v27  ;;  %1847 = vmatprep.mubr.bf16.mxu0 %v2508_v28  ;;  %v2565_v27 = vcombine.low %v272_v16, %v276_v17  ;;  %v2572_v28 = vcombine.high %v279_v22, %v283_v23 }
  0xb9   : > { %2008 = vmatprep.mubr.bf16.mxu1 %v2510_v29  ;;  %v2574_v29 = vcombine.high %v280_v24, %v284_v25 }
  0xbf   : > { %1848 = vmatmul.mubr.bf16.gmra.mrb[76].mxu0 %v2507_v34  ;;  %v292_v34 = vld [vmem:[%s3488_s29 + $0x338] sm:$0xff] }
  0xc0   : > { %2009 = vmatmul.mubr.bf16.gmra.mrb[76].mxu1 %v2509_v35  ;;  %1855 = vmatprep.mubr.bf16.mxu0 %v2516_v36  ;;  %v2582_v46 = vcombine.high %v288_v33, %v292_v34  ;;  %v2581_v63 = vcombine.low %v288_v33, %v292_v34  ;;  %v315_v33 = vld [vmem:[%s3488_s29 + $0x3f0] sm:$0xff] }
  0xc1   : > { %2016 = vmatprep.mubr.bf16.mxu1 %v2518_v37  ;;  %v2571_v37 = vcombine.low %v279_v22, %v283_v23 }
  0xc7   : > { %1856 = vmatmul.mubr.bf16.gmra.mrb[80].mxu0 %v2515_v42  ;;  %v2580_v42 = vcombine.high %v287_v30, %v291_v31 }
  0xc8   : > { %2017 = vmatmul.mubr.bf16.gmra.mrb[80].mxu1 %v2517_v43  ;;  %1863 = vmatprep.mubr.bf16.mxu0 %v2524_v44 }
  0xc9   : > { %2024 = vmatprep.mubr.bf16.mxu1 %v2526_v45 }
  0xcf   : > { %1864 = vmatmul.mubr.bf16.gmra.mrb[84].mxu0 %v2523_v50 }
  0xd0   : > { %2025 = vmatmul.mubr.bf16.gmra.mrb[84].mxu1 %v2525_v51  ;;  %1871 = vmatprep.mubr.bf16.mxu0 %v2532_v52  ;;  %v295_v52 = vld [vmem:[%s3488_s29 + $0x350] sm:$0xff] }
  0xd1   : > { %2032 = vmatprep.mubr.bf16.mxu1 %v2534_v53  ;;  %v299_v53 = vld [vmem:[%s3488_s29 + $0x370] sm:$0xff] }
  0xd2   : > { %v2588_v0 = vcombine.high %v295_v52, %v299_v53  ;;  %v2587_v17 = vcombine.low %v295_v52, %v299_v53 }
  0xd7   : > { %1872 = vmatmul.mubr.bf16.gmra.mrb[88].mxu0 %v2531_v58 }
  0xd8   : > { %2033 = vmatmul.mubr.bf16.gmra.mrb[88].mxu1 %v2533_v59  ;;  %1879 = vmatprep.mubr.bf16.mxu0 %v2540_v60  ;;  %v2579_v59 = vcombine.low %v287_v30, %v291_v31 }
  0xd9   : > { %2040 = vmatprep.mubr.bf16.mxu1 %v2542_v61 }
  0xdf   : > { %1880 = vmatmul.mubr.bf16.gmra.mrb[92].mxu0 %v2539_v2 }
  0xe0   : > { %2041 = vmatmul.mubr.bf16.gmra.mrb[92].mxu1 %v2541_v3  ;;  %1887 = vmatprep.mubr.bf16.mxu0 %v2548_v4  ;;  %v2590_v4 = vcombine.high %v296_v55, %v300_v56 }
  0xe1   : > { %2048 = vmatprep.mubr.bf16.mxu1 %v2550_v5 }
  0xe7   : > { %1888 = vmatmul.mubr.bf16.gmra.mrb[96].mxu0 %v2547_v10  ;;  %v303_v10 = vld [vmem:[%s3488_s29 + $0x390] sm:$0xff] }
  0xe8   : > { %2049 = vmatmul.mubr.bf16.gmra.mrb[96].mxu1 %v2549_v11  ;;  %1895 = vmatprep.mubr.bf16.mxu0 %v2556_v12  ;;  %v307_v11 = vld [vmem:[%s3488_s29 + $0x3b0] sm:$0xff] }
  0xe9   : > { %2056 = vmatprep.mubr.bf16.mxu1 %v2558_v13  ;;  %v304_v13 = vld [vmem:[%s3488_s29 + $0x398] sm:$0xff]  ;;  %v2596_v22 = vcombine.high %v303_v10, %v307_v11 }
  0xef   : > { %1896 = vmatmul.mubr.bf16.gmra.mrb[100].mxu0 %v2555_v18 }
  0xf0   : > { %2057 = vmatmul.mubr.bf16.gmra.mrb[100].mxu1 %v2557_v19  ;;  %1903 = vmatprep.mubr.bf16.mxu0 %v2564_v20 }
  0xf1   : > { %2064 = vmatprep.mubr.bf16.mxu1 %v2566_v21  ;;  %v2589_v21 = vcombine.low %v296_v55, %v300_v56 }
  0xf7   : > { %1904 = vmatmul.mubr.bf16.gmra.mrb[104].mxu0 %v2563_v26  ;;  %v2598_v26 = vcombine.high %v304_v13, %v308_v14 }
  0xf8   : > { %2065 = vmatmul.mubr.bf16.gmra.mrb[104].mxu1 %v2565_v27  ;;  %1911 = vmatprep.mubr.bf16.mxu0 %v2572_v28 }
  0xf9   : > { %2072 = vmatprep.mubr.bf16.mxu1 %v2574_v29 }
  0xfa   : > { %v2849_v32 = vpop.f32.mrb[0].mxu0 }
  0xfb   : > { %v2961_v35 = vpop.f32.mrb[0].mxu1  ;;  %v2850_v36 = vpop.f32.mrb[1].mxu0 }
  0xfc   : > { %v2851_v38 = vadd.f32 %v2850_v36, %v2849_v32  ;;  %v2962_v39 = vpop.f32.mrb[1].mxu1  ;;  %v2852_v40 = vpop.f32.mrb[2].mxu0  ;;  %v311_v32 = vld [vmem:[%s3488_s29 + $0x3d0] sm:$0xff]  ;;  %v316_v36 = vld [vmem:[%s3488_s29 + $0x3f8] sm:$0xff] }
  0xfd   : > { %v2963_v43 = vadd.f32 %v2962_v39, %v2961_v35  ;;  %v2964_v44 = vpop.f32.mrb[2].mxu1  ;;  %v2853_v45 = vpop.f32.mrb[3].mxu0  ;;  %v312_v35 = vld [vmem:[%s3488_s29 + $0x3d8] sm:$0xff]  ;;  %v2595_v39 = vcombine.low %v303_v10, %v307_v11  ;;  %s2477_s29 = sshll.u32 %s3851_s21, 2  ;;  %s2478_s21 = sshll.u32 %s3853_s13, 1 }
  0xfe   : > { %v2854_v47 = vadd.f32 %v2853_v45, %v2852_v40  ;;  %v2965_v48 = vpop.f32.mrb[3].mxu1  ;;  %s3790_s4 = scalar_lea.vmem %s3848_s2, %s2477_s29  ;;  %s187_s7 = scalar_lea.vmem %s3849_s3, %s2478_s21 }
  0xff   : > { %v3708_v49 = vadd.f32 %v2963_v43, %v2851_v38  ;;  %v2966_v50 = vadd.f32 %v2965_v48, %v2964_v44  ;;  %1912 = vmatmul.mubr.bf16.gmra.mrb[108].mxu0 %v2571_v37  ;;  %v2597_v43 = vcombine.low %v304_v13, %v308_v14  ;;  %v2604_v44 = vcombine.high %v311_v32, %v315_v33 }
 0x100   : > { %2073 = vmatmul.mubr.bf16.gmra.mrb[108].mxu1 %v2573_v41  ;;  %1919 = vmatprep.mubr.bf16.mxu0 %v2580_v42  ;;  %v2606_v48 = vcombine.high %v312_v35, %v316_v36 }
 0x101   : > { %v3710_v51 = vadd.f32 %v2966_v50, %v2854_v47  ;;  %2080 = vmatprep.mubr.bf16.mxu1 %v2582_v46 }
 0x102   : > { %v2855_v54 = vpop.f32.mrb[4].mxu0 }
 0x103   : > { %v2967_v57 = vpop.f32.mrb[4].mxu1  ;;  %v2856_v58 = vpop.f32.mrb[5].mxu0 }
 0x104   : > { %v2857_v60 = vadd.f32 %v2856_v58, %v2855_v54  ;;  %v2968_v61 = vpop.f32.mrb[5].mxu1  ;;  %v2858_v62 = vpop.f32.mrb[6].mxu0 }
 0x105   : > { %v2969_v1 = vadd.f32 %v2968_v61, %v2967_v57  ;;  %v2970_v2 = vpop.f32.mrb[6].mxu1  ;;  %v2859_v3 = vpop.f32.mrb[7].mxu0 }
 0x106   : > { %v2860_v5 = vadd.f32 %v2859_v3, %v2858_v62  ;;  %v2971_v6 = vpop.f32.mrb[7].mxu1 }
 0x107   : > { %v3716_v7 = vadd.f32 %v2969_v1, %v2857_v60  ;;  %v2972_v8 = vadd.f32 %v2971_v6, %v2970_v2  ;;  %1920 = vmatmul.mubr.bf16.gmra.mrb[112].mxu0 %v2579_v59  ;;  %v2603_v59 = vcombine.low %v311_v32, %v315_v33 }
 0x108   : > { %2081 = vmatmul.mubr.bf16.gmra.mrb[112].mxu1 %v2581_v63  ;;  %1927 = vmatprep.mubr.bf16.mxu0 %v2588_v0  ;;  %v2605_v63 = vcombine.low %v312_v35, %v316_v36 }
 0x109   : > { %v3718_v9 = vadd.f32 %v2972_v8, %v2860_v5  ;;  %2088 = vmatprep.mubr.bf16.mxu1 %v2590_v4 }
 0x10a   : > { %v2861_v12 = vpop.f32.mrb[8].mxu0 }
 0x10b   : > { %v2973_v15 = vpop.f32.mrb[8].mxu1  ;;  %v2862_v16 = vpop.f32.mrb[9].mxu0 }
 0x10c   : > { %v2863_v18 = vadd.f32 %v2862_v16, %v2861_v12  ;;  %v2974_v19 = vpop.f32.mrb[9].mxu1  ;;  %v2864_v20 = vpop.f32.mrb[10].mxu0 }
 0x10d   : > { %v2975_v23 = vadd.f32 %v2974_v19, %v2973_v15  ;;  %v2976_v24 = vpop.f32.mrb[10].mxu1  ;;  %v2865_v25 = vpop.f32.mrb[11].mxu0 }
 0x10e   : > { %v2866_v27 = vadd.f32 %v2865_v25, %v2864_v20  ;;  %v2977_v28 = vpop.f32.mrb[11].mxu1 }
 0x10f   : > { %v3724_v29 = vadd.f32 %v2975_v23, %v2863_v18  ;;  %v2978_v30 = vadd.f32 %v2977_v28, %v2976_v24  ;;  %1928 = vmatmul.mubr.bf16.gmra.mrb[116].mxu0 %v2587_v17 }
 0x110   : > { %2089 = vmatmul.mubr.bf16.gmra.mrb[116].mxu1 %v2589_v21  ;;  %1935 = vmatprep.mubr.bf16.mxu0 %v2596_v22 }
 0x111   : > { %v3726_v31 = vadd.f32 %v2978_v30, %v2866_v27  ;;  %2096 = vmatprep.mubr.bf16.mxu1 %v2598_v26 }
 0x112   : > { %v2867_v34 = vpop.f32.mrb[12].mxu0 }
 0x113   : > { %v2979_v37 = vpop.f32.mrb[12].mxu1  ;;  %v2868_v38 = vpop.f32.mrb[13].mxu0 }
 0x114   : > { %v2869_v40 = vadd.f32 %v2868_v38, %v2867_v34  ;;  %v2980_v41 = vpop.f32.mrb[13].mxu1  ;;  %v2870_v42 = vpop.f32.mrb[14].mxu0 }
 0x115   : > { %v2981_v45 = vadd.f32 %v2980_v41, %v2979_v37  ;;  %v2982_v46 = vpop.f32.mrb[14].mxu1  ;;  %v2871_v47 = vpop.f32.mrb[15].mxu0 }
 0x116   : > { %v2872_v50 = vadd.f32 %v2871_v47, %v2870_v42  ;;  %v2983_v52 = vpop.f32.mrb[15].mxu1 }
 0x117   : > { %v3732_v53 = vadd.f32 %v2981_v45, %v2869_v40  ;;  %v2984_v54 = vadd.f32 %v2983_v52, %v2982_v46  ;;  %1936 = vmatmul.mubr.bf16.gmra.mrb[120].mxu0 %v2595_v39 }
 0x118   : > { %2097 = vmatmul.mubr.bf16.gmra.mrb[120].mxu1 %v2597_v43  ;;  %1943 = vmatprep.mubr.bf16.mxu0 %v2604_v44 }
 0x119   : > { %v3734_v55 = vadd.f32 %v2984_v54, %v2872_v50  ;;  %2104 = vmatprep.mubr.bf16.mxu1 %v2606_v48 }
 0x11a   : > { %v2873_v56 = vpop.f32.mrb[16].mxu0 }
 0x11b   : > { %v2985_v57 = vpop.f32.mrb[16].mxu1  ;;  %v2874_v58 = vpop.f32.mrb[17].mxu0 }
 0x11c   : > { %v2875_v60 = vadd.f32 %v2874_v58, %v2873_v56  ;;  %v2986_v61 = vpop.f32.mrb[17].mxu1  ;;  %v2876_v62 = vpop.f32.mrb[18].mxu0 }
 0x11d   : > { %v2987_v0 = vadd.f32 %v2986_v61, %v2985_v57  ;;  %v2988_v1 = vpop.f32.mrb[18].mxu1  ;;  %v2877_v2 = vpop.f32.mrb[19].mxu0 }
 0x11e   : > { %v2878_v3 = vadd.f32 %v2877_v2, %v2876_v62  ;;  %v2989_v4 = vpop.f32.mrb[19].mxu1 }
 0x11f   : > { %v3736_v5 = vadd.f32 %v2987_v0, %v2875_v60  ;;  %v2990_v6 = vadd.f32 %v2989_v4, %v2988_v1  ;;  %1944 = vmatmul.mubr.bf16.gmra.mrb[124].mxu0 %v2603_v59 }
 0x120   : > { %2105 = vmatmul.mubr.bf16.gmra.mrb[124].mxu1 %v2605_v63 }
 0x121   : > { %v3738_v8 = vadd.f32 %v2990_v6, %v2878_v3 }
 0x122   : > { %v2879_v10 = vpop.f32.mrb[20].mxu0 }
 0x123   : > { %v2991_v11 = vpop.f32.mrb[20].mxu1  ;;  %v2880_v12 = vpop.f32.mrb[21].mxu0 }
 0x124   : > { %v2881_v13 = vadd.f32 %v2880_v12, %v2879_v10  ;;  %v2992_v14 = vpop.f32.mrb[21].mxu1  ;;  %v2882_v15 = vpop.f32.mrb[22].mxu0 }
 0x125   : > { %v2993_v16 = vadd.f32 %v2992_v14, %v2991_v11  ;;  %v2994_v17 = vpop.f32.mrb[22].mxu1  ;;  %v2883_v18 = vpop.f32.mrb[23].mxu0 }
 0x126   : > { %v2884_v19 = vadd.f32 %v2883_v18, %v2882_v15  ;;  %v2995_v20 = vpop.f32.mrb[23].mxu1 }
 0x127   : > { %v3740_v21 = vadd.f32 %v2993_v16, %v2881_v13  ;;  %v2996_v22 = vadd.f32 %v2995_v20, %v2994_v17 }
 0x129   : > { %v3742_v23 = vadd.f32 %v2996_v22, %v2884_v19 }
 0x12a   : > { %v2885_v24 = vpop.f32.mrb[24].mxu0 }
 0x12b   : > { %v2997_v25 = vpop.f32.mrb[24].mxu1  ;;  %v2886_v26 = vpop.f32.mrb[25].mxu0 }
 0x12c   : > { %v2887_v27 = vadd.f32 %v2886_v26, %v2885_v24  ;;  %v2998_v28 = vpop.f32.mrb[25].mxu1  ;;  %v2888_v30 = vpop.f32.mrb[26].mxu0 }
 0x12d   : > { %v2999_v32 = vadd.f32 %v2998_v28, %v2997_v25  ;;  %v3000_v33 = vpop.f32.mrb[26].mxu1  ;;  %v2889_v34 = vpop.f32.mrb[27].mxu0 }
 0x12e   : > { %v2890_v35 = vadd.f32 %v2889_v34, %v2888_v30  ;;  %v3001_v36 = vpop.f32.mrb[27].mxu1 }
 0x12f   : > { %v3744_v37 = vadd.f32 %v2999_v32, %v2887_v27  ;;  %v3002_v38 = vadd.f32 %v3001_v36, %v3000_v33 }
 0x131   : > { %v3746_v39 = vadd.f32 %v3002_v38, %v2890_v35 }
 0x132   : > { %v2891_v40 = vpop.f32.mrb[28].mxu0 }
 0x133   : > { %v3003_v41 = vpop.f32.mrb[28].mxu1  ;;  %v2892_v42 = vpop.f32.mrb[29].mxu0 }
 0x134   : > { %v2893_v43 = vadd.f32 %v2892_v42, %v2891_v40  ;;  %v3004_v44 = vpop.f32.mrb[29].mxu1  ;;  %v2894_v45 = vpop.f32.mrb[30].mxu0 }
 0x135   : > { %v3005_v46 = vadd.f32 %v3004_v44, %v3003_v41  ;;  %v3006_v47 = vpop.f32.mrb[30].mxu1  ;;  %v2895_v48 = vpop.f32.mrb[31].mxu0 }
 0x136   : > { %v2896_v50 = vadd.f32 %v2895_v48, %v2894_v45  ;;  %v3007_v52 = vpop.f32.mrb[31].mxu1 }
 0x137   : > { %v3748_v54 = vadd.f32 %v3005_v46, %v2893_v43  ;;  %v3008_v56 = vadd.f32 %v3007_v52, %v3006_v47 }
 0x139   : > { %v3750_v57 = vadd.f32 %v3008_v56, %v2896_v50 }
 0x13a   : > { %v2897_v58 = vpop.f32.mrb[32].mxu0 }
 0x13b   : > { %v3009_v59 = vpop.f32.mrb[32].mxu1  ;;  %v2898_v60 = vpop.f32.mrb[33].mxu0 }
 0x13c   : > { %v2899_v61 = vadd.f32 %v2898_v60, %v2897_v58  ;;  %v3010_v62 = vpop.f32.mrb[33].mxu1  ;;  %v2900_v63 = vpop.f32.mrb[34].mxu0 }
 0x13d   : > { %v3011_v0 = vadd.f32 %v3010_v62, %v3009_v59  ;;  %v3012_v1 = vpop.f32.mrb[34].mxu1  ;;  %v2901_v2 = vpop.f32.mrb[35].mxu0 }
 0x13e   : > { %v2902_v3 = vadd.f32 %v2901_v2, %v2900_v63  ;;  %v3013_v4 = vpop.f32.mrb[35].mxu1 }
 0x13f   : > { %v3752_v6 = vadd.f32 %v3011_v0, %v2899_v61  ;;  %v3014_v10 = vadd.f32 %v3013_v4, %v3012_v1 }
 0x141   : > { %v3754_v11 = vadd.f32 %v3014_v10, %v2902_v3 }
 0x142   : > { %v2903_v12 = vpop.f32.mrb[36].mxu0 }
 0x143   : > { %v3015_v13 = vpop.f32.mrb[36].mxu1  ;;  %v2904_v14 = vpop.f32.mrb[37].mxu0 }
 0x144   : > { %v2905_v15 = vadd.f32 %v2904_v14, %v2903_v12  ;;  %v3016_v16 = vpop.f32.mrb[37].mxu1  ;;  %v2906_v17 = vpop.f32.mrb[38].mxu0 }
 0x145   : > { %v3017_v18 = vadd.f32 %v3016_v16, %v3015_v13  ;;  %v3018_v19 = vpop.f32.mrb[38].mxu1  ;;  %v2907_v20 = vpop.f32.mrb[39].mxu0 }
 0x146   : > { %v2908_v22 = vadd.f32 %v2907_v20, %v2906_v17  ;;  %v3019_v24 = vpop.f32.mrb[39].mxu1 }
 0x147   : > { %v3756_v25 = vadd.f32 %v3017_v18, %v2905_v15  ;;  %v3020_v26 = vadd.f32 %v3019_v24, %v3018_v19 }
 0x149   : > { %v3758_v27 = vadd.f32 %v3020_v26, %v2908_v22 }
 0x14a   : > { %v2909_v28 = vpop.f32.mrb[40].mxu0 }
 0x14b   : > { %v3021_v30 = vpop.f32.mrb[40].mxu1  ;;  %v2910_v32 = vpop.f32.mrb[41].mxu0 }
 0x14c   : > { %v2911_v33 = vadd.f32 %v2910_v32, %v2909_v28  ;;  %v3022_v34 = vpop.f32.mrb[41].mxu1  ;;  %v2912_v35 = vpop.f32.mrb[42].mxu0 }
 0x14d   : > { %v3023_v36 = vadd.f32 %v3022_v34, %v3021_v30  ;;  %v3024_v38 = vpop.f32.mrb[42].mxu1  ;;  %v2913_v40 = vpop.f32.mrb[43].mxu0 }
 0x14e   : > { %v2914_v41 = vadd.f32 %v2913_v40, %v2912_v35  ;;  %v3025_v42 = vpop.f32.mrb[43].mxu1 }
 0x14f   : > { %v3760_v43 = vadd.f32 %v3023_v36, %v2911_v33  ;;  %v3026_v44 = vadd.f32 %v3025_v42, %v3024_v38 }
 0x151   : > { %v3762_v45 = vadd.f32 %v3026_v44, %v2914_v41 }
 0x152   : > { %v2915_v46 = vpop.f32.mrb[44].mxu0 }
 0x153   : > { %v3027_v47 = vpop.f32.mrb[44].mxu1  ;;  %v2916_v48 = vpop.f32.mrb[45].mxu0 }
 0x154   : > { %v2917_v50 = vadd.f32 %v2916_v48, %v2915_v46  ;;  %v3028_v52 = vpop.f32.mrb[45].mxu1  ;;  %v2918_v56 = vpop.f32.mrb[46].mxu0 }
 0x155   : > { %v3029_v58 = vadd.f32 %v3028_v52, %v3027_v47  ;;  %v3030_v59 = vpop.f32.mrb[46].mxu1  ;;  %v2919_v60 = vpop.f32.mrb[47].mxu0 }
 0x156   : > { %v2920_v61 = vadd.f32 %v2919_v60, %v2918_v56  ;;  %v3031_v62 = vpop.f32.mrb[47].mxu1 }
 0x157   : > { %v3764_v63 = vadd.f32 %v3029_v58, %v2917_v50  ;;  %v3032_v0 = vadd.f32 %v3031_v62, %v3030_v59 }
 0x159   : > { %v3766_v1 = vadd.f32 %v3032_v0, %v2920_v61 }
 0x15a   : > { %v2921_v2 = vpop.f32.mrb[48].mxu0 }
 0x15b   : > { %v3033_v3 = vpop.f32.mrb[48].mxu1  ;;  %v2922_v4 = vpop.f32.mrb[49].mxu0 }
 0x15c   : > { %v2923_v10 = vadd.f32 %v2922_v4, %v2921_v2  ;;  %v3034_v12 = vpop.f32.mrb[49].mxu1  ;;  %v2924_v13 = vpop.f32.mrb[50].mxu0 }
 0x15d   : > { %v3035_v14 = vadd.f32 %v3034_v12, %v3033_v3  ;;  %v3036_v15 = vpop.f32.mrb[50].mxu1  ;;  %v2925_v16 = vpop.f32.mrb[51].mxu0 }
 0x15e   : > { %v2926_v17 = vadd.f32 %v2925_v16, %v2924_v13  ;;  %v3037_v18 = vpop.f32.mrb[51].mxu1 }
 0x15f   : > { %v3768_v19 = vadd.f32 %v3035_v14, %v2923_v10  ;;  %v3038_v20 = vadd.f32 %v3037_v18, %v3036_v15 }
 0x161   : > { %v3770_v22 = vadd.f32 %v3038_v20, %v2926_v17 }
 0x162   : > { %v2927_v24 = vpop.f32.mrb[52].mxu0 }
 0x163   : > { %v3039_v26 = vpop.f32.mrb[52].mxu1  ;;  %v2928_v28 = vpop.f32.mrb[53].mxu0 }
 0x164   : > { %v2929_v30 = vadd.f32 %v2928_v28, %v2927_v24  ;;  %v3040_v32 = vpop.f32.mrb[53].mxu1  ;;  %v2930_v33 = vpop.f32.mrb[54].mxu0 }
 0x165   : > { %v3041_v34 = vadd.f32 %v3040_v32, %v3039_v26  ;;  %v3042_v35 = vpop.f32.mrb[54].mxu1  ;;  %v2931_v36 = vpop.f32.mrb[55].mxu0 }
 0x166   : > { %v2932_v38 = vadd.f32 %v2931_v36, %v2930_v33  ;;  %v3043_v40 = vpop.f32.mrb[55].mxu1 }
 0x167   : > { %v3772_v41 = vadd.f32 %v3041_v34, %v2929_v30  ;;  %v3044_v42 = vadd.f32 %v3043_v40, %v3042_v35 }
 0x169   : > { %v3774_v44 = vadd.f32 %v3044_v42, %v2932_v38 }
 0x16a   : > { %v2933_v46 = vpop.f32.mrb[56].mxu0 }
 0x16b   : > { %v3045_v47 = vpop.f32.mrb[56].mxu1  ;;  %v2934_v48 = vpop.f32.mrb[57].mxu0 }
 0x16c   : > { %v2935_v50 = vadd.f32 %v2934_v48, %v2933_v46  ;;  %v3046_v52 = vpop.f32.mrb[57].mxu1  ;;  %v2936_v56 = vpop.f32.mrb[58].mxu0 }
 0x16d   : > { %v3047_v58 = vadd.f32 %v3046_v52, %v3045_v47  ;;  %v3048_v59 = vpop.f32.mrb[58].mxu1  ;;  %v2937_v60 = vpop.f32.mrb[59].mxu0 }
 0x16e   : > { %v2938_v61 = vadd.f32 %v2937_v60, %v2936_v56  ;;  %v3049_v62 = vpop.f32.mrb[59].mxu1 }
 0x16f   : > { %v3776_v0 = vadd.f32 %v3047_v58, %v2935_v50  ;;  %v3050_v2 = vadd.f32 %v3049_v62, %v3048_v59 }
 0x171   : > { %v3778_v3 = vadd.f32 %v3050_v2, %v2938_v61 }
 0x172   : > { %v2939_v4 = vpop.f32.mrb[60].mxu0 }
 0x173   : > { %v3051_v10 = vpop.f32.mrb[60].mxu1  ;;  %v2940_v12 = vpop.f32.mrb[61].mxu0 }
 0x174   : > { %v2941_v13 = vadd.f32 %v2940_v12, %v2939_v4  ;;  %v3052_v14 = vpop.f32.mrb[61].mxu1  ;;  %v2942_v15 = vpop.f32.mrb[62].mxu0 }
 0x175   : > { %v3053_v16 = vadd.f32 %v3052_v14, %v3051_v10  ;;  %v3054_v17 = vpop.f32.mrb[62].mxu1  ;;  %v2943_v18 = vpop.f32.mrb[63].mxu0 }
 0x176   : > { %v2944_v20 = vadd.f32 %v2943_v18, %v2942_v15  ;;  %v3055_v24 = vpop.f32.mrb[63].mxu1 }
 0x177   : > { %v3780_v26 = vadd.f32 %v3053_v16, %v2941_v13  ;;  %v3056_v28 = vadd.f32 %v3055_v24, %v3054_v17 }
 0x179   : > { %v3782_v30 = vadd.f32 %v3056_v28, %v2944_v20 }
 0x17a   : > { %v3073_v32 = vpop.f32.mrb[64].mxu0 }
 0x17b   : > { %v3185_v33 = vpop.f32.mrb[64].mxu1  ;;  %v3074_v34 = vpop.f32.mrb[65].mxu0 }
 0x17c   : > { %v3075_v35 = vadd.f32 %v3074_v34, %v3073_v32  ;;  %v3186_v36 = vpop.f32.mrb[65].mxu1  ;;  %v3076_v38 = vpop.f32.mrb[66].mxu0 }
 0x17d   : > { %v3187_v40 = vadd.f32 %v3186_v36, %v3185_v33  ;;  %v3188_v42 = vpop.f32.mrb[66].mxu1  ;;  %v3077_v46 = vpop.f32.mrb[67].mxu0 }
 0x17e   : > { %v1826_v47 = vadd.f32 %v3075_v35, %v3708_v49  ;;  %v3078_v48 = vadd.f32 %v3077_v46, %v3076_v38  ;;  %v3189_v50 = vpop.f32.mrb[67].mxu1 }
 0x17f   : > { %v3190_v52 = vadd.f32 %v3189_v50, %v3188_v42 }
 0x180   : > { %v1987_v56 = vadd.f32 %v3187_v40, %v1826_v47  ;;  %v1829_v58 = vadd.f32 %v3078_v48, %v3710_v51 }
 0x182   : > { %v1990_v59 = vadd.f32 %v3190_v52, %v1829_v58  ;;  %v3079_v60 = vpop.f32.mrb[68].mxu0  ;;  %v2151_v61 = vmul.f32 %v1987_v56, %v1987_v56 }
 0x183   : > { %v3191_v62 = vpop.f32.mrb[68].mxu1  ;;  %v3080_v2 = vpop.f32.mrb[69].mxu0 }
 0x184   : > { %v2113_v4 = vadd.f32 %v1990_v59, %v1987_v56  ;;  %v2152_v49 = vmul.f32 %v1990_v59, %v1990_v59  ;;  %v2741_v10 = vpack.c.bf16 %v1990_v59, %v1987_v56  ;;  %v3081_v12 = vadd.f32 %v3080_v2, %v3079_v60  ;;  %v3192_v13 = vpop.f32.mrb[69].mxu1  ;;  %v3082_v14 = vpop.f32.mrb[70].mxu0 }
 0x185   : > { %v3193_v15 = vadd.f32 %v3192_v13, %v3191_v62  ;;  %v3194_v51 = vpop.f32.mrb[70].mxu1  ;;  %v3083_v16 = vpop.f32.mrb[71].mxu0 }
 0x186   : > { %v2183_v17 = vadd.f32 %v2152_v49, %v2151_v61  ;;  %2742 = vst [vmem:[%s3790_s4] sm:$0xff] %v2741_v10   ;;  %v1834_v18 = vadd.f32 %v3081_v12, %v3716_v7  ;;  %v3084_v20 = vadd.f32 %v3083_v16, %v3082_v14  ;;  %v3195_v24 = vpop.f32.mrb[71].mxu1 }
 0x187   : > { %v3196_v28 = vadd.f32 %v3195_v24, %v3194_v51 }
 0x188   : > { %v1995_v32 = vadd.f32 %v3193_v15, %v1834_v18  ;;  %v1837_v33 = vadd.f32 %v3084_v20, %v3718_v9 }
 0x18a   : > { %v2114_v34 = vadd.f32 %v2113_v4, %v1995_v32  ;;  %v2153_v35 = vmul.f32 %v1995_v32, %v1995_v32  ;;  %v1998_v36 = vadd.f32 %v3196_v28, %v1837_v33  ;;  %v3085_v38 = vpop.f32.mrb[72].mxu0 }
 0x18b   : > { %v3197_v40 = vpop.f32.mrb[72].mxu1  ;;  %v3086_v42 = vpop.f32.mrb[73].mxu0 }
 0x18c   : > { %v2184_v46 = vadd.f32 %v2183_v17, %v2153_v35  ;;  %v2115_v47 = vadd.f32 %v2114_v34, %v1998_v36  ;;  %v2154_v48 = vmul.f32 %v1998_v36, %v1998_v36  ;;  %v2746_v50 = vpack.c.bf16 %v1998_v36, %v1995_v32  ;;  %v3198_v52 = vpop.f32.mrb[73].mxu1  ;;  %v3088_v56 = vpop.f32.mrb[74].mxu0 }
 0x18d   : > { %v3087_v7 = vadd.f32 %v3086_v42, %v3085_v38  ;;  %v3199_v58 = vadd.f32 %v3198_v52, %v3197_v40  ;;  %v3200_v59 = vpop.f32.mrb[74].mxu1  ;;  %v3089_v60 = vpop.f32.mrb[75].mxu0 }
 0x18e   : > { %v2185_v61 = vadd.f32 %v2184_v46, %v2154_v48  ;;  %2818 = vst [vmem:[%s3790_s4 + $0x8] sm:$0xff] %v2746_v50   ;;  %v3090_v9 = vadd.f32 %v3089_v60, %v3088_v56  ;;  %v3201_v62 = vpop.f32.mrb[75].mxu1 }
 0x18f   : > { %v1842_v2 = vadd.f32 %v3087_v7, %v3724_v29  ;;  %v3202_v4 = vadd.f32 %v3201_v62, %v3200_v59 }
 0x190   : > { %v1845_v49 = vadd.f32 %v3090_v9, %v3726_v31 }
 0x191   : > { %v2003_v10 = vadd.f32 %v3199_v58, %v1842_v2 }
 0x192   : > { %v2006_v12 = vadd.f32 %v3202_v4, %v1845_v49  ;;  %v3091_v13 = vpop.f32.mrb[76].mxu0 }
 0x193   : > { %v2116_v14 = vadd.f32 %v2115_v47, %v2003_v10  ;;  %v2155_v15 = vmul.f32 %v2003_v10, %v2003_v10  ;;  %v3203_v51 = vpop.f32.mrb[76].mxu1  ;;  %v3092_v16 = vpop.f32.mrb[77].mxu0 }
 0x194   : > { %v2156_v17 = vmul.f32 %v2006_v12, %v2006_v12  ;;  %v2751_v18 = vpack.c.bf16 %v2006_v12, %v2003_v10  ;;  %v3093_v20 = vadd.f32 %v3092_v16, %v3091_v13  ;;  %v3204_v24 = vpop.f32.mrb[77].mxu1  ;;  %v3094_v28 = vpop.f32.mrb[78].mxu0 }
 0x195   : > { %v2186_v32 = vadd.f32 %v2185_v61, %v2155_v15  ;;  %v2117_v33 = vadd.f32 %v2116_v14, %v2006_v12  ;;  %v3205_v34 = vadd.f32 %v3204_v24, %v3203_v51  ;;  %v3206_v29 = vpop.f32.mrb[78].mxu1  ;;  %v3095_v35 = vpop.f32.mrb[79].mxu0 }
 0x196   : > { %2819 = vst [vmem:[%s3790_s4 + $0x10] sm:$0xff] %v2751_v18   ;;  %v1850_v31 = vadd.f32 %v3093_v20, %v3732_v53  ;;  %v3096_v36 = vadd.f32 %v3095_v35, %v3094_v28  ;;  %v3207_v38 = vpop.f32.mrb[79].mxu1 }
 0x197   : > { %v2187_v40 = vadd.f32 %v2186_v32, %v2156_v17  ;;  %v3208_v42 = vadd.f32 %v3207_v38, %v3206_v29 }
 0x198   : > { %v2011_v46 = vadd.f32 %v3205_v34, %v1850_v31  ;;  %v1853_v47 = vadd.f32 %v3096_v36, %v3734_v55 }
 0x19a   : > { %v2118_v48 = vadd.f32 %v2117_v33, %v2011_v46  ;;  %v2157_v50 = vmul.f32 %v2011_v46, %v2011_v46  ;;  %v2014_v52 = vadd.f32 %v3208_v42, %v1853_v47  ;;  %v3097_v56 = vpop.f32.mrb[80].mxu0 }
 0x19b   : > { %v3209_v7 = vpop.f32.mrb[80].mxu1  ;;  %v3098_v58 = vpop.f32.mrb[81].mxu0 }
 0x19c   : > { %v2188_v59 = vadd.f32 %v2187_v40, %v2157_v50  ;;  %v2119_v60 = vadd.f32 %v2118_v48, %v2014_v52  ;;  %v2158_v61 = vmul.f32 %v2014_v52, %v2014_v52  ;;  %v2756_v9 = vpack.c.bf16 %v2014_v52, %v2011_v46  ;;  %v3210_v62 = vpop.f32.mrb[81].mxu1  ;;  %v3100_v53 = vpop.f32.mrb[82].mxu0 }
 0x19d   : > { %v3099_v2 = vadd.f32 %v3098_v58, %v3097_v56  ;;  %v3211_v4 = vadd.f32 %v3210_v62, %v3209_v7  ;;  %v3212_v49 = vpop.f32.mrb[82].mxu1  ;;  %v3101_v10 = vpop.f32.mrb[83].mxu0 }
 0x19e   : > { %v2189_v12 = vadd.f32 %v2188_v59, %v2158_v61  ;;  %2820 = vst [vmem:[%s3790_s4 + $0x18] sm:$0xff] %v2756_v9   ;;  %v3102_v55 = vadd.f32 %v3101_v10, %v3100_v53  ;;  %v3213_v13 = vpop.f32.mrb[83].mxu1 }
 0x19f   : > { %v1858_v14 = vadd.f32 %v3099_v2, %v3736_v5  ;;  %v3214_v15 = vadd.f32 %v3213_v13, %v3212_v49 }
 0x1a0   : > { %v1861_v51 = vadd.f32 %v3102_v55, %v3738_v8 }
 0x1a1   : > { %v2019_v16 = vadd.f32 %v3211_v4, %v1858_v14 }
 0x1a2   : > { %v2022_v17 = vadd.f32 %v3214_v15, %v1861_v51  ;;  %v3103_v18 = vpop.f32.mrb[84].mxu0 }
 0x1a3   : > { %v2120_v20 = vadd.f32 %v2119_v60, %v2019_v16  ;;  %v2159_v24 = vmul.f32 %v2019_v16, %v2019_v16  ;;  %v3215_v28 = vpop.f32.mrb[84].mxu1  ;;  %v3104_v32 = vpop.f32.mrb[85].mxu0 }
 0x1a4   : > { %v2160_v33 = vmul.f32 %v2022_v17, %v2022_v17  ;;  %v2761_v34 = vpack.c.bf16 %v2022_v17, %v2019_v16  ;;  %v3105_v29 = vadd.f32 %v3104_v32, %v3103_v18  ;;  %v3216_v35 = vpop.f32.mrb[85].mxu1  ;;  %v3106_v31 = vpop.f32.mrb[86].mxu0 }
 0x1a5   : > { %v2190_v36 = vadd.f32 %v2189_v12, %v2159_v24  ;;  %v2121_v38 = vadd.f32 %v2120_v20, %v2022_v17  ;;  %v3217_v40 = vadd.f32 %v3216_v35, %v3215_v28  ;;  %v3218_v5 = vpop.f32.mrb[86].mxu1  ;;  %v3107_v42 = vpop.f32.mrb[87].mxu0 }
 0x1a6   : > { %2821 = vst [vmem:[%s3790_s4 + $0x20] sm:$0xff] %v2761_v34   ;;  %v1866_v8 = vadd.f32 %v3105_v29, %v3740_v21  ;;  %v3108_v46 = vadd.f32 %v3107_v42, %v3106_v31  ;;  %v3219_v47 = vpop.f32.mrb[87].mxu1 }
 0x1a7   : > { %v2191_v48 = vadd.f32 %v2190_v36, %v2160_v33  ;;  %v3220_v50 = vadd.f32 %v3219_v47, %v3218_v5 }
 0x1a8   : > { %v2027_v52 = vadd.f32 %v3217_v40, %v1866_v8  ;;  %v1869_v56 = vadd.f32 %v3108_v46, %v3742_v23 }
 0x1aa   : > { %v2122_v7 = vadd.f32 %v2121_v38, %v2027_v52  ;;  %v2161_v58 = vmul.f32 %v2027_v52, %v2027_v52  ;;  %v2030_v59 = vadd.f32 %v3220_v50, %v1869_v56  ;;  %v3109_v60 = vpop.f32.mrb[88].mxu0 }
 0x1ab   : > { %v3221_v61 = vpop.f32.mrb[88].mxu1  ;;  %v3110_v9 = vpop.f32.mrb[89].mxu0 }
 0x1ac   : > { %v2192_v62 = vadd.f32 %v2191_v48, %v2161_v58  ;;  %v2123_v53 = vadd.f32 %v2122_v7, %v2030_v59  ;;  %v2162_v2 = vmul.f32 %v2030_v59, %v2030_v59  ;;  %v2766_v4 = vpack.c.bf16 %v2030_v59, %v2027_v52  ;;  %v3222_v49 = vpop.f32.mrb[89].mxu1  ;;  %v3112_v21 = vpop.f32.mrb[90].mxu0 }
 0x1ad   : > { %v3111_v10 = vadd.f32 %v3110_v9, %v3109_v60  ;;  %v3223_v12 = vadd.f32 %v3222_v49, %v3221_v61  ;;  %v3224_v55 = vpop.f32.mrb[90].mxu1  ;;  %v3113_v13 = vpop.f32.mrb[91].mxu0 }
 0x1ae   : > { %v2193_v14 = vadd.f32 %v2192_v62, %v2162_v2  ;;  %2822 = vst [vmem:[%s3790_s4 + $0x28] sm:$0xff] %v2766_v4   ;;  %v3114_v23 = vadd.f32 %v3113_v13, %v3112_v21  ;;  %v3225_v15 = vpop.f32.mrb[91].mxu1 }
 0x1af   : > { %v1874_v51 = vadd.f32 %v3111_v10, %v3744_v37  ;;  %v3226_v16 = vadd.f32 %v3225_v15, %v3224_v55 }
 0x1b0   : > { %v1877_v17 = vadd.f32 %v3114_v23, %v3746_v39 }
 0x1b1   : > { %v2035_v18 = vadd.f32 %v3223_v12, %v1874_v51 }
 0x1b2   : > { %v2038_v20 = vadd.f32 %v3226_v16, %v1877_v17  ;;  %v3115_v24 = vpop.f32.mrb[92].mxu0 }
 0x1b3   : > { %v2124_v28 = vadd.f32 %v2123_v53, %v2035_v18  ;;  %v2163_v32 = vmul.f32 %v2035_v18, %v2035_v18  ;;  %v3227_v33 = vpop.f32.mrb[92].mxu1  ;;  %v3116_v34 = vpop.f32.mrb[93].mxu0 }
 0x1b4   : > { %v2164_v29 = vmul.f32 %v2038_v20, %v2038_v20  ;;  %v2771_v35 = vpack.c.bf16 %v2038_v20, %v2035_v18  ;;  %v3117_v31 = vadd.f32 %v3116_v34, %v3115_v24  ;;  %v3228_v36 = vpop.f32.mrb[93].mxu1  ;;  %v3118_v38 = vpop.f32.mrb[94].mxu0 }
 0x1b5   : > { %v2194_v40 = vadd.f32 %v2193_v14, %v2163_v32  ;;  %v2125_v5 = vadd.f32 %v2124_v28, %v2038_v20  ;;  %v3229_v42 = vadd.f32 %v3228_v36, %v3227_v33  ;;  %v3230_v37 = vpop.f32.mrb[94].mxu1  ;;  %v3119_v8 = vpop.f32.mrb[95].mxu0 }
 0x1b6   : > { %2823 = vst [vmem:[%s3790_s4 + $0x30] sm:$0xff] %v2771_v35   ;;  %v1882_v39 = vadd.f32 %v3117_v31, %v3748_v54  ;;  %v3120_v46 = vadd.f32 %v3119_v8, %v3118_v38  ;;  %v3231_v47 = vpop.f32.mrb[95].mxu1 }
 0x1b7   : > { %v2195_v48 = vadd.f32 %v2194_v40, %v2164_v29  ;;  %v3232_v50 = vadd.f32 %v3231_v47, %v3230_v37 }
 0x1b8   : > { %v2043_v52 = vadd.f32 %v3229_v42, %v1882_v39  ;;  %v1885_v56 = vadd.f32 %v3120_v46, %v3750_v57 }
 0x1ba   : > { %v2126_v7 = vadd.f32 %v2125_v5, %v2043_v52  ;;  %v2165_v58 = vmul.f32 %v2043_v52, %v2043_v52  ;;  %v2046_v59 = vadd.f32 %v3232_v50, %v1885_v56  ;;  %v3121_v60 = vpop.f32.mrb[96].mxu0 }
 0x1bb   : > { %v3233_v61 = vpop.f32.mrb[96].mxu1  ;;  %v3122_v9 = vpop.f32.mrb[97].mxu0 }
 0x1bc   : > { %v2196_v62 = vadd.f32 %v2195_v48, %v2165_v58  ;;  %v2127_v53 = vadd.f32 %v2126_v7, %v2046_v59  ;;  %v2166_v2 = vmul.f32 %v2046_v59, %v2046_v59  ;;  %v2776_v4 = vpack.c.bf16 %v2046_v59, %v2043_v52  ;;  %v3234_v49 = vpop.f32.mrb[97].mxu1  ;;  %v3124_v54 = vpop.f32.mrb[98].mxu0 }
 0x1bd   : > { %v3123_v21 = vadd.f32 %v3122_v9, %v3121_v60  ;;  %v3235_v10 = vadd.f32 %v3234_v49, %v3233_v61  ;;  %v3236_v12 = vpop.f32.mrb[98].mxu1  ;;  %v3125_v55 = vpop.f32.mrb[99].mxu0 }
 0x1be   : > { %v2197_v13 = vadd.f32 %v2196_v62, %v2166_v2  ;;  %2824 = vst [vmem:[%s3790_s4 + $0x38] sm:$0xff] %v2776_v4   ;;  %v3126_v57 = vadd.f32 %v3125_v55, %v3124_v54  ;;  %v3237_v14 = vpop.f32.mrb[99].mxu1 }
 0x1bf   : > { %v1890_v23 = vadd.f32 %v3123_v21, %v3752_v6  ;;  %v3238_v15 = vadd.f32 %v3237_v14, %v3236_v12 }
 0x1c0   : > { %v1893_v51 = vadd.f32 %v3126_v57, %v3754_v11 }
 0x1c1   : > { %v2051_v16 = vadd.f32 %v3235_v10, %v1890_v23 }
 0x1c2   : > { %v2054_v17 = vadd.f32 %v3238_v15, %v1893_v51  ;;  %v3127_v18 = vpop.f32.mrb[100].mxu0 }
 0x1c3   : > { %v2128_v20 = vadd.f32 %v2127_v53, %v2051_v16  ;;  %v2167_v24 = vmul.f32 %v2051_v16, %v2051_v16  ;;  %v3239_v28 = vpop.f32.mrb[100].mxu1  ;;  %v3128_v32 = vpop.f32.mrb[101].mxu0 }
 0x1c4   : > { %v2168_v33 = vmul.f32 %v2054_v17, %v2054_v17  ;;  %v2781_v34 = vpack.c.bf16 %v2054_v17, %v2051_v16  ;;  %v3129_v29 = vadd.f32 %v3128_v32, %v3127_v18  ;;  %v3240_v35 = vpop.f32.mrb[101].mxu1  ;;  %v3130_v31 = vpop.f32.mrb[102].mxu0 }
 0x1c5   : > { %v2198_v36 = vadd.f32 %v2197_v13, %v2167_v24  ;;  %v2129_v38 = vadd.f32 %v2128_v20, %v2054_v17  ;;  %v3241_v40 = vadd.f32 %v3240_v35, %v3239_v28  ;;  %v3242_v6 = vpop.f32.mrb[102].mxu1  ;;  %v3131_v5 = vpop.f32.mrb[103].mxu0 }
 0x1c6   : > { %2825 = vst [vmem:[%s3790_s4 + $0x40] sm:$0xff] %v2781_v34   ;;  %v1898_v11 = vadd.f32 %v3129_v29, %v3756_v25  ;;  %v3132_v42 = vadd.f32 %v3131_v5, %v3130_v31  ;;  %v3243_v37 = vpop.f32.mrb[103].mxu1 }
 0x1c7   : > { %v2199_v8 = vadd.f32 %v2198_v36, %v2168_v33  ;;  %v3244_v39 = vadd.f32 %v3243_v37, %v3242_v6 }
 0x1c8   : > { %v2059_v46 = vadd.f32 %v3241_v40, %v1898_v11  ;;  %v1901_v47 = vadd.f32 %v3132_v42, %v3758_v27 }
 0x1ca   : > { %v2130_v48 = vadd.f32 %v2129_v38, %v2059_v46  ;;  %v2169_v50 = vmul.f32 %v2059_v46, %v2059_v46  ;;  %v2062_v52 = vadd.f32 %v3244_v39, %v1901_v47  ;;  %v3133_v56 = vpop.f32.mrb[104].mxu0 }
 0x1cb   : > { %v3245_v7 = vpop.f32.mrb[104].mxu1  ;;  %v3134_v58 = vpop.f32.mrb[105].mxu0 }
 0x1cc   : > { %v2200_v59 = vadd.f32 %v2199_v8, %v2169_v50  ;;  %v2131_v60 = vadd.f32 %v2130_v48, %v2062_v52  ;;  %v2170_v61 = vmul.f32 %v2062_v52, %v2062_v52  ;;  %v2786_v9 = vpack.c.bf16 %v2062_v52, %v2059_v46  ;;  %v3246_v62 = vpop.f32.mrb[105].mxu1  ;;  %v3136_v25 = vpop.f32.mrb[106].mxu0 }
 0x1cd   : > { %v3135_v53 = vadd.f32 %v3134_v58, %v3133_v56  ;;  %v3247_v2 = vadd.f32 %v3246_v62, %v3245_v7  ;;  %v3248_v4 = vpop.f32.mrb[106].mxu1  ;;  %v3137_v49 = vpop.f32.mrb[107].mxu0 }
 0x1ce   : > { %v2201_v54 = vadd.f32 %v2200_v59, %v2170_v61  ;;  %2826 = vst [vmem:[%s3790_s4 + $0x48] sm:$0xff] %v2786_v9   ;;  %v3138_v27 = vadd.f32 %v3137_v49, %v3136_v25  ;;  %v3249_v21 = vpop.f32.mrb[107].mxu1 }
 0x1cf   : > { %v1906_v10 = vadd.f32 %v3135_v53, %v3760_v43  ;;  %v3250_v12 = vadd.f32 %v3249_v21, %v3248_v4 }
 0x1d0   : > { %v1909_v55 = vadd.f32 %v3138_v27, %v3762_v45 }
 0x1d1   : > { %v2067_v13 = vadd.f32 %v3247_v2, %v1906_v10 }
 0x1d2   : > { %v2070_v57 = vadd.f32 %v3250_v12, %v1909_v55  ;;  %v3139_v14 = vpop.f32.mrb[108].mxu0 }
 0x1d3   : > { %v2132_v23 = vadd.f32 %v2131_v60, %v2067_v13  ;;  %v2171_v15 = vmul.f32 %v2067_v13, %v2067_v13  ;;  %v3251_v51 = vpop.f32.mrb[108].mxu1  ;;  %v3140_v16 = vpop.f32.mrb[109].mxu0 }
 0x1d4   : > { %v2172_v17 = vmul.f32 %v2070_v57, %v2070_v57  ;;  %v2791_v18 = vpack.c.bf16 %v2070_v57, %v2067_v13  ;;  %v3141_v20 = vadd.f32 %v3140_v16, %v3139_v14  ;;  %v3252_v24 = vpop.f32.mrb[109].mxu1  ;;  %v3142_v28 = vpop.f32.mrb[110].mxu0 }
 0x1d5   : > { %v2202_v32 = vadd.f32 %v2201_v54, %v2171_v15  ;;  %v2133_v33 = vadd.f32 %v2132_v23, %v2070_v57  ;;  %v3253_v34 = vadd.f32 %v3252_v24, %v3251_v51  ;;  %v3254_v43 = vpop.f32.mrb[110].mxu1  ;;  %v3143_v29 = vpop.f32.mrb[111].mxu0 }
 0x1d6   : > { %2827 = vst [vmem:[%s3790_s4 + $0x50] sm:$0xff] %v2791_v18   ;;  %v1914_v45 = vadd.f32 %v3141_v20, %v3764_v63  ;;  %v3144_v35 = vadd.f32 %v3143_v29, %v3142_v28  ;;  %v3255_v31 = vpop.f32.mrb[111].mxu1 }
 0x1d7   : > { %v2203_v36 = vadd.f32 %v2202_v32, %v2172_v17  ;;  %v3256_v38 = vadd.f32 %v3255_v31, %v3254_v43 }
 0x1d8   : > { %v2075_v40 = vadd.f32 %v3253_v34, %v1914_v45  ;;  %v1917_v6 = vadd.f32 %v3144_v35, %v3766_v1 }
 0x1da   : > { %v2134_v5 = vadd.f32 %v2133_v33, %v2075_v40  ;;  %v2173_v11 = vmul.f32 %v2075_v40, %v2075_v40  ;;  %v2078_v42 = vadd.f32 %v3256_v38, %v1917_v6  ;;  %v3145_v37 = vpop.f32.mrb[112].mxu0 }
 0x1db   : > { %v3257_v8 = vpop.f32.mrb[112].mxu1  ;;  %v3146_v39 = vpop.f32.mrb[113].mxu0 }
 0x1dc   : > { %v2204_v46 = vadd.f32 %v2203_v36, %v2173_v11  ;;  %v2135_v47 = vadd.f32 %v2134_v5, %v2078_v42  ;;  %v2174_v48 = vmul.f32 %v2078_v42, %v2078_v42  ;;  %v2796_v50 = vpack.c.bf16 %v2078_v42, %v2075_v40  ;;  %v3258_v52 = vpop.f32.mrb[113].mxu1  ;;  %v3148_v63 = vpop.f32.mrb[114].mxu0 }
 0x1dd   : > { %v3147_v56 = vadd.f32 %v3146_v39, %v3145_v37  ;;  %v3259_v7 = vadd.f32 %v3258_v52, %v3257_v8  ;;  %v3260_v58 = vpop.f32.mrb[114].mxu1  ;;  %v3149_v59 = vpop.f32.mrb[115].mxu0 }
 0x1de   : > { %v2205_v60 = vadd.f32 %v2204_v46, %v2174_v48  ;;  %2828 = vst [vmem:[%s3790_s4 + $0x58] sm:$0xff] %v2796_v50   ;;  %v3150_v1 = vadd.f32 %v3149_v59, %v3148_v63  ;;  %v3261_v61 = vpop.f32.mrb[115].mxu1 }
 0x1df   : > { %v1922_v9 = vadd.f32 %v3147_v56, %v3768_v19  ;;  %v3262_v62 = vadd.f32 %v3261_v61, %v3260_v58 }
 0x1e0   : > { %v1925_v25 = vadd.f32 %v3150_v1, %v3770_v22 }
 0x1e1   : > { %v2083_v53 = vadd.f32 %v3259_v7, %v1922_v9 }
 0x1e2   : > { %v2086_v2 = vadd.f32 %v3262_v62, %v1925_v25  ;;  %v3151_v4 = vpop.f32.mrb[116].mxu0 }
 0x1e3   : > { %v2136_v49 = vadd.f32 %v2135_v47, %v2083_v53  ;;  %v2175_v54 = vmul.f32 %v2083_v53, %v2083_v53  ;;  %v3263_v27 = vpop.f32.mrb[116].mxu1  ;;  %v3152_v21 = vpop.f32.mrb[117].mxu0 }
 0x1e4   : > { %v2176_v10 = vmul.f32 %v2086_v2, %v2086_v2  ;;  %v2801_v12 = vpack.c.bf16 %v2086_v2, %v2083_v53  ;;  %v3153_v55 = vadd.f32 %v3152_v21, %v3151_v4  ;;  %v3264_v13 = vpop.f32.mrb[117].mxu1  ;;  %v3154_v57 = vpop.f32.mrb[118].mxu0 }
 0x1e5   : > { %v2206_v14 = vadd.f32 %v2205_v60, %v2175_v54  ;;  %v2137_v23 = vadd.f32 %v2136_v49, %v2086_v2  ;;  %v3265_v15 = vadd.f32 %v3264_v13, %v3263_v27  ;;  %v3266_v19 = vpop.f32.mrb[118].mxu1  ;;  %v3155_v51 = vpop.f32.mrb[119].mxu0 }
 0x1e6   : > { %2829 = vst [vmem:[%s3790_s4 + $0x60] sm:$0xff] %v2801_v12   ;;  %v1930_v22 = vadd.f32 %v3153_v55, %v3772_v41  ;;  %v3156_v16 = vadd.f32 %v3155_v51, %v3154_v57  ;;  %v3267_v17 = vpop.f32.mrb[119].mxu1 }
 0x1e7   : > { %v2207_v18 = vadd.f32 %v2206_v14, %v2176_v10  ;;  %v3268_v20 = vadd.f32 %v3267_v17, %v3266_v19 }
 0x1e8   : > { %v2091_v24 = vadd.f32 %v3265_v15, %v1930_v22  ;;  %v1933_v28 = vadd.f32 %v3156_v16, %v3774_v44 }
 0x1ea   : > { %v2138_v32 = vadd.f32 %v2137_v23, %v2091_v24  ;;  %v2177_v33 = vmul.f32 %v2091_v24, %v2091_v24  ;;  %v2094_v34 = vadd.f32 %v3268_v20, %v1933_v28  ;;  %v3157_v43 = vpop.f32.mrb[120].mxu0 }
 0x1eb   : > { %v3269_v29 = vpop.f32.mrb[120].mxu1  ;;  %v3158_v45 = vpop.f32.mrb[121].mxu0 }
 0x1ec   : > { %v2208_v35 = vadd.f32 %v2207_v18, %v2177_v33  ;;  %v2139_v31 = vadd.f32 %v2138_v32, %v2094_v34  ;;  %v2178_v36 = vmul.f32 %v2094_v34, %v2094_v34  ;;  %v2806_v38 = vpack.c.bf16 %v2094_v34, %v2091_v24  ;;  %v3270_v40 = vpop.f32.mrb[121].mxu1  ;;  %v3160_v41 = vpop.f32.mrb[122].mxu0 }
 0x1ed   : > { %v3159_v6 = vadd.f32 %v3158_v45, %v3157_v43  ;;  %v3271_v5 = vadd.f32 %v3270_v40, %v3269_v29  ;;  %v3272_v11 = vpop.f32.mrb[122].mxu1  ;;  %v3161_v42 = vpop.f32.mrb[123].mxu0 }
 0x1ee   : > { %v2209_v37 = vadd.f32 %v2208_v35, %v2178_v36  ;;  %2830 = vst [vmem:[%s3790_s4 + $0x68] sm:$0xff] %v2806_v38   ;;  %v3162_v44 = vadd.f32 %v3161_v42, %v3160_v41  ;;  %v3273_v8 = vpop.f32.mrb[123].mxu1 }
 0x1ef   : > { %v1938_v39 = vadd.f32 %v3159_v6, %v3776_v0  ;;  %v3274_v46 = vadd.f32 %v3273_v8, %v3272_v11 }
 0x1f0   : > { %v1941_v47 = vadd.f32 %v3162_v44, %v3778_v3 }
 0x1f1   : > { %v2099_v48 = vadd.f32 %v3271_v5, %v1938_v39 }
 0x1f2   : > { %v2102_v50 = vadd.f32 %v3274_v46, %v1941_v47  ;;  %v3163_v52 = vpop.f32.mrb[124].mxu0 }
 0x1f3   : > { %v2140_v63 = vadd.f32 %v2139_v31, %v2099_v48  ;;  %v2179_v56 = vmul.f32 %v2099_v48, %v2099_v48  ;;  %v3275_v7 = vpop.f32.mrb[124].mxu1  ;;  %v3164_v58 = vpop.f32.mrb[125].mxu0 }
 0x1f4   : > { %v2180_v59 = vmul.f32 %v2102_v50, %v2102_v50  ;;  %v2811_v60 = vpack.c.bf16 %v2102_v50, %v2099_v48  ;;  %v3165_v1 = vadd.f32 %v3164_v58, %v3163_v52  ;;  %v3276_v61 = vpop.f32.mrb[125].mxu1  ;;  %v3166_v9 = vpop.f32.mrb[126].mxu0 }
 0x1f5   : > { %v2210_v62 = vadd.f32 %v2209_v37, %v2179_v56  ;;  %v2141_v25 = vadd.f32 %v2140_v63, %v2102_v50  ;;  %v3277_v0 = vadd.f32 %v3276_v61, %v3275_v7  ;;  %v3278_v53 = vpop.f32.mrb[126].mxu1  ;;  %v3167_v2 = vpop.f32.mrb[127].mxu0 }
 0x1f6   : > { %2831 = vst [vmem:[%s3790_s4 + $0x70] sm:$0xff] %v2811_v60   ;;  %v1946_v3 = vadd.f32 %v3165_v1, %v3780_v26  ;;  %v3168_v4 = vadd.f32 %v3167_v2, %v3166_v9  ;;  %v3279_v49 = vpop.f32.mrb[127].mxu1 }
 0x1f7   : > { %v2211_v54 = vadd.f32 %v2210_v62, %v2180_v59  ;;  %v3280_v27 = vadd.f32 %v3279_v49, %v3278_v53 }
 0x1f8   : > { %v2107_v21 = vadd.f32 %v3277_v0, %v1946_v3  ;;  %v1949_v10 = vadd.f32 %v3168_v4, %v3782_v30 }
 0x1fa   : > { %v2142_v12 = vadd.f32 %v2141_v25, %v2107_v21  ;;  %v2181_v55 = vmul.f32 %v2107_v21, %v2107_v21  ;;  %v2110_v13 = vadd.f32 %v3280_v27, %v1949_v10 }
 0x1fc   : > { %v2212_v57 = vadd.f32 %v2211_v54, %v2181_v55  ;;  %v2143_v14 = vadd.f32 %v2142_v12, %v2110_v13  ;;  %v2182_v23 = vmul.f32 %v2110_v13, %v2110_v13  ;;  %v2816_v15 = vpack.c.bf16 %v2110_v13, %v2107_v21 }
 0x1fe   : > { %v2144_v19 = vrot.slane %v2143_v14, 4  ;;  %v2213_v51 = vadd.f32 %v2212_v57, %v2182_v23  ;;  %2832 = vst [vmem:[%s3790_s4 + $0x78] sm:$0xff] %v2816_v15  }
 0x200   : > { %v2145_v26 = vadd.f32 %v2144_v19, %v2143_v14  ;;  %v2214_v22 = vrot.slane %v2213_v51, 4 }
 0x202   : > { %v2146_v16 = vrot.slane %v2145_v26, 2  ;;  %v2215_v17 = vadd.f32 %v2214_v22, %v2213_v51 }
 0x204   : > { %v2147_v18 = vadd.f32 %v2146_v16, %v2145_v26  ;;  %v2216_v20 = vrot.slane %v2215_v17, 2 }
 0x206   : > { %v2148_v30 = vrot.slane %v2147_v18, 1  ;;  %v2217_v24 = vadd.f32 %v2216_v20, %v2215_v17 }
 0x208   : > { %v2149_v28 = vadd.f32 %v2148_v30, %v2147_v18  ;;  %v2218_v32 = vrot.slane %v2217_v24, 1 }
 0x20a   : > { %2150 = vst [vmem:[%s187_s7] sm:$0x1] %v2149_v28  ;;  %v2219_v33 = vadd.f32 %v2218_v32, %v2217_v24 }
 0x20c   : > { %2220 = vst [vmem:[%s187_s7 + $0x1] sm:$0x1] %v2219_v33 }
 0x20d PF: > { %s14_s12 = sadd.s32 1, %s3359_s12  }
 0x20e   : > { %p11_p5 = scmp.ge.s32.totalorder %s14_s12, 4  }
 0x210   :  { %13 = sbr.rel (!%p11_p5) target bundleno = 1 (0x1), region = 70 }

// kernel: netD_forward.7
= control target key start
LH: loop header
LB: loop body
LE: loop exit
PB: predicated region body
PF: predicated region fallthrough
CT: control target
= control target key end

     0   :  { %s5753_s1 = inlined_call_operand.vmem [shape: bf16[2048,256], index: 1, kind: input, shape index: {}]   ;;  %s5754_s0 = inlined_call_operand.vmem [shape: bf16[128,2048], index: 0, kind: input, shape index: {}]   ;;  %s5755_s2 = inlined_call_operand.vmem [shape: bf16[128,256], index: 2, kind: output, shape index: {0}]   ;;  %s5756_s3 = inlined_call_operand.vmem [shape: f32[1,2,256], index: 3, kind: output, shape index: {1}]  }
   0x1   :  { %v4142_v0 = vld [vmem:[%s5753_s1 + $0x4] ss:$8 sps:$4 sm:$0xff]   ;;  %v4146_v2 = vld [vmem:[%s5753_s1] ss:$8 sps:$4 sm:$0xff]   ;;  %v4148_v4 = vld [vmem:[%s5753_s1 + $0x14] ss:$8 sps:$4 sm:$0xff]  }
   0x2   :  { %v4144_v1 = vld [vmem:[%s5753_s1 + $0x404] ss:$8 sps:$4 sm:$0xff]   ;;  %2317 = vmatprep.subr.bf16.mxu1 %v4142_v0  ;;  %v4147_v3 = vld [vmem:[%s5753_s1 + $0x400] ss:$8 sps:$4 sm:$0xff]   ;;  %v4150_v5 = vld [vmem:[%s5753_s1 + $0x414] ss:$8 sps:$4 sm:$0xff]  }
   0x3   :  { %2769 = vmatprep.subr.bf16.mxu0 %v4144_v1  ;;  %2318 = vmatpush1.bf16.msra.mxu1 %v4146_v2  ;;  %v4152_v6 = vld [vmem:[%s5753_s1 + $0x10] ss:$8 sps:$4 sm:$0xff]   ;;  %v4154_v8 = vld [vmem:[%s5753_s1 + $0x24] ss:$8 sps:$4 sm:$0xff]   ;;  %v4158_v10 = vld [vmem:[%s5753_s1 + $0x20] ss:$8 sps:$4 sm:$0xff]  }
   0x4   :  { %2770 = vmatpush1.bf16.msra.mxu0 %v4147_v3  ;;  %2319 = vmatprep.subr.bf16.mxu1 %v4148_v4  ;;  %v4153_v7 = vld [vmem:[%s5753_s1 + $0x410] ss:$8 sps:$4 sm:$0xff]   ;;  %v4156_v9 = vld [vmem:[%s5753_s1 + $0x424] ss:$8 sps:$4 sm:$0xff]   ;;  %v4159_v11 = vld [vmem:[%s5753_s1 + $0x420] ss:$8 sps:$4 sm:$0xff]  }
   0x5   :  { %2771 = vmatprep.subr.bf16.mxu0 %v4150_v5  ;;  %v4160_v12 = vld [vmem:[%s5753_s1 + $0x34] ss:$8 sps:$4 sm:$0xff]   ;;  %v4164_v14 = vld [vmem:[%s5753_s1 + $0x30] ss:$8 sps:$4 sm:$0xff]   ;;  %v4166_v16 = vld [vmem:[%s5753_s1 + $0x44] ss:$8 sps:$4 sm:$0xff]  }
   0x6   :  { %v4162_v13 = vld [vmem:[%s5753_s1 + $0x434] ss:$8 sps:$4 sm:$0xff]   ;;  %v4165_v15 = vld [vmem:[%s5753_s1 + $0x430] ss:$8 sps:$4 sm:$0xff]   ;;  %v4168_v17 = vld [vmem:[%s5753_s1 + $0x444] ss:$8 sps:$4 sm:$0xff]  }
   0x7   :  { %2320 = vmatpush1.bf16.msra.mxu1 %v4152_v6  ;;  %v4170_v18 = vld [vmem:[%s5753_s1 + $0x40] ss:$8 sps:$4 sm:$0xff]   ;;  %v4172_v20 = vld [vmem:[%s5753_s1 + $0x54] ss:$8 sps:$4 sm:$0xff]   ;;  %v4176_v22 = vld [vmem:[%s5753_s1 + $0x50] ss:$8 sps:$4 sm:$0xff]  }
   0x8   :  { %2772 = vmatpush1.bf16.msra.mxu0 %v4153_v7  ;;  %2321 = vmatprep.subr.bf16.mxu1 %v4154_v8  ;;  %v4171_v19 = vld [vmem:[%s5753_s1 + $0x440] ss:$8 sps:$4 sm:$0xff]   ;;  %v4174_v21 = vld [vmem:[%s5753_s1 + $0x454] ss:$8 sps:$4 sm:$0xff]   ;;  %v4177_v23 = vld [vmem:[%s5753_s1 + $0x450] ss:$8 sps:$4 sm:$0xff]  }
   0x9   :  { %2773 = vmatprep.subr.bf16.mxu0 %v4156_v9  ;;  %v4178_v24 = vld [vmem:[%s5753_s1 + $0x64] ss:$8 sps:$4 sm:$0xff]   ;;  %v4182_v26 = vld [vmem:[%s5753_s1 + $0x60] ss:$8 sps:$4 sm:$0xff]   ;;  %v4184_v28 = vld [vmem:[%s5753_s1 + $0x74] ss:$8 sps:$4 sm:$0xff]  }
   0xa   :  { %v4180_v25 = vld [vmem:[%s5753_s1 + $0x464] ss:$8 sps:$4 sm:$0xff]   ;;  %v4183_v27 = vld [vmem:[%s5753_s1 + $0x460] ss:$8 sps:$4 sm:$0xff]   ;;  %v4186_v29 = vld [vmem:[%s5753_s1 + $0x474] ss:$8 sps:$4 sm:$0xff]  }
   0xb   :  { %2322 = vmatpush1.bf16.msra.mxu1 %v4158_v10  ;;  %v4188_v30 = vld [vmem:[%s5753_s1 + $0x70] ss:$8 sps:$4 sm:$0xff]   ;;  %v4190_v32 = vld [vmem:[%s5753_s1 + $0x84] ss:$8 sps:$4 sm:$0xff]   ;;  %v4194_v34 = vld [vmem:[%s5753_s1 + $0x80] ss:$8 sps:$4 sm:$0xff]  }
   0xc   :  { %2774 = vmatpush1.bf16.msra.mxu0 %v4159_v11  ;;  %2323 = vmatprep.subr.bf16.mxu1 %v4160_v12  ;;  %v4189_v31 = vld [vmem:[%s5753_s1 + $0x470] ss:$8 sps:$4 sm:$0xff]   ;;  %v4192_v33 = vld [vmem:[%s5753_s1 + $0x484] ss:$8 sps:$4 sm:$0xff]   ;;  %v4195_v35 = vld [vmem:[%s5753_s1 + $0x480] ss:$8 sps:$4 sm:$0xff]  }
   0xd   :  { %2775 = vmatprep.subr.bf16.mxu0 %v4162_v13  ;;  %v4196_v36 = vld [vmem:[%s5753_s1 + $0x94] ss:$8 sps:$4 sm:$0xff]   ;;  %v4200_v38 = vld [vmem:[%s5753_s1 + $0x90] ss:$8 sps:$4 sm:$0xff]   ;;  %v4202_v40 = vld [vmem:[%s5753_s1 + $0xa4] ss:$8 sps:$4 sm:$0xff]  }
   0xe   :  { %v4198_v37 = vld [vmem:[%s5753_s1 + $0x494] ss:$8 sps:$4 sm:$0xff]   ;;  %v4201_v39 = vld [vmem:[%s5753_s1 + $0x490] ss:$8 sps:$4 sm:$0xff]   ;;  %v4204_v41 = vld [vmem:[%s5753_s1 + $0x4a4] ss:$8 sps:$4 sm:$0xff]  }
   0xf   :  { %2324 = vmatpush1.bf16.msra.mxu1 %v4164_v14  ;;  %v4206_v42 = vld [vmem:[%s5753_s1 + $0xa0] ss:$8 sps:$4 sm:$0xff]   ;;  %v4208_v44 = vld [vmem:[%s5753_s1 + $0xb4] ss:$8 sps:$4 sm:$0xff]   ;;  %v4212_v46 = vld [vmem:[%s5753_s1 + $0xb0] ss:$8 sps:$4 sm:$0xff]  }
  0x10   :  { %2776 = vmatpush1.bf16.msra.mxu0 %v4165_v15  ;;  %2325 = vmatprep.subr.bf16.mxu1 %v4166_v16  ;;  %v4207_v43 = vld [vmem:[%s5753_s1 + $0x4a0] ss:$8 sps:$4 sm:$0xff]   ;;  %v4210_v45 = vld [vmem:[%s5753_s1 + $0x4b4] ss:$8 sps:$4 sm:$0xff]   ;;  %v4213_v47 = vld [vmem:[%s5753_s1 + $0x4b0] ss:$8 sps:$4 sm:$0xff]  }
  0x11   :  { %2777 = vmatprep.subr.bf16.mxu0 %v4168_v17  ;;  %v13_v48 = vld [vmem:[%s5754_s0] sm:$0xff]  ;;  %v4220_v58 = vld [vmem:[%s5753_s1 + $0xd4] ss:$8 sps:$4 sm:$0xff]   ;;  %v4224_v60 = vld [vmem:[%s5753_s1 + $0xd0] ss:$8 sps:$4 sm:$0xff]  }
  0x12   :  { %v21_v49 = vld [vmem:[%s5754_s0 + $0x40] sm:$0xff]  ;;  %v4222_v59 = vld [vmem:[%s5753_s1 + $0x4d4] ss:$8 sps:$4 sm:$0xff]   ;;  %v4225_v61 = vld [vmem:[%s5753_s1 + $0x4d0] ss:$8 sps:$4 sm:$0xff]  }
  0x13   :  { %2326 = vmatpush1.bf16.msra.mxu1 %v4170_v18  ;;  %v17_v50 = vld [vmem:[%s5754_s0 + $0x20] sm:$0xff]  ;;  %v3501_v53 = vcombine.high %v13_v48, %v21_v49  ;;  %v4232_v2 = vld [vmem:[%s5753_s1 + $0xf4] ss:$8 sps:$4 sm:$0xff]   ;;  %v4236_v4 = vld [vmem:[%s5753_s1 + $0xf0] ss:$8 sps:$4 sm:$0xff]   ;;  %v3500_v11 = vcombine.low %v13_v48, %v21_v49 }
  0x14   :  { %2778 = vmatpush1.bf16.msra.mxu0 %v4171_v19  ;;  %2327 = vmatprep.subr.bf16.mxu1 %v4172_v20  ;;  %v25_v51 = vld [vmem:[%s5754_s0 + $0x60] sm:$0xff]  ;;  %v4234_v3 = vld [vmem:[%s5753_s1 + $0x4f4] ss:$8 sps:$4 sm:$0xff]   ;;  %v4237_v5 = vld [vmem:[%s5753_s1 + $0x4f0] ss:$8 sps:$4 sm:$0xff]  }
  0x15   :  { %2779 = vmatprep.subr.bf16.mxu0 %v4174_v21  ;;  %v4214_v52 = vld [vmem:[%s5753_s1 + $0xc4] ss:$8 sps:$4 sm:$0xff]   ;;  %v3509_v55 = vcombine.high %v17_v50, %v25_v51  ;;  %2349 = vmatprep.mubr.bf16.mxu1 %v3501_v53  ;;  %v4218_v56 = vld [vmem:[%s5753_s1 + $0xc0] ss:$8 sps:$4 sm:$0xff]   ;;  %v3508_v12 = vcombine.low %v17_v50, %v25_v51  ;;  %v4246_v16 = vld [vmem:[%s5753_s1 + $0x114] ss:$8 sps:$4 sm:$0xff]  }
  0x16   :  { %v4216_v54 = vld [vmem:[%s5753_s1 + $0x4c4] ss:$8 sps:$4 sm:$0xff]   ;;  %v4219_v57 = vld [vmem:[%s5753_s1 + $0x4c0] ss:$8 sps:$4 sm:$0xff]   ;;  %v4249_v17 = vld [vmem:[%s5753_s1 + $0x514] ss:$8 sps:$4 sm:$0xff]  }
  0x17   :  { %2328 = vmatpush1.bf16.msra.mxu1 %v4176_v22  ;;  %2801 = vmatprep.mubr.bf16.mxu0 %v3509_v55  ;;  %v4226_v62 = vld [vmem:[%s5753_s1 + $0xe4] ss:$8 sps:$4 sm:$0xff]   ;;  %v4230_v0 = vld [vmem:[%s5753_s1 + $0xe0] ss:$8 sps:$4 sm:$0xff]   ;;  %v4244_v20 = vld [vmem:[%s5753_s1 + $0x110] ss:$8 sps:$4 sm:$0xff]  }
  0x18   :  { %2780 = vmatpush1.bf16.msra.mxu0 %v4177_v23  ;;  %2329 = vmatprep.subr.bf16.mxu1 %v4178_v24  ;;  %v4228_v63 = vld [vmem:[%s5753_s1 + $0x4e4] ss:$8 sps:$4 sm:$0xff]   ;;  %v4231_v1 = vld [vmem:[%s5753_s1 + $0x4e0] ss:$8 sps:$4 sm:$0xff]   ;;  %v4247_v21 = vld [vmem:[%s5753_s1 + $0x510] ss:$8 sps:$4 sm:$0xff]  }
  0x19   :  { %2781 = vmatprep.subr.bf16.mxu0 %v4180_v25  ;;  %v4240_v6 = vld [vmem:[%s5753_s1 + $0x104] ss:$8 sps:$4 sm:$0xff]   ;;  %v4238_v8 = vld [vmem:[%s5753_s1 + $0x100] ss:$8 sps:$4 sm:$0xff]   ;;  %v4270_v48 = vld [vmem:[%s5753_s1 + $0x154] ss:$8 sps:$4 sm:$0xff]  }
  0x1a   :  { %v4243_v7 = vld [vmem:[%s5753_s1 + $0x504] ss:$8 sps:$4 sm:$0xff]   ;;  %v4241_v9 = vld [vmem:[%s5753_s1 + $0x500] ss:$8 sps:$4 sm:$0xff]   ;;  %v4273_v49 = vld [vmem:[%s5753_s1 + $0x554] ss:$8 sps:$4 sm:$0xff]  }
  0x1b   :  { %2330 = vmatpush1.bf16.msra.mxu1 %v4182_v26  ;;  %v29_v10 = vld [vmem:[%s5754_s0 + $0x80] sm:$0xff]  ;;  %v4271_v53 = vld [vmem:[%s5753_s1 + $0x550] ss:$8 sps:$4 sm:$0xff]  }
  0x1c   :  { %2782 = vmatpush1.bf16.msra.mxu0 %v4183_v27  ;;  %2331 = vmatprep.subr.bf16.mxu1 %v4184_v28  ;;  %v37_v13 = vld [vmem:[%s5754_s0 + $0xc0] sm:$0xff] }
  0x1d   :  { %2783 = vmatprep.subr.bf16.mxu0 %v4186_v29  ;;  %v33_v14 = vld [vmem:[%s5754_s0 + $0xa0] sm:$0xff]  ;;  %v3517_v18 = vcombine.high %v29_v10, %v37_v13  ;;  %v3516_v28 = vcombine.low %v29_v10, %v37_v13 }
  0x1e   :  { %v41_v15 = vld [vmem:[%s5754_s0 + $0xe0] sm:$0xff] }
  0x1f   :  { %2332 = vmatpush1.bf16.msra.mxu1 %v4188_v30  ;;  %v3525_v19 = vcombine.high %v33_v14, %v41_v15  ;;  %v4252_v22 = vld [vmem:[%s5753_s1 + $0x124] ss:$8 sps:$4 sm:$0xff]   ;;  %v4250_v24 = vld [vmem:[%s5753_s1 + $0x120] ss:$8 sps:$4 sm:$0xff]   ;;  %v3524_v29 = vcombine.low %v33_v14, %v41_v15 }
  0x20   :  { %2784 = vmatpush1.bf16.msra.mxu0 %v4189_v31  ;;  %2333 = vmatprep.subr.bf16.mxu1 %v4190_v32  ;;  %v4255_v23 = vld [vmem:[%s5753_s1 + $0x524] ss:$8 sps:$4 sm:$0xff]   ;;  %v4253_v25 = vld [vmem:[%s5753_s1 + $0x520] ss:$8 sps:$4 sm:$0xff]   ;;  %v4258_v32 = vld [vmem:[%s5753_s1 + $0x134] ss:$8 sps:$4 sm:$0xff]  }
  0x21   :  { %2785 = vmatprep.subr.bf16.mxu0 %v4192_v33  ;;  %v45_v26 = vld [vmem:[%s5754_s0 + $0x100] sm:$0xff]  ;;  %v4261_v33 = vld [vmem:[%s5753_s1 + $0x534] ss:$8 sps:$4 sm:$0xff]  }
  0x22   :  { %v53_v27 = vld [vmem:[%s5754_s0 + $0x140] sm:$0xff] }
  0x23   :  { %2334 = vmatpush1.bf16.msra.mxu1 %v4194_v34  ;;  %v49_v30 = vld [vmem:[%s5754_s0 + $0x120] sm:$0xff]  ;;  %v3533_v34 = vcombine.high %v45_v26, %v53_v27 }
  0x24   :  { %2786 = vmatpush1.bf16.msra.mxu0 %v4195_v35  ;;  %2335 = vmatprep.subr.bf16.mxu1 %v4196_v36  ;;  %v57_v31 = vld [vmem:[%s5754_s0 + $0x160] sm:$0xff]  ;;  %v4256_v36 = vld [vmem:[%s5753_s1 + $0x130] ss:$8 sps:$4 sm:$0xff]  }
  0x25   :  { %2787 = vmatprep.subr.bf16.mxu0 %v4198_v37  ;;  %v3541_v35 = vcombine.high %v49_v30, %v57_v31  ;;  %v4259_v37 = vld [vmem:[%s5753_s1 + $0x530] ss:$8 sps:$4 sm:$0xff]   ;;  %v4279_v55 = vld [vmem:[%s5753_s1 + $0x564] ss:$8 sps:$4 sm:$0xff]   ;;  %v4286_v14 = vld [vmem:[%s5753_s1 + $0x180] ss:$8 sps:$4 sm:$0xff]  }
  0x26   :  { %v105_v13 = vld [vmem:[%s5754_s0 + $0x2e0] sm:$0xff] }
  0x27   :  { %2336 = vmatpush1.bf16.msra.mxu1 %v4200_v38  ;;  %v4264_v38 = vld [vmem:[%s5753_s1 + $0x144] ss:$8 sps:$4 sm:$0xff]   ;;  %v4289_v15 = vld [vmem:[%s5753_s1 + $0x580] ss:$8 sps:$4 sm:$0xff]  }
  0x28   :  { %2788 = vmatpush1.bf16.msra.mxu0 %v4201_v39  ;;  %2337 = vmatprep.subr.bf16.mxu1 %v4202_v40  ;;  %v4267_v39 = vld [vmem:[%s5753_s1 + $0x544] ss:$8 sps:$4 sm:$0xff]   ;;  %v4262_v40 = vld [vmem:[%s5753_s1 + $0x140] ss:$8 sps:$4 sm:$0xff]  }
  0x29   :  { %2789 = vmatprep.subr.bf16.mxu0 %v4204_v41  ;;  %v4265_v41 = vld [vmem:[%s5753_s1 + $0x540] ss:$8 sps:$4 sm:$0xff]  }
  0x2b   :  { %2338 = vmatpush1.bf16.msra.mxu1 %v4206_v42  ;;  %v61_v42 = vld [vmem:[%s5754_s0 + $0x180] sm:$0xff] }
  0x2c   :  { %2790 = vmatpush1.bf16.msra.mxu0 %v4207_v43  ;;  %2339 = vmatprep.subr.bf16.mxu1 %v4208_v44  ;;  %v69_v43 = vld [vmem:[%s5754_s0 + $0x1c0] sm:$0xff]  ;;  %v3532_v44 = vcombine.low %v45_v26, %v53_v27 }
  0x2d   :  { %2791 = vmatprep.subr.bf16.mxu0 %v4210_v45  ;;  %v3540_v45 = vcombine.low %v49_v30, %v57_v31  ;;  %v3549_v50 = vcombine.high %v61_v42, %v69_v43  ;;  %v109_v26 = vld [vmem:[%s5754_s0 + $0x300] sm:$0xff] }
  0x2e   :  { %v113_v30 = vld [vmem:[%s5754_s0 + $0x320] sm:$0xff] }
  0x2f   :  { %2340 = vmatpush1.bf16.msra.mxu1 %v4212_v46  ;;  %v65_v46 = vld [vmem:[%s5754_s0 + $0x1a0] sm:$0xff] }
  0x30   :  { %2792 = vmatpush1.bf16.msra.mxu0 %v4213_v47  ;;  %2341 = vmatprep.subr.bf16.mxu1 %v4214_v52  ;;  %v73_v47 = vld [vmem:[%s5754_s0 + $0x1e0] sm:$0xff]  ;;  %v4268_v52 = vld [vmem:[%s5753_s1 + $0x150] ss:$8 sps:$4 sm:$0xff]  }
  0x31   :  { %2793 = vmatprep.subr.bf16.mxu0 %v4216_v54  ;;  %v3557_v51 = vcombine.high %v65_v46, %v73_v47  ;;  %v4276_v54 = vld [vmem:[%s5753_s1 + $0x164] ss:$8 sps:$4 sm:$0xff]  }
  0x32   :  { %v121_v31 = vld [vmem:[%s5754_s0 + $0x360] sm:$0xff] }
  0x33   :  { %2342 = vmatpush1.bf16.msra.mxu1 %v4218_v56  ;;  %v4274_v56 = vld [vmem:[%s5753_s1 + $0x160] ss:$8 sps:$4 sm:$0xff]  }
  0x34   :  { %2794 = vmatpush1.bf16.msra.mxu0 %v4219_v57  ;;  %2343 = vmatprep.subr.bf16.mxu1 %v4220_v58  ;;  %v77_v57 = vld [vmem:[%s5754_s0 + $0x200] sm:$0xff] }
  0x35   :  { %2795 = vmatprep.subr.bf16.mxu0 %v4222_v59  ;;  %v85_v58 = vld [vmem:[%s5754_s0 + $0x240] sm:$0xff]  ;;  %v3548_v59 = vcombine.low %v61_v42, %v69_v43 }
  0x36   :  { %v3564_v10 = vcombine.low %v77_v57, %v85_v58  ;;  %v125_v42 = vld [vmem:[%s5754_s0 + $0x380] sm:$0xff] }
  0x37   :  { %2344 = vmatpush1.bf16.msra.mxu1 %v4224_v60  ;;  %v3556_v60 = vcombine.low %v65_v46, %v73_v47  ;;  %v133_v43 = vld [vmem:[%s5754_s0 + $0x3c0] sm:$0xff] }
  0x38   :  { %2796 = vmatpush1.bf16.msra.mxu0 %v4225_v61  ;;  %2345 = vmatprep.subr.bf16.mxu1 %v4226_v62  ;;  %v81_v61 = vld [vmem:[%s5754_s0 + $0x220] sm:$0xff] }
  0x39   :  { %2797 = vmatprep.subr.bf16.mxu0 %v4228_v63  ;;  %v89_v62 = vld [vmem:[%s5754_s0 + $0x260] sm:$0xff] }
  0x3a   :  { %v4277_v63 = vld [vmem:[%s5753_s1 + $0x560] ss:$8 sps:$4 sm:$0xff]  }
  0x3b   :  { %2346 = vmatpush1.bf16.msra.mxu1 %v4230_v0  ;;  %v4282_v0 = vld [vmem:[%s5753_s1 + $0x174] ss:$8 sps:$4 sm:$0xff]   ;;  %v129_v46 = vld [vmem:[%s5754_s0 + $0x3a0] sm:$0xff] }
  0x3c   :  { %2798 = vmatpush1.bf16.msra.mxu0 %v4231_v1  ;;  %2347 = vmatprep.subr.bf16.mxu1 %v4232_v2  ;;  %v4285_v1 = vld [vmem:[%s5753_s1 + $0x574] ss:$8 sps:$4 sm:$0xff]   ;;  %v3565_v2 = vcombine.high %v77_v57, %v85_v58  ;;  %v137_v47 = vld [vmem:[%s5754_s0 + $0x3e0] sm:$0xff]  ;;  %v14_v58 = vld [vmem:[%s5754_s0 + $0x8] sm:$0xff] }
  0x3d   :  { %2799 = vmatprep.subr.bf16.mxu0 %v4234_v3  ;;  %v3573_v3 = vcombine.high %v81_v61, %v89_v62  ;;  %v4325_v57 = vld [vmem:[%s5753_s1 + $0x5e0] ss:$8 sps:$4 sm:$0xff]  }
  0x3f   :  { %2348 = vmatpush1.bf16.msra.mxu1 %v4236_v4  ;;  %v4280_v4 = vld [vmem:[%s5753_s1 + $0x170] ss:$8 sps:$4 sm:$0xff]  }
  0x40   :  { %2800 = vmatpush1.bf16.msra.mxu0 %v4237_v5  ;;  %2430 = vmatprep.subr.bf16.mxu1 %v4240_v6  ;;  %v4283_v5 = vld [vmem:[%s5753_s1 + $0x570] ss:$8 sps:$4 sm:$0xff]   ;;  %v4288_v6 = vld [vmem:[%s5753_s1 + $0x184] ss:$8 sps:$4 sm:$0xff]  }
  0x41   :  { %2882 = vmatprep.subr.bf16.mxu0 %v4243_v7  ;;  %v4291_v7 = vld [vmem:[%s5753_s1 + $0x584] ss:$8 sps:$4 sm:$0xff]  }
  0x42   :  { %2350 = vmatmul.mubr.bf16.vlgmr.msra.gmra.mrb[0].mxu1 %v3500_v11  ;;  %v3572_v11 = vcombine.low %v81_v61, %v89_v62  ;;  %v3620_v61 = vcombine.low %v129_v46, %v137_v47  ;;  %v18_v62 = vld [vmem:[%s5754_s0 + $0x28] sm:$0xff] }
  0x43   :  { %2802 = vmatmul.mubr.bf16.vlgmr.msra.gmra.mrb[0].mxu0 %v3508_v12  ;;  %2431 = vmatpush1.bf16.msra.mxu1 %v4238_v8  ;;  %v93_v8 = vld [vmem:[%s5754_s0 + $0x280] sm:$0xff] }
  0x44   :  { %2883 = vmatpush1.bf16.msra.mxu0 %v4241_v9  ;;  %2432 = vmatprep.subr.bf16.mxu1 %v4246_v16  ;;  %v101_v9 = vld [vmem:[%s5754_s0 + $0x2c0] sm:$0xff]  ;;  %v4294_v16 = vld [vmem:[%s5753_s1 + $0x194] ss:$8 sps:$4 sm:$0xff]  }
  0x45   :  { %2884 = vmatprep.subr.bf16.mxu0 %v4249_v17  ;;  %2359 = vmatprep.mubr.bf16.mxu1 %v3517_v18  ;;  %v97_v12 = vld [vmem:[%s5754_s0 + $0x2a0] sm:$0xff]  ;;  %v4297_v17 = vld [vmem:[%s5753_s1 + $0x594] ss:$8 sps:$4 sm:$0xff]   ;;  %v3581_v18 = vcombine.high %v93_v8, %v101_v9  ;;  %v3580_v27 = vcombine.low %v93_v8, %v101_v9  ;;  %v30_v9 = vld [vmem:[%s5754_s0 + $0x88] sm:$0xff] }
  0x46   :  { %2811 = vmatprep.mubr.bf16.mxu0 %v3525_v19  ;;  %v3589_v19 = vcombine.high %v97_v12, %v105_v13  ;;  %v4334_v8 = vld [vmem:[%s5753_s1 + $0x200] ss:$8 sps:$4 sm:$0xff]  }
  0x47   :  { %2433 = vmatpush1.bf16.msra.mxu1 %v4244_v20  ;;  %v4292_v20 = vld [vmem:[%s5753_s1 + $0x190] ss:$8 sps:$4 sm:$0xff]  }
  0x48   :  { %2885 = vmatpush1.bf16.msra.mxu0 %v4247_v21  ;;  %2434 = vmatprep.subr.bf16.mxu1 %v4252_v22  ;;  %v4295_v21 = vld [vmem:[%s5753_s1 + $0x590] ss:$8 sps:$4 sm:$0xff]   ;;  %v4300_v22 = vld [vmem:[%s5753_s1 + $0x1a4] ss:$8 sps:$4 sm:$0xff]  }
  0x49   :  { %2886 = vmatprep.subr.bf16.mxu0 %v4255_v23  ;;  %v4303_v23 = vld [vmem:[%s5753_s1 + $0x5a4] ss:$8 sps:$4 sm:$0xff]  }
  0x4a   :  { %2360 = vmatmul.mubr.bf16.gmra.mrb[4].mxu1 %v3516_v28  ;;  %v3588_v28 = vcombine.low %v97_v12, %v105_v13  ;;  %v34_v13 = vld [vmem:[%s5754_s0 + $0xa8] sm:$0xff] }
  0x4b   :  { %2812 = vmatmul.mubr.bf16.gmra.mrb[4].mxu0 %v3524_v29  ;;  %2435 = vmatpush1.bf16.msra.mxu1 %v4250_v24  ;;  %v4298_v24 = vld [vmem:[%s5753_s1 + $0x1a0] ss:$8 sps:$4 sm:$0xff]  }
  0x4c   :  { %2887 = vmatpush1.bf16.msra.mxu0 %v4253_v25  ;;  %2436 = vmatprep.subr.bf16.mxu1 %v4258_v32  ;;  %v4301_v25 = vld [vmem:[%s5753_s1 + $0x5a0] ss:$8 sps:$4 sm:$0xff]   ;;  %v4306_v32 = vld [vmem:[%s5753_s1 + $0x1b4] ss:$8 sps:$4 sm:$0xff]  }
  0x4d   :  { %2888 = vmatprep.subr.bf16.mxu0 %v4261_v33  ;;  %2369 = vmatprep.mubr.bf16.mxu1 %v3533_v34  ;;  %v117_v29 = vld [vmem:[%s5754_s0 + $0x340] sm:$0xff]  ;;  %v4309_v33 = vld [vmem:[%s5753_s1 + $0x5b4] ss:$8 sps:$4 sm:$0xff]  }
  0x4e   :  { %2821 = vmatprep.mubr.bf16.mxu0 %v3541_v35  ;;  %v3597_v34 = vcombine.high %v109_v26, %v117_v29  ;;  %v3605_v35 = vcombine.high %v113_v30, %v121_v31 }
  0x4f   :  { %2437 = vmatpush1.bf16.msra.mxu1 %v4256_v36  ;;  %v4304_v36 = vld [vmem:[%s5753_s1 + $0x1b0] ss:$8 sps:$4 sm:$0xff]  }
  0x50   :  { %2889 = vmatpush1.bf16.msra.mxu0 %v4259_v37  ;;  %2438 = vmatprep.subr.bf16.mxu1 %v4264_v38  ;;  %v4307_v37 = vld [vmem:[%s5753_s1 + $0x5b0] ss:$8 sps:$4 sm:$0xff]   ;;  %v4312_v38 = vld [vmem:[%s5753_s1 + $0x1c4] ss:$8 sps:$4 sm:$0xff]  }
  0x51   :  { %2890 = vmatprep.subr.bf16.mxu0 %v4267_v39  ;;  %v4315_v39 = vld [vmem:[%s5753_s1 + $0x5c4] ss:$8 sps:$4 sm:$0xff]  }
  0x52   :  { %2370 = vmatmul.mubr.bf16.gmra.mrb[8].mxu1 %v3532_v44  ;;  %v3596_v44 = vcombine.low %v109_v26, %v117_v29  ;;  %v58_v29 = vld [vmem:[%s5754_s0 + $0x168] sm:$0xff] }
  0x53   :  { %2822 = vmatmul.mubr.bf16.gmra.mrb[8].mxu0 %v3540_v45  ;;  %2439 = vmatpush1.bf16.msra.mxu1 %v4262_v40  ;;  %v4310_v40 = vld [vmem:[%s5753_s1 + $0x1c0] ss:$8 sps:$4 sm:$0xff]   ;;  %v3604_v45 = vcombine.low %v113_v30, %v121_v31 }
  0x54   :  { %2891 = vmatpush1.bf16.msra.mxu0 %v4265_v41  ;;  %2440 = vmatprep.subr.bf16.mxu1 %v4270_v48  ;;  %v4313_v41 = vld [vmem:[%s5753_s1 + $0x5c0] ss:$8 sps:$4 sm:$0xff]   ;;  %v4318_v48 = vld [vmem:[%s5753_s1 + $0x1d4] ss:$8 sps:$4 sm:$0xff]  }
  0x55   :  { %2892 = vmatprep.subr.bf16.mxu0 %v4273_v49  ;;  %2379 = vmatprep.mubr.bf16.mxu1 %v3549_v50  ;;  %v4321_v49 = vld [vmem:[%s5753_s1 + $0x5d4] ss:$8 sps:$4 sm:$0xff]   ;;  %v3613_v50 = vcombine.high %v125_v42, %v133_v43  ;;  %v4346_v30 = vld [vmem:[%s5753_s1 + $0x220] ss:$8 sps:$4 sm:$0xff]  }
  0x56   :  { %2831 = vmatprep.mubr.bf16.mxu0 %v3557_v51  ;;  %v3621_v51 = vcombine.high %v129_v46, %v137_v47  ;;  %v4349_v31 = vld [vmem:[%s5753_s1 + $0x620] ss:$8 sps:$4 sm:$0xff]  }
  0x57   :  { %2441 = vmatpush1.bf16.msra.mxu1 %v4268_v52  ;;  %v4316_v52 = vld [vmem:[%s5753_s1 + $0x1d0] ss:$8 sps:$4 sm:$0xff]   ;;  %v66_v46 = vld [vmem:[%s5754_s0 + $0x1a8] sm:$0xff] }
  0x58   :  { %2893 = vmatpush1.bf16.msra.mxu0 %v4271_v53  ;;  %2442 = vmatprep.subr.bf16.mxu1 %v4276_v54  ;;  %v4319_v53 = vld [vmem:[%s5753_s1 + $0x5d0] ss:$8 sps:$4 sm:$0xff]   ;;  %v4324_v54 = vld [vmem:[%s5753_s1 + $0x1e4] ss:$8 sps:$4 sm:$0xff]  }
  0x59   :  { %2894 = vmatprep.subr.bf16.mxu0 %v4279_v55  ;;  %v4327_v55 = vld [vmem:[%s5753_s1 + $0x5e4] ss:$8 sps:$4 sm:$0xff]  }
  0x5a   :  { %2380 = vmatmul.mubr.bf16.gmra.mrb[12].mxu1 %v3548_v59  ;;  %v22_v59 = vld [vmem:[%s5754_s0 + $0x48] sm:$0xff] }
  0x5b   :  { %2832 = vmatmul.mubr.bf16.gmra.mrb[12].mxu0 %v3556_v60  ;;  %2443 = vmatpush1.bf16.msra.mxu1 %v4274_v56  ;;  %v4322_v56 = vld [vmem:[%s5753_s1 + $0x1e0] ss:$8 sps:$4 sm:$0xff]   ;;  %v3612_v60 = vcombine.low %v125_v42, %v133_v43 }
  0x5c   :  { %2895 = vmatpush1.bf16.msra.mxu0 %v4277_v63  ;;  %2444 = vmatprep.subr.bf16.mxu1 %v4282_v0  ;;  %v26_v63 = vld [vmem:[%s5754_s0 + $0x68] sm:$0xff]  ;;  %v4330_v0 = vld [vmem:[%s5753_s1 + $0x1f4] ss:$8 sps:$4 sm:$0xff]  }
  0x5d   :  { %2896 = vmatprep.subr.bf16.mxu0 %v4285_v1  ;;  %2389 = vmatprep.mubr.bf16.mxu1 %v3565_v2  ;;  %v4333_v1 = vld [vmem:[%s5753_s1 + $0x5f4] ss:$8 sps:$4 sm:$0xff]   ;;  %v3503_v2 = vcombine.high %v14_v58, %v22_v59  ;;  %v3510_v12 = vcombine.low %v18_v62, %v26_v63  ;;  %v62_v42 = vld [vmem:[%s5754_s0 + $0x188] sm:$0xff] }
  0x5e   :  { %2841 = vmatprep.mubr.bf16.mxu0 %v3573_v3  ;;  %v3511_v3 = vcombine.high %v18_v62, %v26_v63  ;;  %v74_v47 = vld [vmem:[%s5754_s0 + $0x1e8] sm:$0xff] }
  0x5f   :  { %2445 = vmatpush1.bf16.msra.mxu1 %v4280_v4  ;;  %v4328_v4 = vld [vmem:[%s5753_s1 + $0x1f0] ss:$8 sps:$4 sm:$0xff]   ;;  %v82_v62 = vld [vmem:[%s5754_s0 + $0x228] sm:$0xff] }
  0x60   :  { %2897 = vmatpush1.bf16.msra.mxu0 %v4283_v5  ;;  %2446 = vmatprep.subr.bf16.mxu1 %v4288_v6  ;;  %v4331_v5 = vld [vmem:[%s5753_s1 + $0x5f0] ss:$8 sps:$4 sm:$0xff]   ;;  %v4336_v6 = vld [vmem:[%s5753_s1 + $0x204] ss:$8 sps:$4 sm:$0xff]  }
  0x61   :  { %2898 = vmatprep.subr.bf16.mxu0 %v4291_v7  ;;  %v4339_v7 = vld [vmem:[%s5753_s1 + $0x604] ss:$8 sps:$4 sm:$0xff]  }
  0x62   :  { %2390 = vmatmul.mubr.bf16.gmra.mrb[16].mxu1 %v3564_v10  ;;  %v38_v10 = vld [vmem:[%s5754_s0 + $0xc8] sm:$0xff] }
  0x63   :  { %2842 = vmatmul.mubr.bf16.gmra.mrb[16].mxu0 %v3572_v11  ;;  %2447 = vmatpush1.bf16.msra.mxu1 %v4286_v14  ;;  %v3502_v11 = vcombine.low %v14_v58, %v22_v59  ;;  %v42_v14 = vld [vmem:[%s5754_s0 + $0xe8] sm:$0xff]  ;;  %v3518_v26 = vcombine.low %v30_v9, %v38_v10 }
  0x64   :  { %2899 = vmatpush1.bf16.msra.mxu0 %v4289_v15  ;;  %2448 = vmatprep.subr.bf16.mxu1 %v4294_v16  ;;  %v4337_v15 = vld [vmem:[%s5753_s1 + $0x600] ss:$8 sps:$4 sm:$0xff]   ;;  %v4342_v16 = vld [vmem:[%s5753_s1 + $0x214] ss:$8 sps:$4 sm:$0xff]  }
  0x65   :  { %2900 = vmatprep.subr.bf16.mxu0 %v4297_v17  ;;  %2399 = vmatprep.mubr.bf16.mxu1 %v3581_v18  ;;  %v4345_v17 = vld [vmem:[%s5753_s1 + $0x614] ss:$8 sps:$4 sm:$0xff]   ;;  %v3519_v18 = vcombine.high %v30_v9, %v38_v10  ;;  %v78_v58 = vld [vmem:[%s5754_s0 + $0x208] sm:$0xff] }
  0x66   :  { %2851 = vmatprep.mubr.bf16.mxu0 %v3589_v19  ;;  %v3527_v19 = vcombine.high %v34_v13, %v42_v14  ;;  %v86_v59 = vld [vmem:[%s5754_s0 + $0x248] sm:$0xff] }
  0x67   :  { %2449 = vmatpush1.bf16.msra.mxu1 %v4292_v20  ;;  %v4340_v20 = vld [vmem:[%s5753_s1 + $0x210] ss:$8 sps:$4 sm:$0xff]   ;;  %v90_v63 = vld [vmem:[%s5754_s0 + $0x268] sm:$0xff] }
  0x68   :  { %2901 = vmatpush1.bf16.msra.mxu0 %v4295_v21  ;;  %2450 = vmatprep.subr.bf16.mxu1 %v4300_v22  ;;  %v4343_v21 = vld [vmem:[%s5753_s1 + $0x610] ss:$8 sps:$4 sm:$0xff]   ;;  %v4348_v22 = vld [vmem:[%s5753_s1 + $0x224] ss:$8 sps:$4 sm:$0xff]   ;;  %v4385_v9 = vld [vmem:[%s5753_s1 + $0x680] ss:$8 sps:$4 sm:$0xff]  }
  0x69   :  { %2902 = vmatprep.subr.bf16.mxu0 %v4303_v23  ;;  %v4351_v23 = vld [vmem:[%s5753_s1 + $0x624] ss:$8 sps:$4 sm:$0xff]  }
  0x6a   :  { %2400 = vmatmul.mubr.bf16.gmra.mrb[20].mxu1 %v3580_v27  ;;  %v3526_v27 = vcombine.low %v34_v13, %v42_v14  ;;  %v94_v10 = vld [vmem:[%s5754_s0 + $0x288] sm:$0xff]  ;;  %v3574_v13 = vcombine.low %v82_v62, %v90_v63 }
  0x6b   :  { %2852 = vmatmul.mubr.bf16.gmra.mrb[20].mxu0 %v3588_v28  ;;  %2451 = vmatpush1.bf16.msra.mxu1 %v4298_v24  ;;  %v46_v24 = vld [vmem:[%s5754_s0 + $0x108] sm:$0xff] }
  0x6c   :  { %2903 = vmatpush1.bf16.msra.mxu0 %v4301_v25  ;;  %2452 = vmatprep.subr.bf16.mxu1 %v4306_v32  ;;  %v54_v25 = vld [vmem:[%s5754_s0 + $0x148] sm:$0xff]  ;;  %v4354_v32 = vld [vmem:[%s5753_s1 + $0x234] ss:$8 sps:$4 sm:$0xff]  }
  0x6d   :  { %2904 = vmatprep.subr.bf16.mxu0 %v4309_v33  ;;  %2409 = vmatprep.mubr.bf16.mxu1 %v3597_v34  ;;  %v50_v28 = vld [vmem:[%s5754_s0 + $0x128] sm:$0xff]  ;;  %v4357_v33 = vld [vmem:[%s5753_s1 + $0x634] ss:$8 sps:$4 sm:$0xff]   ;;  %v3535_v34 = vcombine.high %v46_v24, %v54_v25  ;;  %v3534_v43 = vcombine.low %v46_v24, %v54_v25 }
  0x6e   :  { %2861 = vmatprep.mubr.bf16.mxu0 %v3605_v35  ;;  %v3543_v35 = vcombine.high %v50_v28, %v58_v29  ;;  %v98_v14 = vld [vmem:[%s5754_s0 + $0x2a8] sm:$0xff] }
  0x6f   :  { %2453 = vmatpush1.bf16.msra.mxu1 %v4304_v36  ;;  %v4352_v36 = vld [vmem:[%s5753_s1 + $0x230] ss:$8 sps:$4 sm:$0xff]   ;;  %v4394_v24 = vld [vmem:[%s5753_s1 + $0x2a0] ss:$8 sps:$4 sm:$0xff]  }
  0x70   :  { %2905 = vmatpush1.bf16.msra.mxu0 %v4307_v37  ;;  %2454 = vmatprep.subr.bf16.mxu1 %v4312_v38  ;;  %v4355_v37 = vld [vmem:[%s5753_s1 + $0x630] ss:$8 sps:$4 sm:$0xff]   ;;  %v4360_v38 = vld [vmem:[%s5753_s1 + $0x244] ss:$8 sps:$4 sm:$0xff]  }
  0x71   :  { %2906 = vmatprep.subr.bf16.mxu0 %v4315_v39  ;;  %v4363_v39 = vld [vmem:[%s5753_s1 + $0x644] ss:$8 sps:$4 sm:$0xff]  }
  0x72   :  { %2410 = vmatmul.mubr.bf16.gmra.mrb[24].mxu1 %v3596_v44  ;;  %v3542_v44 = vcombine.low %v50_v28, %v58_v29  ;;  %v110_v25 = vld [vmem:[%s5754_s0 + $0x308] sm:$0xff] }
  0x73   :  { %2862 = vmatmul.mubr.bf16.gmra.mrb[24].mxu0 %v3604_v45  ;;  %2455 = vmatpush1.bf16.msra.mxu1 %v4310_v40  ;;  %v4358_v40 = vld [vmem:[%s5753_s1 + $0x240] ss:$8 sps:$4 sm:$0xff]  }
  0x74   :  { %2907 = vmatpush1.bf16.msra.mxu0 %v4313_v41  ;;  %2456 = vmatprep.subr.bf16.mxu1 %v4318_v48  ;;  %v4361_v41 = vld [vmem:[%s5753_s1 + $0x640] ss:$8 sps:$4 sm:$0xff]   ;;  %v4366_v48 = vld [vmem:[%s5753_s1 + $0x254] ss:$8 sps:$4 sm:$0xff]  }
  0x75   :  { %2908 = vmatprep.subr.bf16.mxu0 %v4321_v49  ;;  %2419 = vmatprep.mubr.bf16.mxu1 %v3613_v50  ;;  %v70_v45 = vld [vmem:[%s5754_s0 + $0x1c8] sm:$0xff]  ;;  %v4369_v49 = vld [vmem:[%s5753_s1 + $0x654] ss:$8 sps:$4 sm:$0xff]  }
  0x76   :  { %2871 = vmatprep.mubr.bf16.mxu0 %v3621_v51  ;;  %v3551_v50 = vcombine.high %v62_v42, %v70_v45  ;;  %v3559_v51 = vcombine.high %v66_v46, %v74_v47  ;;  %v114_v29 = vld [vmem:[%s5754_s0 + $0x328] sm:$0xff] }
  0x77   :  { %2457 = vmatpush1.bf16.msra.mxu1 %v4316_v52  ;;  %v4364_v52 = vld [vmem:[%s5753_s1 + $0x250] ss:$8 sps:$4 sm:$0xff]  }
  0x78   :  { %2909 = vmatpush1.bf16.msra.mxu0 %v4319_v53  ;;  %2458 = vmatprep.subr.bf16.mxu1 %v4324_v54  ;;  %v4367_v53 = vld [vmem:[%s5753_s1 + $0x650] ss:$8 sps:$4 sm:$0xff]   ;;  %v4372_v54 = vld [vmem:[%s5753_s1 + $0x264] ss:$8 sps:$4 sm:$0xff]  }
  0x79   :  { %2910 = vmatprep.subr.bf16.mxu0 %v4327_v55  ;;  %v4375_v55 = vld [vmem:[%s5753_s1 + $0x664] ss:$8 sps:$4 sm:$0xff]  }
  0x7a   :  { %2420 = vmatmul.mubr.bf16.gmra.mrb[28].mxu1 %v3612_v60  ;;  %v3550_v60 = vcombine.low %v62_v42, %v70_v45  ;;  %v138_v45 = vld [vmem:[%s5754_s0 + $0x3e8] sm:$0xff] }
  0x7b   :  { %2872 = vmatmul.mubr.bf16.gmra.mrb[28].mxu0 %v3620_v61  ;;  %2459 = vmatpush1.bf16.msra.mxu1 %v4322_v56  ;;  %v4370_v56 = vld [vmem:[%s5753_s1 + $0x260] ss:$8 sps:$4 sm:$0xff]   ;;  %v3558_v61 = vcombine.low %v66_v46, %v74_v47 }
  0x7c   :  { %2911 = vmatpush1.bf16.msra.mxu0 %v4325_v57  ;;  %2460 = vmatprep.subr.bf16.mxu1 %v4330_v0  ;;  %v4373_v57 = vld [vmem:[%s5753_s1 + $0x660] ss:$8 sps:$4 sm:$0xff]   ;;  %v4378_v0 = vld [vmem:[%s5753_s1 + $0x274] ss:$8 sps:$4 sm:$0xff]  }
  0x7d   :  { %2912 = vmatprep.subr.bf16.mxu0 %v4333_v1  ;;  %2462 = vmatprep.mubr.bf16.mxu1 %v3503_v2  ;;  %v4381_v1 = vld [vmem:[%s5753_s1 + $0x674] ss:$8 sps:$4 sm:$0xff]   ;;  %v3567_v2 = vcombine.high %v78_v58, %v86_v59  ;;  %v4406_v46 = vld [vmem:[%s5753_s1 + $0x2c0] ss:$8 sps:$4 sm:$0xff]  }
  0x7e   :  { %2914 = vmatprep.mubr.bf16.mxu0 %v3511_v3  ;;  %v3575_v3 = vcombine.high %v82_v62, %v90_v63  ;;  %v4409_v47 = vld [vmem:[%s5753_s1 + $0x6c0] ss:$8 sps:$4 sm:$0xff]   ;;  %v19_v62 = vld [vmem:[%s5754_s0 + $0x30] sm:$0xff] }
  0x7f   :  { %2461 = vmatpush1.bf16.msra.mxu1 %v4328_v4  ;;  %v4376_v4 = vld [vmem:[%s5753_s1 + $0x270] ss:$8 sps:$4 sm:$0xff]  }
  0x80   :  { %2913 = vmatpush1.bf16.msra.mxu0 %v4331_v5  ;;  %2543 = vmatprep.subr.bf16.mxu1 %v4336_v6  ;;  %v4379_v5 = vld [vmem:[%s5753_s1 + $0x670] ss:$8 sps:$4 sm:$0xff]   ;;  %v4384_v6 = vld [vmem:[%s5753_s1 + $0x284] ss:$8 sps:$4 sm:$0xff]  }
  0x81   :  { %2995 = vmatprep.subr.bf16.mxu0 %v4339_v7  ;;  %v4387_v7 = vld [vmem:[%s5753_s1 + $0x684] ss:$8 sps:$4 sm:$0xff]   ;;  %v27_v63 = vld [vmem:[%s5754_s0 + $0x70] sm:$0xff] }
  0x82   :  { %2463 = vmatmul.mubr.bf16.vlgmr.msra.gmra.mrb[0].mxu1 %v3502_v11  ;;  %v102_v11 = vld [vmem:[%s5754_s0 + $0x2c8] sm:$0xff] }
  0x83   :  { %2915 = vmatmul.mubr.bf16.vlgmr.msra.gmra.mrb[0].mxu0 %v3510_v12  ;;  %2544 = vmatpush1.bf16.msra.mxu1 %v4334_v8  ;;  %v4382_v8 = vld [vmem:[%s5753_s1 + $0x280] ss:$8 sps:$4 sm:$0xff]   ;;  %v3566_v12 = vcombine.low %v78_v58, %v86_v59  ;;  %v15_v58 = vld [vmem:[%s5754_s0 + $0x10] sm:$0xff] }
  0x84   :  { %2996 = vmatpush1.bf16.msra.mxu0 %v4337_v15  ;;  %2545 = vmatprep.subr.bf16.mxu1 %v4342_v16  ;;  %v106_v15 = vld [vmem:[%s5754_s0 + $0x2e8] sm:$0xff]  ;;  %v4390_v16 = vld [vmem:[%s5753_s1 + $0x294] ss:$8 sps:$4 sm:$0xff]  }
  0x85   :  { %2997 = vmatprep.subr.bf16.mxu0 %v4345_v17  ;;  %2472 = vmatprep.mubr.bf16.mxu1 %v3519_v18  ;;  %v4393_v17 = vld [vmem:[%s5753_s1 + $0x694] ss:$8 sps:$4 sm:$0xff]   ;;  %v3583_v18 = vcombine.high %v94_v10, %v102_v11  ;;  %v3590_v28 = vcombine.low %v98_v14, %v106_v15 }
  0x86   :  { %2924 = vmatprep.mubr.bf16.mxu0 %v3527_v19  ;;  %v3591_v19 = vcombine.high %v98_v14, %v106_v15  ;;  %v35_v14 = vld [vmem:[%s5754_s0 + $0xb0] sm:$0xff] }
  0x87   :  { %2546 = vmatpush1.bf16.msra.mxu1 %v4340_v20  ;;  %v4388_v20 = vld [vmem:[%s5753_s1 + $0x290] ss:$8 sps:$4 sm:$0xff]  }
  0x88   :  { %2998 = vmatpush1.bf16.msra.mxu0 %v4343_v21  ;;  %2547 = vmatprep.subr.bf16.mxu1 %v4348_v22  ;;  %v4391_v21 = vld [vmem:[%s5753_s1 + $0x690] ss:$8 sps:$4 sm:$0xff]   ;;  %v4396_v22 = vld [vmem:[%s5753_s1 + $0x2a4] ss:$8 sps:$4 sm:$0xff]  }
  0x89   :  { %2999 = vmatprep.subr.bf16.mxu0 %v4351_v23  ;;  %v4399_v23 = vld [vmem:[%s5753_s1 + $0x6a4] ss:$8 sps:$4 sm:$0xff]   ;;  %v43_v15 = vld [vmem:[%s5754_s0 + $0xf0] sm:$0xff] }
  0x8a   :  { %2473 = vmatmul.mubr.bf16.gmra.mrb[4].mxu1 %v3518_v26  ;;  %v118_v26 = vld [vmem:[%s5754_s0 + $0x348] sm:$0xff] }
  0x8b   :  { %2925 = vmatmul.mubr.bf16.gmra.mrb[4].mxu0 %v3526_v27  ;;  %2548 = vmatpush1.bf16.msra.mxu1 %v4346_v30  ;;  %v3582_v27 = vcombine.low %v94_v10, %v102_v11  ;;  %v122_v30 = vld [vmem:[%s5754_s0 + $0x368] sm:$0xff]  ;;  %v3598_v42 = vcombine.low %v110_v25, %v118_v26  ;;  %v31_v10 = vld [vmem:[%s5754_s0 + $0x90] sm:$0xff] }
  0x8c   :  { %3000 = vmatpush1.bf16.msra.mxu0 %v4349_v31  ;;  %2549 = vmatprep.subr.bf16.mxu1 %v4354_v32  ;;  %v4397_v31 = vld [vmem:[%s5753_s1 + $0x6a0] ss:$8 sps:$4 sm:$0xff]   ;;  %v4402_v32 = vld [vmem:[%s5753_s1 + $0x2b4] ss:$8 sps:$4 sm:$0xff]  }
  0x8d   :  { %3001 = vmatprep.subr.bf16.mxu0 %v4357_v33  ;;  %2482 = vmatprep.mubr.bf16.mxu1 %v3535_v34  ;;  %v4405_v33 = vld [vmem:[%s5753_s1 + $0x6b4] ss:$8 sps:$4 sm:$0xff]   ;;  %v3599_v34 = vcombine.high %v110_v25, %v118_v26  ;;  %v4445_v25 = vld [vmem:[%s5753_s1 + $0x720] ss:$8 sps:$4 sm:$0xff]  }
  0x8e   :  { %2934 = vmatprep.mubr.bf16.mxu0 %v3543_v35  ;;  %v3607_v35 = vcombine.high %v114_v29, %v122_v30  ;;  %v39_v11 = vld [vmem:[%s5754_s0 + $0xd0] sm:$0xff] }
  0x8f   :  { %2550 = vmatpush1.bf16.msra.mxu1 %v4352_v36  ;;  %v4400_v36 = vld [vmem:[%s5753_s1 + $0x2b0] ss:$8 sps:$4 sm:$0xff]  }
  0x90   :  { %3002 = vmatpush1.bf16.msra.mxu0 %v4355_v37  ;;  %2551 = vmatprep.subr.bf16.mxu1 %v4360_v38  ;;  %v4403_v37 = vld [vmem:[%s5753_s1 + $0x6b0] ss:$8 sps:$4 sm:$0xff]   ;;  %v4408_v38 = vld [vmem:[%s5753_s1 + $0x2c4] ss:$8 sps:$4 sm:$0xff]  }
  0x91   :  { %3003 = vmatprep.subr.bf16.mxu0 %v4363_v39  ;;  %v4411_v39 = vld [vmem:[%s5753_s1 + $0x6c4] ss:$8 sps:$4 sm:$0xff]   ;;  %v47_v26 = vld [vmem:[%s5754_s0 + $0x110] sm:$0xff] }
  0x92   :  { %2483 = vmatmul.mubr.bf16.gmra.mrb[8].mxu1 %v3534_v43  ;;  %v3606_v43 = vcombine.low %v114_v29, %v122_v30  ;;  %v3528_v29 = vcombine.low %v35_v14, %v43_v15  ;;  %v51_v30 = vld [vmem:[%s5754_s0 + $0x130] sm:$0xff] }
  0x93   :  { %2935 = vmatmul.mubr.bf16.gmra.mrb[8].mxu0 %v3542_v44  ;;  %2552 = vmatpush1.bf16.msra.mxu1 %v4358_v40  ;;  %v126_v40 = vld [vmem:[%s5754_s0 + $0x388] sm:$0xff] }
  0x94   :  { %3004 = vmatpush1.bf16.msra.mxu0 %v4361_v41  ;;  %2553 = vmatprep.subr.bf16.mxu1 %v4366_v48  ;;  %v134_v41 = vld [vmem:[%s5754_s0 + $0x3c8] sm:$0xff]  ;;  %v4414_v48 = vld [vmem:[%s5753_s1 + $0x2d4] ss:$8 sps:$4 sm:$0xff]  }
  0x95   :  { %3005 = vmatprep.subr.bf16.mxu0 %v4369_v49  ;;  %2492 = vmatprep.mubr.bf16.mxu1 %v3551_v50  ;;  %v130_v44 = vld [vmem:[%s5754_s0 + $0x3a8] sm:$0xff]  ;;  %v4417_v49 = vld [vmem:[%s5753_s1 + $0x6d4] ss:$8 sps:$4 sm:$0xff]   ;;  %v3615_v50 = vcombine.high %v126_v40, %v134_v41  ;;  %v3614_v59 = vcombine.low %v126_v40, %v134_v41 }
  0x96   :  { %2944 = vmatprep.mubr.bf16.mxu0 %v3559_v51  ;;  %v3623_v51 = vcombine.high %v130_v44, %v138_v45  ;;  %v63_v40 = vld [vmem:[%s5754_s0 + $0x190] sm:$0xff] }
  0x97   :  { %2554 = vmatpush1.bf16.msra.mxu1 %v4364_v52  ;;  %v4412_v52 = vld [vmem:[%s5753_s1 + $0x2d0] ss:$8 sps:$4 sm:$0xff]  }
  0x98   :  { %3006 = vmatpush1.bf16.msra.mxu0 %v4367_v53  ;;  %2555 = vmatprep.subr.bf16.mxu1 %v4372_v54  ;;  %v4415_v53 = vld [vmem:[%s5753_s1 + $0x6d0] ss:$8 sps:$4 sm:$0xff]   ;;  %v4420_v54 = vld [vmem:[%s5753_s1 + $0x2e4] ss:$8 sps:$4 sm:$0xff]  }
  0x99   :  { %3007 = vmatprep.subr.bf16.mxu0 %v4375_v55  ;;  %v4423_v55 = vld [vmem:[%s5753_s1 + $0x6e4] ss:$8 sps:$4 sm:$0xff]  }
  0x9a   :  { %2493 = vmatmul.mubr.bf16.gmra.mrb[12].mxu1 %v3550_v60  ;;  %v3622_v60 = vcombine.low %v130_v44, %v138_v45  ;;  %v67_v44 = vld [vmem:[%s5754_s0 + $0x1b0] sm:$0xff] }
  0x9b   :  { %2945 = vmatmul.mubr.bf16.gmra.mrb[12].mxu0 %v3558_v61  ;;  %2556 = vmatpush1.bf16.msra.mxu1 %v4370_v56  ;;  %v4418_v56 = vld [vmem:[%s5753_s1 + $0x2e0] ss:$8 sps:$4 sm:$0xff]   ;;  %v23_v61 = vld [vmem:[%s5754_s0 + $0x50] sm:$0xff] }
  0x9c   :  { %3008 = vmatpush1.bf16.msra.mxu0 %v4373_v57  ;;  %2557 = vmatprep.subr.bf16.mxu1 %v4378_v0  ;;  %v4421_v57 = vld [vmem:[%s5753_s1 + $0x6e0] ss:$8 sps:$4 sm:$0xff]   ;;  %v4426_v0 = vld [vmem:[%s5753_s1 + $0x2f4] ss:$8 sps:$4 sm:$0xff]  }
  0x9d   :  { %3009 = vmatprep.subr.bf16.mxu0 %v4381_v1  ;;  %2502 = vmatprep.mubr.bf16.mxu1 %v3567_v2  ;;  %v4429_v1 = vld [vmem:[%s5753_s1 + $0x6f4] ss:$8 sps:$4 sm:$0xff]   ;;  %v3505_v2 = vcombine.high %v15_v58, %v23_v61 }
  0x9e   :  { %2954 = vmatprep.mubr.bf16.mxu0 %v3575_v3  ;;  %v3513_v3 = vcombine.high %v19_v62, %v27_v63  ;;  %v75_v45 = vld [vmem:[%s5754_s0 + $0x1f0] sm:$0xff] }
  0x9f   :  { %2558 = vmatpush1.bf16.msra.mxu1 %v4376_v4  ;;  %v4424_v4 = vld [vmem:[%s5753_s1 + $0x2f0] ss:$8 sps:$4 sm:$0xff]  }
  0xa0   :  { %3010 = vmatpush1.bf16.msra.mxu0 %v4379_v5  ;;  %2559 = vmatprep.subr.bf16.mxu1 %v4384_v6  ;;  %v4427_v5 = vld [vmem:[%s5753_s1 + $0x6f0] ss:$8 sps:$4 sm:$0xff]   ;;  %v4432_v6 = vld [vmem:[%s5753_s1 + $0x304] ss:$8 sps:$4 sm:$0xff]  }
  0xa1   :  { %3011 = vmatprep.subr.bf16.mxu0 %v4387_v7  ;;  %v4435_v7 = vld [vmem:[%s5753_s1 + $0x704] ss:$8 sps:$4 sm:$0xff]  }
  0xa2   :  { %2503 = vmatmul.mubr.bf16.gmra.mrb[16].mxu1 %v3566_v12  ;;  %v3504_v12 = vcombine.low %v15_v58, %v23_v61  ;;  %v3560_v58 = vcombine.low %v67_v44, %v75_v45  ;;  %v91_v61 = vld [vmem:[%s5754_s0 + $0x270] sm:$0xff] }
  0xa3   :  { %2955 = vmatmul.mubr.bf16.gmra.mrb[16].mxu0 %v3574_v13  ;;  %2560 = vmatpush1.bf16.msra.mxu1 %v4382_v8  ;;  %v4430_v8 = vld [vmem:[%s5753_s1 + $0x300] ss:$8 sps:$4 sm:$0xff]   ;;  %v3512_v13 = vcombine.low %v19_v62, %v27_v63 }
  0xa4   :  { %3012 = vmatpush1.bf16.msra.mxu0 %v4385_v9  ;;  %2561 = vmatprep.subr.bf16.mxu1 %v4390_v16  ;;  %v4433_v9 = vld [vmem:[%s5753_s1 + $0x700] ss:$8 sps:$4 sm:$0xff]   ;;  %v4438_v16 = vld [vmem:[%s5753_s1 + $0x314] ss:$8 sps:$4 sm:$0xff]  }
  0xa5   :  { %3013 = vmatprep.subr.bf16.mxu0 %v4393_v17  ;;  %2512 = vmatprep.mubr.bf16.mxu1 %v3583_v18  ;;  %v4441_v17 = vld [vmem:[%s5753_s1 + $0x714] ss:$8 sps:$4 sm:$0xff]   ;;  %v3521_v18 = vcombine.high %v31_v10, %v39_v11  ;;  %v4466_v62 = vld [vmem:[%s5753_s1 + $0x360] ss:$8 sps:$4 sm:$0xff]  }
  0xa6   :  { %2964 = vmatprep.mubr.bf16.mxu0 %v3591_v19  ;;  %v3529_v19 = vcombine.high %v35_v14, %v43_v15  ;;  %v4469_v63 = vld [vmem:[%s5753_s1 + $0x760] ss:$8 sps:$4 sm:$0xff]  }
  0xa7   :  { %2562 = vmatpush1.bf16.msra.mxu1 %v4388_v20  ;;  %v4436_v20 = vld [vmem:[%s5753_s1 + $0x310] ss:$8 sps:$4 sm:$0xff]   ;;  %v4478_v14 = vld [vmem:[%s5753_s1 + $0x380] ss:$8 sps:$4 sm:$0xff]  }
  0xa8   :  { %3014 = vmatpush1.bf16.msra.mxu0 %v4391_v21  ;;  %2563 = vmatprep.subr.bf16.mxu1 %v4396_v22  ;;  %v4439_v21 = vld [vmem:[%s5753_s1 + $0x710] ss:$8 sps:$4 sm:$0xff]   ;;  %v4444_v22 = vld [vmem:[%s5753_s1 + $0x324] ss:$8 sps:$4 sm:$0xff]   ;;  %v4481_v15 = vld [vmem:[%s5753_s1 + $0x780] ss:$8 sps:$4 sm:$0xff]  }
  0xa9   :  { %3015 = vmatprep.subr.bf16.mxu0 %v4399_v23  ;;  %v4447_v23 = vld [vmem:[%s5753_s1 + $0x724] ss:$8 sps:$4 sm:$0xff]  }
  0xaa   :  { %2513 = vmatmul.mubr.bf16.gmra.mrb[20].mxu1 %v3582_v27  ;;  %v55_v27 = vld [vmem:[%s5754_s0 + $0x150] sm:$0xff] }
  0xab   :  { %2965 = vmatmul.mubr.bf16.gmra.mrb[20].mxu0 %v3590_v28  ;;  %2564 = vmatpush1.bf16.msra.mxu1 %v4394_v24  ;;  %v4442_v24 = vld [vmem:[%s5753_s1 + $0x320] ss:$8 sps:$4 sm:$0xff]   ;;  %v3520_v28 = vcombine.low %v31_v10, %v39_v11  ;;  %v3536_v41 = vcombine.low %v47_v26, %v55_v27  ;;  %v103_v11 = vld [vmem:[%s5754_s0 + $0x2d0] sm:$0xff] }
  0xac   :  { %3016 = vmatpush1.bf16.msra.mxu0 %v4397_v31  ;;  %2565 = vmatprep.subr.bf16.mxu1 %v4402_v32  ;;  %v59_v31 = vld [vmem:[%s5754_s0 + $0x170] sm:$0xff] }
  0xad   :  { %3017 = vmatprep.subr.bf16.mxu0 %v4405_v33  ;;  %2522 = vmatprep.mubr.bf16.mxu1 %v3599_v34  ;;  %v4450_v32 = vld [vmem:[%s5753_s1 + $0x334] ss:$8 sps:$4 sm:$0xff]   ;;  %v3537_v34 = vcombine.high %v47_v26, %v55_v27 }
  0xae   :  { %2974 = vmatprep.mubr.bf16.mxu0 %v3607_v35  ;;  %v4453_v33 = vld [vmem:[%s5753_s1 + $0x734] ss:$8 sps:$4 sm:$0xff]   ;;  %v3545_v35 = vcombine.high %v51_v30, %v59_v31 }
  0xaf   :  { %2566 = vmatpush1.bf16.msra.mxu1 %v4400_v36  ;;  %v4448_v36 = vld [vmem:[%s5753_s1 + $0x330] ss:$8 sps:$4 sm:$0xff]  }
  0xb0   :  { %3018 = vmatpush1.bf16.msra.mxu0 %v4403_v37  ;;  %2567 = vmatprep.subr.bf16.mxu1 %v4408_v38  ;;  %v4451_v37 = vld [vmem:[%s5753_s1 + $0x730] ss:$8 sps:$4 sm:$0xff]   ;;  %v4456_v38 = vld [vmem:[%s5753_s1 + $0x344] ss:$8 sps:$4 sm:$0xff]  }
  0xb1   :  { %3019 = vmatprep.subr.bf16.mxu0 %v4411_v39  ;;  %v4459_v39 = vld [vmem:[%s5753_s1 + $0x744] ss:$8 sps:$4 sm:$0xff]   ;;  %v119_v27 = vld [vmem:[%s5754_s0 + $0x350] sm:$0xff] }
  0xb2   :  { %2523 = vmatmul.mubr.bf16.gmra.mrb[24].mxu1 %v3598_v42  ;;  %v3544_v42 = vcombine.low %v51_v30, %v59_v31  ;;  %v4490_v30 = vld [vmem:[%s5753_s1 + $0x3a0] ss:$8 sps:$4 sm:$0xff]  }
  0xb3   :  { %2975 = vmatmul.mubr.bf16.gmra.mrb[24].mxu0 %v3606_v43  ;;  %2568 = vmatpush1.bf16.msra.mxu1 %v4406_v46  ;;  %v71_v43 = vld [vmem:[%s5754_s0 + $0x1d0] sm:$0xff]  ;;  %v4454_v46 = vld [vmem:[%s5753_s1 + $0x340] ss:$8 sps:$4 sm:$0xff]  }
  0xb4   :  { %3020 = vmatpush1.bf16.msra.mxu0 %v4409_v47  ;;  %2569 = vmatprep.subr.bf16.mxu1 %v4414_v48  ;;  %v4457_v47 = vld [vmem:[%s5753_s1 + $0x740] ss:$8 sps:$4 sm:$0xff]   ;;  %v4462_v48 = vld [vmem:[%s5753_s1 + $0x354] ss:$8 sps:$4 sm:$0xff]  }
  0xb5   :  { %3021 = vmatprep.subr.bf16.mxu0 %v4417_v49  ;;  %2532 = vmatprep.mubr.bf16.mxu1 %v3615_v50  ;;  %v4465_v49 = vld [vmem:[%s5753_s1 + $0x754] ss:$8 sps:$4 sm:$0xff]   ;;  %v3553_v50 = vcombine.high %v63_v40, %v71_v43  ;;  %v4493_v31 = vld [vmem:[%s5753_s1 + $0x7a0] ss:$8 sps:$4 sm:$0xff]  }
  0xb6   :  { %2984 = vmatprep.mubr.bf16.mxu0 %v3623_v51  ;;  %v3561_v51 = vcombine.high %v67_v44, %v75_v45  ;;  %v131_v44 = vld [vmem:[%s5754_s0 + $0x3b0] sm:$0xff] }
  0xb7   :  { %2570 = vmatpush1.bf16.msra.mxu1 %v4412_v52  ;;  %v4460_v52 = vld [vmem:[%s5753_s1 + $0x350] ss:$8 sps:$4 sm:$0xff]  }
  0xb8   :  { %3022 = vmatpush1.bf16.msra.mxu0 %v4415_v53  ;;  %2571 = vmatprep.subr.bf16.mxu1 %v4420_v54  ;;  %v4463_v53 = vld [vmem:[%s5753_s1 + $0x750] ss:$8 sps:$4 sm:$0xff]   ;;  %v4468_v54 = vld [vmem:[%s5753_s1 + $0x364] ss:$8 sps:$4 sm:$0xff]  }
  0xb9   :  { %3023 = vmatprep.subr.bf16.mxu0 %v4423_v55  ;;  %v4471_v55 = vld [vmem:[%s5753_s1 + $0x764] ss:$8 sps:$4 sm:$0xff]   ;;  %v139_v45 = vld [vmem:[%s5754_s0 + $0x3f0] sm:$0xff] }
  0xba   :  { %2533 = vmatmul.mubr.bf16.gmra.mrb[28].mxu1 %v3614_v59  ;;  %v87_v59 = vld [vmem:[%s5754_s0 + $0x250] sm:$0xff] }
  0xbb   :  { %2985 = vmatmul.mubr.bf16.gmra.mrb[28].mxu0 %v3622_v60  ;;  %2572 = vmatpush1.bf16.msra.mxu1 %v4418_v56  ;;  %v79_v56 = vld [vmem:[%s5754_s0 + $0x210] sm:$0xff] }
  0xbc   :  { %3024 = vmatpush1.bf16.msra.mxu0 %v4421_v57  ;;  %2573 = vmatprep.subr.bf16.mxu1 %v4426_v0  ;;  %v3552_v57 = vcombine.low %v63_v40, %v71_v43  ;;  %v83_v60 = vld [vmem:[%s5754_s0 + $0x230] sm:$0xff] }
  0xbd   :  { %3025 = vmatprep.subr.bf16.mxu0 %v4429_v1  ;;  %2575 = vmatprep.mubr.bf16.mxu1 %v3505_v2  ;;  %v4474_v0 = vld [vmem:[%s5753_s1 + $0x374] ss:$8 sps:$4 sm:$0xff]   ;;  %v3569_v2 = vcombine.high %v79_v56, %v87_v59  ;;  %v3576_v10 = vcombine.low %v83_v60, %v91_v61 }
  0xbe   :  { %3027 = vmatprep.mubr.bf16.mxu0 %v3513_v3  ;;  %v4477_v1 = vld [vmem:[%s5753_s1 + $0x774] ss:$8 sps:$4 sm:$0xff]   ;;  %v3577_v3 = vcombine.high %v83_v60, %v91_v61 }
  0xbf   :  { %2574 = vmatpush1.bf16.msra.mxu1 %v4424_v4  ;;  %v4472_v4 = vld [vmem:[%s5753_s1 + $0x370] ss:$8 sps:$4 sm:$0xff]  }
  0xc0   :  { %3026 = vmatpush1.bf16.msra.mxu0 %v4427_v5  ;;  %2656 = vmatprep.subr.bf16.mxu1 %v4432_v6  ;;  %v4475_v5 = vld [vmem:[%s5753_s1 + $0x770] ss:$8 sps:$4 sm:$0xff]   ;;  %v4480_v6 = vld [vmem:[%s5753_s1 + $0x384] ss:$8 sps:$4 sm:$0xff]  }
  0xc1   :  { %3108 = vmatprep.subr.bf16.mxu0 %v4435_v7  ;;  %v4483_v7 = vld [vmem:[%s5753_s1 + $0x784] ss:$8 sps:$4 sm:$0xff]   ;;  %v127_v40 = vld [vmem:[%s5754_s0 + $0x390] sm:$0xff]  ;;  %v20_v60 = vld [vmem:[%s5754_s0 + $0x38] sm:$0xff] }
  0xc2   :  { %2576 = vmatmul.mubr.bf16.vlgmr.msra.gmra.mrb[0].mxu1 %v3504_v12  ;;  %v99_v12 = vld [vmem:[%s5754_s0 + $0x2b0] sm:$0xff]  ;;  %v28_v61 = vld [vmem:[%s5754_s0 + $0x78] sm:$0xff] }
  0xc3   :  { %3028 = vmatmul.mubr.bf16.vlgmr.msra.gmra.mrb[0].mxu0 %v3512_v13  ;;  %2657 = vmatpush1.bf16.msra.mxu1 %v4430_v8  ;;  %v95_v8 = vld [vmem:[%s5754_s0 + $0x290] sm:$0xff] }
  0xc4   :  { %3109 = vmatpush1.bf16.msra.mxu0 %v4433_v9  ;;  %2658 = vmatprep.subr.bf16.mxu1 %v4438_v16  ;;  %v3568_v9 = vcombine.low %v79_v56, %v87_v59  ;;  %v107_v13 = vld [vmem:[%s5754_s0 + $0x2f0] sm:$0xff]  ;;  %v16_v56 = vld [vmem:[%s5754_s0 + $0x18] sm:$0xff] }
  0xc5   :  { %3110 = vmatprep.subr.bf16.mxu0 %v4441_v17  ;;  %2585 = vmatprep.mubr.bf16.mxu1 %v3521_v18  ;;  %v4486_v16 = vld [vmem:[%s5753_s1 + $0x394] ss:$8 sps:$4 sm:$0xff]   ;;  %v3585_v18 = vcombine.high %v95_v8, %v103_v11  ;;  %v3592_v26 = vcombine.low %v99_v12, %v107_v13 }
  0xc6   :  { %3037 = vmatprep.mubr.bf16.mxu0 %v3529_v19  ;;  %v4489_v17 = vld [vmem:[%s5753_s1 + $0x794] ss:$8 sps:$4 sm:$0xff]   ;;  %v3593_v19 = vcombine.high %v99_v12, %v107_v13 }
  0xc7   :  { %2659 = vmatpush1.bf16.msra.mxu1 %v4436_v20  ;;  %v4484_v20 = vld [vmem:[%s5753_s1 + $0x390] ss:$8 sps:$4 sm:$0xff]  }
  0xc8   :  { %3111 = vmatpush1.bf16.msra.mxu0 %v4439_v21  ;;  %2660 = vmatprep.subr.bf16.mxu1 %v4444_v22  ;;  %v4487_v21 = vld [vmem:[%s5753_s1 + $0x790] ss:$8 sps:$4 sm:$0xff]   ;;  %v4492_v22 = vld [vmem:[%s5753_s1 + $0x3a4] ss:$8 sps:$4 sm:$0xff]  }
  0xc9   :  { %3112 = vmatprep.subr.bf16.mxu0 %v4447_v23  ;;  %v4495_v23 = vld [vmem:[%s5753_s1 + $0x7a4] ss:$8 sps:$4 sm:$0xff]   ;;  %v135_v43 = vld [vmem:[%s5754_s0 + $0x3d0] sm:$0xff]  ;;  %v24_v59 = vld [vmem:[%s5754_s0 + $0x58] sm:$0xff] }
  0xca   :  { %2586 = vmatmul.mubr.bf16.gmra.mrb[4].mxu1 %v3520_v28  ;;  %v115_v28 = vld [vmem:[%s5754_s0 + $0x330] sm:$0xff] }
  0xcb   :  { %3038 = vmatmul.mubr.bf16.gmra.mrb[4].mxu0 %v3528_v29  ;;  %2661 = vmatpush1.bf16.msra.mxu1 %v4442_v24  ;;  %v111_v24 = vld [vmem:[%s5754_s0 + $0x310] sm:$0xff] }
  0xcc   :  { %3113 = vmatpush1.bf16.msra.mxu0 %v4445_v25  ;;  %2662 = vmatprep.subr.bf16.mxu1 %v4450_v32  ;;  %v3584_v25 = vcombine.low %v95_v8, %v103_v11  ;;  %v123_v29 = vld [vmem:[%s5754_s0 + $0x370] sm:$0xff]  ;;  %v36_v8 = vld [vmem:[%s5754_s0 + $0xb8] sm:$0xff]  ;;  %v3514_v11 = vcombine.low %v20_v60, %v28_v61 }
  0xcd   :  { %3114 = vmatprep.subr.bf16.mxu0 %v4453_v33  ;;  %2595 = vmatprep.mubr.bf16.mxu1 %v3537_v34  ;;  %v4498_v32 = vld [vmem:[%s5753_s1 + $0x3b4] ss:$8 sps:$4 sm:$0xff]   ;;  %v3601_v34 = vcombine.high %v111_v24, %v119_v27 }
  0xce   :  { %3047 = vmatprep.mubr.bf16.mxu0 %v3545_v35  ;;  %v4501_v33 = vld [vmem:[%s5753_s1 + $0x7b4] ss:$8 sps:$4 sm:$0xff]   ;;  %v3609_v35 = vcombine.high %v115_v28, %v123_v29 }
  0xcf   :  { %2663 = vmatpush1.bf16.msra.mxu1 %v4448_v36  ;;  %v4496_v36 = vld [vmem:[%s5753_s1 + $0x3b0] ss:$8 sps:$4 sm:$0xff]  }
  0xd0   :  { %3115 = vmatpush1.bf16.msra.mxu0 %v4451_v37  ;;  %2664 = vmatprep.subr.bf16.mxu1 %v4456_v38  ;;  %v4499_v37 = vld [vmem:[%s5753_s1 + $0x7b0] ss:$8 sps:$4 sm:$0xff]   ;;  %v4504_v38 = vld [vmem:[%s5753_s1 + $0x3c4] ss:$8 sps:$4 sm:$0xff]  }
  0xd1   :  { %3116 = vmatprep.subr.bf16.mxu0 %v4459_v39  ;;  %v4507_v39 = vld [vmem:[%s5753_s1 + $0x7c4] ss:$8 sps:$4 sm:$0xff]  }
  0xd2   :  { %2596 = vmatmul.mubr.bf16.gmra.mrb[8].mxu1 %v3536_v41  ;;  %v3600_v41 = vcombine.low %v111_v24, %v119_v27  ;;  %v68_v24 = vld [vmem:[%s5754_s0 + $0x1b8] sm:$0xff] }
  0xd3   :  { %3048 = vmatmul.mubr.bf16.gmra.mrb[8].mxu0 %v3544_v42  ;;  %2665 = vmatpush1.bf16.msra.mxu1 %v4454_v46  ;;  %v3608_v42 = vcombine.low %v115_v28, %v123_v29  ;;  %v4502_v46 = vld [vmem:[%s5753_s1 + $0x3c0] ss:$8 sps:$4 sm:$0xff]  }
  0xd4   :  { %3117 = vmatpush1.bf16.msra.mxu0 %v4457_v47  ;;  %2666 = vmatprep.subr.bf16.mxu1 %v4462_v48  ;;  %v4505_v47 = vld [vmem:[%s5753_s1 + $0x7c0] ss:$8 sps:$4 sm:$0xff]   ;;  %v4510_v48 = vld [vmem:[%s5753_s1 + $0x3d4] ss:$8 sps:$4 sm:$0xff]  }
  0xd5   :  { %3118 = vmatprep.subr.bf16.mxu0 %v4465_v49  ;;  %2605 = vmatprep.mubr.bf16.mxu1 %v3553_v50  ;;  %v4513_v49 = vld [vmem:[%s5753_s1 + $0x7d4] ss:$8 sps:$4 sm:$0xff]   ;;  %v3617_v50 = vcombine.high %v127_v40, %v135_v43 }
  0xd6   :  { %3057 = vmatprep.mubr.bf16.mxu0 %v3561_v51  ;;  %v3625_v51 = vcombine.high %v131_v44, %v139_v45 }
  0xd7   :  { %2667 = vmatpush1.bf16.msra.mxu1 %v4460_v52  ;;  %v4508_v52 = vld [vmem:[%s5753_s1 + $0x3d0] ss:$8 sps:$4 sm:$0xff]  }
  0xd8   :  { %3119 = vmatpush1.bf16.msra.mxu0 %v4463_v53  ;;  %2668 = vmatprep.subr.bf16.mxu1 %v4468_v54  ;;  %v4511_v53 = vld [vmem:[%s5753_s1 + $0x7d0] ss:$8 sps:$4 sm:$0xff]   ;;  %v4516_v54 = vld [vmem:[%s5753_s1 + $0x3e4] ss:$8 sps:$4 sm:$0xff]  }
  0xd9   :  { %3120 = vmatprep.subr.bf16.mxu0 %v4471_v55  ;;  %v4519_v55 = vld [vmem:[%s5753_s1 + $0x7e4] ss:$8 sps:$4 sm:$0xff]  }
  0xda   :  { %2606 = vmatmul.mubr.bf16.gmra.mrb[12].mxu1 %v3552_v57  ;;  %v3616_v57 = vcombine.low %v127_v40, %v135_v43  ;;  %v100_v40 = vld [vmem:[%s5754_s0 + $0x2b8] sm:$0xff] }
  0xdb   :  { %3058 = vmatmul.mubr.bf16.gmra.mrb[12].mxu0 %v3560_v58  ;;  %2669 = vmatpush1.bf16.msra.mxu1 %v4466_v62  ;;  %v3624_v58 = vcombine.low %v131_v44, %v139_v45  ;;  %v4514_v62 = vld [vmem:[%s5753_s1 + $0x3e0] ss:$8 sps:$4 sm:$0xff]  }
  0xdc   :  { %3121 = vmatpush1.bf16.msra.mxu0 %v4469_v63  ;;  %2670 = vmatprep.subr.bf16.mxu1 %v4474_v0  ;;  %v4517_v63 = vld [vmem:[%s5753_s1 + $0x7e0] ss:$8 sps:$4 sm:$0xff]   ;;  %v4522_v0 = vld [vmem:[%s5753_s1 + $0x3f4] ss:$8 sps:$4 sm:$0xff]  }
  0xdd   :  { %3122 = vmatprep.subr.bf16.mxu0 %v4477_v1  ;;  %2615 = vmatprep.mubr.bf16.mxu1 %v3569_v2  ;;  %v4525_v1 = vld [vmem:[%s5753_s1 + $0x7f4] ss:$8 sps:$4 sm:$0xff]   ;;  %v3507_v2 = vcombine.high %v16_v56, %v24_v59 }
  0xde   :  { %3067 = vmatprep.mubr.bf16.mxu0 %v3577_v3  ;;  %v3515_v3 = vcombine.high %v20_v60, %v28_v61 }
  0xdf   :  { %2671 = vmatpush1.bf16.msra.mxu1 %v4472_v4  ;;  %v4520_v4 = vld [vmem:[%s5753_s1 + $0x3f0] ss:$8 sps:$4 sm:$0xff]  }
  0xe0   :  { %3123 = vmatpush1.bf16.msra.mxu0 %v4475_v5  ;;  %2672 = vmatprep.subr.bf16.mxu1 %v4480_v6  ;;  %v4523_v5 = vld [vmem:[%s5753_s1 + $0x7f0] ss:$8 sps:$4 sm:$0xff]  }
  0xe1   :  { %3124 = vmatprep.subr.bf16.mxu0 %v4483_v7  ;;  %v32_v6 = vld [vmem:[%s5754_s0 + $0x98] sm:$0xff] }
  0xe2   :  { %2616 = vmatmul.mubr.bf16.gmra.mrb[16].mxu1 %v3568_v9  ;;  %v40_v7 = vld [vmem:[%s5754_s0 + $0xd8] sm:$0xff] }
  0xe3   :  { %3068 = vmatmul.mubr.bf16.gmra.mrb[16].mxu0 %v3576_v10  ;;  %2673 = vmatpush1.bf16.msra.mxu1 %v4478_v14  ;;  %v44_v9 = vld [vmem:[%s5754_s0 + $0xf8] sm:$0xff]  ;;  %v3506_v10 = vcombine.low %v16_v56, %v24_v59  ;;  %v3523_v12 = vcombine.high %v32_v6, %v40_v7 }
  0xe4   :  { %3125 = vmatpush1.bf16.msra.mxu0 %v4481_v15  ;;  %2674 = vmatprep.subr.bf16.mxu1 %v4486_v16  ;;  %v3531_v13 = vcombine.high %v36_v8, %v44_v9  ;;  %v48_v14 = vld [vmem:[%s5754_s0 + $0x118] sm:$0xff] }
  0xe5   :  { %3126 = vmatprep.subr.bf16.mxu0 %v4489_v17  ;;  %2625 = vmatprep.mubr.bf16.mxu1 %v3585_v18  ;;  %v56_v15 = vld [vmem:[%s5754_s0 + $0x158] sm:$0xff]  ;;  %v3522_v18 = vcombine.low %v32_v6, %v40_v7 }
  0xe6   :  { %3077 = vmatprep.mubr.bf16.mxu0 %v3593_v19  ;;  %v52_v16 = vld [vmem:[%s5754_s0 + $0x138] sm:$0xff]  ;;  %v3530_v19 = vcombine.low %v36_v8, %v44_v9 }
  0xe7   :  { %2675 = vmatpush1.bf16.msra.mxu1 %v4484_v20  ;;  %v60_v17 = vld [vmem:[%s5754_s0 + $0x178] sm:$0xff]  ;;  %v3539_v20 = vcombine.high %v48_v14, %v56_v15 }
  0xe8   :  { %3127 = vmatpush1.bf16.msra.mxu0 %v4487_v21  ;;  %2676 = vmatprep.subr.bf16.mxu1 %v4492_v22  ;;  %v3547_v21 = vcombine.high %v52_v16, %v60_v17  ;;  %v64_v22 = vld [vmem:[%s5754_s0 + $0x198] sm:$0xff]  ;;  %v3546_v27 = vcombine.low %v52_v16, %v60_v17 }
  0xe9   :  { %3128 = vmatprep.subr.bf16.mxu0 %v4495_v23  ;;  %v72_v23 = vld [vmem:[%s5754_s0 + $0x1d8] sm:$0xff] }
  0xea   :  { %2626 = vmatmul.mubr.bf16.gmra.mrb[20].mxu1 %v3584_v25  ;;  %v76_v25 = vld [vmem:[%s5754_s0 + $0x1f8] sm:$0xff]  ;;  %v3555_v28 = vcombine.high %v64_v22, %v72_v23 }
  0xeb   :  { %3078 = vmatmul.mubr.bf16.gmra.mrb[20].mxu0 %v3592_v26  ;;  %2677 = vmatpush1.bf16.msra.mxu1 %v4490_v30  ;;  %v3538_v26 = vcombine.low %v48_v14, %v56_v15  ;;  %v3563_v29 = vcombine.high %v68_v24, %v76_v25  ;;  %v80_v30 = vld [vmem:[%s5754_s0 + $0x218] sm:$0xff] }
  0xec   :  { %3129 = vmatpush1.bf16.msra.mxu0 %v4493_v31  ;;  %2678 = vmatprep.subr.bf16.mxu1 %v4498_v32  ;;  %v88_v31 = vld [vmem:[%s5754_s0 + $0x258] sm:$0xff] }
  0xed   :  { %3130 = vmatprep.subr.bf16.mxu0 %v4501_v33  ;;  %2635 = vmatprep.mubr.bf16.mxu1 %v3601_v34  ;;  %v84_v32 = vld [vmem:[%s5754_s0 + $0x238] sm:$0xff]  ;;  %v3554_v34 = vcombine.low %v64_v22, %v72_v23 }
  0xee   :  { %3087 = vmatprep.mubr.bf16.mxu0 %v3609_v35  ;;  %v92_v33 = vld [vmem:[%s5754_s0 + $0x278] sm:$0xff]  ;;  %v3562_v35 = vcombine.low %v68_v24, %v76_v25 }
  0xef   :  { %2679 = vmatpush1.bf16.msra.mxu1 %v4496_v36  ;;  %v3571_v36 = vcombine.high %v80_v30, %v88_v31  ;;  %v3578_v43 = vcombine.low %v84_v32, %v92_v33  ;;  %v132_v56 = vld [vmem:[%s5754_s0 + $0x3b8] sm:$0xff] }
  0xf0   :  { %3131 = vmatpush1.bf16.msra.mxu0 %v4499_v37  ;;  %2680 = vmatprep.subr.bf16.mxu1 %v4504_v38  ;;  %v3579_v37 = vcombine.high %v84_v32, %v92_v33  ;;  %v96_v38 = vld [vmem:[%s5754_s0 + $0x298] sm:$0xff] }
  0xf1   :  { %3132 = vmatprep.subr.bf16.mxu0 %v4507_v39  ;;  %v104_v39 = vld [vmem:[%s5754_s0 + $0x2d8] sm:$0xff] }
  0xf2   :  { %2636 = vmatmul.mubr.bf16.gmra.mrb[24].mxu1 %v3600_v41  ;;  %v108_v41 = vld [vmem:[%s5754_s0 + $0x2f8] sm:$0xff]  ;;  %v3587_v44 = vcombine.high %v96_v38, %v104_v39 }
  0xf3   :  { %3088 = vmatmul.mubr.bf16.gmra.mrb[24].mxu0 %v3608_v42  ;;  %2681 = vmatpush1.bf16.msra.mxu1 %v4502_v46  ;;  %v3570_v42 = vcombine.low %v80_v30, %v88_v31  ;;  %v3595_v45 = vcombine.high %v100_v40, %v108_v41  ;;  %v112_v46 = vld [vmem:[%s5754_s0 + $0x318] sm:$0xff] }
  0xf4   :  { %3133 = vmatpush1.bf16.msra.mxu0 %v4505_v47  ;;  %2682 = vmatprep.subr.bf16.mxu1 %v4510_v48  ;;  %v120_v47 = vld [vmem:[%s5754_s0 + $0x358] sm:$0xff] }
  0xf5   :  { %3134 = vmatprep.subr.bf16.mxu0 %v4513_v49  ;;  %2645 = vmatprep.mubr.bf16.mxu1 %v3617_v50  ;;  %v116_v48 = vld [vmem:[%s5754_s0 + $0x338] sm:$0xff]  ;;  %v3586_v50 = vcombine.low %v96_v38, %v104_v39 }
  0xf6   :  { %3097 = vmatprep.mubr.bf16.mxu0 %v3625_v51  ;;  %v124_v49 = vld [vmem:[%s5754_s0 + $0x378] sm:$0xff]  ;;  %v3594_v51 = vcombine.low %v100_v40, %v108_v41 }
  0xf7   :  { %2683 = vmatpush1.bf16.msra.mxu1 %v4508_v52  ;;  %v3603_v52 = vcombine.high %v112_v46, %v120_v47  ;;  %v3610_v59 = vcombine.low %v116_v48, %v124_v49 }
  0xf8   :  { %3135 = vmatpush1.bf16.msra.mxu0 %v4511_v53  ;;  %2684 = vmatprep.subr.bf16.mxu1 %v4516_v54  ;;  %v3611_v53 = vcombine.high %v116_v48, %v124_v49  ;;  %v128_v54 = vld [vmem:[%s5754_s0 + $0x398] sm:$0xff] }
  0xf9   :  { %3136 = vmatprep.subr.bf16.mxu0 %v4519_v55  ;;  %v136_v55 = vld [vmem:[%s5754_s0 + $0x3d8] sm:$0xff] }
  0xfa   :  { %2646 = vmatmul.mubr.bf16.gmra.mrb[28].mxu1 %v3616_v57  ;;  %v140_v57 = vld [vmem:[%s5754_s0 + $0x3f8] sm:$0xff]  ;;  %v3619_v60 = vcombine.high %v128_v54, %v136_v55 }
  0xfb   :  { %3098 = vmatmul.mubr.bf16.gmra.mrb[28].mxu0 %v3624_v58  ;;  %2685 = vmatpush1.bf16.msra.mxu1 %v4514_v62  ;;  %v3602_v58 = vcombine.low %v112_v46, %v120_v47  ;;  %v3627_v61 = vcombine.high %v132_v56, %v140_v57  ;;  %v3618_v62 = vcombine.low %v128_v54, %v136_v55 }
  0xfc   :  { %3137 = vmatpush1.bf16.msra.mxu0 %v4517_v63  ;;  %2686 = vmatprep.subr.bf16.mxu1 %v4522_v0  ;;  %v3626_v63 = vcombine.low %v132_v56, %v140_v57 }
  0xfd   :  { %3138 = vmatprep.subr.bf16.mxu0 %v4525_v1  ;;  %2688 = vmatprep.mubr.bf16.mxu1 %v3507_v2 }
  0xfe   :  { %3140 = vmatprep.mubr.bf16.mxu0 %v3515_v3 }
  0xff   :  { %2687 = vmatpush1.bf16.msra.mxu1 %v4520_v4 }
 0x100   :  { %3139 = vmatpush1.bf16.msra.mxu0 %v4523_v5 }
 0x102   :  { %2689 = vmatmul.mubr.bf16.vlgmr.msra.gmra.mrb[0].mxu1 %v3506_v10 }
 0x103   :  { %3141 = vmatmul.mubr.bf16.vlgmr.msra.gmra.mrb[0].mxu0 %v3514_v11  ;;  %2698 = vmatprep.mubr.bf16.mxu1 %v3523_v12 }
 0x104   :  { %3150 = vmatprep.mubr.bf16.mxu0 %v3531_v13 }
 0x10a   :  { %2699 = vmatmul.mubr.bf16.gmra.mrb[4].mxu1 %v3522_v18 }
 0x10b   :  { %3151 = vmatmul.mubr.bf16.gmra.mrb[4].mxu0 %v3530_v19  ;;  %2708 = vmatprep.mubr.bf16.mxu1 %v3539_v20 }
 0x10c   :  { %3160 = vmatprep.mubr.bf16.mxu0 %v3547_v21 }
 0x112   :  { %2709 = vmatmul.mubr.bf16.gmra.mrb[8].mxu1 %v3538_v26 }
 0x113   :  { %3161 = vmatmul.mubr.bf16.gmra.mrb[8].mxu0 %v3546_v27  ;;  %2718 = vmatprep.mubr.bf16.mxu1 %v3555_v28 }
 0x114   :  { %3170 = vmatprep.mubr.bf16.mxu0 %v3563_v29 }
 0x11a   :  { %2719 = vmatmul.mubr.bf16.gmra.mrb[12].mxu1 %v3554_v34 }
 0x11b   :  { %3171 = vmatmul.mubr.bf16.gmra.mrb[12].mxu0 %v3562_v35  ;;  %2728 = vmatprep.mubr.bf16.mxu1 %v3571_v36 }
 0x11c   :  { %3180 = vmatprep.mubr.bf16.mxu0 %v3579_v37 }
 0x122   :  { %2729 = vmatmul.mubr.bf16.gmra.mrb[16].mxu1 %v3570_v42 }
 0x123   :  { %3181 = vmatmul.mubr.bf16.gmra.mrb[16].mxu0 %v3578_v43  ;;  %2738 = vmatprep.mubr.bf16.mxu1 %v3587_v44 }
 0x124   :  { %3190 = vmatprep.mubr.bf16.mxu0 %v3595_v45 }
 0x12a   :  { %2739 = vmatmul.mubr.bf16.gmra.mrb[20].mxu1 %v3586_v50 }
 0x12b   :  { %3191 = vmatmul.mubr.bf16.gmra.mrb[20].mxu0 %v3594_v51  ;;  %2748 = vmatprep.mubr.bf16.mxu1 %v3603_v52 }
 0x12c   :  { %3200 = vmatprep.mubr.bf16.mxu0 %v3611_v53 }
 0x132   :  { %2749 = vmatmul.mubr.bf16.gmra.mrb[24].mxu1 %v3602_v58 }
 0x133   :  { %3201 = vmatmul.mubr.bf16.gmra.mrb[24].mxu0 %v3610_v59  ;;  %2758 = vmatprep.mubr.bf16.mxu1 %v3619_v60 }
 0x134   :  { %3210 = vmatprep.mubr.bf16.mxu0 %v3627_v61 }
 0x13a   :  { %2759 = vmatmul.mubr.bf16.gmra.mrb[28].mxu1 %v3618_v62 }
 0x13b   :  { %3211 = vmatmul.mubr.bf16.gmra.mrb[28].mxu0 %v3626_v63 }
 0x1d5   :  { %v2690_v0 = vpop.f32.mrb[0].mxu1 }
 0x1d6   :  { %v3142_v1 = vpop.f32.mrb[0].mxu0  ;;  %v2692_v3 = vpop.f32.mrb[1].mxu1 }
 0x1d7   :  { %v3917_v2 = vadd.f32 %v3142_v1, %v2690_v0  ;;  %v3144_v4 = vpop.f32.mrb[1].mxu0  ;;  %v2694_v6 = vpop.f32.mrb[2].mxu1 }
 0x1d8   :  { %v3918_v5 = vadd.f32 %v3144_v4, %v2692_v3  ;;  %v3146_v7 = vpop.f32.mrb[2].mxu0  ;;  %v2696_v9 = vpop.f32.mrb[3].mxu1 }
 0x1d9   :  { %v3919_v8 = vadd.f32 %v3146_v7, %v2694_v6  ;;  %v3148_v10 = vpop.f32.mrb[3].mxu0  ;;  %v3286_v13 = vmul.f32 %v3917_v2, %v3917_v2 }
 0x1da   :  { %v3901_v11 = vpack.c.bf16 %v3918_v5, %v3917_v2  ;;  %v3920_v12 = vadd.f32 %v3148_v10, %v2696_v9  ;;  %v3287_v16 = vmul.f32 %v3918_v5, %v3918_v5 }
 0x1db   :  { %v3221_v14 = vadd.f32 %v3919_v8, %v3917_v2  ;;  %v3288_v15 = vmul.f32 %v3919_v8, %v3919_v8 }
 0x1dc   :  { %3476 = vst [vmem:[%s5755_s2] sm:$0xff] %v3901_v11  ;;  %v3242_v17 = vadd.f32 %v3920_v12, %v3918_v5  ;;  %v3289_v18 = vmul.f32 %v3920_v12, %v3920_v12  ;;  %v3902_v19 = vpack.c.bf16 %v3920_v12, %v3919_v8 }
 0x1dd   :  { %v3318_v20 = vadd.f32 %v3288_v15, %v3286_v13  ;;  %v2700_v22 = vpop.f32.mrb[4].mxu1 }
 0x1de   :  { %v3339_v21 = vadd.f32 %v3289_v18, %v3287_v16  ;;  %3477 = vst [vmem:[%s5755_s2 + $0x8] sm:$0xff] %v3902_v19  ;;  %v3152_v23 = vpop.f32.mrb[4].mxu0  ;;  %v2702_v25 = vpop.f32.mrb[5].mxu1 }
 0x1df   :  { %v3921_v24 = vadd.f32 %v3152_v23, %v2700_v22  ;;  %v3154_v26 = vpop.f32.mrb[5].mxu0  ;;  %v2704_v28 = vpop.f32.mrb[6].mxu1 }
 0x1e0   :  { %v3922_v27 = vadd.f32 %v3154_v26, %v2702_v25  ;;  %v3156_v29 = vpop.f32.mrb[6].mxu0  ;;  %v2706_v33 = vpop.f32.mrb[7].mxu1 }
 0x1e1   :  { %v3222_v30 = vadd.f32 %v3921_v24, %v3221_v14  ;;  %v3290_v31 = vmul.f32 %v3921_v24, %v3921_v24  ;;  %v3923_v32 = vadd.f32 %v3156_v29, %v2704_v28  ;;  %v3158_v34 = vpop.f32.mrb[7].mxu0 }
 0x1e2   :  { %v3243_v35 = vadd.f32 %v3922_v27, %v3242_v17  ;;  %v3291_v36 = vmul.f32 %v3922_v27, %v3922_v27  ;;  %v3903_v37 = vpack.c.bf16 %v3922_v27, %v3921_v24  ;;  %v3924_v38 = vadd.f32 %v3158_v34, %v2706_v33 }
 0x1e3   :  { %v3319_v39 = vadd.f32 %v3318_v20, %v3290_v31  ;;  %v3223_v40 = vadd.f32 %v3923_v32, %v3222_v30  ;;  %v3292_v41 = vmul.f32 %v3923_v32, %v3923_v32 }
 0x1e4   :  { %v3340_v42 = vadd.f32 %v3339_v21, %v3291_v36  ;;  %3478 = vst [vmem:[%s5755_s2 + $0x10] sm:$0xff] %v3903_v37  ;;  %v3244_v43 = vadd.f32 %v3924_v38, %v3243_v35  ;;  %v3293_v44 = vmul.f32 %v3924_v38, %v3924_v38  ;;  %v3904_v45 = vpack.c.bf16 %v3924_v38, %v3923_v32 }
 0x1e5   :  { %v3320_v46 = vadd.f32 %v3319_v39, %v3292_v41  ;;  %v2710_v48 = vpop.f32.mrb[8].mxu1 }
 0x1e6   :  { %v3341_v47 = vadd.f32 %v3340_v42, %v3293_v44  ;;  %3479 = vst [vmem:[%s5755_s2 + $0x18] sm:$0xff] %v3904_v45  ;;  %v3162_v49 = vpop.f32.mrb[8].mxu0  ;;  %v2712_v51 = vpop.f32.mrb[9].mxu1 }
 0x1e7   :  { %v3925_v50 = vadd.f32 %v3162_v49, %v2710_v48  ;;  %v3164_v52 = vpop.f32.mrb[9].mxu0  ;;  %v2714_v54 = vpop.f32.mrb[10].mxu1 }
 0x1e8   :  { %v3926_v53 = vadd.f32 %v3164_v52, %v2712_v51  ;;  %v3166_v55 = vpop.f32.mrb[10].mxu0  ;;  %v2716_v59 = vpop.f32.mrb[11].mxu1 }
 0x1e9   :  { %v3224_v56 = vadd.f32 %v3925_v50, %v3223_v40  ;;  %v3294_v57 = vmul.f32 %v3925_v50, %v3925_v50  ;;  %v3927_v58 = vadd.f32 %v3166_v55, %v2714_v54  ;;  %v3168_v60 = vpop.f32.mrb[11].mxu0 }
 0x1ea   :  { %v3245_v61 = vadd.f32 %v3926_v53, %v3244_v43  ;;  %v3295_v62 = vmul.f32 %v3926_v53, %v3926_v53  ;;  %v3905_v63 = vpack.c.bf16 %v3926_v53, %v3925_v50  ;;  %v3928_v0 = vadd.f32 %v3168_v60, %v2716_v59 }
 0x1eb   :  { %v3321_v1 = vadd.f32 %v3320_v46, %v3294_v57  ;;  %v3225_v2 = vadd.f32 %v3927_v58, %v3224_v56  ;;  %v3296_v3 = vmul.f32 %v3927_v58, %v3927_v58 }
 0x1ec   :  { %v3342_v4 = vadd.f32 %v3341_v47, %v3295_v62  ;;  %3480 = vst [vmem:[%s5755_s2 + $0x20] sm:$0xff] %v3905_v63  ;;  %v3246_v5 = vadd.f32 %v3928_v0, %v3245_v61  ;;  %v3297_v6 = vmul.f32 %v3928_v0, %v3928_v0  ;;  %v3906_v7 = vpack.c.bf16 %v3928_v0, %v3927_v58 }
 0x1ed   :  { %v3322_v8 = vadd.f32 %v3321_v1, %v3296_v3  ;;  %v2720_v10 = vpop.f32.mrb[12].mxu1 }
 0x1ee   :  { %v3343_v9 = vadd.f32 %v3342_v4, %v3297_v6  ;;  %3481 = vst [vmem:[%s5755_s2 + $0x28] sm:$0xff] %v3906_v7  ;;  %v3172_v11 = vpop.f32.mrb[12].mxu0  ;;  %v2722_v13 = vpop.f32.mrb[13].mxu1 }
 0x1ef   :  { %v3929_v12 = vadd.f32 %v3172_v11, %v2720_v10  ;;  %v3174_v14 = vpop.f32.mrb[13].mxu0  ;;  %v2724_v16 = vpop.f32.mrb[14].mxu1 }
 0x1f0   :  { %v3930_v15 = vadd.f32 %v3174_v14, %v2722_v13  ;;  %v3176_v17 = vpop.f32.mrb[14].mxu0  ;;  %v2726_v21 = vpop.f32.mrb[15].mxu1 }
 0x1f1   :  { %v3226_v18 = vadd.f32 %v3929_v12, %v3225_v2  ;;  %v3298_v19 = vmul.f32 %v3929_v12, %v3929_v12  ;;  %v3931_v20 = vadd.f32 %v3176_v17, %v2724_v16  ;;  %v3178_v22 = vpop.f32.mrb[15].mxu0 }
 0x1f2   :  { %v3247_v23 = vadd.f32 %v3930_v15, %v3246_v5  ;;  %v3299_v24 = vmul.f32 %v3930_v15, %v3930_v15  ;;  %v3907_v25 = vpack.c.bf16 %v3930_v15, %v3929_v12  ;;  %v3932_v26 = vadd.f32 %v3178_v22, %v2726_v21 }
 0x1f3   :  { %v3323_v27 = vadd.f32 %v3322_v8, %v3298_v19  ;;  %v3227_v28 = vadd.f32 %v3931_v20, %v3226_v18  ;;  %v3300_v29 = vmul.f32 %v3931_v20, %v3931_v20 }
 0x1f4   :  { %v3344_v30 = vadd.f32 %v3343_v9, %v3299_v24  ;;  %3482 = vst [vmem:[%s5755_s2 + $0x30] sm:$0xff] %v3907_v25  ;;  %v3248_v31 = vadd.f32 %v3932_v26, %v3247_v23  ;;  %v3301_v32 = vmul.f32 %v3932_v26, %v3932_v26  ;;  %v3908_v33 = vpack.c.bf16 %v3932_v26, %v3931_v20 }
 0x1f5   :  { %v3324_v34 = vadd.f32 %v3323_v27, %v3300_v29  ;;  %v2730_v36 = vpop.f32.mrb[16].mxu1 }
 0x1f6   :  { %v3345_v35 = vadd.f32 %v3344_v30, %v3301_v32  ;;  %3483 = vst [vmem:[%s5755_s2 + $0x38] sm:$0xff] %v3908_v33  ;;  %v3182_v37 = vpop.f32.mrb[16].mxu0  ;;  %v2732_v39 = vpop.f32.mrb[17].mxu1 }
 0x1f7   :  { %v3933_v38 = vadd.f32 %v3182_v37, %v2730_v36  ;;  %v3184_v40 = vpop.f32.mrb[17].mxu0  ;;  %v2734_v42 = vpop.f32.mrb[18].mxu1 }
 0x1f8   :  { %v3934_v41 = vadd.f32 %v3184_v40, %v2732_v39  ;;  %v3186_v43 = vpop.f32.mrb[18].mxu0  ;;  %v2736_v47 = vpop.f32.mrb[19].mxu1 }
 0x1f9   :  { %v3228_v44 = vadd.f32 %v3933_v38, %v3227_v28  ;;  %v3302_v45 = vmul.f32 %v3933_v38, %v3933_v38  ;;  %v3935_v46 = vadd.f32 %v3186_v43, %v2734_v42  ;;  %v3188_v48 = vpop.f32.mrb[19].mxu0 }
 0x1fa   :  { %v3249_v49 = vadd.f32 %v3934_v41, %v3248_v31  ;;  %v3303_v50 = vmul.f32 %v3934_v41, %v3934_v41  ;;  %v3909_v51 = vpack.c.bf16 %v3934_v41, %v3933_v38  ;;  %v3936_v52 = vadd.f32 %v3188_v48, %v2736_v47 }
 0x1fb   :  { %v3325_v53 = vadd.f32 %v3324_v34, %v3302_v45  ;;  %v3229_v54 = vadd.f32 %v3935_v46, %v3228_v44  ;;  %v3304_v55 = vmul.f32 %v3935_v46, %v3935_v46 }
 0x1fc   :  { %v3346_v56 = vadd.f32 %v3345_v35, %v3303_v50  ;;  %3484 = vst [vmem:[%s5755_s2 + $0x40] sm:$0xff] %v3909_v51  ;;  %v3250_v57 = vadd.f32 %v3936_v52, %v3249_v49  ;;  %v3305_v58 = vmul.f32 %v3936_v52, %v3936_v52  ;;  %v3910_v59 = vpack.c.bf16 %v3936_v52, %v3935_v46 }
 0x1fd   :  { %v3326_v60 = vadd.f32 %v3325_v53, %v3304_v55  ;;  %v2740_v62 = vpop.f32.mrb[20].mxu1 }
 0x1fe   :  { %v3347_v61 = vadd.f32 %v3346_v56, %v3305_v58  ;;  %3485 = vst [vmem:[%s5755_s2 + $0x48] sm:$0xff] %v3910_v59  ;;  %v3192_v63 = vpop.f32.mrb[20].mxu0  ;;  %v2742_v1 = vpop.f32.mrb[21].mxu1 }
 0x1ff   :  { %v3937_v0 = vadd.f32 %v3192_v63, %v2740_v62  ;;  %v3194_v2 = vpop.f32.mrb[21].mxu0  ;;  %v2744_v4 = vpop.f32.mrb[22].mxu1 }
 0x200   :  { %v3938_v3 = vadd.f32 %v3194_v2, %v2742_v1  ;;  %v3196_v5 = vpop.f32.mrb[22].mxu0  ;;  %v2746_v9 = vpop.f32.mrb[23].mxu1 }
 0x201   :  { %v3230_v6 = vadd.f32 %v3937_v0, %v3229_v54  ;;  %v3306_v7 = vmul.f32 %v3937_v0, %v3937_v0  ;;  %v3939_v8 = vadd.f32 %v3196_v5, %v2744_v4  ;;  %v3198_v10 = vpop.f32.mrb[23].mxu0 }
 0x202   :  { %v3251_v11 = vadd.f32 %v3938_v3, %v3250_v57  ;;  %v3307_v12 = vmul.f32 %v3938_v3, %v3938_v3  ;;  %v3911_v13 = vpack.c.bf16 %v3938_v3, %v3937_v0  ;;  %v3940_v14 = vadd.f32 %v3198_v10, %v2746_v9 }
 0x203   :  { %v3327_v15 = vadd.f32 %v3326_v60, %v3306_v7  ;;  %v3231_v16 = vadd.f32 %v3939_v8, %v3230_v6  ;;  %v3308_v17 = vmul.f32 %v3939_v8, %v3939_v8 }
 0x204   :  { %v3348_v18 = vadd.f32 %v3347_v61, %v3307_v12  ;;  %3486 = vst [vmem:[%s5755_s2 + $0x50] sm:$0xff] %v3911_v13  ;;  %v3252_v19 = vadd.f32 %v3940_v14, %v3251_v11  ;;  %v3309_v20 = vmul.f32 %v3940_v14, %v3940_v14  ;;  %v3912_v21 = vpack.c.bf16 %v3940_v14, %v3939_v8 }
 0x205   :  { %v3328_v22 = vadd.f32 %v3327_v15, %v3308_v17  ;;  %v2750_v24 = vpop.f32.mrb[24].mxu1  ;;  %v4526_v17 = vmov 1966171168  }
 0x206   :  { %v3349_v23 = vadd.f32 %v3348_v18, %v3309_v20  ;;  %3487 = vst [vmem:[%s5755_s2 + $0x58] sm:$0xff] %v3912_v21  ;;  %v3202_v25 = vpop.f32.mrb[24].mxu0  ;;  %v2752_v27 = vpop.f32.mrb[25].mxu1  ;;  %v3267_v18 = vunpack.c.l.s4 %v4526_v17 }
 0x207   :  { %v3941_v26 = vadd.f32 %v3202_v25, %v2750_v24  ;;  %v3204_v28 = vpop.f32.mrb[25].mxu0  ;;  %v2754_v30 = vpop.f32.mrb[26].mxu1 }
 0x208   :  { %v3942_v29 = vadd.f32 %v3204_v28, %v2752_v27  ;;  %v3206_v31 = vpop.f32.mrb[26].mxu0  ;;  %v2756_v35 = vpop.f32.mrb[27].mxu1  ;;  %v3268_v28 = vunpack.c.0.s8 %v3267_v18 }
 0x209   :  { %v3232_v32 = vadd.f32 %v3941_v26, %v3231_v16  ;;  %v3310_v33 = vmul.f32 %v3941_v26, %v3941_v26  ;;  %v3943_v34 = vadd.f32 %v3206_v31, %v2754_v30  ;;  %v3208_v36 = vpop.f32.mrb[27].mxu0 }
 0x20a   :  { %v3253_v37 = vadd.f32 %v3942_v29, %v3252_v19  ;;  %v3311_v38 = vmul.f32 %v3942_v29, %v3942_v29  ;;  %v3913_v39 = vpack.c.bf16 %v3942_v29, %v3941_v26  ;;  %v3944_v40 = vadd.f32 %v3208_v36, %v2756_v35 }
 0x20b   :  { %v3329_v41 = vadd.f32 %v3328_v22, %v3310_v33  ;;  %v3233_v42 = vadd.f32 %v3943_v34, %v3232_v32  ;;  %v3312_v43 = vmul.f32 %v3943_v34, %v3943_v34  ;;  %v3269_v19 = vlaneseq }
 0x20c   :  { %v3350_v44 = vadd.f32 %v3349_v23, %v3311_v38  ;;  %3488 = vst [vmem:[%s5755_s2 + $0x60] sm:$0xff] %v3913_v39  ;;  %v3254_v45 = vadd.f32 %v3944_v40, %v3253_v37  ;;  %v3313_v46 = vmul.f32 %v3944_v40, %v3944_v40  ;;  %v3914_v47 = vpack.c.bf16 %v3944_v40, %v3943_v34 }
 0x20d   :  { %v3330_v48 = vadd.f32 %v3329_v41, %v3312_v43  ;;  %v2760_v50 = vpop.f32.mrb[28].mxu1  ;;  %v3270_v29 = vshrl.u32 %v3269_v19, 7  ;;  %vm3283_vm0 = vcmp.lt.s32.totalorder %v3269_v19, 256 }
 0x20e   :  { %v3351_v49 = vadd.f32 %v3350_v44, %v3313_v46  ;;  %3489 = vst [vmem:[%s5755_s2 + $0x68] sm:$0xff] %v3914_v47  ;;  %v3212_v51 = vpop.f32.mrb[28].mxu0  ;;  %v2762_v53 = vpop.f32.mrb[29].mxu1 }
 0x20f   :  { %v3945_v52 = vadd.f32 %v3212_v51, %v2760_v50  ;;  %v3214_v54 = vpop.f32.mrb[29].mxu0  ;;  %v2764_v56 = vpop.f32.mrb[30].mxu1  ;;  %v3271_v38 = vsub.s32 %v3268_v28, %v3270_v29 }
 0x210   :  { %v3946_v55 = vadd.f32 %v3214_v54, %v2762_v53  ;;  %v3216_v57 = vpop.f32.mrb[30].mxu0  ;;  %v2766_v61 = vpop.f32.mrb[31].mxu1 }
 0x211   :  { %v3234_v58 = vadd.f32 %v3945_v52, %v3233_v42  ;;  %v3314_v59 = vmul.f32 %v3945_v52, %v3945_v52  ;;  %v3947_v60 = vadd.f32 %v3216_v57, %v2764_v56  ;;  %v3218_v62 = vpop.f32.mrb[31].mxu0 }
 0x212   :  { %v3255_v63 = vadd.f32 %v3946_v55, %v3254_v45  ;;  %v3315_v0 = vmul.f32 %v3946_v55, %v3946_v55  ;;  %v3915_v1 = vpack.c.bf16 %v3946_v55, %v3945_v52  ;;  %v3948_v2 = vadd.f32 %v3218_v62, %v2766_v61 }
 0x213   :  { %v3331_v3 = vadd.f32 %v3330_v48, %v3314_v59  ;;  %v3235_v4 = vadd.f32 %v3947_v60, %v3234_v58  ;;  %v3316_v5 = vmul.f32 %v3947_v60, %v3947_v60 }
 0x214   :  { %v3352_v6 = vadd.f32 %v3351_v49, %v3315_v0  ;;  %3490 = vst [vmem:[%s5755_s2 + $0x70] sm:$0xff] %v3915_v1  ;;  %v3256_v7 = vadd.f32 %v3948_v2, %v3255_v63  ;;  %v3317_v8 = vmul.f32 %v3948_v2, %v3948_v2  ;;  %v3916_v9 = vpack.c.bf16 %v3948_v2, %v3947_v60 }
 0x215   :  { %v3236_v10 = vrot.slane %v3235_v4, 4  ;;  %v3332_v11 = vadd.f32 %v3331_v3, %v3316_v5 }
 0x216   :  { %v3257_v12 = vrot.slane %v3256_v7, 4  ;;  %v3353_v13 = vadd.f32 %v3352_v6, %v3317_v8  ;;  %3491 = vst [vmem:[%s5755_s2 + $0x78] sm:$0xff] %v3916_v9 }
 0x217   :  { %v3237_v14 = vadd.f32 %v3236_v10, %v3235_v4  ;;  %v3333_v15 = vrot.slane %v3332_v11, 4 }
 0x218   :  { %v3258_v16 = vadd.f32 %v3257_v12, %v3256_v7  ;;  %v3354_v20 = vrot.slane %v3353_v13, 4 }
 0x219   :  { %v3238_v21 = vrot.slane %v3237_v14, 2  ;;  %v3334_v22 = vadd.f32 %v3333_v15, %v3332_v11 }
 0x21a   :  { %v3259_v23 = vrot.slane %v3258_v16, 2  ;;  %v3355_v24 = vadd.f32 %v3354_v20, %v3353_v13 }
 0x21b   :  { %v3239_v25 = vadd.f32 %v3238_v21, %v3237_v14  ;;  %v3335_v26 = vrot.slane %v3334_v22, 2 }
 0x21c   :  { %v3260_v27 = vadd.f32 %v3259_v23, %v3258_v16  ;;  %v3356_v30 = vrot.slane %v3355_v24, 2 }
 0x21d   :  { %v3240_v31 = vrot.slane %v3239_v25, 1  ;;  %v3336_v32 = vadd.f32 %v3335_v26, %v3334_v22 }
 0x21e   :  { %v3261_v33 = vrot.slane %v3260_v27, 1  ;;  %v3357_v34 = vadd.f32 %v3356_v30, %v3355_v24 }
 0x21f   :  { %v3241_v35 = vadd.f32 %v3240_v31, %v3239_v25  ;;  %v3337_v36 = vrot.slane %v3336_v32, 1 }
 0x220   :  { %v3262_v37 = vadd.f32 %v3261_v33, %v3260_v27  ;;  %v3358_v39 = vrot.slane %v3357_v34, 1 }
 0x221   :  { %v3338_v40 = vadd.f32 %v3337_v36, %v3336_v32 }
 0x222   :  { %v3265_v41 = vcombine.low %v3241_v35, %v3262_v37  ;;  %v3359_v42 = vadd.f32 %v3358_v39, %v3357_v34 }
 0x224   :  { %v3272_v43 = vrot.slane %v3265_v41, %v3271_v38  ;;  %v3362_v44 = vcombine.low %v3338_v40, %v3359_v42 }
 0x226   :  { %v3279_v45 = vrot.slane %v3272_v43, %v3271_v38  ;;  %v3369_v46 = vrot.slane %v3362_v44, %v3271_v38 }
 0x228   :  { %3285 = vst.msk [vmem:[%s5756_s3] ss:$2 sm:$0x3] %vm3283_vm0, %v3279_v45  ;;  %v3376_v47 = vrot.slane %v3369_v46, %v3271_v38 }
 0x22a   :  { %3884 = vst.msk [vmem:[%s5756_s3 + $0x1] ss:$2 sm:$0x3] %vm3283_vm0, %v3376_v47 }

// kernel: netD_forward.9
= control target key start
LH: loop header
LB: loop body
LE: loop exit
PB: predicated region body
PF: predicated region fallthrough
CT: control target
= control target key end

     0   :  { %v43_v0 = vlaneseq  ;;  %s412_s0 = inlined_call_operand.vmem [shape: bf16[2,16,512], index: 0, kind: input, shape index: {}]   ;;  %s413_s1 = inlined_call_operand.vmem [shape: f32[1,512], index: 1, kind: input, shape index: {}]   ;;  %s414_s2 = inlined_call_operand.vmem [shape: f32[1,512], index: 2, kind: input, shape index: {}]   ;;  %s415_s3 = inlined_call_operand.vmem [shape: f32[16,512], index: 3, kind: input, shape index: {}]   ;;  %s416_s4 = inlined_call_operand.vmem [shape: f32[2,1], index: 4, kind: output, shape index: {}]  }
   0x1   :  { %v21_v1 = vld [vmem:[%s412_s0 + $0x20] sm:$0xff]  ;;  %v22_v2 = vld [vmem:[%s412_s0 + $0x28] sm:$0xff]  ;;  %v304_v13 = vld [vmem:[%s412_s0 + $0x30] sm:$0xff] }
   0x2   :  { %v33_v3 = vunpack.c.l.bf16 %v21_v1  ;;  %v34_v4 = vunpack.c.h.bf16 %v21_v1  ;;  %v35_v5 = vunpack.c.l.bf16 %v22_v2  ;;  %v290_v6 = vshrl.u32 %v43_v0, 7  ;;  %v17_v7 = vld [vmem:[%s412_s0] sm:$0xff]  ;;  %v18_v10 = vld [vmem:[%s412_s0 + $0x8] sm:$0xff]  ;;  %v24_v44 = vld [vmem:[%s412_s0 + $0x38] sm:$0xff] }
   0x3   :  { %v36_v8 = vunpack.c.h.bf16 %v22_v2  ;;  %v41_v9 = vld [vmem:[%s413_s1] sm:$0xf]  ;;  %v25_v11 = vunpack.c.l.bf16 %v17_v7  ;;  %v26_v12 = vunpack.c.h.bf16 %v17_v7  ;;  %v306_v14 = vand.u32 127, %v43_v0  ;;  %v166_v50 = vld [vmem:[%s415_s3 + $0x8] sm:$0xff]  ;;  %v167_v51 = vld [vmem:[%s415_s3 + $0x10] sm:$0xff] }
   0x4   :  { %v45_v15 = vsub.s32 0, %v290_v6  ;;  %v49_v16 = vsub.s32 1, %v290_v6  ;;  %v53_v17 = vsub.s32 2, %v290_v6  ;;  %v57_v18 = vsub.s32 3, %v290_v6  ;;  %v79_v19 = vld [vmem:[%s414_s2] sm:$0xf] }
   0x5   :  { %v27_v20 = vunpack.c.l.bf16 %v18_v10  ;;  %v28_v21 = vunpack.c.h.bf16 %v18_v10  ;;  %v37_v22 = vunpack.c.l.bf16 %v304_v13  ;;  %v38_v23 = vunpack.c.h.bf16 %v304_v13  ;;  %v165_v45 = vld [vmem:[%s415_s3] sm:$0xff]  ;;  %v168_v57 = vld [vmem:[%s415_s3 + $0x18] sm:$0xff] }
   0x6   :  { %v317_v24 = vrot.slane %v41_v9, %v45_v15  ;;  %v319_v25 = vrot.slane %v41_v9, %v49_v16  ;;  %v321_v26 = vrot.slane %v41_v9, %v53_v17  ;;  %v323_v27 = vrot.slane %v41_v9, %v57_v18 }
   0x7   :  { %v325_v28 = vrot.slane %v79_v19, %v45_v15  ;;  %v327_v29 = vrot.slane %v79_v19, %v49_v16  ;;  %v329_v30 = vrot.slane %v79_v19, %v53_v17  ;;  %v331_v31 = vrot.slane %v79_v19, %v57_v18 }
   0x8   :  { %v71_v32 = vmul.f32 %v317_v24, %v33_v3  ;;  %v72_v33 = vmul.f32 %v319_v25, %v34_v4  ;;  %v73_v34 = vmul.f32 %v321_v26, %v35_v5  ;;  %v74_v35 = vmul.f32 %v323_v27, %v36_v8 }
   0x9   :  { %v63_v36 = vmul.f32 %v317_v24, %v25_v11  ;;  %v64_v37 = vmul.f32 %v319_v25, %v26_v12  ;;  %v65_v38 = vmul.f32 %v321_v26, %v27_v20  ;;  %v66_v39 = vmul.f32 %v323_v27, %v28_v21  ;;  %v19_v20 = vld [vmem:[%s412_s0 + $0x10] sm:$0xff] }
   0xa   :  { %v109_v40 = vadd.f32 %v325_v28, %v71_v32  ;;  %v110_v41 = vadd.f32 %v327_v29, %v72_v33  ;;  %v111_v42 = vadd.f32 %v329_v30, %v73_v34  ;;  %v112_v43 = vadd.f32 %v331_v31, %v74_v35 }
   0xb   :  { %v101_v46 = vadd.f32 %v325_v28, %v63_v36  ;;  %v102_v47 = vadd.f32 %v327_v29, %v64_v37  ;;  %v103_v48 = vadd.f32 %v329_v30, %v65_v38  ;;  %v104_v49 = vadd.f32 %v331_v31, %v66_v39  ;;  %v169_v38 = vld [vmem:[%s415_s3 + $0x20] sm:$0xff]  ;;  %v20_v39 = vld [vmem:[%s412_s0 + $0x18] sm:$0xff] }
   0xc   :  { %vm125_vm0 = vcmp.ge.f32.partialorder %v109_v40, 0.0  ;;  %vm126_vm1 = vcmp.ge.f32.partialorder %v110_v41, 0.0  ;;  %vm127_vm2 = vcmp.ge.f32.partialorder %v111_v42, 0.0  ;;  %vm128_vm3 = vcmp.ge.f32.partialorder %v112_v43, 0.0 }
   0xd   :  { %v141_v52 = vmul.f32 0.2, %v109_v40  ;;  %v142_v53 = vmul.f32 0.2, %v110_v41  ;;  %v143_v54 = vmul.f32 0.2, %v111_v42  ;;  %v39_v55 = vunpack.c.l.bf16 %v24_v44 }
   0xe   :  { %v144_v56 = vmul.f32 0.2, %v112_v43  ;;  %vm117_vm4 = vcmp.ge.f32.partialorder %v101_v46, 0.0  ;;  %vm118_vm5 = vcmp.ge.f32.partialorder %v102_v47, 0.0  ;;  %vm119_vm6 = vcmp.ge.f32.partialorder %v103_v48, 0.0 }
   0xf   :  { %v157_v58 = vsel %vm125_vm0, %v109_v40, %v141_v52  ;;  %v158_v59 = vsel %vm126_vm1, %v110_v41, %v142_v53  ;;  %v159_v60 = vsel %vm127_vm2, %v111_v42, %v143_v54  ;;  %vm120_vm7 = vcmp.ge.f32.partialorder %v104_v49, 0.0  ;;  %v172_v54 = vld [vmem:[%s415_s3 + $0x38] sm:$0xff] }
  0x10   :  { %v160_v61 = vsel %vm128_vm3, %v112_v43, %v144_v56  ;;  %v181_v62 = vmul.f32 %v165_v45, %v157_v58  ;;  %v182_v63 = vmul.f32 %v166_v50, %v158_v59  ;;  %v183_v0 = vmul.f32 %v167_v51, %v159_v60 }
  0x11   :  { %v184_v1 = vmul.f32 %v168_v57, %v160_v61  ;;  %v133_v2 = vmul.f32 0.2, %v101_v46  ;;  %v134_v3 = vmul.f32 0.2, %v102_v47  ;;  %v135_v4 = vmul.f32 0.2, %v103_v48 }
  0x12   :  { %v199_v5 = vadd.f32 %v182_v63, %v181_v62  ;;  %v136_v7 = vmul.f32 0.2, %v104_v49  ;;  %v40_v8 = vunpack.c.h.bf16 %v24_v44  ;;  %v75_v9 = vmul.f32 %v317_v24, %v37_v22  ;;  %v170_v44 = vld [vmem:[%s415_s3 + $0x28] sm:$0xff] }
  0x13   :  { %v149_v10 = vsel %vm117_vm4, %v101_v46, %v133_v2  ;;  %v150_v11 = vsel %vm118_vm5, %v102_v47, %v134_v3  ;;  %v151_v12 = vsel %vm119_vm6, %v103_v48, %v135_v4  ;;  %v76_v15 = vmul.f32 %v319_v25, %v38_v23 }
  0x14   :  { %v200_v16 = vadd.f32 %v199_v5, %v183_v0  ;;  %v152_v17 = vsel %vm120_vm7, %v104_v49, %v136_v7  ;;  %v173_v18 = vmul.f32 %v165_v45, %v149_v10  ;;  %v174_v19 = vmul.f32 %v166_v50, %v150_v11  ;;  %v171_v45 = vld [vmem:[%s415_s3 + $0x30] sm:$0xff] }
  0x15   :  { %v175_v21 = vmul.f32 %v167_v51, %v151_v12  ;;  %v176_v22 = vmul.f32 %v168_v57, %v152_v17  ;;  %v77_v32 = vmul.f32 %v321_v26, %v39_v55  ;;  %v78_v33 = vmul.f32 %v323_v27, %v40_v8 }
  0x16   :  { %v201_v34 = vadd.f32 %v200_v16, %v184_v1  ;;  %v189_v35 = vadd.f32 %v174_v19, %v173_v18  ;;  %v113_v13 = vadd.f32 %v325_v28, %v75_v9  ;;  %v114_v23 = vadd.f32 %v327_v29, %v76_v15 }
  0x17   :  { %v115_v36 = vadd.f32 %v329_v30, %v77_v32  ;;  %v116_v37 = vadd.f32 %v331_v31, %v78_v33  ;;  %v29_v40 = vunpack.c.l.bf16 %v19_v20  ;;  %v30_v41 = vunpack.c.h.bf16 %v19_v20 }
  0x18   :  { %202 = vadd.xlane.f32.xlu1 %v201_v34  ;;  %v190_v42 = vadd.f32 %v189_v35, %v175_v21  ;;  %vm129_vm8 = vcmp.ge.f32.partialorder %v113_v13, 0.0  ;;  %vm130_vm9 = vcmp.ge.f32.partialorder %v114_v23, 0.0  ;;  %v145_v43 = vmul.f32 0.2, %v113_v13 }
  0x19   :  { %vm131_vm10 = vcmp.ge.f32.partialorder %v115_v36, 0.0  ;;  %vm132_vm11 = vcmp.ge.f32.partialorder %v116_v37, 0.0  ;;  %v146_v46 = vmul.f32 0.2, %v114_v23  ;;  %v147_v47 = vmul.f32 0.2, %v115_v36 }
  0x1a   :  { %v191_v48 = vadd.f32 %v190_v42, %v176_v22  ;;  %v148_v49 = vmul.f32 0.2, %v116_v37  ;;  %v161_v50 = vsel %vm129_vm8, %v113_v13, %v145_v43  ;;  %v31_v51 = vunpack.c.l.bf16 %v20_v39 }
  0x1b   :  { %v162_v52 = vsel %vm130_vm9, %v114_v23, %v146_v46  ;;  %v163_v53 = vsel %vm131_vm10, %v115_v36, %v147_v47  ;;  %v185_v55 = vmul.f32 %v169_v38, %v161_v50  ;;  %v32_v56 = vunpack.c.h.bf16 %v20_v39 }
  0x1c   :  { %192 = vadd.xlane.f32.xlu0 %v191_v48  ;;  %v164_v57 = vsel %vm132_vm11, %v116_v37, %v148_v49  ;;  %v186_v58 = vmul.f32 %v170_v44, %v162_v52  ;;  %v187_v59 = vmul.f32 %v171_v45, %v163_v53  ;;  %v67_v60 = vmul.f32 %v317_v24, %v29_v40 }
  0x1d   :  { %v68_v61 = vmul.f32 %v319_v25, %v30_v41  ;;  %v69_v62 = vmul.f32 %v321_v26, %v31_v51  ;;  %v70_v63 = vmul.f32 %v323_v27, %v32_v56  ;;  %v188_v0 = vmul.f32 %v172_v54, %v164_v57 }
  0x1e   :  { %v204_v1 = vadd.f32 %v186_v58, %v185_v55  ;;  %v105_v2 = vadd.f32 %v325_v28, %v67_v60  ;;  %v217_v3 = vsub.s32 %v306_v14, %v290_v6  ;;  %v219_v19 = vadd.s32 4294967288, %v306_v14 }
  0x1f   :  { %v106_v4 = vadd.f32 %v327_v29, %v68_v61  ;;  %v107_v5 = vadd.f32 %v329_v30, %v69_v62  ;;  %v108_v7 = vadd.f32 %v331_v31, %v70_v63  ;;  %vm224_vm0 = vcmask 130112  }
  0x20   :  { %v205_v24 = vadd.f32 %v204_v1, %v187_v59  ;;  %vm121_vm12 = vcmp.ge.f32.partialorder %v105_v2, 0.0  ;;  %v137_v25 = vmul.f32 0.2, %v105_v2  ;;  %v222_v20 = vsub.s32 %v219_v19, %v290_v6 }
  0x21   :  { %vm122_vm13 = vcmp.ge.f32.partialorder %v106_v4, 0.0  ;;  %vm123_vm14 = vcmp.ge.f32.partialorder %v107_v5, 0.0  ;;  %vm124_vm15 = vcmp.ge.f32.partialorder %v108_v7, 0.0  ;;  %v138_v26 = vmul.f32 0.2, %v106_v4 }
  0x22   :  { %v206_v27 = vadd.f32 %v205_v24, %v188_v0  ;;  %v139_v8 = vmul.f32 0.2, %v107_v5  ;;  %v140_v9 = vmul.f32 0.2, %v108_v7  ;;  %v153_v28 = vsel %vm121_vm12, %v105_v2, %v137_v25 }
  0x23   :  { %v154_v10 = vsel %vm122_vm13, %v106_v4, %v138_v26  ;;  %v177_v11 = vmul.f32 %v169_v38, %v153_v28  ;;  %vm235_vm1 = vcmask 1041409   ;;  %vm238_vm2 = vcmask 123904  }
  0x24   :  { %207 = vadd.xlane.f32.xlu1 %v206_v27  ;;  %v155_v12 = vsel %vm123_vm14, %v107_v5, %v139_v8  ;;  %v156_v29 = vsel %vm124_vm15, %v108_v7, %v140_v9  ;;  %v178_v15 = vmul.f32 %v170_v44, %v154_v10  ;;  %vm248_vm3 = vcmask 1024  }
  0x25   :  { %v179_v30 = vmul.f32 %v171_v45, %v155_v12  ;;  %v180_v16 = vmul.f32 %v172_v54, %v156_v29 }
  0x26   :  { %v194_v31 = vadd.f32 %v178_v15, %v177_v11 }
  0x28   :  { %v195_v17 = vadd.f32 %v194_v31, %v179_v30 }
  0x2a   :  { %v196_v18 = vadd.f32 %v195_v17, %v180_v16 }
  0x2c   :  { %197 = vadd.xlane.f32.xlu0 %v196_v18 }
  0xa5   :  { %v203_v21 = vpop.xlane.xlu1 %202 }
  0xa6   :  { %v229_v32 = vrot.slane %v203_v21, %v217_v3 }
  0xa9   :  { %v193_v34 = vpop.xlane.xlu0 %192 }
  0xaa   :  { %v218_v23 = vrot.slane %v193_v34, %v217_v3 }
  0xb1   :  { %v208_v22 = vpop.xlane.xlu1 %207 }
  0xb2   :  { %v233_v33 = vrot.slane %v208_v22, %v222_v20 }
  0xb4   :  { %v234_v35 = vsel %vm224_vm0, %v233_v33, %v229_v32 }
  0xb9   :  { %v198_v13 = vpop.xlane.xlu0 %197 }
  0xba   :  { %v223_v36 = vrot.slane %v198_v13, %v222_v20 }
  0xbc   :  { %v225_v37 = vsel %vm224_vm0, %v223_v36, %v218_v23 }
  0xbd   :  { %v236_v38 = vsel %vm235_vm1, %v234_v35, %v225_v37 }
  0xbe   :  { %v239_v39 = vsel %vm238_vm2, %v236_v38, 0.0 }
  0xbf   :  { %240 = vadd.xlane.f32.xlu0 %v239_v39 }
 0x14c   :  { %v241_v14 = vpop.xlane.xlu0 %240 }
 0x14d   :  { %v254_v40 = vmul.f32 -1.442695, %v241_v14 }
 0x14f   :  { %255 = vpow2.f32 %v254_v40 }
 0x159   :  { %v256_v6 = vpop.eup %255 }
 0x15a   :  { %v245_v41 = vadd.f32 1.0, %v256_v6 }
 0x15c   :  { %257 = vrcp.f32 %v245_v41 }
 0x166   :  { %v258_v42 = vpop.eup %257 }
 0x167   :  { %249 = vst.msk [vmem:[%s416_s4] sm:$0x3] %vm248_vm3, %v258_v42 }

// kernel: netD_forward.8
= control target key start
LH: loop header
LB: loop body
LE: loop exit
PB: predicated region body
PF: predicated region fallthrough
CT: control target
= control target key end

     0   :  { %s14793_s1 = inlined_call_operand.vmem [shape: bf16[4096,512], index: 1, kind: input, shape index: {}]   ;;  %s14794_s0 = inlined_call_operand.vmem [shape: bf16[32,4096], index: 0, kind: input, shape index: {}]   ;;  %s14795_s2 = inlined_call_operand.vmem [shape: bf16[32,512], index: 2, kind: output, shape index: {0}]   ;;  %s14796_s3 = inlined_call_operand.vmem [shape: f32[1,2,512], index: 3, kind: output, shape index: {1}]  }
   0x1   :  { %v9800_v0 = vld [vmem:[%s14793_s1 + $0x4] ss:$16 sps:$4 sm:$0xff]   ;;  %v9802_v1 = vld [vmem:[%s14793_s1 + $0xc] ss:$16 sps:$4 sm:$0xff]   ;;  %v9804_v2 = vld [vmem:[%s14793_s1] ss:$16 sps:$4 sm:$0xff]  }
   0x2   :  { %6541 = vmatprep.subr.bf16.mxu0 %v9800_v0  ;;  %v9805_v3 = vld [vmem:[%s14793_s1 + $0x8] ss:$16 sps:$4 sm:$0xff]   ;;  %7389 = vmatprep.subr.bf16.mxu1 %v9802_v1  ;;  %v9806_v4 = vld [vmem:[%s14793_s1 + $0x24] ss:$16 sps:$4 sm:$0xff]   ;;  %v9808_v5 = vld [vmem:[%s14793_s1 + $0x2c] ss:$16 sps:$4 sm:$0xff]  }
   0x3   :  { %6542 = vmatpush1.bf16.msra.mxu0 %v9804_v2  ;;  %7390 = vmatpush1.bf16.msra.mxu1 %v9805_v3  ;;  %v9810_v6 = vld [vmem:[%s14793_s1 + $0x20] ss:$16 sps:$4 sm:$0xff]   ;;  %v9811_v7 = vld [vmem:[%s14793_s1 + $0x28] ss:$16 sps:$4 sm:$0xff]   ;;  %v9812_v8 = vld [vmem:[%s14793_s1 + $0x44] ss:$16 sps:$4 sm:$0xff]  }
   0x4   :  { %6543 = vmatprep.subr.bf16.mxu0 %v9806_v4  ;;  %7391 = vmatprep.subr.bf16.mxu1 %v9808_v5  ;;  %v9814_v9 = vld [vmem:[%s14793_s1 + $0x4c] ss:$16 sps:$4 sm:$0xff]   ;;  %v9816_v10 = vld [vmem:[%s14793_s1 + $0x40] ss:$16 sps:$4 sm:$0xff]   ;;  %v9817_v11 = vld [vmem:[%s14793_s1 + $0x48] ss:$16 sps:$4 sm:$0xff]  }
   0x5   :  { %v9818_v12 = vld [vmem:[%s14793_s1 + $0x64] ss:$16 sps:$4 sm:$0xff]   ;;  %v9820_v13 = vld [vmem:[%s14793_s1 + $0x6c] ss:$16 sps:$4 sm:$0xff]   ;;  %v9822_v14 = vld [vmem:[%s14793_s1 + $0x60] ss:$16 sps:$4 sm:$0xff]  }
   0x6   :  { %v9823_v15 = vld [vmem:[%s14793_s1 + $0x68] ss:$16 sps:$4 sm:$0xff]   ;;  %v9824_v16 = vld [vmem:[%s14793_s1 + $0x84] ss:$16 sps:$4 sm:$0xff]   ;;  %v9826_v17 = vld [vmem:[%s14793_s1 + $0x8c] ss:$16 sps:$4 sm:$0xff]  }
   0x7   :  { %6544 = vmatpush1.bf16.msra.mxu0 %v9810_v6  ;;  %7392 = vmatpush1.bf16.msra.mxu1 %v9811_v7  ;;  %v9828_v18 = vld [vmem:[%s14793_s1 + $0x80] ss:$16 sps:$4 sm:$0xff]   ;;  %v9829_v19 = vld [vmem:[%s14793_s1 + $0x88] ss:$16 sps:$4 sm:$0xff]   ;;  %v9830_v20 = vld [vmem:[%s14793_s1 + $0xa4] ss:$16 sps:$4 sm:$0xff]  }
   0x8   :  { %6545 = vmatprep.subr.bf16.mxu0 %v9812_v8  ;;  %7393 = vmatprep.subr.bf16.mxu1 %v9814_v9  ;;  %v9832_v21 = vld [vmem:[%s14793_s1 + $0xac] ss:$16 sps:$4 sm:$0xff]   ;;  %v9834_v22 = vld [vmem:[%s14793_s1 + $0xa0] ss:$16 sps:$4 sm:$0xff]   ;;  %v9835_v23 = vld [vmem:[%s14793_s1 + $0xa8] ss:$16 sps:$4 sm:$0xff]  }
   0x9   :  { %v9836_v24 = vld [vmem:[%s14793_s1 + $0xc4] ss:$16 sps:$4 sm:$0xff]   ;;  %v9838_v25 = vld [vmem:[%s14793_s1 + $0xcc] ss:$16 sps:$4 sm:$0xff]   ;;  %v9840_v26 = vld [vmem:[%s14793_s1 + $0xc0] ss:$16 sps:$4 sm:$0xff]  }
   0xa   :  { %v9841_v27 = vld [vmem:[%s14793_s1 + $0xc8] ss:$16 sps:$4 sm:$0xff]   ;;  %v9842_v28 = vld [vmem:[%s14793_s1 + $0xe4] ss:$16 sps:$4 sm:$0xff]   ;;  %v9844_v29 = vld [vmem:[%s14793_s1 + $0xec] ss:$16 sps:$4 sm:$0xff]  }
   0xb   :  { %6546 = vmatpush1.bf16.msra.mxu0 %v9816_v10  ;;  %7394 = vmatpush1.bf16.msra.mxu1 %v9817_v11  ;;  %v9846_v30 = vld [vmem:[%s14793_s1 + $0xe0] ss:$16 sps:$4 sm:$0xff]   ;;  %v9847_v31 = vld [vmem:[%s14793_s1 + $0xe8] ss:$16 sps:$4 sm:$0xff]   ;;  %v9848_v32 = vld [vmem:[%s14793_s1 + $0x104] ss:$16 sps:$4 sm:$0xff]  }
   0xc   :  { %6547 = vmatprep.subr.bf16.mxu0 %v9818_v12  ;;  %7395 = vmatprep.subr.bf16.mxu1 %v9820_v13  ;;  %v9850_v33 = vld [vmem:[%s14793_s1 + $0x10c] ss:$16 sps:$4 sm:$0xff]   ;;  %v9852_v34 = vld [vmem:[%s14793_s1 + $0x100] ss:$16 sps:$4 sm:$0xff]   ;;  %v9853_v35 = vld [vmem:[%s14793_s1 + $0x108] ss:$16 sps:$4 sm:$0xff]  }
   0xd   :  { %v9854_v36 = vld [vmem:[%s14793_s1 + $0x124] ss:$16 sps:$4 sm:$0xff]   ;;  %v9856_v37 = vld [vmem:[%s14793_s1 + $0x12c] ss:$16 sps:$4 sm:$0xff]   ;;  %v9858_v38 = vld [vmem:[%s14793_s1 + $0x120] ss:$16 sps:$4 sm:$0xff]  }
   0xe   :  { %v9859_v39 = vld [vmem:[%s14793_s1 + $0x128] ss:$16 sps:$4 sm:$0xff]   ;;  %v9860_v40 = vld [vmem:[%s14793_s1 + $0x144] ss:$16 sps:$4 sm:$0xff]   ;;  %v9862_v41 = vld [vmem:[%s14793_s1 + $0x14c] ss:$16 sps:$4 sm:$0xff]  }
   0xf   :  { %6548 = vmatpush1.bf16.msra.mxu0 %v9822_v14  ;;  %7396 = vmatpush1.bf16.msra.mxu1 %v9823_v15  ;;  %v9864_v42 = vld [vmem:[%s14793_s1 + $0x140] ss:$16 sps:$4 sm:$0xff]   ;;  %v9865_v43 = vld [vmem:[%s14793_s1 + $0x148] ss:$16 sps:$4 sm:$0xff]   ;;  %v9866_v44 = vld [vmem:[%s14793_s1 + $0x164] ss:$16 sps:$4 sm:$0xff]  }
  0x10   :  { %6549 = vmatprep.subr.bf16.mxu0 %v9824_v16  ;;  %7397 = vmatprep.subr.bf16.mxu1 %v9826_v17  ;;  %v9868_v45 = vld [vmem:[%s14793_s1 + $0x16c] ss:$16 sps:$4 sm:$0xff]   ;;  %v13_v46 = vld [vmem:[%s14794_s0] sm:$0xff]  ;;  %v9871_v49 = vld [vmem:[%s14793_s1 + $0x168] ss:$16 sps:$4 sm:$0xff]  }
  0x11   :  { %v29_v47 = vld [vmem:[%s14794_s0 + $0x80] sm:$0xff]  ;;  %v9874_v52 = vld [vmem:[%s14793_s1 + $0x18c] ss:$16 sps:$4 sm:$0xff]   ;;  %v9877_v54 = vld [vmem:[%s14793_s1 + $0x188] ss:$16 sps:$4 sm:$0xff]  }
  0x12   :  { %v9870_v48 = vld [vmem:[%s14793_s1 + $0x160] ss:$16 sps:$4 sm:$0xff]   ;;  %v8455_v50 = vcombine.high %v13_v46, %v29_v47  ;;  %v9872_v51 = vld [vmem:[%s14793_s1 + $0x184] ss:$16 sps:$4 sm:$0xff]   ;;  %v9880_v56 = vld [vmem:[%s14793_s1 + $0x1ac] ss:$16 sps:$4 sm:$0xff]   ;;  %v8454_v5 = vcombine.low %v13_v46, %v29_v47 }
  0x13   :  { %6550 = vmatpush1.bf16.msra.mxu0 %v9828_v18  ;;  %7398 = vmatpush1.bf16.msra.mxu1 %v9829_v19  ;;  %v9876_v53 = vld [vmem:[%s14793_s1 + $0x180] ss:$16 sps:$4 sm:$0xff]   ;;  %v9878_v55 = vld [vmem:[%s14793_s1 + $0x1a4] ss:$16 sps:$4 sm:$0xff]   ;;  %v9883_v58 = vld [vmem:[%s14793_s1 + $0x1a8] ss:$16 sps:$4 sm:$0xff]  }
  0x14   :  { %6551 = vmatprep.subr.bf16.mxu0 %v9830_v20  ;;  %7399 = vmatprep.subr.bf16.mxu1 %v9832_v21  ;;  %v9882_v57 = vld [vmem:[%s14793_s1 + $0x1a0] ss:$16 sps:$4 sm:$0xff]   ;;  %v9884_v59 = vld [vmem:[%s14793_s1 + $0x1c4] ss:$16 sps:$4 sm:$0xff]   ;;  %v9886_v60 = vld [vmem:[%s14793_s1 + $0x1cc] ss:$16 sps:$4 sm:$0xff]  }
  0x15   :  { %6573 = vmatprep.mubr.bf16.mxu0 %v8455_v50  ;;  %7421 = vmatprep.mubr.bf16.mxu1 %v8455_v50  ;;  %v9888_v61 = vld [vmem:[%s14793_s1 + $0x1c0] ss:$16 sps:$4 sm:$0xff]   ;;  %v9889_v62 = vld [vmem:[%s14793_s1 + $0x1c8] ss:$16 sps:$4 sm:$0xff]   ;;  %v9890_v63 = vld [vmem:[%s14793_s1 + $0x1e4] ss:$16 sps:$4 sm:$0xff]  }
  0x16   :  { %v9892_v0 = vld [vmem:[%s14793_s1 + $0x1ec] ss:$16 sps:$4 sm:$0xff]   ;;  %v9894_v1 = vld [vmem:[%s14793_s1 + $0x1e0] ss:$16 sps:$4 sm:$0xff]   ;;  %v9895_v2 = vld [vmem:[%s14793_s1 + $0x1e8] ss:$16 sps:$4 sm:$0xff]  }
  0x17   :  { %6552 = vmatpush1.bf16.msra.mxu0 %v9834_v22  ;;  %7400 = vmatpush1.bf16.msra.mxu1 %v9835_v23  ;;  %v9898_v3 = vld [vmem:[%s14793_s1 + $0x204] ss:$16 sps:$4 sm:$0xff]   ;;  %v9901_v4 = vld [vmem:[%s14793_s1 + $0x20c] ss:$16 sps:$4 sm:$0xff]   ;;  %v9896_v6 = vld [vmem:[%s14793_s1 + $0x200] ss:$16 sps:$4 sm:$0xff]  }
  0x18   :  { %6553 = vmatprep.subr.bf16.mxu0 %v9836_v24  ;;  %7401 = vmatprep.subr.bf16.mxu1 %v9838_v25  ;;  %v9899_v7 = vld [vmem:[%s14793_s1 + $0x208] ss:$16 sps:$4 sm:$0xff]   ;;  %v9904_v8 = vld [vmem:[%s14793_s1 + $0x224] ss:$16 sps:$4 sm:$0xff]   ;;  %v9907_v9 = vld [vmem:[%s14793_s1 + $0x22c] ss:$16 sps:$4 sm:$0xff]  }
  0x19   :  { %v9902_v10 = vld [vmem:[%s14793_s1 + $0x220] ss:$16 sps:$4 sm:$0xff]   ;;  %v9905_v11 = vld [vmem:[%s14793_s1 + $0x228] ss:$16 sps:$4 sm:$0xff]   ;;  %v9910_v12 = vld [vmem:[%s14793_s1 + $0x244] ss:$16 sps:$4 sm:$0xff]  }
  0x1a   :  { %v9913_v13 = vld [vmem:[%s14793_s1 + $0x24c] ss:$16 sps:$4 sm:$0xff]   ;;  %v9908_v14 = vld [vmem:[%s14793_s1 + $0x240] ss:$16 sps:$4 sm:$0xff]   ;;  %v9911_v15 = vld [vmem:[%s14793_s1 + $0x248] ss:$16 sps:$4 sm:$0xff]  }
  0x1b   :  { %6554 = vmatpush1.bf16.msra.mxu0 %v9840_v26  ;;  %7402 = vmatpush1.bf16.msra.mxu1 %v9841_v27  ;;  %v9916_v16 = vld [vmem:[%s14793_s1 + $0x264] ss:$16 sps:$4 sm:$0xff]   ;;  %v9919_v17 = vld [vmem:[%s14793_s1 + $0x26c] ss:$16 sps:$4 sm:$0xff]   ;;  %v9914_v18 = vld [vmem:[%s14793_s1 + $0x260] ss:$16 sps:$4 sm:$0xff]  }
  0x1c   :  { %6555 = vmatprep.subr.bf16.mxu0 %v9842_v28  ;;  %7403 = vmatprep.subr.bf16.mxu1 %v9844_v29  ;;  %v9917_v19 = vld [vmem:[%s14793_s1 + $0x268] ss:$16 sps:$4 sm:$0xff]   ;;  %v9922_v20 = vld [vmem:[%s14793_s1 + $0x284] ss:$16 sps:$4 sm:$0xff]   ;;  %v9925_v21 = vld [vmem:[%s14793_s1 + $0x28c] ss:$16 sps:$4 sm:$0xff]  }
  0x1d   :  { %v9920_v22 = vld [vmem:[%s14793_s1 + $0x280] ss:$16 sps:$4 sm:$0xff]   ;;  %v9923_v23 = vld [vmem:[%s14793_s1 + $0x288] ss:$16 sps:$4 sm:$0xff]   ;;  %v9928_v24 = vld [vmem:[%s14793_s1 + $0x2a4] ss:$16 sps:$4 sm:$0xff]  }
  0x1e   :  { %v9931_v25 = vld [vmem:[%s14793_s1 + $0x2ac] ss:$16 sps:$4 sm:$0xff]   ;;  %v45_v26 = vld [vmem:[%s14794_s0 + $0x100] sm:$0xff]  ;;  %v9947_v46 = vld [vmem:[%s14793_s1 + $0x308] ss:$16 sps:$4 sm:$0xff]  }
  0x1f   :  { %6556 = vmatpush1.bf16.msra.mxu0 %v9846_v30  ;;  %7404 = vmatpush1.bf16.msra.mxu1 %v9847_v31  ;;  %v61_v27 = vld [vmem:[%s14794_s0 + $0x180] sm:$0xff]  ;;  %v9929_v30 = vld [vmem:[%s14793_s1 + $0x2a8] ss:$16 sps:$4 sm:$0xff]  }
  0x20   :  { %6557 = vmatprep.subr.bf16.mxu0 %v9848_v32  ;;  %7405 = vmatprep.subr.bf16.mxu1 %v9850_v33  ;;  %v8487_v28 = vcombine.high %v45_v26, %v61_v27  ;;  %v9926_v29 = vld [vmem:[%s14793_s1 + $0x2a0] ss:$16 sps:$4 sm:$0xff]   ;;  %v8486_v31 = vcombine.low %v45_v26, %v61_v27  ;;  %v9934_v32 = vld [vmem:[%s14793_s1 + $0x2c4] ss:$16 sps:$4 sm:$0xff]   ;;  %v9937_v33 = vld [vmem:[%s14793_s1 + $0x2cc] ss:$16 sps:$4 sm:$0xff]  }
  0x21   :  { %v9952_v47 = vld [vmem:[%s14793_s1 + $0x324] ss:$16 sps:$4 sm:$0xff]   ;;  %v9953_v50 = vld [vmem:[%s14793_s1 + $0x328] ss:$16 sps:$4 sm:$0xff]  }
  0x22   :  { %v11811_v27 = vld [vmem:[%s14794_s0 + $0x90] sm:$0xff] }
  0x23   :  { %6558 = vmatpush1.bf16.msra.mxu0 %v9852_v34  ;;  %7406 = vmatpush1.bf16.msra.mxu1 %v9853_v35  ;;  %v11642_v34 = vld [vmem:[%s14794_s0 + $0x8] sm:$0xff] }
  0x24   :  { %6559 = vmatprep.subr.bf16.mxu0 %v9854_v36  ;;  %7407 = vmatprep.subr.bf16.mxu1 %v9856_v37  ;;  %v11647_v35 = vld [vmem:[%s14794_s0 + $0x88] sm:$0xff]  ;;  %v9932_v36 = vld [vmem:[%s14793_s1 + $0x2c0] ss:$16 sps:$4 sm:$0xff]  }
  0x25   :  { %v9935_v37 = vld [vmem:[%s14793_s1 + $0x2c8] ss:$16 sps:$4 sm:$0xff]  }
  0x27   :  { %6560 = vmatpush1.bf16.msra.mxu0 %v9858_v38  ;;  %7408 = vmatpush1.bf16.msra.mxu1 %v9859_v39  ;;  %v8457_v38 = vcombine.high %v11642_v34, %v11647_v35  ;;  %v9940_v39 = vld [vmem:[%s14793_s1 + $0x2e4] ss:$16 sps:$4 sm:$0xff]  }
  0x28   :  { %6561 = vmatprep.subr.bf16.mxu0 %v9860_v40  ;;  %7409 = vmatprep.subr.bf16.mxu1 %v9862_v41  ;;  %v9943_v40 = vld [vmem:[%s14793_s1 + $0x2ec] ss:$16 sps:$4 sm:$0xff]   ;;  %v9938_v41 = vld [vmem:[%s14793_s1 + $0x2e0] ss:$16 sps:$4 sm:$0xff]  }
  0x2b   :  { %6562 = vmatpush1.bf16.msra.mxu0 %v9864_v42  ;;  %7410 = vmatpush1.bf16.msra.mxu1 %v9865_v43  ;;  %v9941_v42 = vld [vmem:[%s14793_s1 + $0x2e8] ss:$16 sps:$4 sm:$0xff]   ;;  %v9946_v43 = vld [vmem:[%s14793_s1 + $0x304] ss:$16 sps:$4 sm:$0xff]  }
  0x2c   :  { %6563 = vmatprep.subr.bf16.mxu0 %v9866_v44  ;;  %7411 = vmatprep.subr.bf16.mxu1 %v9868_v45  ;;  %v9949_v44 = vld [vmem:[%s14793_s1 + $0x30c] ss:$16 sps:$4 sm:$0xff]   ;;  %v9944_v45 = vld [vmem:[%s14793_s1 + $0x300] ss:$16 sps:$4 sm:$0xff]  }
  0x2f   :  { %6564 = vmatpush1.bf16.msra.mxu0 %v9870_v48  ;;  %7412 = vmatpush1.bf16.msra.mxu1 %v9871_v49  ;;  %v9955_v48 = vld [vmem:[%s14793_s1 + $0x32c] ss:$16 sps:$4 sm:$0xff]   ;;  %v9950_v49 = vld [vmem:[%s14793_s1 + $0x320] ss:$16 sps:$4 sm:$0xff]  }
  0x30   :  { %6565 = vmatprep.subr.bf16.mxu0 %v9872_v51  ;;  %7413 = vmatprep.subr.bf16.mxu1 %v9874_v52  ;;  %v9958_v51 = vld [vmem:[%s14793_s1 + $0x344] ss:$16 sps:$4 sm:$0xff]   ;;  %v9961_v52 = vld [vmem:[%s14793_s1 + $0x34c] ss:$16 sps:$4 sm:$0xff]  }
  0x33   :  { %6566 = vmatpush1.bf16.msra.mxu0 %v9876_v53  ;;  %7414 = vmatpush1.bf16.msra.mxu1 %v9877_v54  ;;  %v9956_v53 = vld [vmem:[%s14793_s1 + $0x340] ss:$16 sps:$4 sm:$0xff]   ;;  %v9959_v54 = vld [vmem:[%s14793_s1 + $0x348] ss:$16 sps:$4 sm:$0xff]  }
  0x34   :  { %6567 = vmatprep.subr.bf16.mxu0 %v9878_v55  ;;  %7415 = vmatprep.subr.bf16.mxu1 %v9880_v56  ;;  %v9964_v55 = vld [vmem:[%s14793_s1 + $0x364] ss:$16 sps:$4 sm:$0xff]   ;;  %v9967_v56 = vld [vmem:[%s14793_s1 + $0x36c] ss:$16 sps:$4 sm:$0xff]  }
  0x37   :  { %6568 = vmatpush1.bf16.msra.mxu0 %v9882_v57  ;;  %7416 = vmatpush1.bf16.msra.mxu1 %v9883_v58  ;;  %v9962_v57 = vld [vmem:[%s14793_s1 + $0x360] ss:$16 sps:$4 sm:$0xff]   ;;  %v9965_v58 = vld [vmem:[%s14793_s1 + $0x368] ss:$16 sps:$4 sm:$0xff]  }
  0x38   :  { %6569 = vmatprep.subr.bf16.mxu0 %v9884_v59  ;;  %7417 = vmatprep.subr.bf16.mxu1 %v9886_v60  ;;  %v9970_v59 = vld [vmem:[%s14793_s1 + $0x384] ss:$16 sps:$4 sm:$0xff]   ;;  %v9973_v60 = vld [vmem:[%s14793_s1 + $0x38c] ss:$16 sps:$4 sm:$0xff]  }
  0x3b   :  { %6570 = vmatpush1.bf16.msra.mxu0 %v9888_v61  ;;  %7418 = vmatpush1.bf16.msra.mxu1 %v9889_v62  ;;  %v9968_v61 = vld [vmem:[%s14793_s1 + $0x380] ss:$16 sps:$4 sm:$0xff]   ;;  %v9971_v62 = vld [vmem:[%s14793_s1 + $0x388] ss:$16 sps:$4 sm:$0xff]  }
  0x3c   :  { %6571 = vmatprep.subr.bf16.mxu0 %v9890_v63  ;;  %7419 = vmatprep.subr.bf16.mxu1 %v9892_v0  ;;  %v9976_v63 = vld [vmem:[%s14793_s1 + $0x3a4] ss:$16 sps:$4 sm:$0xff]   ;;  %v9979_v0 = vld [vmem:[%s14793_s1 + $0x3ac] ss:$16 sps:$4 sm:$0xff]  }
  0x3f   :  { %6572 = vmatpush1.bf16.msra.mxu0 %v9894_v1  ;;  %7420 = vmatpush1.bf16.msra.mxu1 %v9895_v2  ;;  %v9974_v1 = vld [vmem:[%s14793_s1 + $0x3a0] ss:$16 sps:$4 sm:$0xff]   ;;  %v9977_v2 = vld [vmem:[%s14793_s1 + $0x3a8] ss:$16 sps:$4 sm:$0xff]  }
  0x40   :  { %6594 = vmatprep.subr.bf16.mxu0 %v9898_v3  ;;  %7442 = vmatprep.subr.bf16.mxu1 %v9901_v4  ;;  %v9982_v3 = vld [vmem:[%s14793_s1 + $0x3c4] ss:$16 sps:$4 sm:$0xff]   ;;  %v9985_v4 = vld [vmem:[%s14793_s1 + $0x3cc] ss:$16 sps:$4 sm:$0xff]  }
  0x42   :  { %6574 = vmatmul.mubr.bf16.vlgmr.msra.gmra.mrb[0].mxu0 %v8454_v5  ;;  %7422 = vmatmul.mubr.bf16.vlgmr.msra.gmra.mrb[0].mxu1 %v8454_v5  ;;  %v9980_v5 = vld [vmem:[%s14793_s1 + $0x3c0] ss:$16 sps:$4 sm:$0xff]  }
  0x43   :  { %6595 = vmatpush1.bf16.msra.mxu0 %v9896_v6  ;;  %7443 = vmatpush1.bf16.msra.mxu1 %v9899_v7  ;;  %v9983_v6 = vld [vmem:[%s14793_s1 + $0x3c8] ss:$16 sps:$4 sm:$0xff]   ;;  %v9988_v7 = vld [vmem:[%s14793_s1 + $0x3e4] ss:$16 sps:$4 sm:$0xff]  }
  0x44   :  { %6596 = vmatprep.subr.bf16.mxu0 %v9904_v8  ;;  %7444 = vmatprep.subr.bf16.mxu1 %v9907_v9  ;;  %v9991_v8 = vld [vmem:[%s14793_s1 + $0x3ec] ss:$16 sps:$4 sm:$0xff]   ;;  %v9986_v9 = vld [vmem:[%s14793_s1 + $0x3e0] ss:$16 sps:$4 sm:$0xff]  }
  0x45   :  { %6583 = vmatprep.mubr.bf16.mxu0 %v8487_v28  ;;  %7431 = vmatprep.mubr.bf16.mxu1 %v8487_v28  ;;  %v10004_v28 = vld [vmem:[%s14793_s1 + $0x440] ss:$16 sps:$4 sm:$0xff]  }
  0x47   :  { %6597 = vmatpush1.bf16.msra.mxu0 %v9902_v10  ;;  %7445 = vmatpush1.bf16.msra.mxu1 %v9905_v11  ;;  %v9989_v10 = vld [vmem:[%s14793_s1 + $0x3e8] ss:$16 sps:$4 sm:$0xff]   ;;  %v9994_v11 = vld [vmem:[%s14793_s1 + $0x404] ss:$16 sps:$4 sm:$0xff]  }
  0x48   :  { %6598 = vmatprep.subr.bf16.mxu0 %v9910_v12  ;;  %7446 = vmatprep.subr.bf16.mxu1 %v9913_v13  ;;  %v9997_v12 = vld [vmem:[%s14793_s1 + $0x40c] ss:$16 sps:$4 sm:$0xff]   ;;  %v9992_v13 = vld [vmem:[%s14793_s1 + $0x400] ss:$16 sps:$4 sm:$0xff]  }
  0x4a   :  { %6584 = vmatmul.mubr.bf16.gmra.mrb[4].mxu0 %v8486_v31  ;;  %7432 = vmatmul.mubr.bf16.gmra.mrb[4].mxu1 %v8486_v31  ;;  %v10015_v31 = vld [vmem:[%s14793_s1 + $0x46c] ss:$16 sps:$4 sm:$0xff]  }
  0x4b   :  { %6599 = vmatpush1.bf16.msra.mxu0 %v9908_v14  ;;  %7447 = vmatpush1.bf16.msra.mxu1 %v9911_v15  ;;  %v9995_v14 = vld [vmem:[%s14793_s1 + $0x408] ss:$16 sps:$4 sm:$0xff]   ;;  %v8456_v15 = vcombine.low %v11642_v34, %v11647_v35  ;;  %v10018_v35 = vld [vmem:[%s14793_s1 + $0x484] ss:$16 sps:$4 sm:$0xff]  }
  0x4c   :  { %6600 = vmatprep.subr.bf16.mxu0 %v9916_v16  ;;  %7448 = vmatprep.subr.bf16.mxu1 %v9919_v17  ;;  %v46_v16 = vld [vmem:[%s14794_s0 + $0x108] sm:$0xff] }
  0x4d   :  { %6626 = vmatprep.mubr.bf16.mxu0 %v8457_v38  ;;  %7474 = vmatprep.mubr.bf16.mxu1 %v8457_v38  ;;  %v62_v17 = vld [vmem:[%s14794_s0 + $0x188] sm:$0xff] }
  0x4e   :  { %v8488_v26 = vcombine.low %v46_v16, %v62_v17  ;;  %v10013_v34 = vld [vmem:[%s14793_s1 + $0x468] ss:$16 sps:$4 sm:$0xff]  }
  0x4f   :  { %6601 = vmatpush1.bf16.msra.mxu0 %v9914_v18  ;;  %7449 = vmatpush1.bf16.msra.mxu1 %v9917_v19  ;;  %v10000_v18 = vld [vmem:[%s14793_s1 + $0x424] ss:$16 sps:$4 sm:$0xff]   ;;  %v10003_v19 = vld [vmem:[%s14793_s1 + $0x42c] ss:$16 sps:$4 sm:$0xff]   ;;  %v10019_v38 = vld [vmem:[%s14793_s1 + $0x488] ss:$16 sps:$4 sm:$0xff]  }
  0x50   :  { %6602 = vmatprep.subr.bf16.mxu0 %v9922_v20  ;;  %7450 = vmatprep.subr.bf16.mxu1 %v9925_v21  ;;  %v8489_v20 = vcombine.high %v46_v16, %v62_v17  ;;  %v9998_v21 = vld [vmem:[%s14793_s1 + $0x420] ss:$16 sps:$4 sm:$0xff]   ;;  %v10087_v16 = vld [vmem:[%s14793_s1 + $0x5ec] ss:$16 sps:$4 sm:$0xff]  }
  0x51   :  { %v10082_v17 = vld [vmem:[%s14793_s1 + $0x5e0] ss:$16 sps:$4 sm:$0xff]  }
  0x53   :  { %6603 = vmatpush1.bf16.msra.mxu0 %v9920_v22  ;;  %7451 = vmatpush1.bf16.msra.mxu1 %v9923_v23  ;;  %v10001_v22 = vld [vmem:[%s14793_s1 + $0x428] ss:$16 sps:$4 sm:$0xff]   ;;  %v10006_v23 = vld [vmem:[%s14793_s1 + $0x444] ss:$16 sps:$4 sm:$0xff]  }
  0x54   :  { %6604 = vmatprep.subr.bf16.mxu0 %v9928_v24  ;;  %7452 = vmatprep.subr.bf16.mxu1 %v9931_v25  ;;  %v10009_v24 = vld [vmem:[%s14793_s1 + $0x44c] ss:$16 sps:$4 sm:$0xff]   ;;  %v11806_v25 = vld [vmem:[%s14794_s0 + $0x10] sm:$0xff] }
  0x57   :  { %6605 = vmatpush1.bf16.msra.mxu0 %v9926_v29  ;;  %7453 = vmatpush1.bf16.msra.mxu1 %v9929_v30  ;;  %v10007_v29 = vld [vmem:[%s14793_s1 + $0x448] ss:$16 sps:$4 sm:$0xff]   ;;  %v10012_v30 = vld [vmem:[%s14793_s1 + $0x464] ss:$16 sps:$4 sm:$0xff]  }
  0x58   :  { %6606 = vmatprep.subr.bf16.mxu0 %v9934_v32  ;;  %7454 = vmatprep.subr.bf16.mxu1 %v9937_v33  ;;  %v8459_v32 = vcombine.high %v11806_v25, %v11811_v27  ;;  %v10010_v33 = vld [vmem:[%s14793_s1 + $0x460] ss:$16 sps:$4 sm:$0xff]  }
  0x5b   :  { %6607 = vmatpush1.bf16.msra.mxu0 %v9932_v36  ;;  %7455 = vmatpush1.bf16.msra.mxu1 %v9935_v37  ;;  %v10021_v36 = vld [vmem:[%s14793_s1 + $0x48c] ss:$16 sps:$4 sm:$0xff]   ;;  %v10016_v37 = vld [vmem:[%s14793_s1 + $0x480] ss:$16 sps:$4 sm:$0xff]  }
  0x5c   :  { %6608 = vmatprep.subr.bf16.mxu0 %v9940_v39  ;;  %7456 = vmatprep.subr.bf16.mxu1 %v9943_v40  ;;  %v10024_v39 = vld [vmem:[%s14793_s1 + $0x4a4] ss:$16 sps:$4 sm:$0xff]   ;;  %v10027_v40 = vld [vmem:[%s14793_s1 + $0x4ac] ss:$16 sps:$4 sm:$0xff]  }
  0x5f   :  { %6609 = vmatpush1.bf16.msra.mxu0 %v9938_v41  ;;  %7457 = vmatpush1.bf16.msra.mxu1 %v9941_v42  ;;  %v10022_v41 = vld [vmem:[%s14793_s1 + $0x4a0] ss:$16 sps:$4 sm:$0xff]   ;;  %v10025_v42 = vld [vmem:[%s14793_s1 + $0x4a8] ss:$16 sps:$4 sm:$0xff]  }
  0x60   :  { %6610 = vmatprep.subr.bf16.mxu0 %v9946_v43  ;;  %7458 = vmatprep.subr.bf16.mxu1 %v9949_v44  ;;  %v10030_v43 = vld [vmem:[%s14793_s1 + $0x4c4] ss:$16 sps:$4 sm:$0xff]   ;;  %v10033_v44 = vld [vmem:[%s14793_s1 + $0x4cc] ss:$16 sps:$4 sm:$0xff]  }
  0x63   :  { %6611 = vmatpush1.bf16.msra.mxu0 %v9944_v45  ;;  %7459 = vmatpush1.bf16.msra.mxu1 %v9947_v46  ;;  %v10028_v45 = vld [vmem:[%s14793_s1 + $0x4c0] ss:$16 sps:$4 sm:$0xff]   ;;  %v10031_v46 = vld [vmem:[%s14793_s1 + $0x4c8] ss:$16 sps:$4 sm:$0xff]  }
  0x64   :  { %6612 = vmatprep.subr.bf16.mxu0 %v9952_v47  ;;  %7460 = vmatprep.subr.bf16.mxu1 %v9955_v48  ;;  %v10036_v47 = vld [vmem:[%s14793_s1 + $0x4e4] ss:$16 sps:$4 sm:$0xff]   ;;  %v10039_v48 = vld [vmem:[%s14793_s1 + $0x4ec] ss:$16 sps:$4 sm:$0xff]  }
  0x67   :  { %6613 = vmatpush1.bf16.msra.mxu0 %v9950_v49  ;;  %7461 = vmatpush1.bf16.msra.mxu1 %v9953_v50  ;;  %v10034_v49 = vld [vmem:[%s14793_s1 + $0x4e0] ss:$16 sps:$4 sm:$0xff]   ;;  %v10037_v50 = vld [vmem:[%s14793_s1 + $0x4e8] ss:$16 sps:$4 sm:$0xff]  }
  0x68   :  { %6614 = vmatprep.subr.bf16.mxu0 %v9958_v51  ;;  %7462 = vmatprep.subr.bf16.mxu1 %v9961_v52  ;;  %v10042_v51 = vld [vmem:[%s14793_s1 + $0x504] ss:$16 sps:$4 sm:$0xff]   ;;  %v10045_v52 = vld [vmem:[%s14793_s1 + $0x50c] ss:$16 sps:$4 sm:$0xff]  }
  0x6b   :  { %6615 = vmatpush1.bf16.msra.mxu0 %v9956_v53  ;;  %7463 = vmatpush1.bf16.msra.mxu1 %v9959_v54  ;;  %v10040_v53 = vld [vmem:[%s14793_s1 + $0x500] ss:$16 sps:$4 sm:$0xff]   ;;  %v10043_v54 = vld [vmem:[%s14793_s1 + $0x508] ss:$16 sps:$4 sm:$0xff]  }
  0x6c   :  { %6616 = vmatprep.subr.bf16.mxu0 %v9964_v55  ;;  %7464 = vmatprep.subr.bf16.mxu1 %v9967_v56  ;;  %v10048_v55 = vld [vmem:[%s14793_s1 + $0x524] ss:$16 sps:$4 sm:$0xff]   ;;  %v10051_v56 = vld [vmem:[%s14793_s1 + $0x52c] ss:$16 sps:$4 sm:$0xff]  }
  0x6f   :  { %6617 = vmatpush1.bf16.msra.mxu0 %v9962_v57  ;;  %7465 = vmatpush1.bf16.msra.mxu1 %v9965_v58  ;;  %v10046_v57 = vld [vmem:[%s14793_s1 + $0x520] ss:$16 sps:$4 sm:$0xff]   ;;  %v10049_v58 = vld [vmem:[%s14793_s1 + $0x528] ss:$16 sps:$4 sm:$0xff]  }
  0x70   :  { %6618 = vmatprep.subr.bf16.mxu0 %v9970_v59  ;;  %7466 = vmatprep.subr.bf16.mxu1 %v9973_v60  ;;  %v10054_v59 = vld [vmem:[%s14793_s1 + $0x544] ss:$16 sps:$4 sm:$0xff]   ;;  %v10057_v60 = vld [vmem:[%s14793_s1 + $0x54c] ss:$16 sps:$4 sm:$0xff]  }
  0x73   :  { %6619 = vmatpush1.bf16.msra.mxu0 %v9968_v61  ;;  %7467 = vmatpush1.bf16.msra.mxu1 %v9971_v62  ;;  %v10052_v61 = vld [vmem:[%s14793_s1 + $0x540] ss:$16 sps:$4 sm:$0xff]   ;;  %v10055_v62 = vld [vmem:[%s14793_s1 + $0x548] ss:$16 sps:$4 sm:$0xff]  }
  0x74   :  { %6620 = vmatprep.subr.bf16.mxu0 %v9976_v63  ;;  %7468 = vmatprep.subr.bf16.mxu1 %v9979_v0  ;;  %v10060_v63 = vld [vmem:[%s14793_s1 + $0x564] ss:$16 sps:$4 sm:$0xff]   ;;  %v10063_v0 = vld [vmem:[%s14793_s1 + $0x56c] ss:$16 sps:$4 sm:$0xff]  }
  0x77   :  { %6621 = vmatpush1.bf16.msra.mxu0 %v9974_v1  ;;  %7469 = vmatpush1.bf16.msra.mxu1 %v9977_v2  ;;  %v10058_v1 = vld [vmem:[%s14793_s1 + $0x560] ss:$16 sps:$4 sm:$0xff]   ;;  %v10061_v2 = vld [vmem:[%s14793_s1 + $0x568] ss:$16 sps:$4 sm:$0xff]  }
  0x78   :  { %6622 = vmatprep.subr.bf16.mxu0 %v9982_v3  ;;  %7470 = vmatprep.subr.bf16.mxu1 %v9985_v4  ;;  %v10066_v3 = vld [vmem:[%s14793_s1 + $0x584] ss:$16 sps:$4 sm:$0xff]   ;;  %v10069_v4 = vld [vmem:[%s14793_s1 + $0x58c] ss:$16 sps:$4 sm:$0xff]  }
  0x7b   :  { %6623 = vmatpush1.bf16.msra.mxu0 %v9980_v5  ;;  %7471 = vmatpush1.bf16.msra.mxu1 %v9983_v6  ;;  %v10064_v5 = vld [vmem:[%s14793_s1 + $0x580] ss:$16 sps:$4 sm:$0xff]   ;;  %v10067_v6 = vld [vmem:[%s14793_s1 + $0x588] ss:$16 sps:$4 sm:$0xff]  }
  0x7c   :  { %6624 = vmatprep.subr.bf16.mxu0 %v9988_v7  ;;  %7472 = vmatprep.subr.bf16.mxu1 %v9991_v8  ;;  %v10072_v7 = vld [vmem:[%s14793_s1 + $0x5a4] ss:$16 sps:$4 sm:$0xff]   ;;  %v10075_v8 = vld [vmem:[%s14793_s1 + $0x5ac] ss:$16 sps:$4 sm:$0xff]  }
  0x7f   :  { %6625 = vmatpush1.bf16.msra.mxu0 %v9986_v9  ;;  %7473 = vmatpush1.bf16.msra.mxu1 %v9989_v10  ;;  %v10070_v9 = vld [vmem:[%s14793_s1 + $0x5a0] ss:$16 sps:$4 sm:$0xff]   ;;  %v10073_v10 = vld [vmem:[%s14793_s1 + $0x5a8] ss:$16 sps:$4 sm:$0xff]  }
  0x80   :  { %6647 = vmatprep.subr.bf16.mxu0 %v9994_v11  ;;  %7495 = vmatprep.subr.bf16.mxu1 %v9997_v12  ;;  %v10078_v11 = vld [vmem:[%s14793_s1 + $0x5c4] ss:$16 sps:$4 sm:$0xff]   ;;  %v10081_v12 = vld [vmem:[%s14793_s1 + $0x5cc] ss:$16 sps:$4 sm:$0xff]  }
  0x82   :  { %6627 = vmatmul.mubr.bf16.vlgmr.msra.gmra.mrb[0].mxu0 %v8456_v15  ;;  %7475 = vmatmul.mubr.bf16.vlgmr.msra.gmra.mrb[0].mxu1 %v8456_v15  ;;  %v10084_v15 = vld [vmem:[%s14793_s1 + $0x5e4] ss:$16 sps:$4 sm:$0xff]  }
  0x83   :  { %6648 = vmatpush1.bf16.msra.mxu0 %v9992_v13  ;;  %7496 = vmatpush1.bf16.msra.mxu1 %v9995_v14  ;;  %v10076_v13 = vld [vmem:[%s14793_s1 + $0x5c0] ss:$16 sps:$4 sm:$0xff]   ;;  %v10079_v14 = vld [vmem:[%s14793_s1 + $0x5c8] ss:$16 sps:$4 sm:$0xff]  }
  0x84   :  { %6649 = vmatprep.subr.bf16.mxu0 %v10000_v18  ;;  %7497 = vmatprep.subr.bf16.mxu1 %v10003_v19  ;;  %v10085_v18 = vld [vmem:[%s14793_s1 + $0x5e8] ss:$16 sps:$4 sm:$0xff]   ;;  %v10090_v19 = vld [vmem:[%s14793_s1 + $0x604] ss:$16 sps:$4 sm:$0xff]  }
  0x85   :  { %6636 = vmatprep.mubr.bf16.mxu0 %v8489_v20  ;;  %7484 = vmatprep.mubr.bf16.mxu1 %v8489_v20  ;;  %v10093_v20 = vld [vmem:[%s14793_s1 + $0x60c] ss:$16 sps:$4 sm:$0xff]  }
  0x87   :  { %6650 = vmatpush1.bf16.msra.mxu0 %v9998_v21  ;;  %7498 = vmatpush1.bf16.msra.mxu1 %v10001_v22  ;;  %v47_v21 = vld [vmem:[%s14794_s0 + $0x110] sm:$0xff]  ;;  %v8458_v22 = vcombine.low %v11806_v25, %v11811_v27  ;;  %v10099_v27 = vld [vmem:[%s14793_s1 + $0x62c] ss:$16 sps:$4 sm:$0xff]  }
  0x88   :  { %6651 = vmatprep.subr.bf16.mxu0 %v10006_v23  ;;  %7499 = vmatprep.subr.bf16.mxu1 %v10009_v24  ;;  %v63_v23 = vld [vmem:[%s14794_s0 + $0x190] sm:$0xff] }
  0x89   :  { %v10088_v24 = vld [vmem:[%s14793_s1 + $0x600] ss:$16 sps:$4 sm:$0xff]   ;;  %v10096_v25 = vld [vmem:[%s14793_s1 + $0x624] ss:$16 sps:$4 sm:$0xff]  }
  0x8a   :  { %6637 = vmatmul.mubr.bf16.gmra.mrb[4].mxu0 %v8488_v26  ;;  %7485 = vmatmul.mubr.bf16.gmra.mrb[4].mxu1 %v8488_v26  ;;  %v10091_v26 = vld [vmem:[%s14793_s1 + $0x608] ss:$16 sps:$4 sm:$0xff]  }
  0x8b   :  { %6652 = vmatpush1.bf16.msra.mxu0 %v10004_v28  ;;  %7500 = vmatpush1.bf16.msra.mxu1 %v10007_v29  ;;  %v8491_v28 = vcombine.high %v47_v21, %v63_v23  ;;  %v10094_v29 = vld [vmem:[%s14793_s1 + $0x620] ss:$16 sps:$4 sm:$0xff]  }
  0x8c   :  { %6653 = vmatprep.subr.bf16.mxu0 %v10012_v30  ;;  %7501 = vmatprep.subr.bf16.mxu1 %v10015_v31  ;;  %v10097_v30 = vld [vmem:[%s14793_s1 + $0x628] ss:$16 sps:$4 sm:$0xff]   ;;  %v10102_v31 = vld [vmem:[%s14793_s1 + $0x644] ss:$16 sps:$4 sm:$0xff]  }
  0x8d   :  { %6679 = vmatprep.mubr.bf16.mxu0 %v8459_v32  ;;  %7527 = vmatprep.mubr.bf16.mxu1 %v8459_v32  ;;  %v10105_v32 = vld [vmem:[%s14793_s1 + $0x64c] ss:$16 sps:$4 sm:$0xff]  }
  0x8f   :  { %6654 = vmatpush1.bf16.msra.mxu0 %v10010_v33  ;;  %7502 = vmatpush1.bf16.msra.mxu1 %v10013_v34  ;;  %v12018_v33 = vld [vmem:[%s14794_s0 + $0x18] sm:$0xff]  ;;  %v8490_v34 = vcombine.low %v47_v21, %v63_v23  ;;  %v10172_v21 = vld [vmem:[%s14793_s1 + $0x7c0] ss:$16 sps:$4 sm:$0xff]   ;;  %v10180_v23 = vld [vmem:[%s14793_s1 + $0x7e4] ss:$16 sps:$4 sm:$0xff]  }
  0x90   :  { %6655 = vmatprep.subr.bf16.mxu0 %v10018_v35  ;;  %7503 = vmatprep.subr.bf16.mxu1 %v10021_v36  ;;  %v12023_v35 = vld [vmem:[%s14794_s0 + $0x98] sm:$0xff]  ;;  %v10100_v36 = vld [vmem:[%s14793_s1 + $0x640] ss:$16 sps:$4 sm:$0xff]  }
  0x93   :  { %6656 = vmatpush1.bf16.msra.mxu0 %v10016_v37  ;;  %7504 = vmatpush1.bf16.msra.mxu1 %v10019_v38  ;;  %v10103_v37 = vld [vmem:[%s14793_s1 + $0x648] ss:$16 sps:$4 sm:$0xff]   ;;  %v10108_v38 = vld [vmem:[%s14793_s1 + $0x664] ss:$16 sps:$4 sm:$0xff]  }
  0x94   :  { %6657 = vmatprep.subr.bf16.mxu0 %v10024_v39  ;;  %7505 = vmatprep.subr.bf16.mxu1 %v10027_v40  ;;  %v10111_v39 = vld [vmem:[%s14793_s1 + $0x66c] ss:$16 sps:$4 sm:$0xff]   ;;  %v8461_v40 = vcombine.high %v12018_v33, %v12023_v35 }
  0x97   :  { %6658 = vmatpush1.bf16.msra.mxu0 %v10022_v41  ;;  %7506 = vmatpush1.bf16.msra.mxu1 %v10025_v42  ;;  %v10106_v41 = vld [vmem:[%s14793_s1 + $0x660] ss:$16 sps:$4 sm:$0xff]   ;;  %v10109_v42 = vld [vmem:[%s14793_s1 + $0x668] ss:$16 sps:$4 sm:$0xff]  }
  0x98   :  { %6659 = vmatprep.subr.bf16.mxu0 %v10030_v43  ;;  %7507 = vmatprep.subr.bf16.mxu1 %v10033_v44  ;;  %v10114_v43 = vld [vmem:[%s14793_s1 + $0x684] ss:$16 sps:$4 sm:$0xff]   ;;  %v10117_v44 = vld [vmem:[%s14793_s1 + $0x68c] ss:$16 sps:$4 sm:$0xff]  }
  0x9b   :  { %6660 = vmatpush1.bf16.msra.mxu0 %v10028_v45  ;;  %7508 = vmatpush1.bf16.msra.mxu1 %v10031_v46  ;;  %v10112_v45 = vld [vmem:[%s14793_s1 + $0x680] ss:$16 sps:$4 sm:$0xff]   ;;  %v10115_v46 = vld [vmem:[%s14793_s1 + $0x688] ss:$16 sps:$4 sm:$0xff]  }
  0x9c   :  { %6661 = vmatprep.subr.bf16.mxu0 %v10036_v47  ;;  %7509 = vmatprep.subr.bf16.mxu1 %v10039_v48  ;;  %v10120_v47 = vld [vmem:[%s14793_s1 + $0x6a4] ss:$16 sps:$4 sm:$0xff]   ;;  %v10123_v48 = vld [vmem:[%s14793_s1 + $0x6ac] ss:$16 sps:$4 sm:$0xff]  }
  0x9f   :  { %6662 = vmatpush1.bf16.msra.mxu0 %v10034_v49  ;;  %7510 = vmatpush1.bf16.msra.mxu1 %v10037_v50  ;;  %v10118_v49 = vld [vmem:[%s14793_s1 + $0x6a0] ss:$16 sps:$4 sm:$0xff]   ;;  %v10121_v50 = vld [vmem:[%s14793_s1 + $0x6a8] ss:$16 sps:$4 sm:$0xff]  }
  0xa0   :  { %6663 = vmatprep.subr.bf16.mxu0 %v10042_v51  ;;  %7511 = vmatprep.subr.bf16.mxu1 %v10045_v52  ;;  %v10126_v51 = vld [vmem:[%s14793_s1 + $0x6c4] ss:$16 sps:$4 sm:$0xff]   ;;  %v10129_v52 = vld [vmem:[%s14793_s1 + $0x6cc] ss:$16 sps:$4 sm:$0xff]  }
  0xa3   :  { %6664 = vmatpush1.bf16.msra.mxu0 %v10040_v53  ;;  %7512 = vmatpush1.bf16.msra.mxu1 %v10043_v54  ;;  %v10124_v53 = vld [vmem:[%s14793_s1 + $0x6c0] ss:$16 sps:$4 sm:$0xff]   ;;  %v10127_v54 = vld [vmem:[%s14793_s1 + $0x6c8] ss:$16 sps:$4 sm:$0xff]  }
  0xa4   :  { %6665 = vmatprep.subr.bf16.mxu0 %v10048_v55  ;;  %7513 = vmatprep.subr.bf16.mxu1 %v10051_v56  ;;  %v10132_v55 = vld [vmem:[%s14793_s1 + $0x6e4] ss:$16 sps:$4 sm:$0xff]   ;;  %v10135_v56 = vld [vmem:[%s14793_s1 + $0x6ec] ss:$16 sps:$4 sm:$0xff]  }
  0xa7   :  { %6666 = vmatpush1.bf16.msra.mxu0 %v10046_v57  ;;  %7514 = vmatpush1.bf16.msra.mxu1 %v10049_v58  ;;  %v10130_v57 = vld [vmem:[%s14793_s1 + $0x6e0] ss:$16 sps:$4 sm:$0xff]   ;;  %v10133_v58 = vld [vmem:[%s14793_s1 + $0x6e8] ss:$16 sps:$4 sm:$0xff]  }
  0xa8   :  { %6667 = vmatprep.subr.bf16.mxu0 %v10054_v59  ;;  %7515 = vmatprep.subr.bf16.mxu1 %v10057_v60  ;;  %v10138_v59 = vld [vmem:[%s14793_s1 + $0x704] ss:$16 sps:$4 sm:$0xff]   ;;  %v10141_v60 = vld [vmem:[%s14793_s1 + $0x70c] ss:$16 sps:$4 sm:$0xff]  }
  0xab   :  { %6668 = vmatpush1.bf16.msra.mxu0 %v10052_v61  ;;  %7516 = vmatpush1.bf16.msra.mxu1 %v10055_v62  ;;  %v10136_v61 = vld [vmem:[%s14793_s1 + $0x700] ss:$16 sps:$4 sm:$0xff]   ;;  %v10139_v62 = vld [vmem:[%s14793_s1 + $0x708] ss:$16 sps:$4 sm:$0xff]  }
  0xac   :  { %6669 = vmatprep.subr.bf16.mxu0 %v10060_v63  ;;  %7517 = vmatprep.subr.bf16.mxu1 %v10063_v0  ;;  %v10144_v63 = vld [vmem:[%s14793_s1 + $0x724] ss:$16 sps:$4 sm:$0xff]   ;;  %v10147_v0 = vld [vmem:[%s14793_s1 + $0x72c] ss:$16 sps:$4 sm:$0xff]  }
  0xaf   :  { %6670 = vmatpush1.bf16.msra.mxu0 %v10058_v1  ;;  %7518 = vmatpush1.bf16.msra.mxu1 %v10061_v2  ;;  %v10142_v1 = vld [vmem:[%s14793_s1 + $0x720] ss:$16 sps:$4 sm:$0xff]   ;;  %v10145_v2 = vld [vmem:[%s14793_s1 + $0x728] ss:$16 sps:$4 sm:$0xff]  }
  0xb0   :  { %6671 = vmatprep.subr.bf16.mxu0 %v10066_v3  ;;  %7519 = vmatprep.subr.bf16.mxu1 %v10069_v4  ;;  %v10150_v3 = vld [vmem:[%s14793_s1 + $0x744] ss:$16 sps:$4 sm:$0xff]   ;;  %v10153_v4 = vld [vmem:[%s14793_s1 + $0x74c] ss:$16 sps:$4 sm:$0xff]  }
  0xb3   :  { %6672 = vmatpush1.bf16.msra.mxu0 %v10064_v5  ;;  %7520 = vmatpush1.bf16.msra.mxu1 %v10067_v6  ;;  %v10148_v5 = vld [vmem:[%s14793_s1 + $0x740] ss:$16 sps:$4 sm:$0xff]   ;;  %v10151_v6 = vld [vmem:[%s14793_s1 + $0x748] ss:$16 sps:$4 sm:$0xff]  }
  0xb4   :  { %6673 = vmatprep.subr.bf16.mxu0 %v10072_v7  ;;  %7521 = vmatprep.subr.bf16.mxu1 %v10075_v8  ;;  %v10156_v7 = vld [vmem:[%s14793_s1 + $0x764] ss:$16 sps:$4 sm:$0xff]   ;;  %v10159_v8 = vld [vmem:[%s14793_s1 + $0x76c] ss:$16 sps:$4 sm:$0xff]  }
  0xb7   :  { %6674 = vmatpush1.bf16.msra.mxu0 %v10070_v9  ;;  %7522 = vmatpush1.bf16.msra.mxu1 %v10073_v10  ;;  %v10154_v9 = vld [vmem:[%s14793_s1 + $0x760] ss:$16 sps:$4 sm:$0xff]   ;;  %v10157_v10 = vld [vmem:[%s14793_s1 + $0x768] ss:$16 sps:$4 sm:$0xff]  }
  0xb8   :  { %6675 = vmatprep.subr.bf16.mxu0 %v10078_v11  ;;  %7523 = vmatprep.subr.bf16.mxu1 %v10081_v12  ;;  %v10162_v11 = vld [vmem:[%s14793_s1 + $0x784] ss:$16 sps:$4 sm:$0xff]   ;;  %v10165_v12 = vld [vmem:[%s14793_s1 + $0x78c] ss:$16 sps:$4 sm:$0xff]  }
  0xbb   :  { %6676 = vmatpush1.bf16.msra.mxu0 %v10076_v13  ;;  %7524 = vmatpush1.bf16.msra.mxu1 %v10079_v14  ;;  %v10160_v13 = vld [vmem:[%s14793_s1 + $0x780] ss:$16 sps:$4 sm:$0xff]   ;;  %v10163_v14 = vld [vmem:[%s14793_s1 + $0x788] ss:$16 sps:$4 sm:$0xff]  }
  0xbc   :  { %6677 = vmatprep.subr.bf16.mxu0 %v10084_v15  ;;  %7525 = vmatprep.subr.bf16.mxu1 %v10087_v16  ;;  %v10168_v15 = vld [vmem:[%s14793_s1 + $0x7a4] ss:$16 sps:$4 sm:$0xff]   ;;  %v10171_v16 = vld [vmem:[%s14793_s1 + $0x7ac] ss:$16 sps:$4 sm:$0xff]  }
  0xbf   :  { %6678 = vmatpush1.bf16.msra.mxu0 %v10082_v17  ;;  %7526 = vmatpush1.bf16.msra.mxu1 %v10085_v18  ;;  %v10166_v17 = vld [vmem:[%s14793_s1 + $0x7a0] ss:$16 sps:$4 sm:$0xff]   ;;  %v10169_v18 = vld [vmem:[%s14793_s1 + $0x7a8] ss:$16 sps:$4 sm:$0xff]  }
  0xc0   :  { %6700 = vmatprep.subr.bf16.mxu0 %v10090_v19  ;;  %7548 = vmatprep.subr.bf16.mxu1 %v10093_v20  ;;  %v10174_v19 = vld [vmem:[%s14793_s1 + $0x7c4] ss:$16 sps:$4 sm:$0xff]   ;;  %v10177_v20 = vld [vmem:[%s14793_s1 + $0x7cc] ss:$16 sps:$4 sm:$0xff]  }
  0xc2   :  { %6680 = vmatmul.mubr.bf16.vlgmr.msra.gmra.mrb[0].mxu0 %v8458_v22  ;;  %7528 = vmatmul.mubr.bf16.vlgmr.msra.gmra.mrb[0].mxu1 %v8458_v22  ;;  %v10175_v22 = vld [vmem:[%s14793_s1 + $0x7c8] ss:$16 sps:$4 sm:$0xff]  }
  0xc3   :  { %6701 = vmatpush1.bf16.msra.mxu0 %v10088_v24  ;;  %7549 = vmatpush1.bf16.msra.mxu1 %v10091_v26  ;;  %v10183_v24 = vld [vmem:[%s14793_s1 + $0x7ec] ss:$16 sps:$4 sm:$0xff]   ;;  %v10178_v26 = vld [vmem:[%s14793_s1 + $0x7e0] ss:$16 sps:$4 sm:$0xff]  }
  0xc4   :  { %6702 = vmatprep.subr.bf16.mxu0 %v10096_v25  ;;  %7550 = vmatprep.subr.bf16.mxu1 %v10099_v27  ;;  %v10181_v25 = vld [vmem:[%s14793_s1 + $0x7e8] ss:$16 sps:$4 sm:$0xff]   ;;  %v10186_v27 = vld [vmem:[%s14793_s1 + $0x804] ss:$16 sps:$4 sm:$0xff]  }
  0xc5   :  { %6689 = vmatprep.mubr.bf16.mxu0 %v8491_v28  ;;  %7537 = vmatprep.mubr.bf16.mxu1 %v8491_v28  ;;  %v10189_v28 = vld [vmem:[%s14793_s1 + $0x80c] ss:$16 sps:$4 sm:$0xff]  }
  0xc7   :  { %6703 = vmatpush1.bf16.msra.mxu0 %v10094_v29  ;;  %7551 = vmatpush1.bf16.msra.mxu1 %v10097_v30  ;;  %v48_v29 = vld [vmem:[%s14794_s0 + $0x118] sm:$0xff]  ;;  %v8460_v30 = vcombine.low %v12018_v33, %v12023_v35 }
  0xc8   :  { %6704 = vmatprep.subr.bf16.mxu0 %v10102_v31  ;;  %7552 = vmatprep.subr.bf16.mxu1 %v10105_v32  ;;  %v64_v31 = vld [vmem:[%s14794_s0 + $0x198] sm:$0xff]  ;;  %v10184_v32 = vld [vmem:[%s14793_s1 + $0x800] ss:$16 sps:$4 sm:$0xff]  }
  0xc9   :  { %v10195_v33 = vld [vmem:[%s14793_s1 + $0x82c] ss:$16 sps:$4 sm:$0xff]   ;;  %v8493_v35 = vcombine.high %v48_v29, %v64_v31 }
  0xca   :  { %6690 = vmatmul.mubr.bf16.gmra.mrb[4].mxu0 %v8490_v34  ;;  %7538 = vmatmul.mubr.bf16.gmra.mrb[4].mxu1 %v8490_v34  ;;  %v10187_v34 = vld [vmem:[%s14793_s1 + $0x808] ss:$16 sps:$4 sm:$0xff]  }
  0xcb   :  { %6705 = vmatpush1.bf16.msra.mxu0 %v10100_v36  ;;  %7553 = vmatpush1.bf16.msra.mxu1 %v10103_v37  ;;  %v10192_v36 = vld [vmem:[%s14793_s1 + $0x824] ss:$16 sps:$4 sm:$0xff]   ;;  %v10190_v37 = vld [vmem:[%s14793_s1 + $0x820] ss:$16 sps:$4 sm:$0xff]  }
  0xcc   :  { %6706 = vmatprep.subr.bf16.mxu0 %v10108_v38  ;;  %7554 = vmatprep.subr.bf16.mxu1 %v10111_v39  ;;  %v10193_v38 = vld [vmem:[%s14793_s1 + $0x828] ss:$16 sps:$4 sm:$0xff]   ;;  %v10198_v39 = vld [vmem:[%s14793_s1 + $0x844] ss:$16 sps:$4 sm:$0xff]  }
  0xcd   :  { %6732 = vmatprep.mubr.bf16.mxu0 %v8461_v40  ;;  %7580 = vmatprep.mubr.bf16.mxu1 %v8461_v40  ;;  %v10201_v40 = vld [vmem:[%s14793_s1 + $0x84c] ss:$16 sps:$4 sm:$0xff]  }
  0xcf   :  { %6707 = vmatpush1.bf16.msra.mxu0 %v10106_v41  ;;  %7555 = vmatpush1.bf16.msra.mxu1 %v10109_v42  ;;  %v12230_v41 = vld [vmem:[%s14794_s0 + $0x20] sm:$0xff]  ;;  %v8492_v42 = vcombine.low %v48_v29, %v64_v31 }
  0xd0   :  { %6708 = vmatprep.subr.bf16.mxu0 %v10114_v43  ;;  %7556 = vmatprep.subr.bf16.mxu1 %v10117_v44  ;;  %v12235_v43 = vld [vmem:[%s14794_s0 + $0xa0] sm:$0xff] }
  0xd1   :  { %v10196_v44 = vld [vmem:[%s14793_s1 + $0x840] ss:$16 sps:$4 sm:$0xff]   ;;  %v10276_v31 = vld [vmem:[%s14793_s1 + $0x9e4] ss:$16 sps:$4 sm:$0xff]  }
  0xd2   :  { %v10268_v29 = vld [vmem:[%s14793_s1 + $0x9c0] ss:$16 sps:$4 sm:$0xff]  }
  0xd3   :  { %6709 = vmatpush1.bf16.msra.mxu0 %v10112_v45  ;;  %7557 = vmatpush1.bf16.msra.mxu1 %v10115_v46  ;;  %v10199_v45 = vld [vmem:[%s14793_s1 + $0x848] ss:$16 sps:$4 sm:$0xff]   ;;  %v10204_v46 = vld [vmem:[%s14793_s1 + $0x864] ss:$16 sps:$4 sm:$0xff]  }
  0xd4   :  { %6710 = vmatprep.subr.bf16.mxu0 %v10120_v47  ;;  %7558 = vmatprep.subr.bf16.mxu1 %v10123_v48  ;;  %v10207_v47 = vld [vmem:[%s14793_s1 + $0x86c] ss:$16 sps:$4 sm:$0xff]   ;;  %v8463_v48 = vcombine.high %v12230_v41, %v12235_v43 }
  0xd7   :  { %6711 = vmatpush1.bf16.msra.mxu0 %v10118_v49  ;;  %7559 = vmatpush1.bf16.msra.mxu1 %v10121_v50  ;;  %v10202_v49 = vld [vmem:[%s14793_s1 + $0x860] ss:$16 sps:$4 sm:$0xff]   ;;  %v10205_v50 = vld [vmem:[%s14793_s1 + $0x868] ss:$16 sps:$4 sm:$0xff]  }
  0xd8   :  { %6712 = vmatprep.subr.bf16.mxu0 %v10126_v51  ;;  %7560 = vmatprep.subr.bf16.mxu1 %v10129_v52  ;;  %v10210_v51 = vld [vmem:[%s14793_s1 + $0x884] ss:$16 sps:$4 sm:$0xff]   ;;  %v10213_v52 = vld [vmem:[%s14793_s1 + $0x88c] ss:$16 sps:$4 sm:$0xff]  }
  0xdb   :  { %6713 = vmatpush1.bf16.msra.mxu0 %v10124_v53  ;;  %7561 = vmatpush1.bf16.msra.mxu1 %v10127_v54  ;;  %v10208_v53 = vld [vmem:[%s14793_s1 + $0x880] ss:$16 sps:$4 sm:$0xff]   ;;  %v10211_v54 = vld [vmem:[%s14793_s1 + $0x888] ss:$16 sps:$4 sm:$0xff]  }
  0xdc   :  { %6714 = vmatprep.subr.bf16.mxu0 %v10132_v55  ;;  %7562 = vmatprep.subr.bf16.mxu1 %v10135_v56  ;;  %v10216_v55 = vld [vmem:[%s14793_s1 + $0x8a4] ss:$16 sps:$4 sm:$0xff]   ;;  %v10219_v56 = vld [vmem:[%s14793_s1 + $0x8ac] ss:$16 sps:$4 sm:$0xff]  }
  0xdf   :  { %6715 = vmatpush1.bf16.msra.mxu0 %v10130_v57  ;;  %7563 = vmatpush1.bf16.msra.mxu1 %v10133_v58  ;;  %v10214_v57 = vld [vmem:[%s14793_s1 + $0x8a0] ss:$16 sps:$4 sm:$0xff]   ;;  %v10217_v58 = vld [vmem:[%s14793_s1 + $0x8a8] ss:$16 sps:$4 sm:$0xff]  }
  0xe0   :  { %6716 = vmatprep.subr.bf16.mxu0 %v10138_v59  ;;  %7564 = vmatprep.subr.bf16.mxu1 %v10141_v60  ;;  %v10222_v59 = vld [vmem:[%s14793_s1 + $0x8c4] ss:$16 sps:$4 sm:$0xff]   ;;  %v10225_v60 = vld [vmem:[%s14793_s1 + $0x8cc] ss:$16 sps:$4 sm:$0xff]  }
  0xe3   :  { %6717 = vmatpush1.bf16.msra.mxu0 %v10136_v61  ;;  %7565 = vmatpush1.bf16.msra.mxu1 %v10139_v62  ;;  %v10220_v61 = vld [vmem:[%s14793_s1 + $0x8c0] ss:$16 sps:$4 sm:$0xff]   ;;  %v10223_v62 = vld [vmem:[%s14793_s1 + $0x8c8] ss:$16 sps:$4 sm:$0xff]  }
  0xe4   :  { %6718 = vmatprep.subr.bf16.mxu0 %v10144_v63  ;;  %7566 = vmatprep.subr.bf16.mxu1 %v10147_v0  ;;  %v10228_v63 = vld [vmem:[%s14793_s1 + $0x8e4] ss:$16 sps:$4 sm:$0xff]   ;;  %v10231_v0 = vld [vmem:[%s14793_s1 + $0x8ec] ss:$16 sps:$4 sm:$0xff]  }
  0xe7   :  { %6719 = vmatpush1.bf16.msra.mxu0 %v10142_v1  ;;  %7567 = vmatpush1.bf16.msra.mxu1 %v10145_v2  ;;  %v10226_v1 = vld [vmem:[%s14793_s1 + $0x8e0] ss:$16 sps:$4 sm:$0xff]   ;;  %v10229_v2 = vld [vmem:[%s14793_s1 + $0x8e8] ss:$16 sps:$4 sm:$0xff]  }
  0xe8   :  { %6720 = vmatprep.subr.bf16.mxu0 %v10150_v3  ;;  %7568 = vmatprep.subr.bf16.mxu1 %v10153_v4  ;;  %v10234_v3 = vld [vmem:[%s14793_s1 + $0x904] ss:$16 sps:$4 sm:$0xff]   ;;  %v10237_v4 = vld [vmem:[%s14793_s1 + $0x90c] ss:$16 sps:$4 sm:$0xff]  }
  0xeb   :  { %6721 = vmatpush1.bf16.msra.mxu0 %v10148_v5  ;;  %7569 = vmatpush1.bf16.msra.mxu1 %v10151_v6  ;;  %v10232_v5 = vld [vmem:[%s14793_s1 + $0x900] ss:$16 sps:$4 sm:$0xff]   ;;  %v10235_v6 = vld [vmem:[%s14793_s1 + $0x908] ss:$16 sps:$4 sm:$0xff]  }
  0xec   :  { %6722 = vmatprep.subr.bf16.mxu0 %v10156_v7  ;;  %7570 = vmatprep.subr.bf16.mxu1 %v10159_v8  ;;  %v10240_v7 = vld [vmem:[%s14793_s1 + $0x924] ss:$16 sps:$4 sm:$0xff]   ;;  %v10243_v8 = vld [vmem:[%s14793_s1 + $0x92c] ss:$16 sps:$4 sm:$0xff]  }
  0xef   :  { %6723 = vmatpush1.bf16.msra.mxu0 %v10154_v9  ;;  %7571 = vmatpush1.bf16.msra.mxu1 %v10157_v10  ;;  %v10238_v9 = vld [vmem:[%s14793_s1 + $0x920] ss:$16 sps:$4 sm:$0xff]   ;;  %v10241_v10 = vld [vmem:[%s14793_s1 + $0x928] ss:$16 sps:$4 sm:$0xff]  }
  0xf0   :  { %6724 = vmatprep.subr.bf16.mxu0 %v10162_v11  ;;  %7572 = vmatprep.subr.bf16.mxu1 %v10165_v12  ;;  %v10246_v11 = vld [vmem:[%s14793_s1 + $0x944] ss:$16 sps:$4 sm:$0xff]   ;;  %v10249_v12 = vld [vmem:[%s14793_s1 + $0x94c] ss:$16 sps:$4 sm:$0xff]  }
  0xf3   :  { %6725 = vmatpush1.bf16.msra.mxu0 %v10160_v13  ;;  %7573 = vmatpush1.bf16.msra.mxu1 %v10163_v14  ;;  %v10244_v13 = vld [vmem:[%s14793_s1 + $0x940] ss:$16 sps:$4 sm:$0xff]   ;;  %v10247_v14 = vld [vmem:[%s14793_s1 + $0x948] ss:$16 sps:$4 sm:$0xff]  }
  0xf4   :  { %6726 = vmatprep.subr.bf16.mxu0 %v10168_v15  ;;  %7574 = vmatprep.subr.bf16.mxu1 %v10171_v16  ;;  %v10252_v15 = vld [vmem:[%s14793_s1 + $0x964] ss:$16 sps:$4 sm:$0xff]   ;;  %v10255_v16 = vld [vmem:[%s14793_s1 + $0x96c] ss:$16 sps:$4 sm:$0xff]  }
  0xf7   :  { %6727 = vmatpush1.bf16.msra.mxu0 %v10166_v17  ;;  %7575 = vmatpush1.bf16.msra.mxu1 %v10169_v18  ;;  %v10250_v17 = vld [vmem:[%s14793_s1 + $0x960] ss:$16 sps:$4 sm:$0xff]   ;;  %v10253_v18 = vld [vmem:[%s14793_s1 + $0x968] ss:$16 sps:$4 sm:$0xff]  }
  0xf8   :  { %6728 = vmatprep.subr.bf16.mxu0 %v10174_v19  ;;  %7576 = vmatprep.subr.bf16.mxu1 %v10177_v20  ;;  %v10258_v19 = vld [vmem:[%s14793_s1 + $0x984] ss:$16 sps:$4 sm:$0xff]   ;;  %v10261_v20 = vld [vmem:[%s14793_s1 + $0x98c] ss:$16 sps:$4 sm:$0xff]  }
  0xfb   :  { %6729 = vmatpush1.bf16.msra.mxu0 %v10172_v21  ;;  %7577 = vmatpush1.bf16.msra.mxu1 %v10175_v22  ;;  %v10256_v21 = vld [vmem:[%s14793_s1 + $0x980] ss:$16 sps:$4 sm:$0xff]   ;;  %v10259_v22 = vld [vmem:[%s14793_s1 + $0x988] ss:$16 sps:$4 sm:$0xff]  }
  0xfc   :  { %6730 = vmatprep.subr.bf16.mxu0 %v10180_v23  ;;  %7578 = vmatprep.subr.bf16.mxu1 %v10183_v24  ;;  %v10264_v23 = vld [vmem:[%s14793_s1 + $0x9a4] ss:$16 sps:$4 sm:$0xff]   ;;  %v10267_v24 = vld [vmem:[%s14793_s1 + $0x9ac] ss:$16 sps:$4 sm:$0xff]  }
  0xff   :  { %6731 = vmatpush1.bf16.msra.mxu0 %v10178_v26  ;;  %7579 = vmatpush1.bf16.msra.mxu1 %v10181_v25  ;;  %v10262_v26 = vld [vmem:[%s14793_s1 + $0x9a0] ss:$16 sps:$4 sm:$0xff]   ;;  %v10265_v25 = vld [vmem:[%s14793_s1 + $0x9a8] ss:$16 sps:$4 sm:$0xff]  }
 0x100   :  { %6753 = vmatprep.subr.bf16.mxu0 %v10186_v27  ;;  %7601 = vmatprep.subr.bf16.mxu1 %v10189_v28  ;;  %v10270_v27 = vld [vmem:[%s14793_s1 + $0x9c4] ss:$16 sps:$4 sm:$0xff]   ;;  %v10273_v28 = vld [vmem:[%s14793_s1 + $0x9cc] ss:$16 sps:$4 sm:$0xff]  }
 0x102   :  { %6733 = vmatmul.mubr.bf16.vlgmr.msra.gmra.mrb[0].mxu0 %v8460_v30  ;;  %7581 = vmatmul.mubr.bf16.vlgmr.msra.gmra.mrb[0].mxu1 %v8460_v30  ;;  %v10271_v30 = vld [vmem:[%s14793_s1 + $0x9c8] ss:$16 sps:$4 sm:$0xff]  }
 0x103   :  { %6754 = vmatpush1.bf16.msra.mxu0 %v10184_v32  ;;  %7602 = vmatpush1.bf16.msra.mxu1 %v10187_v34  ;;  %v10279_v32 = vld [vmem:[%s14793_s1 + $0x9ec] ss:$16 sps:$4 sm:$0xff]   ;;  %v10274_v34 = vld [vmem:[%s14793_s1 + $0x9e0] ss:$16 sps:$4 sm:$0xff]  }
 0x104   :  { %6755 = vmatprep.subr.bf16.mxu0 %v10192_v36  ;;  %7603 = vmatprep.subr.bf16.mxu1 %v10195_v33  ;;  %v10277_v36 = vld [vmem:[%s14793_s1 + $0x9e8] ss:$16 sps:$4 sm:$0xff]   ;;  %v10282_v33 = vld [vmem:[%s14793_s1 + $0xa04] ss:$16 sps:$4 sm:$0xff]  }
 0x105   :  { %6742 = vmatprep.mubr.bf16.mxu0 %v8493_v35  ;;  %7590 = vmatprep.mubr.bf16.mxu1 %v8493_v35  ;;  %v10285_v35 = vld [vmem:[%s14793_s1 + $0xa0c] ss:$16 sps:$4 sm:$0xff]  }
 0x107   :  { %6756 = vmatpush1.bf16.msra.mxu0 %v10190_v37  ;;  %7604 = vmatpush1.bf16.msra.mxu1 %v10193_v38  ;;  %v49_v37 = vld [vmem:[%s14794_s0 + $0x120] sm:$0xff] }
 0x108   :  { %6757 = vmatprep.subr.bf16.mxu0 %v10198_v39  ;;  %7605 = vmatprep.subr.bf16.mxu1 %v10201_v40  ;;  %v65_v38 = vld [vmem:[%s14794_s0 + $0x1a0] sm:$0xff]  ;;  %v8462_v39 = vcombine.low %v12230_v41, %v12235_v43  ;;  %v10291_v41 = vld [vmem:[%s14793_s1 + $0xa2c] ss:$16 sps:$4 sm:$0xff]  }
 0x109   :  { %v10280_v40 = vld [vmem:[%s14793_s1 + $0xa00] ss:$16 sps:$4 sm:$0xff]  }
 0x10a   :  { %6743 = vmatmul.mubr.bf16.gmra.mrb[4].mxu0 %v8492_v42  ;;  %7591 = vmatmul.mubr.bf16.gmra.mrb[4].mxu1 %v8492_v42  ;;  %v10283_v42 = vld [vmem:[%s14793_s1 + $0xa08] ss:$16 sps:$4 sm:$0xff]   ;;  %v10286_v43 = vld [vmem:[%s14793_s1 + $0xa20] ss:$16 sps:$4 sm:$0xff]  }
 0x10b   :  { %6758 = vmatpush1.bf16.msra.mxu0 %v10196_v44  ;;  %7606 = vmatpush1.bf16.msra.mxu1 %v10199_v45  ;;  %v10288_v44 = vld [vmem:[%s14793_s1 + $0xa24] ss:$16 sps:$4 sm:$0xff]   ;;  %v10289_v45 = vld [vmem:[%s14793_s1 + $0xa28] ss:$16 sps:$4 sm:$0xff]  }
 0x10c   :  { %6759 = vmatprep.subr.bf16.mxu0 %v10204_v46  ;;  %7607 = vmatprep.subr.bf16.mxu1 %v10207_v47  ;;  %v8495_v46 = vcombine.high %v49_v37, %v65_v38  ;;  %v10294_v47 = vld [vmem:[%s14793_s1 + $0xa44] ss:$16 sps:$4 sm:$0xff]  }
 0x10d   :  { %6785 = vmatprep.mubr.bf16.mxu0 %v8463_v48  ;;  %7633 = vmatprep.mubr.bf16.mxu1 %v8463_v48  ;;  %v10297_v48 = vld [vmem:[%s14793_s1 + $0xa4c] ss:$16 sps:$4 sm:$0xff]  }
 0x10f   :  { %6760 = vmatpush1.bf16.msra.mxu0 %v10202_v49  ;;  %7608 = vmatpush1.bf16.msra.mxu1 %v10205_v50  ;;  %v12442_v49 = vld [vmem:[%s14794_s0 + $0x28] sm:$0xff] }
 0x110   :  { %6761 = vmatprep.subr.bf16.mxu0 %v10210_v51  ;;  %7609 = vmatprep.subr.bf16.mxu1 %v10213_v52  ;;  %v12447_v50 = vld [vmem:[%s14794_s0 + $0xa8] sm:$0xff]  ;;  %v8494_v51 = vcombine.low %v49_v37, %v65_v38  ;;  %v10292_v52 = vld [vmem:[%s14793_s1 + $0xa40] ss:$16 sps:$4 sm:$0xff]  }
 0x111   :  { %v10364_v37 = vld [vmem:[%s14793_s1 + $0xbc0] ss:$16 sps:$4 sm:$0xff]   ;;  %v10367_v38 = vld [vmem:[%s14793_s1 + $0xbc8] ss:$16 sps:$4 sm:$0xff]  }
 0x113   :  { %6762 = vmatpush1.bf16.msra.mxu0 %v10208_v53  ;;  %7610 = vmatpush1.bf16.msra.mxu1 %v10211_v54  ;;  %v10295_v53 = vld [vmem:[%s14793_s1 + $0xa48] ss:$16 sps:$4 sm:$0xff]   ;;  %v10300_v54 = vld [vmem:[%s14793_s1 + $0xa64] ss:$16 sps:$4 sm:$0xff]  }
 0x114   :  { %6763 = vmatprep.subr.bf16.mxu0 %v10216_v55  ;;  %7611 = vmatprep.subr.bf16.mxu1 %v10219_v56  ;;  %v10303_v55 = vld [vmem:[%s14793_s1 + $0xa6c] ss:$16 sps:$4 sm:$0xff]   ;;  %v8465_v56 = vcombine.high %v12442_v49, %v12447_v50 }
 0x117   :  { %6764 = vmatpush1.bf16.msra.mxu0 %v10214_v57  ;;  %7612 = vmatpush1.bf16.msra.mxu1 %v10217_v58  ;;  %v10298_v57 = vld [vmem:[%s14793_s1 + $0xa60] ss:$16 sps:$4 sm:$0xff]   ;;  %v10301_v58 = vld [vmem:[%s14793_s1 + $0xa68] ss:$16 sps:$4 sm:$0xff]  }
 0x118   :  { %6765 = vmatprep.subr.bf16.mxu0 %v10222_v59  ;;  %7613 = vmatprep.subr.bf16.mxu1 %v10225_v60  ;;  %v10306_v59 = vld [vmem:[%s14793_s1 + $0xa84] ss:$16 sps:$4 sm:$0xff]   ;;  %v10309_v60 = vld [vmem:[%s14793_s1 + $0xa8c] ss:$16 sps:$4 sm:$0xff]  }
 0x11b   :  { %6766 = vmatpush1.bf16.msra.mxu0 %v10220_v61  ;;  %7614 = vmatpush1.bf16.msra.mxu1 %v10223_v62  ;;  %v10304_v61 = vld [vmem:[%s14793_s1 + $0xa80] ss:$16 sps:$4 sm:$0xff]   ;;  %v10307_v62 = vld [vmem:[%s14793_s1 + $0xa88] ss:$16 sps:$4 sm:$0xff]  }
 0x11c   :  { %6767 = vmatprep.subr.bf16.mxu0 %v10228_v63  ;;  %7615 = vmatprep.subr.bf16.mxu1 %v10231_v0  ;;  %v10312_v63 = vld [vmem:[%s14793_s1 + $0xaa4] ss:$16 sps:$4 sm:$0xff]   ;;  %v10315_v0 = vld [vmem:[%s14793_s1 + $0xaac] ss:$16 sps:$4 sm:$0xff]  }
 0x11f   :  { %6768 = vmatpush1.bf16.msra.mxu0 %v10226_v1  ;;  %7616 = vmatpush1.bf16.msra.mxu1 %v10229_v2  ;;  %v10310_v1 = vld [vmem:[%s14793_s1 + $0xaa0] ss:$16 sps:$4 sm:$0xff]   ;;  %v10313_v2 = vld [vmem:[%s14793_s1 + $0xaa8] ss:$16 sps:$4 sm:$0xff]  }
 0x120   :  { %6769 = vmatprep.subr.bf16.mxu0 %v10234_v3  ;;  %7617 = vmatprep.subr.bf16.mxu1 %v10237_v4  ;;  %v10318_v3 = vld [vmem:[%s14793_s1 + $0xac4] ss:$16 sps:$4 sm:$0xff]   ;;  %v10321_v4 = vld [vmem:[%s14793_s1 + $0xacc] ss:$16 sps:$4 sm:$0xff]  }
 0x123   :  { %6770 = vmatpush1.bf16.msra.mxu0 %v10232_v5  ;;  %7618 = vmatpush1.bf16.msra.mxu1 %v10235_v6  ;;  %v10316_v5 = vld [vmem:[%s14793_s1 + $0xac0] ss:$16 sps:$4 sm:$0xff]   ;;  %v10319_v6 = vld [vmem:[%s14793_s1 + $0xac8] ss:$16 sps:$4 sm:$0xff]  }
 0x124   :  { %6771 = vmatprep.subr.bf16.mxu0 %v10240_v7  ;;  %7619 = vmatprep.subr.bf16.mxu1 %v10243_v8  ;;  %v10324_v7 = vld [vmem:[%s14793_s1 + $0xae4] ss:$16 sps:$4 sm:$0xff]   ;;  %v10327_v8 = vld [vmem:[%s14793_s1 + $0xaec] ss:$16 sps:$4 sm:$0xff]  }
 0x127   :  { %6772 = vmatpush1.bf16.msra.mxu0 %v10238_v9  ;;  %7620 = vmatpush1.bf16.msra.mxu1 %v10241_v10  ;;  %v10322_v9 = vld [vmem:[%s14793_s1 + $0xae0] ss:$16 sps:$4 sm:$0xff]   ;;  %v10325_v10 = vld [vmem:[%s14793_s1 + $0xae8] ss:$16 sps:$4 sm:$0xff]  }
 0x128   :  { %6773 = vmatprep.subr.bf16.mxu0 %v10246_v11  ;;  %7621 = vmatprep.subr.bf16.mxu1 %v10249_v12  ;;  %v10330_v11 = vld [vmem:[%s14793_s1 + $0xb04] ss:$16 sps:$4 sm:$0xff]   ;;  %v10333_v12 = vld [vmem:[%s14793_s1 + $0xb0c] ss:$16 sps:$4 sm:$0xff]  }
 0x12b   :  { %6774 = vmatpush1.bf16.msra.mxu0 %v10244_v13  ;;  %7622 = vmatpush1.bf16.msra.mxu1 %v10247_v14  ;;  %v10328_v13 = vld [vmem:[%s14793_s1 + $0xb00] ss:$16 sps:$4 sm:$0xff]   ;;  %v10331_v14 = vld [vmem:[%s14793_s1 + $0xb08] ss:$16 sps:$4 sm:$0xff]  }
 0x12c   :  { %6775 = vmatprep.subr.bf16.mxu0 %v10252_v15  ;;  %7623 = vmatprep.subr.bf16.mxu1 %v10255_v16  ;;  %v10336_v15 = vld [vmem:[%s14793_s1 + $0xb24] ss:$16 sps:$4 sm:$0xff]   ;;  %v10339_v16 = vld [vmem:[%s14793_s1 + $0xb2c] ss:$16 sps:$4 sm:$0xff]  }
 0x12f   :  { %6776 = vmatpush1.bf16.msra.mxu0 %v10250_v17  ;;  %7624 = vmatpush1.bf16.msra.mxu1 %v10253_v18  ;;  %v10334_v17 = vld [vmem:[%s14793_s1 + $0xb20] ss:$16 sps:$4 sm:$0xff]   ;;  %v10337_v18 = vld [vmem:[%s14793_s1 + $0xb28] ss:$16 sps:$4 sm:$0xff]  }
 0x130   :  { %6777 = vmatprep.subr.bf16.mxu0 %v10258_v19  ;;  %7625 = vmatprep.subr.bf16.mxu1 %v10261_v20  ;;  %v10342_v19 = vld [vmem:[%s14793_s1 + $0xb44] ss:$16 sps:$4 sm:$0xff]   ;;  %v10345_v20 = vld [vmem:[%s14793_s1 + $0xb4c] ss:$16 sps:$4 sm:$0xff]  }
 0x133   :  { %6778 = vmatpush1.bf16.msra.mxu0 %v10256_v21  ;;  %7626 = vmatpush1.bf16.msra.mxu1 %v10259_v22  ;;  %v10340_v21 = vld [vmem:[%s14793_s1 + $0xb40] ss:$16 sps:$4 sm:$0xff]   ;;  %v10343_v22 = vld [vmem:[%s14793_s1 + $0xb48] ss:$16 sps:$4 sm:$0xff]  }
 0x134   :  { %6779 = vmatprep.subr.bf16.mxu0 %v10264_v23  ;;  %7627 = vmatprep.subr.bf16.mxu1 %v10267_v24  ;;  %v10348_v23 = vld [vmem:[%s14793_s1 + $0xb64] ss:$16 sps:$4 sm:$0xff]   ;;  %v10351_v24 = vld [vmem:[%s14793_s1 + $0xb6c] ss:$16 sps:$4 sm:$0xff]  }
 0x137   :  { %6780 = vmatpush1.bf16.msra.mxu0 %v10262_v26  ;;  %7628 = vmatpush1.bf16.msra.mxu1 %v10265_v25  ;;  %v10346_v26 = vld [vmem:[%s14793_s1 + $0xb60] ss:$16 sps:$4 sm:$0xff]   ;;  %v10349_v25 = vld [vmem:[%s14793_s1 + $0xb68] ss:$16 sps:$4 sm:$0xff]  }
 0x138   :  { %6781 = vmatprep.subr.bf16.mxu0 %v10270_v27  ;;  %7629 = vmatprep.subr.bf16.mxu1 %v10273_v28  ;;  %v10354_v27 = vld [vmem:[%s14793_s1 + $0xb84] ss:$16 sps:$4 sm:$0xff]   ;;  %v10357_v28 = vld [vmem:[%s14793_s1 + $0xb8c] ss:$16 sps:$4 sm:$0xff]  }
 0x13b   :  { %6782 = vmatpush1.bf16.msra.mxu0 %v10268_v29  ;;  %7630 = vmatpush1.bf16.msra.mxu1 %v10271_v30  ;;  %v10352_v29 = vld [vmem:[%s14793_s1 + $0xb80] ss:$16 sps:$4 sm:$0xff]   ;;  %v10355_v30 = vld [vmem:[%s14793_s1 + $0xb88] ss:$16 sps:$4 sm:$0xff]  }
 0x13c   :  { %6783 = vmatprep.subr.bf16.mxu0 %v10276_v31  ;;  %7631 = vmatprep.subr.bf16.mxu1 %v10279_v32  ;;  %v10360_v31 = vld [vmem:[%s14793_s1 + $0xba4] ss:$16 sps:$4 sm:$0xff]   ;;  %v10363_v32 = vld [vmem:[%s14793_s1 + $0xbac] ss:$16 sps:$4 sm:$0xff]  }
 0x13f   :  { %6784 = vmatpush1.bf16.msra.mxu0 %v10274_v34  ;;  %7632 = vmatpush1.bf16.msra.mxu1 %v10277_v36  ;;  %v10358_v34 = vld [vmem:[%s14793_s1 + $0xba0] ss:$16 sps:$4 sm:$0xff]   ;;  %v10361_v36 = vld [vmem:[%s14793_s1 + $0xba8] ss:$16 sps:$4 sm:$0xff]  }
 0x140   :  { %6806 = vmatprep.subr.bf16.mxu0 %v10282_v33  ;;  %7654 = vmatprep.subr.bf16.mxu1 %v10285_v35  ;;  %v10366_v33 = vld [vmem:[%s14793_s1 + $0xbc4] ss:$16 sps:$4 sm:$0xff]   ;;  %v10369_v35 = vld [vmem:[%s14793_s1 + $0xbcc] ss:$16 sps:$4 sm:$0xff]  }
 0x142   :  { %6786 = vmatmul.mubr.bf16.vlgmr.msra.gmra.mrb[0].mxu0 %v8462_v39  ;;  %7634 = vmatmul.mubr.bf16.vlgmr.msra.gmra.mrb[0].mxu1 %v8462_v39  ;;  %v10372_v39 = vld [vmem:[%s14793_s1 + $0xbe4] ss:$16 sps:$4 sm:$0xff]  }
 0x143   :  { %6807 = vmatpush1.bf16.msra.mxu0 %v10280_v40  ;;  %7655 = vmatpush1.bf16.msra.mxu1 %v10283_v42  ;;  %v10375_v40 = vld [vmem:[%s14793_s1 + $0xbec] ss:$16 sps:$4 sm:$0xff]   ;;  %v10370_v42 = vld [vmem:[%s14793_s1 + $0xbe0] ss:$16 sps:$4 sm:$0xff]  }
 0x144   :  { %6808 = vmatprep.subr.bf16.mxu0 %v10288_v44  ;;  %7656 = vmatprep.subr.bf16.mxu1 %v10291_v41  ;;  %v10373_v44 = vld [vmem:[%s14793_s1 + $0xbe8] ss:$16 sps:$4 sm:$0xff]   ;;  %v10378_v41 = vld [vmem:[%s14793_s1 + $0xc04] ss:$16 sps:$4 sm:$0xff]  }
 0x145   :  { %6795 = vmatprep.mubr.bf16.mxu0 %v8495_v46  ;;  %7643 = vmatprep.mubr.bf16.mxu1 %v8495_v46  ;;  %v66_v46 = vld [vmem:[%s14794_s0 + $0x1a8] sm:$0xff] }
 0x147   :  { %6809 = vmatpush1.bf16.msra.mxu0 %v10286_v43  ;;  %7657 = vmatpush1.bf16.msra.mxu1 %v10289_v45  ;;  %v10381_v43 = vld [vmem:[%s14793_s1 + $0xc0c] ss:$16 sps:$4 sm:$0xff]  }
 0x148   :  { %6810 = vmatprep.subr.bf16.mxu0 %v10294_v47  ;;  %7658 = vmatprep.subr.bf16.mxu1 %v10297_v48  ;;  %v50_v45 = vld [vmem:[%s14794_s0 + $0x128] sm:$0xff]  ;;  %v8464_v47 = vcombine.low %v12442_v49, %v12447_v50  ;;  %v10376_v48 = vld [vmem:[%s14793_s1 + $0xc00] ss:$16 sps:$4 sm:$0xff]  }
 0x149   :  { %v10387_v49 = vld [vmem:[%s14793_s1 + $0xc2c] ss:$16 sps:$4 sm:$0xff]   ;;  %v10382_v50 = vld [vmem:[%s14793_s1 + $0xc20] ss:$16 sps:$4 sm:$0xff]  }
 0x14a   :  { %6796 = vmatmul.mubr.bf16.gmra.mrb[4].mxu0 %v8494_v51  ;;  %7644 = vmatmul.mubr.bf16.gmra.mrb[4].mxu1 %v8494_v51  ;;  %v10379_v51 = vld [vmem:[%s14793_s1 + $0xc08] ss:$16 sps:$4 sm:$0xff]  }
 0x14b   :  { %6811 = vmatpush1.bf16.msra.mxu0 %v10292_v52  ;;  %7659 = vmatpush1.bf16.msra.mxu1 %v10295_v53  ;;  %v10384_v52 = vld [vmem:[%s14793_s1 + $0xc24] ss:$16 sps:$4 sm:$0xff]   ;;  %v10385_v53 = vld [vmem:[%s14793_s1 + $0xc28] ss:$16 sps:$4 sm:$0xff]  }
 0x14c   :  { %6812 = vmatprep.subr.bf16.mxu0 %v10300_v54  ;;  %7660 = vmatprep.subr.bf16.mxu1 %v10303_v55  ;;  %v8497_v54 = vcombine.high %v50_v45, %v66_v46  ;;  %v10390_v55 = vld [vmem:[%s14793_s1 + $0xc44] ss:$16 sps:$4 sm:$0xff]  }
 0x14d   :  { %6838 = vmatprep.mubr.bf16.mxu0 %v8465_v56  ;;  %7686 = vmatprep.mubr.bf16.mxu1 %v8465_v56  ;;  %v10393_v56 = vld [vmem:[%s14793_s1 + $0xc4c] ss:$16 sps:$4 sm:$0xff]  }
 0x14f   :  { %6813 = vmatpush1.bf16.msra.mxu0 %v10298_v57  ;;  %7661 = vmatpush1.bf16.msra.mxu1 %v10301_v58  ;;  %v12654_v57 = vld [vmem:[%s14794_s0 + $0x30] sm:$0xff] }
 0x150   :  { %6814 = vmatprep.subr.bf16.mxu0 %v10306_v59  ;;  %7662 = vmatprep.subr.bf16.mxu1 %v10309_v60  ;;  %v12659_v58 = vld [vmem:[%s14794_s0 + $0xb0] sm:$0xff]  ;;  %v8496_v59 = vcombine.low %v50_v45, %v66_v46  ;;  %v10463_v46 = vld [vmem:[%s14793_s1 + $0xdc8] ss:$16 sps:$4 sm:$0xff]  }
 0x151   :  { %v10388_v60 = vld [vmem:[%s14793_s1 + $0xc40] ss:$16 sps:$4 sm:$0xff]  }
 0x152   :  { %v10460_v45 = vld [vmem:[%s14793_s1 + $0xdc0] ss:$16 sps:$4 sm:$0xff]  }
 0x153   :  { %6815 = vmatpush1.bf16.msra.mxu0 %v10304_v61  ;;  %7663 = vmatpush1.bf16.msra.mxu1 %v10307_v62  ;;  %v10391_v61 = vld [vmem:[%s14793_s1 + $0xc48] ss:$16 sps:$4 sm:$0xff]   ;;  %v10396_v62 = vld [vmem:[%s14793_s1 + $0xc64] ss:$16 sps:$4 sm:$0xff]  }
 0x154   :  { %6816 = vmatprep.subr.bf16.mxu0 %v10312_v63  ;;  %7664 = vmatprep.subr.bf16.mxu1 %v10315_v0  ;;  %v10399_v63 = vld [vmem:[%s14793_s1 + $0xc6c] ss:$16 sps:$4 sm:$0xff]   ;;  %v8467_v0 = vcombine.high %v12654_v57, %v12659_v58 }
 0x157   :  { %6817 = vmatpush1.bf16.msra.mxu0 %v10310_v1  ;;  %7665 = vmatpush1.bf16.msra.mxu1 %v10313_v2  ;;  %v10394_v1 = vld [vmem:[%s14793_s1 + $0xc60] ss:$16 sps:$4 sm:$0xff]   ;;  %v10397_v2 = vld [vmem:[%s14793_s1 + $0xc68] ss:$16 sps:$4 sm:$0xff]  }
 0x158   :  { %6818 = vmatprep.subr.bf16.mxu0 %v10318_v3  ;;  %7666 = vmatprep.subr.bf16.mxu1 %v10321_v4  ;;  %v10402_v3 = vld [vmem:[%s14793_s1 + $0xc84] ss:$16 sps:$4 sm:$0xff]   ;;  %v10405_v4 = vld [vmem:[%s14793_s1 + $0xc8c] ss:$16 sps:$4 sm:$0xff]  }
 0x15b   :  { %6819 = vmatpush1.bf16.msra.mxu0 %v10316_v5  ;;  %7667 = vmatpush1.bf16.msra.mxu1 %v10319_v6  ;;  %v10400_v5 = vld [vmem:[%s14793_s1 + $0xc80] ss:$16 sps:$4 sm:$0xff]   ;;  %v10403_v6 = vld [vmem:[%s14793_s1 + $0xc88] ss:$16 sps:$4 sm:$0xff]  }
 0x15c   :  { %6820 = vmatprep.subr.bf16.mxu0 %v10324_v7  ;;  %7668 = vmatprep.subr.bf16.mxu1 %v10327_v8  ;;  %v10408_v7 = vld [vmem:[%s14793_s1 + $0xca4] ss:$16 sps:$4 sm:$0xff]   ;;  %v10411_v8 = vld [vmem:[%s14793_s1 + $0xcac] ss:$16 sps:$4 sm:$0xff]  }
 0x15f   :  { %6821 = vmatpush1.bf16.msra.mxu0 %v10322_v9  ;;  %7669 = vmatpush1.bf16.msra.mxu1 %v10325_v10  ;;  %v10406_v9 = vld [vmem:[%s14793_s1 + $0xca0] ss:$16 sps:$4 sm:$0xff]   ;;  %v10409_v10 = vld [vmem:[%s14793_s1 + $0xca8] ss:$16 sps:$4 sm:$0xff]  }
 0x160   :  { %6822 = vmatprep.subr.bf16.mxu0 %v10330_v11  ;;  %7670 = vmatprep.subr.bf16.mxu1 %v10333_v12  ;;  %v10414_v11 = vld [vmem:[%s14793_s1 + $0xcc4] ss:$16 sps:$4 sm:$0xff]   ;;  %v10417_v12 = vld [vmem:[%s14793_s1 + $0xccc] ss:$16 sps:$4 sm:$0xff]  }
 0x163   :  { %6823 = vmatpush1.bf16.msra.mxu0 %v10328_v13  ;;  %7671 = vmatpush1.bf16.msra.mxu1 %v10331_v14  ;;  %v10412_v13 = vld [vmem:[%s14793_s1 + $0xcc0] ss:$16 sps:$4 sm:$0xff]   ;;  %v10415_v14 = vld [vmem:[%s14793_s1 + $0xcc8] ss:$16 sps:$4 sm:$0xff]  }
 0x164   :  { %6824 = vmatprep.subr.bf16.mxu0 %v10336_v15  ;;  %7672 = vmatprep.subr.bf16.mxu1 %v10339_v16  ;;  %v10420_v15 = vld [vmem:[%s14793_s1 + $0xce4] ss:$16 sps:$4 sm:$0xff]   ;;  %v10423_v16 = vld [vmem:[%s14793_s1 + $0xcec] ss:$16 sps:$4 sm:$0xff]  }
 0x167   :  { %6825 = vmatpush1.bf16.msra.mxu0 %v10334_v17  ;;  %7673 = vmatpush1.bf16.msra.mxu1 %v10337_v18  ;;  %v10418_v17 = vld [vmem:[%s14793_s1 + $0xce0] ss:$16 sps:$4 sm:$0xff]   ;;  %v10421_v18 = vld [vmem:[%s14793_s1 + $0xce8] ss:$16 sps:$4 sm:$0xff]  }
 0x168   :  { %6826 = vmatprep.subr.bf16.mxu0 %v10342_v19  ;;  %7674 = vmatprep.subr.bf16.mxu1 %v10345_v20  ;;  %v10426_v19 = vld [vmem:[%s14793_s1 + $0xd04] ss:$16 sps:$4 sm:$0xff]   ;;  %v10429_v20 = vld [vmem:[%s14793_s1 + $0xd0c] ss:$16 sps:$4 sm:$0xff]  }
 0x16b   :  { %6827 = vmatpush1.bf16.msra.mxu0 %v10340_v21  ;;  %7675 = vmatpush1.bf16.msra.mxu1 %v10343_v22  ;;  %v10424_v21 = vld [vmem:[%s14793_s1 + $0xd00] ss:$16 sps:$4 sm:$0xff]   ;;  %v10427_v22 = vld [vmem:[%s14793_s1 + $0xd08] ss:$16 sps:$4 sm:$0xff]  }
 0x16c   :  { %6828 = vmatprep.subr.bf16.mxu0 %v10348_v23  ;;  %7676 = vmatprep.subr.bf16.mxu1 %v10351_v24  ;;  %v10432_v23 = vld [vmem:[%s14793_s1 + $0xd24] ss:$16 sps:$4 sm:$0xff]   ;;  %v10435_v24 = vld [vmem:[%s14793_s1 + $0xd2c] ss:$16 sps:$4 sm:$0xff]  }
 0x16f   :  { %6829 = vmatpush1.bf16.msra.mxu0 %v10346_v26  ;;  %7677 = vmatpush1.bf16.msra.mxu1 %v10349_v25  ;;  %v10430_v26 = vld [vmem:[%s14793_s1 + $0xd20] ss:$16 sps:$4 sm:$0xff]   ;;  %v10433_v25 = vld [vmem:[%s14793_s1 + $0xd28] ss:$16 sps:$4 sm:$0xff]  }
 0x170   :  { %6830 = vmatprep.subr.bf16.mxu0 %v10354_v27  ;;  %7678 = vmatprep.subr.bf16.mxu1 %v10357_v28  ;;  %v10438_v27 = vld [vmem:[%s14793_s1 + $0xd44] ss:$16 sps:$4 sm:$0xff]   ;;  %v10441_v28 = vld [vmem:[%s14793_s1 + $0xd4c] ss:$16 sps:$4 sm:$0xff]  }
 0x173   :  { %6831 = vmatpush1.bf16.msra.mxu0 %v10352_v29  ;;  %7679 = vmatpush1.bf16.msra.mxu1 %v10355_v30  ;;  %v10436_v29 = vld [vmem:[%s14793_s1 + $0xd40] ss:$16 sps:$4 sm:$0xff]   ;;  %v10439_v30 = vld [vmem:[%s14793_s1 + $0xd48] ss:$16 sps:$4 sm:$0xff]  }
 0x174   :  { %6832 = vmatprep.subr.bf16.mxu0 %v10360_v31  ;;  %7680 = vmatprep.subr.bf16.mxu1 %v10363_v32  ;;  %v10444_v31 = vld [vmem:[%s14793_s1 + $0xd64] ss:$16 sps:$4 sm:$0xff]   ;;  %v10447_v32 = vld [vmem:[%s14793_s1 + $0xd6c] ss:$16 sps:$4 sm:$0xff]  }
 0x177   :  { %6833 = vmatpush1.bf16.msra.mxu0 %v10358_v34  ;;  %7681 = vmatpush1.bf16.msra.mxu1 %v10361_v36  ;;  %v10442_v34 = vld [vmem:[%s14793_s1 + $0xd60] ss:$16 sps:$4 sm:$0xff]   ;;  %v10445_v36 = vld [vmem:[%s14793_s1 + $0xd68] ss:$16 sps:$4 sm:$0xff]  }
 0x178   :  { %6834 = vmatprep.subr.bf16.mxu0 %v10366_v33  ;;  %7682 = vmatprep.subr.bf16.mxu1 %v10369_v35  ;;  %v10450_v33 = vld [vmem:[%s14793_s1 + $0xd84] ss:$16 sps:$4 sm:$0xff]   ;;  %v10453_v35 = vld [vmem:[%s14793_s1 + $0xd8c] ss:$16 sps:$4 sm:$0xff]  }
 0x17b   :  { %6835 = vmatpush1.bf16.msra.mxu0 %v10364_v37  ;;  %7683 = vmatpush1.bf16.msra.mxu1 %v10367_v38  ;;  %v10448_v37 = vld [vmem:[%s14793_s1 + $0xd80] ss:$16 sps:$4 sm:$0xff]   ;;  %v10451_v38 = vld [vmem:[%s14793_s1 + $0xd88] ss:$16 sps:$4 sm:$0xff]  }
 0x17c   :  { %6836 = vmatprep.subr.bf16.mxu0 %v10372_v39  ;;  %7684 = vmatprep.subr.bf16.mxu1 %v10375_v40  ;;  %v10456_v39 = vld [vmem:[%s14793_s1 + $0xda4] ss:$16 sps:$4 sm:$0xff]   ;;  %v10459_v40 = vld [vmem:[%s14793_s1 + $0xdac] ss:$16 sps:$4 sm:$0xff]  }
 0x17f   :  { %6837 = vmatpush1.bf16.msra.mxu0 %v10370_v42  ;;  %7685 = vmatpush1.bf16.msra.mxu1 %v10373_v44  ;;  %v10454_v42 = vld [vmem:[%s14793_s1 + $0xda0] ss:$16 sps:$4 sm:$0xff]   ;;  %v10457_v44 = vld [vmem:[%s14793_s1 + $0xda8] ss:$16 sps:$4 sm:$0xff]  }
 0x180   :  { %6859 = vmatprep.subr.bf16.mxu0 %v10378_v41  ;;  %7707 = vmatprep.subr.bf16.mxu1 %v10381_v43  ;;  %v10462_v41 = vld [vmem:[%s14793_s1 + $0xdc4] ss:$16 sps:$4 sm:$0xff]   ;;  %v10465_v43 = vld [vmem:[%s14793_s1 + $0xdcc] ss:$16 sps:$4 sm:$0xff]  }
 0x182   :  { %6839 = vmatmul.mubr.bf16.vlgmr.msra.gmra.mrb[0].mxu0 %v8464_v47  ;;  %7687 = vmatmul.mubr.bf16.vlgmr.msra.gmra.mrb[0].mxu1 %v8464_v47  ;;  %v10468_v47 = vld [vmem:[%s14793_s1 + $0xde4] ss:$16 sps:$4 sm:$0xff]  }
 0x183   :  { %6860 = vmatpush1.bf16.msra.mxu0 %v10376_v48  ;;  %7708 = vmatpush1.bf16.msra.mxu1 %v10379_v51  ;;  %v10471_v48 = vld [vmem:[%s14793_s1 + $0xdec] ss:$16 sps:$4 sm:$0xff]   ;;  %v10466_v51 = vld [vmem:[%s14793_s1 + $0xde0] ss:$16 sps:$4 sm:$0xff]  }
 0x184   :  { %6861 = vmatprep.subr.bf16.mxu0 %v10384_v52  ;;  %7709 = vmatprep.subr.bf16.mxu1 %v10387_v49  ;;  %v10469_v52 = vld [vmem:[%s14793_s1 + $0xde8] ss:$16 sps:$4 sm:$0xff]   ;;  %v10474_v49 = vld [vmem:[%s14793_s1 + $0xe04] ss:$16 sps:$4 sm:$0xff]  }
 0x185   :  { %6848 = vmatprep.mubr.bf16.mxu0 %v8497_v54  ;;  %7696 = vmatprep.mubr.bf16.mxu1 %v8497_v54  ;;  %v67_v54 = vld [vmem:[%s14794_s0 + $0x1b0] sm:$0xff] }
 0x187   :  { %6862 = vmatpush1.bf16.msra.mxu0 %v10382_v50  ;;  %7710 = vmatpush1.bf16.msra.mxu1 %v10385_v53  ;;  %v10477_v50 = vld [vmem:[%s14793_s1 + $0xe0c] ss:$16 sps:$4 sm:$0xff]   ;;  %v51_v53 = vld [vmem:[%s14794_s0 + $0x130] sm:$0xff] }
 0x188   :  { %6863 = vmatprep.subr.bf16.mxu0 %v10390_v55  ;;  %7711 = vmatprep.subr.bf16.mxu1 %v10393_v56  ;;  %v8466_v55 = vcombine.low %v12654_v57, %v12659_v58  ;;  %v10472_v56 = vld [vmem:[%s14793_s1 + $0xe00] ss:$16 sps:$4 sm:$0xff]   ;;  %v10483_v57 = vld [vmem:[%s14793_s1 + $0xe2c] ss:$16 sps:$4 sm:$0xff]  }
 0x189   :  { %v10478_v58 = vld [vmem:[%s14793_s1 + $0xe20] ss:$16 sps:$4 sm:$0xff]  }
 0x18a   :  { %6849 = vmatmul.mubr.bf16.gmra.mrb[4].mxu0 %v8496_v59  ;;  %7697 = vmatmul.mubr.bf16.gmra.mrb[4].mxu1 %v8496_v59  ;;  %v10475_v59 = vld [vmem:[%s14793_s1 + $0xe08] ss:$16 sps:$4 sm:$0xff]  }
 0x18b   :  { %6864 = vmatpush1.bf16.msra.mxu0 %v10388_v60  ;;  %7712 = vmatpush1.bf16.msra.mxu1 %v10391_v61  ;;  %v10480_v60 = vld [vmem:[%s14793_s1 + $0xe24] ss:$16 sps:$4 sm:$0xff]   ;;  %v10481_v61 = vld [vmem:[%s14793_s1 + $0xe28] ss:$16 sps:$4 sm:$0xff]  }
 0x18c   :  { %6865 = vmatprep.subr.bf16.mxu0 %v10396_v62  ;;  %7713 = vmatprep.subr.bf16.mxu1 %v10399_v63  ;;  %v8499_v62 = vcombine.high %v51_v53, %v67_v54  ;;  %v10486_v63 = vld [vmem:[%s14793_s1 + $0xe44] ss:$16 sps:$4 sm:$0xff]  }
 0x18d   :  { %6891 = vmatprep.mubr.bf16.mxu0 %v8467_v0  ;;  %7739 = vmatprep.mubr.bf16.mxu1 %v8467_v0  ;;  %v10489_v0 = vld [vmem:[%s14793_s1 + $0xe4c] ss:$16 sps:$4 sm:$0xff]  }
 0x18f   :  { %6866 = vmatpush1.bf16.msra.mxu0 %v10394_v1  ;;  %7714 = vmatpush1.bf16.msra.mxu1 %v10397_v2  ;;  %v12866_v1 = vld [vmem:[%s14794_s0 + $0x38] sm:$0xff] }
 0x190   :  { %6867 = vmatprep.subr.bf16.mxu0 %v10402_v3  ;;  %7715 = vmatprep.subr.bf16.mxu1 %v10405_v4  ;;  %v12871_v2 = vld [vmem:[%s14794_s0 + $0xb8] sm:$0xff]  ;;  %v8498_v3 = vcombine.low %v51_v53, %v67_v54  ;;  %v10484_v4 = vld [vmem:[%s14793_s1 + $0xe40] ss:$16 sps:$4 sm:$0xff]  }
 0x191   :  { %v10556_v53 = vld [vmem:[%s14793_s1 + $0xfc0] ss:$16 sps:$4 sm:$0xff]   ;;  %v10559_v54 = vld [vmem:[%s14793_s1 + $0xfc8] ss:$16 sps:$4 sm:$0xff]  }
 0x193   :  { %6868 = vmatpush1.bf16.msra.mxu0 %v10400_v5  ;;  %7716 = vmatpush1.bf16.msra.mxu1 %v10403_v6  ;;  %v10487_v5 = vld [vmem:[%s14793_s1 + $0xe48] ss:$16 sps:$4 sm:$0xff]   ;;  %v10492_v6 = vld [vmem:[%s14793_s1 + $0xe64] ss:$16 sps:$4 sm:$0xff]  }
 0x194   :  { %6869 = vmatprep.subr.bf16.mxu0 %v10408_v7  ;;  %7717 = vmatprep.subr.bf16.mxu1 %v10411_v8  ;;  %v10495_v7 = vld [vmem:[%s14793_s1 + $0xe6c] ss:$16 sps:$4 sm:$0xff]   ;;  %v8469_v8 = vcombine.high %v12866_v1, %v12871_v2 }
 0x197   :  { %6870 = vmatpush1.bf16.msra.mxu0 %v10406_v9  ;;  %7718 = vmatpush1.bf16.msra.mxu1 %v10409_v10  ;;  %v10490_v9 = vld [vmem:[%s14793_s1 + $0xe60] ss:$16 sps:$4 sm:$0xff]   ;;  %v10493_v10 = vld [vmem:[%s14793_s1 + $0xe68] ss:$16 sps:$4 sm:$0xff]  }
 0x198   :  { %6871 = vmatprep.subr.bf16.mxu0 %v10414_v11  ;;  %7719 = vmatprep.subr.bf16.mxu1 %v10417_v12  ;;  %v10498_v11 = vld [vmem:[%s14793_s1 + $0xe84] ss:$16 sps:$4 sm:$0xff]   ;;  %v10501_v12 = vld [vmem:[%s14793_s1 + $0xe8c] ss:$16 sps:$4 sm:$0xff]  }
 0x19b   :  { %6872 = vmatpush1.bf16.msra.mxu0 %v10412_v13  ;;  %7720 = vmatpush1.bf16.msra.mxu1 %v10415_v14  ;;  %v10496_v13 = vld [vmem:[%s14793_s1 + $0xe80] ss:$16 sps:$4 sm:$0xff]   ;;  %v10499_v14 = vld [vmem:[%s14793_s1 + $0xe88] ss:$16 sps:$4 sm:$0xff]  }
 0x19c   :  { %6873 = vmatprep.subr.bf16.mxu0 %v10420_v15  ;;  %7721 = vmatprep.subr.bf16.mxu1 %v10423_v16  ;;  %v10504_v15 = vld [vmem:[%s14793_s1 + $0xea4] ss:$16 sps:$4 sm:$0xff]   ;;  %v10507_v16 = vld [vmem:[%s14793_s1 + $0xeac] ss:$16 sps:$4 sm:$0xff]  }
 0x19f   :  { %6874 = vmatpush1.bf16.msra.mxu0 %v10418_v17  ;;  %7722 = vmatpush1.bf16.msra.mxu1 %v10421_v18  ;;  %v10502_v17 = vld [vmem:[%s14793_s1 + $0xea0] ss:$16 sps:$4 sm:$0xff]   ;;  %v10505_v18 = vld [vmem:[%s14793_s1 + $0xea8] ss:$16 sps:$4 sm:$0xff]  }
 0x1a0   :  { %6875 = vmatprep.subr.bf16.mxu0 %v10426_v19  ;;  %7723 = vmatprep.subr.bf16.mxu1 %v10429_v20  ;;  %v10510_v19 = vld [vmem:[%s14793_s1 + $0xec4] ss:$16 sps:$4 sm:$0xff]   ;;  %v10513_v20 = vld [vmem:[%s14793_s1 + $0xecc] ss:$16 sps:$4 sm:$0xff]  }
 0x1a3   :  { %6876 = vmatpush1.bf16.msra.mxu0 %v10424_v21  ;;  %7724 = vmatpush1.bf16.msra.mxu1 %v10427_v22  ;;  %v10508_v21 = vld [vmem:[%s14793_s1 + $0xec0] ss:$16 sps:$4 sm:$0xff]   ;;  %v10511_v22 = vld [vmem:[%s14793_s1 + $0xec8] ss:$16 sps:$4 sm:$0xff]  }
 0x1a4   :  { %6877 = vmatprep.subr.bf16.mxu0 %v10432_v23  ;;  %7725 = vmatprep.subr.bf16.mxu1 %v10435_v24  ;;  %v10516_v23 = vld [vmem:[%s14793_s1 + $0xee4] ss:$16 sps:$4 sm:$0xff]   ;;  %v10519_v24 = vld [vmem:[%s14793_s1 + $0xeec] ss:$16 sps:$4 sm:$0xff]  }
 0x1a7   :  { %6878 = vmatpush1.bf16.msra.mxu0 %v10430_v26  ;;  %7726 = vmatpush1.bf16.msra.mxu1 %v10433_v25  ;;  %v10514_v26 = vld [vmem:[%s14793_s1 + $0xee0] ss:$16 sps:$4 sm:$0xff]   ;;  %v10517_v25 = vld [vmem:[%s14793_s1 + $0xee8] ss:$16 sps:$4 sm:$0xff]  }
 0x1a8   :  { %6879 = vmatprep.subr.bf16.mxu0 %v10438_v27  ;;  %7727 = vmatprep.subr.bf16.mxu1 %v10441_v28  ;;  %v10522_v27 = vld [vmem:[%s14793_s1 + $0xf04] ss:$16 sps:$4 sm:$0xff]   ;;  %v10525_v28 = vld [vmem:[%s14793_s1 + $0xf0c] ss:$16 sps:$4 sm:$0xff]  }
 0x1ab   :  { %6880 = vmatpush1.bf16.msra.mxu0 %v10436_v29  ;;  %7728 = vmatpush1.bf16.msra.mxu1 %v10439_v30  ;;  %v10520_v29 = vld [vmem:[%s14793_s1 + $0xf00] ss:$16 sps:$4 sm:$0xff]   ;;  %v10523_v30 = vld [vmem:[%s14793_s1 + $0xf08] ss:$16 sps:$4 sm:$0xff]  }
 0x1ac   :  { %6881 = vmatprep.subr.bf16.mxu0 %v10444_v31  ;;  %7729 = vmatprep.subr.bf16.mxu1 %v10447_v32  ;;  %v10528_v31 = vld [vmem:[%s14793_s1 + $0xf24] ss:$16 sps:$4 sm:$0xff]   ;;  %v10531_v32 = vld [vmem:[%s14793_s1 + $0xf2c] ss:$16 sps:$4 sm:$0xff]  }
 0x1af   :  { %6882 = vmatpush1.bf16.msra.mxu0 %v10442_v34  ;;  %7730 = vmatpush1.bf16.msra.mxu1 %v10445_v36  ;;  %v10526_v34 = vld [vmem:[%s14793_s1 + $0xf20] ss:$16 sps:$4 sm:$0xff]   ;;  %v10529_v36 = vld [vmem:[%s14793_s1 + $0xf28] ss:$16 sps:$4 sm:$0xff]  }
 0x1b0   :  { %6883 = vmatprep.subr.bf16.mxu0 %v10450_v33  ;;  %7731 = vmatprep.subr.bf16.mxu1 %v10453_v35  ;;  %v10534_v33 = vld [vmem:[%s14793_s1 + $0xf44] ss:$16 sps:$4 sm:$0xff]   ;;  %v10537_v35 = vld [vmem:[%s14793_s1 + $0xf4c] ss:$16 sps:$4 sm:$0xff]  }
 0x1b3   :  { %6884 = vmatpush1.bf16.msra.mxu0 %v10448_v37  ;;  %7732 = vmatpush1.bf16.msra.mxu1 %v10451_v38  ;;  %v10532_v37 = vld [vmem:[%s14793_s1 + $0xf40] ss:$16 sps:$4 sm:$0xff]   ;;  %v10535_v38 = vld [vmem:[%s14793_s1 + $0xf48] ss:$16 sps:$4 sm:$0xff]  }
 0x1b4   :  { %6885 = vmatprep.subr.bf16.mxu0 %v10456_v39  ;;  %7733 = vmatprep.subr.bf16.mxu1 %v10459_v40  ;;  %v10540_v39 = vld [vmem:[%s14793_s1 + $0xf64] ss:$16 sps:$4 sm:$0xff]   ;;  %v10543_v40 = vld [vmem:[%s14793_s1 + $0xf6c] ss:$16 sps:$4 sm:$0xff]  }
 0x1b7   :  { %6886 = vmatpush1.bf16.msra.mxu0 %v10454_v42  ;;  %7734 = vmatpush1.bf16.msra.mxu1 %v10457_v44  ;;  %v10538_v42 = vld [vmem:[%s14793_s1 + $0xf60] ss:$16 sps:$4 sm:$0xff]   ;;  %v10541_v44 = vld [vmem:[%s14793_s1 + $0xf68] ss:$16 sps:$4 sm:$0xff]  }
 0x1b8   :  { %6887 = vmatprep.subr.bf16.mxu0 %v10462_v41  ;;  %7735 = vmatprep.subr.bf16.mxu1 %v10465_v43  ;;  %v10546_v41 = vld [vmem:[%s14793_s1 + $0xf84] ss:$16 sps:$4 sm:$0xff]   ;;  %v10549_v43 = vld [vmem:[%s14793_s1 + $0xf8c] ss:$16 sps:$4 sm:$0xff]  }
 0x1bb   :  { %6888 = vmatpush1.bf16.msra.mxu0 %v10460_v45  ;;  %7736 = vmatpush1.bf16.msra.mxu1 %v10463_v46  ;;  %v10544_v45 = vld [vmem:[%s14793_s1 + $0xf80] ss:$16 sps:$4 sm:$0xff]   ;;  %v10547_v46 = vld [vmem:[%s14793_s1 + $0xf88] ss:$16 sps:$4 sm:$0xff]  }
 0x1bc   :  { %6889 = vmatprep.subr.bf16.mxu0 %v10468_v47  ;;  %7737 = vmatprep.subr.bf16.mxu1 %v10471_v48  ;;  %v10552_v47 = vld [vmem:[%s14793_s1 + $0xfa4] ss:$16 sps:$4 sm:$0xff]   ;;  %v10555_v48 = vld [vmem:[%s14793_s1 + $0xfac] ss:$16 sps:$4 sm:$0xff]  }
 0x1bf   :  { %6890 = vmatpush1.bf16.msra.mxu0 %v10466_v51  ;;  %7738 = vmatpush1.bf16.msra.mxu1 %v10469_v52  ;;  %v10550_v51 = vld [vmem:[%s14793_s1 + $0xfa0] ss:$16 sps:$4 sm:$0xff]   ;;  %v10553_v52 = vld [vmem:[%s14793_s1 + $0xfa8] ss:$16 sps:$4 sm:$0xff]  }
 0x1c0   :  { %6912 = vmatprep.subr.bf16.mxu0 %v10474_v49  ;;  %7760 = vmatprep.subr.bf16.mxu1 %v10477_v50  ;;  %v10558_v49 = vld [vmem:[%s14793_s1 + $0xfc4] ss:$16 sps:$4 sm:$0xff]   ;;  %v10561_v50 = vld [vmem:[%s14793_s1 + $0xfcc] ss:$16 sps:$4 sm:$0xff]  }
 0x1c2   :  { %6892 = vmatmul.mubr.bf16.vlgmr.msra.gmra.mrb[0].mxu0 %v8466_v55  ;;  %7740 = vmatmul.mubr.bf16.vlgmr.msra.gmra.mrb[0].mxu1 %v8466_v55  ;;  %v10564_v55 = vld [vmem:[%s14793_s1 + $0xfe4] ss:$16 sps:$4 sm:$0xff]  }
 0x1c3   :  { %6913 = vmatpush1.bf16.msra.mxu0 %v10472_v56  ;;  %7761 = vmatpush1.bf16.msra.mxu1 %v10475_v59  ;;  %v10567_v56 = vld [vmem:[%s14793_s1 + $0xfec] ss:$16 sps:$4 sm:$0xff]   ;;  %v10562_v59 = vld [vmem:[%s14793_s1 + $0xfe0] ss:$16 sps:$4 sm:$0xff]  }
 0x1c4   :  { %6914 = vmatprep.subr.bf16.mxu0 %v10480_v60  ;;  %7762 = vmatprep.subr.bf16.mxu1 %v10483_v57  ;;  %v10565_v60 = vld [vmem:[%s14793_s1 + $0xfe8] ss:$16 sps:$4 sm:$0xff]   ;;  %v10570_v57 = vld [vmem:[%s14793_s1 + $0x1004] ss:$16 sps:$4 sm:$0xff]  }
 0x1c5   :  { %6901 = vmatprep.mubr.bf16.mxu0 %v8499_v62  ;;  %7749 = vmatprep.mubr.bf16.mxu1 %v8499_v62  ;;  %v68_v62 = vld [vmem:[%s14794_s0 + $0x1b8] sm:$0xff] }
 0x1c7   :  { %6915 = vmatpush1.bf16.msra.mxu0 %v10478_v58  ;;  %7763 = vmatpush1.bf16.msra.mxu1 %v10481_v61  ;;  %v10573_v58 = vld [vmem:[%s14793_s1 + $0x100c] ss:$16 sps:$4 sm:$0xff]  }
 0x1c8   :  { %6916 = vmatprep.subr.bf16.mxu0 %v10486_v63  ;;  %7764 = vmatprep.subr.bf16.mxu1 %v10489_v0  ;;  %v52_v61 = vld [vmem:[%s14794_s0 + $0x138] sm:$0xff]  ;;  %v8468_v63 = vcombine.low %v12866_v1, %v12871_v2  ;;  %v10568_v0 = vld [vmem:[%s14793_s1 + $0x1000] ss:$16 sps:$4 sm:$0xff]  }
 0x1c9   :  { %v10579_v1 = vld [vmem:[%s14793_s1 + $0x102c] ss:$16 sps:$4 sm:$0xff]   ;;  %v10574_v2 = vld [vmem:[%s14793_s1 + $0x1020] ss:$16 sps:$4 sm:$0xff]  }
 0x1ca   :  { %6902 = vmatmul.mubr.bf16.gmra.mrb[4].mxu0 %v8498_v3  ;;  %7750 = vmatmul.mubr.bf16.gmra.mrb[4].mxu1 %v8498_v3  ;;  %v10571_v3 = vld [vmem:[%s14793_s1 + $0x1008] ss:$16 sps:$4 sm:$0xff]  }
 0x1cb   :  { %6917 = vmatpush1.bf16.msra.mxu0 %v10484_v4  ;;  %7765 = vmatpush1.bf16.msra.mxu1 %v10487_v5  ;;  %v10576_v4 = vld [vmem:[%s14793_s1 + $0x1024] ss:$16 sps:$4 sm:$0xff]   ;;  %v10577_v5 = vld [vmem:[%s14793_s1 + $0x1028] ss:$16 sps:$4 sm:$0xff]  }
 0x1cc   :  { %6918 = vmatprep.subr.bf16.mxu0 %v10492_v6  ;;  %7766 = vmatprep.subr.bf16.mxu1 %v10495_v7  ;;  %v8501_v6 = vcombine.high %v52_v61, %v68_v62  ;;  %v10582_v7 = vld [vmem:[%s14793_s1 + $0x1044] ss:$16 sps:$4 sm:$0xff]  }
 0x1cd   :  { %6944 = vmatprep.mubr.bf16.mxu0 %v8469_v8  ;;  %7792 = vmatprep.mubr.bf16.mxu1 %v8469_v8  ;;  %v10585_v8 = vld [vmem:[%s14793_s1 + $0x104c] ss:$16 sps:$4 sm:$0xff]  }
 0x1cf   :  { %6919 = vmatpush1.bf16.msra.mxu0 %v10490_v9  ;;  %7767 = vmatpush1.bf16.msra.mxu1 %v10493_v10  ;;  %v13078_v9 = vld [vmem:[%s14794_s0 + $0x40] sm:$0xff] }
 0x1d0   :  { %6920 = vmatprep.subr.bf16.mxu0 %v10498_v11  ;;  %7768 = vmatprep.subr.bf16.mxu1 %v10501_v12  ;;  %v13083_v10 = vld [vmem:[%s14794_s0 + $0xc0] sm:$0xff]  ;;  %v8500_v11 = vcombine.low %v52_v61, %v68_v62  ;;  %v10655_v62 = vld [vmem:[%s14793_s1 + $0x11c8] ss:$16 sps:$4 sm:$0xff]  }
 0x1d1   :  { %v10580_v12 = vld [vmem:[%s14793_s1 + $0x1040] ss:$16 sps:$4 sm:$0xff]  }
 0x1d2   :  { %v10652_v61 = vld [vmem:[%s14793_s1 + $0x11c0] ss:$16 sps:$4 sm:$0xff]  }
 0x1d3   :  { %6921 = vmatpush1.bf16.msra.mxu0 %v10496_v13  ;;  %7769 = vmatpush1.bf16.msra.mxu1 %v10499_v14  ;;  %v10583_v13 = vld [vmem:[%s14793_s1 + $0x1048] ss:$16 sps:$4 sm:$0xff]   ;;  %v10588_v14 = vld [vmem:[%s14793_s1 + $0x1064] ss:$16 sps:$4 sm:$0xff]  }
 0x1d4   :  { %6922 = vmatprep.subr.bf16.mxu0 %v10504_v15  ;;  %7770 = vmatprep.subr.bf16.mxu1 %v10507_v16  ;;  %v10591_v15 = vld [vmem:[%s14793_s1 + $0x106c] ss:$16 sps:$4 sm:$0xff]   ;;  %v8471_v16 = vcombine.high %v13078_v9, %v13083_v10 }
 0x1d7   :  { %6923 = vmatpush1.bf16.msra.mxu0 %v10502_v17  ;;  %7771 = vmatpush1.bf16.msra.mxu1 %v10505_v18  ;;  %v10586_v17 = vld [vmem:[%s14793_s1 + $0x1060] ss:$16 sps:$4 sm:$0xff]   ;;  %v10589_v18 = vld [vmem:[%s14793_s1 + $0x1068] ss:$16 sps:$4 sm:$0xff]  }
 0x1d8   :  { %6924 = vmatprep.subr.bf16.mxu0 %v10510_v19  ;;  %7772 = vmatprep.subr.bf16.mxu1 %v10513_v20  ;;  %v10594_v19 = vld [vmem:[%s14793_s1 + $0x1084] ss:$16 sps:$4 sm:$0xff]   ;;  %v10597_v20 = vld [vmem:[%s14793_s1 + $0x108c] ss:$16 sps:$4 sm:$0xff]  }
 0x1db   :  { %6925 = vmatpush1.bf16.msra.mxu0 %v10508_v21  ;;  %7773 = vmatpush1.bf16.msra.mxu1 %v10511_v22  ;;  %v10592_v21 = vld [vmem:[%s14793_s1 + $0x1080] ss:$16 sps:$4 sm:$0xff]   ;;  %v10595_v22 = vld [vmem:[%s14793_s1 + $0x1088] ss:$16 sps:$4 sm:$0xff]  }
 0x1dc   :  { %6926 = vmatprep.subr.bf16.mxu0 %v10516_v23  ;;  %7774 = vmatprep.subr.bf16.mxu1 %v10519_v24  ;;  %v10600_v23 = vld [vmem:[%s14793_s1 + $0x10a4] ss:$16 sps:$4 sm:$0xff]   ;;  %v10603_v24 = vld [vmem:[%s14793_s1 + $0x10ac] ss:$16 sps:$4 sm:$0xff]  }
 0x1df   :  { %6927 = vmatpush1.bf16.msra.mxu0 %v10514_v26  ;;  %7775 = vmatpush1.bf16.msra.mxu1 %v10517_v25  ;;  %v10598_v26 = vld [vmem:[%s14793_s1 + $0x10a0] ss:$16 sps:$4 sm:$0xff]   ;;  %v10601_v25 = vld [vmem:[%s14793_s1 + $0x10a8] ss:$16 sps:$4 sm:$0xff]  }
 0x1e0   :  { %6928 = vmatprep.subr.bf16.mxu0 %v10522_v27  ;;  %7776 = vmatprep.subr.bf16.mxu1 %v10525_v28  ;;  %v10606_v27 = vld [vmem:[%s14793_s1 + $0x10c4] ss:$16 sps:$4 sm:$0xff]   ;;  %v10609_v28 = vld [vmem:[%s14793_s1 + $0x10cc] ss:$16 sps:$4 sm:$0xff]  }
 0x1e3   :  { %6929 = vmatpush1.bf16.msra.mxu0 %v10520_v29  ;;  %7777 = vmatpush1.bf16.msra.mxu1 %v10523_v30  ;;  %v10604_v29 = vld [vmem:[%s14793_s1 + $0x10c0] ss:$16 sps:$4 sm:$0xff]   ;;  %v10607_v30 = vld [vmem:[%s14793_s1 + $0x10c8] ss:$16 sps:$4 sm:$0xff]  }
 0x1e4   :  { %6930 = vmatprep.subr.bf16.mxu0 %v10528_v31  ;;  %7778 = vmatprep.subr.bf16.mxu1 %v10531_v32  ;;  %v10612_v31 = vld [vmem:[%s14793_s1 + $0x10e4] ss:$16 sps:$4 sm:$0xff]   ;;  %v10615_v32 = vld [vmem:[%s14793_s1 + $0x10ec] ss:$16 sps:$4 sm:$0xff]  }
 0x1e7   :  { %6931 = vmatpush1.bf16.msra.mxu0 %v10526_v34  ;;  %7779 = vmatpush1.bf16.msra.mxu1 %v10529_v36  ;;  %v10610_v34 = vld [vmem:[%s14793_s1 + $0x10e0] ss:$16 sps:$4 sm:$0xff]   ;;  %v10613_v36 = vld [vmem:[%s14793_s1 + $0x10e8] ss:$16 sps:$4 sm:$0xff]  }
 0x1e8   :  { %6932 = vmatprep.subr.bf16.mxu0 %v10534_v33  ;;  %7780 = vmatprep.subr.bf16.mxu1 %v10537_v35  ;;  %v10618_v33 = vld [vmem:[%s14793_s1 + $0x1104] ss:$16 sps:$4 sm:$0xff]   ;;  %v10621_v35 = vld [vmem:[%s14793_s1 + $0x110c] ss:$16 sps:$4 sm:$0xff]  }
 0x1eb   :  { %6933 = vmatpush1.bf16.msra.mxu0 %v10532_v37  ;;  %7781 = vmatpush1.bf16.msra.mxu1 %v10535_v38  ;;  %v10616_v37 = vld [vmem:[%s14793_s1 + $0x1100] ss:$16 sps:$4 sm:$0xff]   ;;  %v10619_v38 = vld [vmem:[%s14793_s1 + $0x1108] ss:$16 sps:$4 sm:$0xff]  }
 0x1ec   :  { %6934 = vmatprep.subr.bf16.mxu0 %v10540_v39  ;;  %7782 = vmatprep.subr.bf16.mxu1 %v10543_v40  ;;  %v10624_v39 = vld [vmem:[%s14793_s1 + $0x1124] ss:$16 sps:$4 sm:$0xff]   ;;  %v10627_v40 = vld [vmem:[%s14793_s1 + $0x112c] ss:$16 sps:$4 sm:$0xff]  }
 0x1ef   :  { %6935 = vmatpush1.bf16.msra.mxu0 %v10538_v42  ;;  %7783 = vmatpush1.bf16.msra.mxu1 %v10541_v44  ;;  %v10622_v42 = vld [vmem:[%s14793_s1 + $0x1120] ss:$16 sps:$4 sm:$0xff]   ;;  %v10625_v44 = vld [vmem:[%s14793_s1 + $0x1128] ss:$16 sps:$4 sm:$0xff]  }
 0x1f0   :  { %6936 = vmatprep.subr.bf16.mxu0 %v10546_v41  ;;  %7784 = vmatprep.subr.bf16.mxu1 %v10549_v43  ;;  %v10630_v41 = vld [vmem:[%s14793_s1 + $0x1144] ss:$16 sps:$4 sm:$0xff]   ;;  %v10633_v43 = vld [vmem:[%s14793_s1 + $0x114c] ss:$16 sps:$4 sm:$0xff]  }
 0x1f3   :  { %6937 = vmatpush1.bf16.msra.mxu0 %v10544_v45  ;;  %7785 = vmatpush1.bf16.msra.mxu1 %v10547_v46  ;;  %v10628_v45 = vld [vmem:[%s14793_s1 + $0x1140] ss:$16 sps:$4 sm:$0xff]   ;;  %v10631_v46 = vld [vmem:[%s14793_s1 + $0x1148] ss:$16 sps:$4 sm:$0xff]  }
 0x1f4   :  { %6938 = vmatprep.subr.bf16.mxu0 %v10552_v47  ;;  %7786 = vmatprep.subr.bf16.mxu1 %v10555_v48  ;;  %v10636_v47 = vld [vmem:[%s14793_s1 + $0x1164] ss:$16 sps:$4 sm:$0xff]   ;;  %v10639_v48 = vld [vmem:[%s14793_s1 + $0x116c] ss:$16 sps:$4 sm:$0xff]  }
 0x1f7   :  { %6939 = vmatpush1.bf16.msra.mxu0 %v10550_v51  ;;  %7787 = vmatpush1.bf16.msra.mxu1 %v10553_v52  ;;  %v10634_v51 = vld [vmem:[%s14793_s1 + $0x1160] ss:$16 sps:$4 sm:$0xff]   ;;  %v10637_v52 = vld [vmem:[%s14793_s1 + $0x1168] ss:$16 sps:$4 sm:$0xff]  }
 0x1f8   :  { %6940 = vmatprep.subr.bf16.mxu0 %v10558_v49  ;;  %7788 = vmatprep.subr.bf16.mxu1 %v10561_v50  ;;  %v10642_v49 = vld [vmem:[%s14793_s1 + $0x1184] ss:$16 sps:$4 sm:$0xff]   ;;  %v10645_v50 = vld [vmem:[%s14793_s1 + $0x118c] ss:$16 sps:$4 sm:$0xff]  }
 0x1fb   :  { %6941 = vmatpush1.bf16.msra.mxu0 %v10556_v53  ;;  %7789 = vmatpush1.bf16.msra.mxu1 %v10559_v54  ;;  %v10640_v53 = vld [vmem:[%s14793_s1 + $0x1180] ss:$16 sps:$4 sm:$0xff]   ;;  %v10643_v54 = vld [vmem:[%s14793_s1 + $0x1188] ss:$16 sps:$4 sm:$0xff]  }
 0x1fc   :  { %6942 = vmatprep.subr.bf16.mxu0 %v10564_v55  ;;  %7790 = vmatprep.subr.bf16.mxu1 %v10567_v56  ;;  %v10648_v55 = vld [vmem:[%s14793_s1 + $0x11a4] ss:$16 sps:$4 sm:$0xff]   ;;  %v10651_v56 = vld [vmem:[%s14793_s1 + $0x11ac] ss:$16 sps:$4 sm:$0xff]  }
 0x1ff   :  { %6943 = vmatpush1.bf16.msra.mxu0 %v10562_v59  ;;  %7791 = vmatpush1.bf16.msra.mxu1 %v10565_v60  ;;  %v10646_v59 = vld [vmem:[%s14793_s1 + $0x11a0] ss:$16 sps:$4 sm:$0xff]   ;;  %v10649_v60 = vld [vmem:[%s14793_s1 + $0x11a8] ss:$16 sps:$4 sm:$0xff]  }
 0x200   :  { %6965 = vmatprep.subr.bf16.mxu0 %v10570_v57  ;;  %7813 = vmatprep.subr.bf16.mxu1 %v10573_v58  ;;  %v10654_v57 = vld [vmem:[%s14793_s1 + $0x11c4] ss:$16 sps:$4 sm:$0xff]   ;;  %v10657_v58 = vld [vmem:[%s14793_s1 + $0x11cc] ss:$16 sps:$4 sm:$0xff]  }
 0x202   :  { %6945 = vmatmul.mubr.bf16.vlgmr.msra.gmra.mrb[0].mxu0 %v8468_v63  ;;  %7793 = vmatmul.mubr.bf16.vlgmr.msra.gmra.mrb[0].mxu1 %v8468_v63  ;;  %v10660_v63 = vld [vmem:[%s14793_s1 + $0x11e4] ss:$16 sps:$4 sm:$0xff]  }
 0x203   :  { %6966 = vmatpush1.bf16.msra.mxu0 %v10568_v0  ;;  %7814 = vmatpush1.bf16.msra.mxu1 %v10571_v3  ;;  %v10663_v0 = vld [vmem:[%s14793_s1 + $0x11ec] ss:$16 sps:$4 sm:$0xff]   ;;  %v10658_v3 = vld [vmem:[%s14793_s1 + $0x11e0] ss:$16 sps:$4 sm:$0xff]  }
 0x204   :  { %6967 = vmatprep.subr.bf16.mxu0 %v10576_v4  ;;  %7815 = vmatprep.subr.bf16.mxu1 %v10579_v1  ;;  %v10661_v4 = vld [vmem:[%s14793_s1 + $0x11e8] ss:$16 sps:$4 sm:$0xff]   ;;  %v10666_v1 = vld [vmem:[%s14793_s1 + $0x1204] ss:$16 sps:$4 sm:$0xff]  }
 0x205   :  { %6954 = vmatprep.mubr.bf16.mxu0 %v8501_v6  ;;  %7802 = vmatprep.mubr.bf16.mxu1 %v8501_v6  ;;  %v69_v6 = vld [vmem:[%s14794_s0 + $0x1c0] sm:$0xff] }
 0x207   :  { %6968 = vmatpush1.bf16.msra.mxu0 %v10574_v2  ;;  %7816 = vmatpush1.bf16.msra.mxu1 %v10577_v5  ;;  %v10669_v2 = vld [vmem:[%s14793_s1 + $0x120c] ss:$16 sps:$4 sm:$0xff]   ;;  %v53_v5 = vld [vmem:[%s14794_s0 + $0x140] sm:$0xff] }
 0x208   :  { %6969 = vmatprep.subr.bf16.mxu0 %v10582_v7  ;;  %7817 = vmatprep.subr.bf16.mxu1 %v10585_v8  ;;  %v8470_v7 = vcombine.low %v13078_v9, %v13083_v10  ;;  %v10664_v8 = vld [vmem:[%s14793_s1 + $0x1200] ss:$16 sps:$4 sm:$0xff]   ;;  %v10675_v9 = vld [vmem:[%s14793_s1 + $0x122c] ss:$16 sps:$4 sm:$0xff]  }
 0x209   :  { %v10670_v10 = vld [vmem:[%s14793_s1 + $0x1220] ss:$16 sps:$4 sm:$0xff]  }
 0x20a   :  { %6955 = vmatmul.mubr.bf16.gmra.mrb[4].mxu0 %v8500_v11  ;;  %7803 = vmatmul.mubr.bf16.gmra.mrb[4].mxu1 %v8500_v11  ;;  %v10667_v11 = vld [vmem:[%s14793_s1 + $0x1208] ss:$16 sps:$4 sm:$0xff]  }
 0x20b   :  { %6970 = vmatpush1.bf16.msra.mxu0 %v10580_v12  ;;  %7818 = vmatpush1.bf16.msra.mxu1 %v10583_v13  ;;  %v10672_v12 = vld [vmem:[%s14793_s1 + $0x1224] ss:$16 sps:$4 sm:$0xff]   ;;  %v10673_v13 = vld [vmem:[%s14793_s1 + $0x1228] ss:$16 sps:$4 sm:$0xff]  }
 0x20c   :  { %6971 = vmatprep.subr.bf16.mxu0 %v10588_v14  ;;  %7819 = vmatprep.subr.bf16.mxu1 %v10591_v15  ;;  %v8503_v14 = vcombine.high %v53_v5, %v69_v6  ;;  %v10678_v15 = vld [vmem:[%s14793_s1 + $0x1244] ss:$16 sps:$4 sm:$0xff]  }
 0x20d   :  { %6997 = vmatprep.mubr.bf16.mxu0 %v8471_v16  ;;  %7845 = vmatprep.mubr.bf16.mxu1 %v8471_v16  ;;  %v10681_v16 = vld [vmem:[%s14793_s1 + $0x124c] ss:$16 sps:$4 sm:$0xff]  }
 0x20f   :  { %6972 = vmatpush1.bf16.msra.mxu0 %v10586_v17  ;;  %7820 = vmatpush1.bf16.msra.mxu1 %v10589_v18  ;;  %v13290_v17 = vld [vmem:[%s14794_s0 + $0x48] sm:$0xff] }
 0x210   :  { %6973 = vmatprep.subr.bf16.mxu0 %v10594_v19  ;;  %7821 = vmatprep.subr.bf16.mxu1 %v10597_v20  ;;  %v13295_v18 = vld [vmem:[%s14794_s0 + $0xc8] sm:$0xff]  ;;  %v8502_v19 = vcombine.low %v53_v5, %v69_v6  ;;  %v10676_v20 = vld [vmem:[%s14793_s1 + $0x1240] ss:$16 sps:$4 sm:$0xff]  }
 0x211   :  { %v10748_v5 = vld [vmem:[%s14793_s1 + $0x13c0] ss:$16 sps:$4 sm:$0xff]   ;;  %v10751_v6 = vld [vmem:[%s14793_s1 + $0x13c8] ss:$16 sps:$4 sm:$0xff]  }
 0x213   :  { %6974 = vmatpush1.bf16.msra.mxu0 %v10592_v21  ;;  %7822 = vmatpush1.bf16.msra.mxu1 %v10595_v22  ;;  %v10679_v21 = vld [vmem:[%s14793_s1 + $0x1248] ss:$16 sps:$4 sm:$0xff]   ;;  %v10684_v22 = vld [vmem:[%s14793_s1 + $0x1264] ss:$16 sps:$4 sm:$0xff]  }
 0x214   :  { %6975 = vmatprep.subr.bf16.mxu0 %v10600_v23  ;;  %7823 = vmatprep.subr.bf16.mxu1 %v10603_v24  ;;  %v10687_v23 = vld [vmem:[%s14793_s1 + $0x126c] ss:$16 sps:$4 sm:$0xff]   ;;  %v8473_v24 = vcombine.high %v13290_v17, %v13295_v18 }
 0x217   :  { %6976 = vmatpush1.bf16.msra.mxu0 %v10598_v26  ;;  %7824 = vmatpush1.bf16.msra.mxu1 %v10601_v25  ;;  %v10682_v26 = vld [vmem:[%s14793_s1 + $0x1260] ss:$16 sps:$4 sm:$0xff]   ;;  %v10685_v25 = vld [vmem:[%s14793_s1 + $0x1268] ss:$16 sps:$4 sm:$0xff]  }
 0x218   :  { %6977 = vmatprep.subr.bf16.mxu0 %v10606_v27  ;;  %7825 = vmatprep.subr.bf16.mxu1 %v10609_v28  ;;  %v10690_v27 = vld [vmem:[%s14793_s1 + $0x1284] ss:$16 sps:$4 sm:$0xff]   ;;  %v10693_v28 = vld [vmem:[%s14793_s1 + $0x128c] ss:$16 sps:$4 sm:$0xff]  }
 0x21b   :  { %6978 = vmatpush1.bf16.msra.mxu0 %v10604_v29  ;;  %7826 = vmatpush1.bf16.msra.mxu1 %v10607_v30  ;;  %v10688_v29 = vld [vmem:[%s14793_s1 + $0x1280] ss:$16 sps:$4 sm:$0xff]   ;;  %v10691_v30 = vld [vmem:[%s14793_s1 + $0x1288] ss:$16 sps:$4 sm:$0xff]  }
 0x21c   :  { %6979 = vmatprep.subr.bf16.mxu0 %v10612_v31  ;;  %7827 = vmatprep.subr.bf16.mxu1 %v10615_v32  ;;  %v10696_v31 = vld [vmem:[%s14793_s1 + $0x12a4] ss:$16 sps:$4 sm:$0xff]   ;;  %v10699_v32 = vld [vmem:[%s14793_s1 + $0x12ac] ss:$16 sps:$4 sm:$0xff]  }
 0x21f   :  { %6980 = vmatpush1.bf16.msra.mxu0 %v10610_v34  ;;  %7828 = vmatpush1.bf16.msra.mxu1 %v10613_v36  ;;  %v10694_v34 = vld [vmem:[%s14793_s1 + $0x12a0] ss:$16 sps:$4 sm:$0xff]   ;;  %v10697_v36 = vld [vmem:[%s14793_s1 + $0x12a8] ss:$16 sps:$4 sm:$0xff]  }
 0x220   :  { %6981 = vmatprep.subr.bf16.mxu0 %v10618_v33  ;;  %7829 = vmatprep.subr.bf16.mxu1 %v10621_v35  ;;  %v10702_v33 = vld [vmem:[%s14793_s1 + $0x12c4] ss:$16 sps:$4 sm:$0xff]   ;;  %v10705_v35 = vld [vmem:[%s14793_s1 + $0x12cc] ss:$16 sps:$4 sm:$0xff]  }
 0x223   :  { %6982 = vmatpush1.bf16.msra.mxu0 %v10616_v37  ;;  %7830 = vmatpush1.bf16.msra.mxu1 %v10619_v38  ;;  %v10700_v37 = vld [vmem:[%s14793_s1 + $0x12c0] ss:$16 sps:$4 sm:$0xff]   ;;  %v10703_v38 = vld [vmem:[%s14793_s1 + $0x12c8] ss:$16 sps:$4 sm:$0xff]  }
 0x224   :  { %6983 = vmatprep.subr.bf16.mxu0 %v10624_v39  ;;  %7831 = vmatprep.subr.bf16.mxu1 %v10627_v40  ;;  %v10708_v39 = vld [vmem:[%s14793_s1 + $0x12e4] ss:$16 sps:$4 sm:$0xff]   ;;  %v10711_v40 = vld [vmem:[%s14793_s1 + $0x12ec] ss:$16 sps:$4 sm:$0xff]  }
 0x227   :  { %6984 = vmatpush1.bf16.msra.mxu0 %v10622_v42  ;;  %7832 = vmatpush1.bf16.msra.mxu1 %v10625_v44  ;;  %v10706_v42 = vld [vmem:[%s14793_s1 + $0x12e0] ss:$16 sps:$4 sm:$0xff]   ;;  %v10709_v44 = vld [vmem:[%s14793_s1 + $0x12e8] ss:$16 sps:$4 sm:$0xff]  }
 0x228   :  { %6985 = vmatprep.subr.bf16.mxu0 %v10630_v41  ;;  %7833 = vmatprep.subr.bf16.mxu1 %v10633_v43  ;;  %v10714_v41 = vld [vmem:[%s14793_s1 + $0x1304] ss:$16 sps:$4 sm:$0xff]   ;;  %v10717_v43 = vld [vmem:[%s14793_s1 + $0x130c] ss:$16 sps:$4 sm:$0xff]  }
 0x22b   :  { %6986 = vmatpush1.bf16.msra.mxu0 %v10628_v45  ;;  %7834 = vmatpush1.bf16.msra.mxu1 %v10631_v46  ;;  %v10712_v45 = vld [vmem:[%s14793_s1 + $0x1300] ss:$16 sps:$4 sm:$0xff]   ;;  %v10715_v46 = vld [vmem:[%s14793_s1 + $0x1308] ss:$16 sps:$4 sm:$0xff]  }
 0x22c   :  { %6987 = vmatprep.subr.bf16.mxu0 %v10636_v47  ;;  %7835 = vmatprep.subr.bf16.mxu1 %v10639_v48  ;;  %v10720_v47 = vld [vmem:[%s14793_s1 + $0x1324] ss:$16 sps:$4 sm:$0xff]   ;;  %v10723_v48 = vld [vmem:[%s14793_s1 + $0x132c] ss:$16 sps:$4 sm:$0xff]  }
 0x22f   :  { %6988 = vmatpush1.bf16.msra.mxu0 %v10634_v51  ;;  %7836 = vmatpush1.bf16.msra.mxu1 %v10637_v52  ;;  %v10718_v51 = vld [vmem:[%s14793_s1 + $0x1320] ss:$16 sps:$4 sm:$0xff]   ;;  %v10721_v52 = vld [vmem:[%s14793_s1 + $0x1328] ss:$16 sps:$4 sm:$0xff]  }
 0x230   :  { %6989 = vmatprep.subr.bf16.mxu0 %v10642_v49  ;;  %7837 = vmatprep.subr.bf16.mxu1 %v10645_v50  ;;  %v10726_v49 = vld [vmem:[%s14793_s1 + $0x1344] ss:$16 sps:$4 sm:$0xff]   ;;  %v10729_v50 = vld [vmem:[%s14793_s1 + $0x134c] ss:$16 sps:$4 sm:$0xff]  }
 0x233   :  { %6990 = vmatpush1.bf16.msra.mxu0 %v10640_v53  ;;  %7838 = vmatpush1.bf16.msra.mxu1 %v10643_v54  ;;  %v10724_v53 = vld [vmem:[%s14793_s1 + $0x1340] ss:$16 sps:$4 sm:$0xff]   ;;  %v10727_v54 = vld [vmem:[%s14793_s1 + $0x1348] ss:$16 sps:$4 sm:$0xff]  }
 0x234   :  { %6991 = vmatprep.subr.bf16.mxu0 %v10648_v55  ;;  %7839 = vmatprep.subr.bf16.mxu1 %v10651_v56  ;;  %v10732_v55 = vld [vmem:[%s14793_s1 + $0x1364] ss:$16 sps:$4 sm:$0xff]   ;;  %v10735_v56 = vld [vmem:[%s14793_s1 + $0x136c] ss:$16 sps:$4 sm:$0xff]  }
 0x237   :  { %6992 = vmatpush1.bf16.msra.mxu0 %v10646_v59  ;;  %7840 = vmatpush1.bf16.msra.mxu1 %v10649_v60  ;;  %v10730_v59 = vld [vmem:[%s14793_s1 + $0x1360] ss:$16 sps:$4 sm:$0xff]   ;;  %v10733_v60 = vld [vmem:[%s14793_s1 + $0x1368] ss:$16 sps:$4 sm:$0xff]  }
 0x238   :  { %6993 = vmatprep.subr.bf16.mxu0 %v10654_v57  ;;  %7841 = vmatprep.subr.bf16.mxu1 %v10657_v58  ;;  %v10738_v57 = vld [vmem:[%s14793_s1 + $0x1384] ss:$16 sps:$4 sm:$0xff]   ;;  %v10741_v58 = vld [vmem:[%s14793_s1 + $0x138c] ss:$16 sps:$4 sm:$0xff]  }
 0x23b   :  { %6994 = vmatpush1.bf16.msra.mxu0 %v10652_v61  ;;  %7842 = vmatpush1.bf16.msra.mxu1 %v10655_v62  ;;  %v10736_v61 = vld [vmem:[%s14793_s1 + $0x1380] ss:$16 sps:$4 sm:$0xff]   ;;  %v10739_v62 = vld [vmem:[%s14793_s1 + $0x1388] ss:$16 sps:$4 sm:$0xff]  }
 0x23c   :  { %6995 = vmatprep.subr.bf16.mxu0 %v10660_v63  ;;  %7843 = vmatprep.subr.bf16.mxu1 %v10663_v0  ;;  %v10744_v63 = vld [vmem:[%s14793_s1 + $0x13a4] ss:$16 sps:$4 sm:$0xff]   ;;  %v10747_v0 = vld [vmem:[%s14793_s1 + $0x13ac] ss:$16 sps:$4 sm:$0xff]  }
 0x23f   :  { %6996 = vmatpush1.bf16.msra.mxu0 %v10658_v3  ;;  %7844 = vmatpush1.bf16.msra.mxu1 %v10661_v4  ;;  %v10742_v3 = vld [vmem:[%s14793_s1 + $0x13a0] ss:$16 sps:$4 sm:$0xff]   ;;  %v10745_v4 = vld [vmem:[%s14793_s1 + $0x13a8] ss:$16 sps:$4 sm:$0xff]  }
 0x240   :  { %7018 = vmatprep.subr.bf16.mxu0 %v10666_v1  ;;  %7866 = vmatprep.subr.bf16.mxu1 %v10669_v2  ;;  %v10750_v1 = vld [vmem:[%s14793_s1 + $0x13c4] ss:$16 sps:$4 sm:$0xff]   ;;  %v10753_v2 = vld [vmem:[%s14793_s1 + $0x13cc] ss:$16 sps:$4 sm:$0xff]  }
 0x242   :  { %6998 = vmatmul.mubr.bf16.vlgmr.msra.gmra.mrb[0].mxu0 %v8470_v7  ;;  %7846 = vmatmul.mubr.bf16.vlgmr.msra.gmra.mrb[0].mxu1 %v8470_v7  ;;  %v10756_v7 = vld [vmem:[%s14793_s1 + $0x13e4] ss:$16 sps:$4 sm:$0xff]  }
 0x243   :  { %7019 = vmatpush1.bf16.msra.mxu0 %v10664_v8  ;;  %7867 = vmatpush1.bf16.msra.mxu1 %v10667_v11  ;;  %v10759_v8 = vld [vmem:[%s14793_s1 + $0x13ec] ss:$16 sps:$4 sm:$0xff]   ;;  %v10754_v11 = vld [vmem:[%s14793_s1 + $0x13e0] ss:$16 sps:$4 sm:$0xff]  }
 0x244   :  { %7020 = vmatprep.subr.bf16.mxu0 %v10672_v12  ;;  %7868 = vmatprep.subr.bf16.mxu1 %v10675_v9  ;;  %v10757_v12 = vld [vmem:[%s14793_s1 + $0x13e8] ss:$16 sps:$4 sm:$0xff]   ;;  %v10762_v9 = vld [vmem:[%s14793_s1 + $0x1404] ss:$16 sps:$4 sm:$0xff]  }
 0x245   :  { %7007 = vmatprep.mubr.bf16.mxu0 %v8503_v14  ;;  %7855 = vmatprep.mubr.bf16.mxu1 %v8503_v14  ;;  %v54_v14 = vld [vmem:[%s14794_s0 + $0x148] sm:$0xff] }
 0x247   :  { %7021 = vmatpush1.bf16.msra.mxu0 %v10670_v10  ;;  %7869 = vmatpush1.bf16.msra.mxu1 %v10673_v13  ;;  %v10765_v10 = vld [vmem:[%s14793_s1 + $0x140c] ss:$16 sps:$4 sm:$0xff]   ;;  %v8472_v13 = vcombine.low %v13290_v17, %v13295_v18  ;;  %v10768_v17 = vld [vmem:[%s14793_s1 + $0x1424] ss:$16 sps:$4 sm:$0xff]  }
 0x248   :  { %7022 = vmatprep.subr.bf16.mxu0 %v10678_v15  ;;  %7870 = vmatprep.subr.bf16.mxu1 %v10681_v16  ;;  %v70_v15 = vld [vmem:[%s14794_s0 + $0x1c8] sm:$0xff]  ;;  %v10760_v16 = vld [vmem:[%s14793_s1 + $0x1400] ss:$16 sps:$4 sm:$0xff]  }
 0x249   :  { %v10771_v18 = vld [vmem:[%s14793_s1 + $0x142c] ss:$16 sps:$4 sm:$0xff]  }
 0x24a   :  { %7008 = vmatmul.mubr.bf16.gmra.mrb[4].mxu0 %v8502_v19  ;;  %7856 = vmatmul.mubr.bf16.gmra.mrb[4].mxu1 %v8502_v19  ;;  %v10763_v19 = vld [vmem:[%s14793_s1 + $0x1408] ss:$16 sps:$4 sm:$0xff]  }
 0x24b   :  { %7023 = vmatpush1.bf16.msra.mxu0 %v10676_v20  ;;  %7871 = vmatpush1.bf16.msra.mxu1 %v10679_v21  ;;  %v8505_v20 = vcombine.high %v54_v14, %v70_v15  ;;  %v10766_v21 = vld [vmem:[%s14793_s1 + $0x1420] ss:$16 sps:$4 sm:$0xff]  }
 0x24c   :  { %7024 = vmatprep.subr.bf16.mxu0 %v10684_v22  ;;  %7872 = vmatprep.subr.bf16.mxu1 %v10687_v23  ;;  %v10769_v22 = vld [vmem:[%s14793_s1 + $0x1428] ss:$16 sps:$4 sm:$0xff]   ;;  %v10774_v23 = vld [vmem:[%s14793_s1 + $0x1444] ss:$16 sps:$4 sm:$0xff]  }
 0x24d   :  { %7050 = vmatprep.mubr.bf16.mxu0 %v8473_v24  ;;  %7898 = vmatprep.mubr.bf16.mxu1 %v8473_v24  ;;  %v10777_v24 = vld [vmem:[%s14793_s1 + $0x144c] ss:$16 sps:$4 sm:$0xff]  }
 0x24f   :  { %7025 = vmatpush1.bf16.msra.mxu0 %v10682_v26  ;;  %7873 = vmatpush1.bf16.msra.mxu1 %v10685_v25  ;;  %v8504_v26 = vcombine.low %v54_v14, %v70_v15  ;;  %v13502_v25 = vld [vmem:[%s14794_s0 + $0x50] sm:$0xff]  ;;  %v10847_v14 = vld [vmem:[%s14793_s1 + $0x15c8] ss:$16 sps:$4 sm:$0xff]  }
 0x250   :  { %7026 = vmatprep.subr.bf16.mxu0 %v10690_v27  ;;  %7874 = vmatprep.subr.bf16.mxu1 %v10693_v28  ;;  %v13507_v27 = vld [vmem:[%s14794_s0 + $0xd0] sm:$0xff] }
 0x251   :  { %v10772_v28 = vld [vmem:[%s14793_s1 + $0x1440] ss:$16 sps:$4 sm:$0xff]   ;;  %v10852_v15 = vld [vmem:[%s14793_s1 + $0x15e4] ss:$16 sps:$4 sm:$0xff]  }
 0x253   :  { %7027 = vmatpush1.bf16.msra.mxu0 %v10688_v29  ;;  %7875 = vmatpush1.bf16.msra.mxu1 %v10691_v30  ;;  %v10775_v29 = vld [vmem:[%s14793_s1 + $0x1448] ss:$16 sps:$4 sm:$0xff]   ;;  %v10780_v30 = vld [vmem:[%s14793_s1 + $0x1464] ss:$16 sps:$4 sm:$0xff]  }
 0x254   :  { %7028 = vmatprep.subr.bf16.mxu0 %v10696_v31  ;;  %7876 = vmatprep.subr.bf16.mxu1 %v10699_v32  ;;  %v10783_v31 = vld [vmem:[%s14793_s1 + $0x146c] ss:$16 sps:$4 sm:$0xff]   ;;  %v8475_v32 = vcombine.high %v13502_v25, %v13507_v27 }
 0x257   :  { %7029 = vmatpush1.bf16.msra.mxu0 %v10694_v34  ;;  %7877 = vmatpush1.bf16.msra.mxu1 %v10697_v36  ;;  %v10778_v34 = vld [vmem:[%s14793_s1 + $0x1460] ss:$16 sps:$4 sm:$0xff]   ;;  %v10781_v36 = vld [vmem:[%s14793_s1 + $0x1468] ss:$16 sps:$4 sm:$0xff]  }
 0x258   :  { %7030 = vmatprep.subr.bf16.mxu0 %v10702_v33  ;;  %7878 = vmatprep.subr.bf16.mxu1 %v10705_v35  ;;  %v10786_v33 = vld [vmem:[%s14793_s1 + $0x1484] ss:$16 sps:$4 sm:$0xff]   ;;  %v10789_v35 = vld [vmem:[%s14793_s1 + $0x148c] ss:$16 sps:$4 sm:$0xff]  }
 0x25b   :  { %7031 = vmatpush1.bf16.msra.mxu0 %v10700_v37  ;;  %7879 = vmatpush1.bf16.msra.mxu1 %v10703_v38  ;;  %v10784_v37 = vld [vmem:[%s14793_s1 + $0x1480] ss:$16 sps:$4 sm:$0xff]   ;;  %v10787_v38 = vld [vmem:[%s14793_s1 + $0x1488] ss:$16 sps:$4 sm:$0xff]  }
 0x25c   :  { %7032 = vmatprep.subr.bf16.mxu0 %v10708_v39  ;;  %7880 = vmatprep.subr.bf16.mxu1 %v10711_v40  ;;  %v10792_v39 = vld [vmem:[%s14793_s1 + $0x14a4] ss:$16 sps:$4 sm:$0xff]   ;;  %v10795_v40 = vld [vmem:[%s14793_s1 + $0x14ac] ss:$16 sps:$4 sm:$0xff]  }
 0x25f   :  { %7033 = vmatpush1.bf16.msra.mxu0 %v10706_v42  ;;  %7881 = vmatpush1.bf16.msra.mxu1 %v10709_v44  ;;  %v10790_v42 = vld [vmem:[%s14793_s1 + $0x14a0] ss:$16 sps:$4 sm:$0xff]   ;;  %v10793_v44 = vld [vmem:[%s14793_s1 + $0x14a8] ss:$16 sps:$4 sm:$0xff]  }
 0x260   :  { %7034 = vmatprep.subr.bf16.mxu0 %v10714_v41  ;;  %7882 = vmatprep.subr.bf16.mxu1 %v10717_v43  ;;  %v10798_v41 = vld [vmem:[%s14793_s1 + $0x14c4] ss:$16 sps:$4 sm:$0xff]   ;;  %v10801_v43 = vld [vmem:[%s14793_s1 + $0x14cc] ss:$16 sps:$4 sm:$0xff]  }
 0x263   :  { %7035 = vmatpush1.bf16.msra.mxu0 %v10712_v45  ;;  %7883 = vmatpush1.bf16.msra.mxu1 %v10715_v46  ;;  %v10796_v45 = vld [vmem:[%s14793_s1 + $0x14c0] ss:$16 sps:$4 sm:$0xff]   ;;  %v10799_v46 = vld [vmem:[%s14793_s1 + $0x14c8] ss:$16 sps:$4 sm:$0xff]  }
 0x264   :  { %7036 = vmatprep.subr.bf16.mxu0 %v10720_v47  ;;  %7884 = vmatprep.subr.bf16.mxu1 %v10723_v48  ;;  %v10804_v47 = vld [vmem:[%s14793_s1 + $0x14e4] ss:$16 sps:$4 sm:$0xff]   ;;  %v10807_v48 = vld [vmem:[%s14793_s1 + $0x14ec] ss:$16 sps:$4 sm:$0xff]  }
 0x267   :  { %7037 = vmatpush1.bf16.msra.mxu0 %v10718_v51  ;;  %7885 = vmatpush1.bf16.msra.mxu1 %v10721_v52  ;;  %v10802_v51 = vld [vmem:[%s14793_s1 + $0x14e0] ss:$16 sps:$4 sm:$0xff]   ;;  %v10805_v52 = vld [vmem:[%s14793_s1 + $0x14e8] ss:$16 sps:$4 sm:$0xff]  }
 0x268   :  { %7038 = vmatprep.subr.bf16.mxu0 %v10726_v49  ;;  %7886 = vmatprep.subr.bf16.mxu1 %v10729_v50  ;;  %v10810_v49 = vld [vmem:[%s14793_s1 + $0x1504] ss:$16 sps:$4 sm:$0xff]   ;;  %v10813_v50 = vld [vmem:[%s14793_s1 + $0x150c] ss:$16 sps:$4 sm:$0xff]  }
 0x26b   :  { %7039 = vmatpush1.bf16.msra.mxu0 %v10724_v53  ;;  %7887 = vmatpush1.bf16.msra.mxu1 %v10727_v54  ;;  %v10808_v53 = vld [vmem:[%s14793_s1 + $0x1500] ss:$16 sps:$4 sm:$0xff]   ;;  %v10811_v54 = vld [vmem:[%s14793_s1 + $0x1508] ss:$16 sps:$4 sm:$0xff]  }
 0x26c   :  { %7040 = vmatprep.subr.bf16.mxu0 %v10732_v55  ;;  %7888 = vmatprep.subr.bf16.mxu1 %v10735_v56  ;;  %v10816_v55 = vld [vmem:[%s14793_s1 + $0x1524] ss:$16 sps:$4 sm:$0xff]   ;;  %v10819_v56 = vld [vmem:[%s14793_s1 + $0x152c] ss:$16 sps:$4 sm:$0xff]  }
 0x26f   :  { %7041 = vmatpush1.bf16.msra.mxu0 %v10730_v59  ;;  %7889 = vmatpush1.bf16.msra.mxu1 %v10733_v60  ;;  %v10814_v59 = vld [vmem:[%s14793_s1 + $0x1520] ss:$16 sps:$4 sm:$0xff]   ;;  %v10817_v60 = vld [vmem:[%s14793_s1 + $0x1528] ss:$16 sps:$4 sm:$0xff]  }
 0x270   :  { %7042 = vmatprep.subr.bf16.mxu0 %v10738_v57  ;;  %7890 = vmatprep.subr.bf16.mxu1 %v10741_v58  ;;  %v10822_v57 = vld [vmem:[%s14793_s1 + $0x1544] ss:$16 sps:$4 sm:$0xff]   ;;  %v10825_v58 = vld [vmem:[%s14793_s1 + $0x154c] ss:$16 sps:$4 sm:$0xff]  }
 0x273   :  { %7043 = vmatpush1.bf16.msra.mxu0 %v10736_v61  ;;  %7891 = vmatpush1.bf16.msra.mxu1 %v10739_v62  ;;  %v10820_v61 = vld [vmem:[%s14793_s1 + $0x1540] ss:$16 sps:$4 sm:$0xff]   ;;  %v10823_v62 = vld [vmem:[%s14793_s1 + $0x1548] ss:$16 sps:$4 sm:$0xff]  }
 0x274   :  { %7044 = vmatprep.subr.bf16.mxu0 %v10744_v63  ;;  %7892 = vmatprep.subr.bf16.mxu1 %v10747_v0  ;;  %v10828_v63 = vld [vmem:[%s14793_s1 + $0x1564] ss:$16 sps:$4 sm:$0xff]   ;;  %v10831_v0 = vld [vmem:[%s14793_s1 + $0x156c] ss:$16 sps:$4 sm:$0xff]  }
 0x277   :  { %7045 = vmatpush1.bf16.msra.mxu0 %v10742_v3  ;;  %7893 = vmatpush1.bf16.msra.mxu1 %v10745_v4  ;;  %v10826_v3 = vld [vmem:[%s14793_s1 + $0x1560] ss:$16 sps:$4 sm:$0xff]   ;;  %v10829_v4 = vld [vmem:[%s14793_s1 + $0x1568] ss:$16 sps:$4 sm:$0xff]  }
 0x278   :  { %7046 = vmatprep.subr.bf16.mxu0 %v10750_v1  ;;  %7894 = vmatprep.subr.bf16.mxu1 %v10753_v2  ;;  %v10834_v1 = vld [vmem:[%s14793_s1 + $0x1584] ss:$16 sps:$4 sm:$0xff]   ;;  %v10837_v2 = vld [vmem:[%s14793_s1 + $0x158c] ss:$16 sps:$4 sm:$0xff]  }
 0x27b   :  { %7047 = vmatpush1.bf16.msra.mxu0 %v10748_v5  ;;  %7895 = vmatpush1.bf16.msra.mxu1 %v10751_v6  ;;  %v10832_v5 = vld [vmem:[%s14793_s1 + $0x1580] ss:$16 sps:$4 sm:$0xff]   ;;  %v10835_v6 = vld [vmem:[%s14793_s1 + $0x1588] ss:$16 sps:$4 sm:$0xff]  }
 0x27c   :  { %7048 = vmatprep.subr.bf16.mxu0 %v10756_v7  ;;  %7896 = vmatprep.subr.bf16.mxu1 %v10759_v8  ;;  %v10840_v7 = vld [vmem:[%s14793_s1 + $0x15a4] ss:$16 sps:$4 sm:$0xff]   ;;  %v10843_v8 = vld [vmem:[%s14793_s1 + $0x15ac] ss:$16 sps:$4 sm:$0xff]  }
 0x27f   :  { %7049 = vmatpush1.bf16.msra.mxu0 %v10754_v11  ;;  %7897 = vmatpush1.bf16.msra.mxu1 %v10757_v12  ;;  %v10838_v11 = vld [vmem:[%s14793_s1 + $0x15a0] ss:$16 sps:$4 sm:$0xff]   ;;  %v10841_v12 = vld [vmem:[%s14793_s1 + $0x15a8] ss:$16 sps:$4 sm:$0xff]  }
 0x280   :  { %7071 = vmatprep.subr.bf16.mxu0 %v10762_v9  ;;  %7919 = vmatprep.subr.bf16.mxu1 %v10765_v10  ;;  %v10846_v9 = vld [vmem:[%s14793_s1 + $0x15c4] ss:$16 sps:$4 sm:$0xff]   ;;  %v10849_v10 = vld [vmem:[%s14793_s1 + $0x15cc] ss:$16 sps:$4 sm:$0xff]  }
 0x282   :  { %7051 = vmatmul.mubr.bf16.vlgmr.msra.gmra.mrb[0].mxu0 %v8472_v13  ;;  %7899 = vmatmul.mubr.bf16.vlgmr.msra.gmra.mrb[0].mxu1 %v8472_v13  ;;  %v10844_v13 = vld [vmem:[%s14793_s1 + $0x15c0] ss:$16 sps:$4 sm:$0xff]  }
 0x283   :  { %7072 = vmatpush1.bf16.msra.mxu0 %v10760_v16  ;;  %7920 = vmatpush1.bf16.msra.mxu1 %v10763_v19  ;;  %v10855_v16 = vld [vmem:[%s14793_s1 + $0x15ec] ss:$16 sps:$4 sm:$0xff]   ;;  %v10850_v19 = vld [vmem:[%s14793_s1 + $0x15e0] ss:$16 sps:$4 sm:$0xff]  }
 0x284   :  { %7073 = vmatprep.subr.bf16.mxu0 %v10768_v17  ;;  %7921 = vmatprep.subr.bf16.mxu1 %v10771_v18  ;;  %v10853_v17 = vld [vmem:[%s14793_s1 + $0x15e8] ss:$16 sps:$4 sm:$0xff]   ;;  %v10858_v18 = vld [vmem:[%s14793_s1 + $0x1604] ss:$16 sps:$4 sm:$0xff]  }
 0x285   :  { %7060 = vmatprep.mubr.bf16.mxu0 %v8505_v20  ;;  %7908 = vmatprep.mubr.bf16.mxu1 %v8505_v20  ;;  %v10861_v20 = vld [vmem:[%s14793_s1 + $0x160c] ss:$16 sps:$4 sm:$0xff]  }
 0x287   :  { %7074 = vmatpush1.bf16.msra.mxu0 %v10766_v21  ;;  %7922 = vmatpush1.bf16.msra.mxu1 %v10769_v22  ;;  %v8474_v21 = vcombine.low %v13502_v25, %v13507_v27  ;;  %v55_v22 = vld [vmem:[%s14794_s0 + $0x150] sm:$0xff]  ;;  %v10867_v27 = vld [vmem:[%s14793_s1 + $0x162c] ss:$16 sps:$4 sm:$0xff]  }
 0x288   :  { %7075 = vmatprep.subr.bf16.mxu0 %v10774_v23  ;;  %7923 = vmatprep.subr.bf16.mxu1 %v10777_v24  ;;  %v71_v23 = vld [vmem:[%s14794_s0 + $0x1d0] sm:$0xff] }
 0x289   :  { %v10856_v24 = vld [vmem:[%s14793_s1 + $0x1600] ss:$16 sps:$4 sm:$0xff]   ;;  %v10864_v25 = vld [vmem:[%s14793_s1 + $0x1624] ss:$16 sps:$4 sm:$0xff]  }
 0x28a   :  { %7061 = vmatmul.mubr.bf16.gmra.mrb[4].mxu0 %v8504_v26  ;;  %7909 = vmatmul.mubr.bf16.gmra.mrb[4].mxu1 %v8504_v26  ;;  %v10859_v26 = vld [vmem:[%s14793_s1 + $0x1608] ss:$16 sps:$4 sm:$0xff]  }
 0x28b   :  { %7076 = vmatpush1.bf16.msra.mxu0 %v10772_v28  ;;  %7924 = vmatpush1.bf16.msra.mxu1 %v10775_v29  ;;  %v8507_v28 = vcombine.high %v55_v22, %v71_v23  ;;  %v10862_v29 = vld [vmem:[%s14793_s1 + $0x1620] ss:$16 sps:$4 sm:$0xff]  }
 0x28c   :  { %7077 = vmatprep.subr.bf16.mxu0 %v10780_v30  ;;  %7925 = vmatprep.subr.bf16.mxu1 %v10783_v31  ;;  %v10865_v30 = vld [vmem:[%s14793_s1 + $0x1628] ss:$16 sps:$4 sm:$0xff]   ;;  %v10870_v31 = vld [vmem:[%s14793_s1 + $0x1644] ss:$16 sps:$4 sm:$0xff]  }
 0x28d   :  { %7103 = vmatprep.mubr.bf16.mxu0 %v8475_v32  ;;  %7951 = vmatprep.mubr.bf16.mxu1 %v8475_v32  ;;  %v10873_v32 = vld [vmem:[%s14793_s1 + $0x164c] ss:$16 sps:$4 sm:$0xff]  }
 0x28f   :  { %7078 = vmatpush1.bf16.msra.mxu0 %v10778_v34  ;;  %7926 = vmatpush1.bf16.msra.mxu1 %v10781_v36  ;;  %v8506_v34 = vcombine.low %v55_v22, %v71_v23  ;;  %v13714_v36 = vld [vmem:[%s14794_s0 + $0x58] sm:$0xff]  ;;  %v10948_v23 = vld [vmem:[%s14793_s1 + $0x17e4] ss:$16 sps:$4 sm:$0xff]  }
 0x290   :  { %7079 = vmatprep.subr.bf16.mxu0 %v10786_v33  ;;  %7927 = vmatprep.subr.bf16.mxu1 %v10789_v35  ;;  %v13719_v33 = vld [vmem:[%s14794_s0 + $0xd8] sm:$0xff]  ;;  %v10868_v35 = vld [vmem:[%s14793_s1 + $0x1640] ss:$16 sps:$4 sm:$0xff]  }
 0x291   :  { %v10943_v22 = vld [vmem:[%s14793_s1 + $0x17c8] ss:$16 sps:$4 sm:$0xff]  }
 0x293   :  { %7080 = vmatpush1.bf16.msra.mxu0 %v10784_v37  ;;  %7928 = vmatpush1.bf16.msra.mxu1 %v10787_v38  ;;  %v10871_v37 = vld [vmem:[%s14793_s1 + $0x1648] ss:$16 sps:$4 sm:$0xff]   ;;  %v10876_v38 = vld [vmem:[%s14793_s1 + $0x1664] ss:$16 sps:$4 sm:$0xff]  }
 0x294   :  { %7081 = vmatprep.subr.bf16.mxu0 %v10792_v39  ;;  %7929 = vmatprep.subr.bf16.mxu1 %v10795_v40  ;;  %v10879_v39 = vld [vmem:[%s14793_s1 + $0x166c] ss:$16 sps:$4 sm:$0xff]   ;;  %v8477_v40 = vcombine.high %v13714_v36, %v13719_v33 }
 0x297   :  { %7082 = vmatpush1.bf16.msra.mxu0 %v10790_v42  ;;  %7930 = vmatpush1.bf16.msra.mxu1 %v10793_v44  ;;  %v10874_v42 = vld [vmem:[%s14793_s1 + $0x1660] ss:$16 sps:$4 sm:$0xff]   ;;  %v10877_v44 = vld [vmem:[%s14793_s1 + $0x1668] ss:$16 sps:$4 sm:$0xff]  }
 0x298   :  { %7083 = vmatprep.subr.bf16.mxu0 %v10798_v41  ;;  %7931 = vmatprep.subr.bf16.mxu1 %v10801_v43  ;;  %v10882_v41 = vld [vmem:[%s14793_s1 + $0x1684] ss:$16 sps:$4 sm:$0xff]   ;;  %v10885_v43 = vld [vmem:[%s14793_s1 + $0x168c] ss:$16 sps:$4 sm:$0xff]  }
 0x29b   :  { %7084 = vmatpush1.bf16.msra.mxu0 %v10796_v45  ;;  %7932 = vmatpush1.bf16.msra.mxu1 %v10799_v46  ;;  %v10880_v45 = vld [vmem:[%s14793_s1 + $0x1680] ss:$16 sps:$4 sm:$0xff]   ;;  %v10883_v46 = vld [vmem:[%s14793_s1 + $0x1688] ss:$16 sps:$4 sm:$0xff]  }
 0x29c   :  { %7085 = vmatprep.subr.bf16.mxu0 %v10804_v47  ;;  %7933 = vmatprep.subr.bf16.mxu1 %v10807_v48  ;;  %v10888_v47 = vld [vmem:[%s14793_s1 + $0x16a4] ss:$16 sps:$4 sm:$0xff]   ;;  %v10891_v48 = vld [vmem:[%s14793_s1 + $0x16ac] ss:$16 sps:$4 sm:$0xff]  }
 0x29f   :  { %7086 = vmatpush1.bf16.msra.mxu0 %v10802_v51  ;;  %7934 = vmatpush1.bf16.msra.mxu1 %v10805_v52  ;;  %v10886_v51 = vld [vmem:[%s14793_s1 + $0x16a0] ss:$16 sps:$4 sm:$0xff]   ;;  %v10889_v52 = vld [vmem:[%s14793_s1 + $0x16a8] ss:$16 sps:$4 sm:$0xff]  }
 0x2a0   :  { %7087 = vmatprep.subr.bf16.mxu0 %v10810_v49  ;;  %7935 = vmatprep.subr.bf16.mxu1 %v10813_v50  ;;  %v10894_v49 = vld [vmem:[%s14793_s1 + $0x16c4] ss:$16 sps:$4 sm:$0xff]   ;;  %v10897_v50 = vld [vmem:[%s14793_s1 + $0x16cc] ss:$16 sps:$4 sm:$0xff]  }
 0x2a3   :  { %7088 = vmatpush1.bf16.msra.mxu0 %v10808_v53  ;;  %7936 = vmatpush1.bf16.msra.mxu1 %v10811_v54  ;;  %v10892_v53 = vld [vmem:[%s14793_s1 + $0x16c0] ss:$16 sps:$4 sm:$0xff]   ;;  %v10895_v54 = vld [vmem:[%s14793_s1 + $0x16c8] ss:$16 sps:$4 sm:$0xff]  }
 0x2a4   :  { %7089 = vmatprep.subr.bf16.mxu0 %v10816_v55  ;;  %7937 = vmatprep.subr.bf16.mxu1 %v10819_v56  ;;  %v10900_v55 = vld [vmem:[%s14793_s1 + $0x16e4] ss:$16 sps:$4 sm:$0xff]   ;;  %v10903_v56 = vld [vmem:[%s14793_s1 + $0x16ec] ss:$16 sps:$4 sm:$0xff]  }
 0x2a7   :  { %7090 = vmatpush1.bf16.msra.mxu0 %v10814_v59  ;;  %7938 = vmatpush1.bf16.msra.mxu1 %v10817_v60  ;;  %v10898_v59 = vld [vmem:[%s14793_s1 + $0x16e0] ss:$16 sps:$4 sm:$0xff]   ;;  %v10901_v60 = vld [vmem:[%s14793_s1 + $0x16e8] ss:$16 sps:$4 sm:$0xff]  }
 0x2a8   :  { %7091 = vmatprep.subr.bf16.mxu0 %v10822_v57  ;;  %7939 = vmatprep.subr.bf16.mxu1 %v10825_v58  ;;  %v10906_v57 = vld [vmem:[%s14793_s1 + $0x1704] ss:$16 sps:$4 sm:$0xff]   ;;  %v10909_v58 = vld [vmem:[%s14793_s1 + $0x170c] ss:$16 sps:$4 sm:$0xff]  }
 0x2ab   :  { %7092 = vmatpush1.bf16.msra.mxu0 %v10820_v61  ;;  %7940 = vmatpush1.bf16.msra.mxu1 %v10823_v62  ;;  %v10904_v61 = vld [vmem:[%s14793_s1 + $0x1700] ss:$16 sps:$4 sm:$0xff]   ;;  %v10907_v62 = vld [vmem:[%s14793_s1 + $0x1708] ss:$16 sps:$4 sm:$0xff]  }
 0x2ac   :  { %7093 = vmatprep.subr.bf16.mxu0 %v10828_v63  ;;  %7941 = vmatprep.subr.bf16.mxu1 %v10831_v0  ;;  %v10912_v63 = vld [vmem:[%s14793_s1 + $0x1724] ss:$16 sps:$4 sm:$0xff]   ;;  %v10915_v0 = vld [vmem:[%s14793_s1 + $0x172c] ss:$16 sps:$4 sm:$0xff]  }
 0x2af   :  { %7094 = vmatpush1.bf16.msra.mxu0 %v10826_v3  ;;  %7942 = vmatpush1.bf16.msra.mxu1 %v10829_v4  ;;  %v10910_v3 = vld [vmem:[%s14793_s1 + $0x1720] ss:$16 sps:$4 sm:$0xff]   ;;  %v10913_v4 = vld [vmem:[%s14793_s1 + $0x1728] ss:$16 sps:$4 sm:$0xff]  }
 0x2b0   :  { %7095 = vmatprep.subr.bf16.mxu0 %v10834_v1  ;;  %7943 = vmatprep.subr.bf16.mxu1 %v10837_v2  ;;  %v10918_v1 = vld [vmem:[%s14793_s1 + $0x1744] ss:$16 sps:$4 sm:$0xff]   ;;  %v10921_v2 = vld [vmem:[%s14793_s1 + $0x174c] ss:$16 sps:$4 sm:$0xff]  }
 0x2b3   :  { %7096 = vmatpush1.bf16.msra.mxu0 %v10832_v5  ;;  %7944 = vmatpush1.bf16.msra.mxu1 %v10835_v6  ;;  %v10916_v5 = vld [vmem:[%s14793_s1 + $0x1740] ss:$16 sps:$4 sm:$0xff]   ;;  %v10919_v6 = vld [vmem:[%s14793_s1 + $0x1748] ss:$16 sps:$4 sm:$0xff]  }
 0x2b4   :  { %7097 = vmatprep.subr.bf16.mxu0 %v10840_v7  ;;  %7945 = vmatprep.subr.bf16.mxu1 %v10843_v8  ;;  %v10924_v7 = vld [vmem:[%s14793_s1 + $0x1764] ss:$16 sps:$4 sm:$0xff]   ;;  %v10927_v8 = vld [vmem:[%s14793_s1 + $0x176c] ss:$16 sps:$4 sm:$0xff]  }
 0x2b7   :  { %7098 = vmatpush1.bf16.msra.mxu0 %v10838_v11  ;;  %7946 = vmatpush1.bf16.msra.mxu1 %v10841_v12  ;;  %v10922_v11 = vld [vmem:[%s14793_s1 + $0x1760] ss:$16 sps:$4 sm:$0xff]   ;;  %v10925_v12 = vld [vmem:[%s14793_s1 + $0x1768] ss:$16 sps:$4 sm:$0xff]  }
 0x2b8   :  { %7099 = vmatprep.subr.bf16.mxu0 %v10846_v9  ;;  %7947 = vmatprep.subr.bf16.mxu1 %v10849_v10  ;;  %v10930_v9 = vld [vmem:[%s14793_s1 + $0x1784] ss:$16 sps:$4 sm:$0xff]   ;;  %v10933_v10 = vld [vmem:[%s14793_s1 + $0x178c] ss:$16 sps:$4 sm:$0xff]  }
 0x2bb   :  { %7100 = vmatpush1.bf16.msra.mxu0 %v10844_v13  ;;  %7948 = vmatpush1.bf16.msra.mxu1 %v10847_v14  ;;  %v10928_v13 = vld [vmem:[%s14793_s1 + $0x1780] ss:$16 sps:$4 sm:$0xff]   ;;  %v10931_v14 = vld [vmem:[%s14793_s1 + $0x1788] ss:$16 sps:$4 sm:$0xff]  }
 0x2bc   :  { %7101 = vmatprep.subr.bf16.mxu0 %v10852_v15  ;;  %7949 = vmatprep.subr.bf16.mxu1 %v10855_v16  ;;  %v10936_v15 = vld [vmem:[%s14793_s1 + $0x17a4] ss:$16 sps:$4 sm:$0xff]   ;;  %v10939_v16 = vld [vmem:[%s14793_s1 + $0x17ac] ss:$16 sps:$4 sm:$0xff]  }
 0x2bf   :  { %7102 = vmatpush1.bf16.msra.mxu0 %v10850_v19  ;;  %7950 = vmatpush1.bf16.msra.mxu1 %v10853_v17  ;;  %v10934_v19 = vld [vmem:[%s14793_s1 + $0x17a0] ss:$16 sps:$4 sm:$0xff]   ;;  %v10937_v17 = vld [vmem:[%s14793_s1 + $0x17a8] ss:$16 sps:$4 sm:$0xff]  }
 0x2c0   :  { %7124 = vmatprep.subr.bf16.mxu0 %v10858_v18  ;;  %7972 = vmatprep.subr.bf16.mxu1 %v10861_v20  ;;  %v10942_v18 = vld [vmem:[%s14793_s1 + $0x17c4] ss:$16 sps:$4 sm:$0xff]   ;;  %v10945_v20 = vld [vmem:[%s14793_s1 + $0x17cc] ss:$16 sps:$4 sm:$0xff]  }
 0x2c2   :  { %7104 = vmatmul.mubr.bf16.vlgmr.msra.gmra.mrb[0].mxu0 %v8474_v21  ;;  %7952 = vmatmul.mubr.bf16.vlgmr.msra.gmra.mrb[0].mxu1 %v8474_v21  ;;  %v10940_v21 = vld [vmem:[%s14793_s1 + $0x17c0] ss:$16 sps:$4 sm:$0xff]  }
 0x2c3   :  { %7125 = vmatpush1.bf16.msra.mxu0 %v10856_v24  ;;  %7973 = vmatpush1.bf16.msra.mxu1 %v10859_v26  ;;  %v10951_v24 = vld [vmem:[%s14793_s1 + $0x17ec] ss:$16 sps:$4 sm:$0xff]   ;;  %v10946_v26 = vld [vmem:[%s14793_s1 + $0x17e0] ss:$16 sps:$4 sm:$0xff]  }
 0x2c4   :  { %7126 = vmatprep.subr.bf16.mxu0 %v10864_v25  ;;  %7974 = vmatprep.subr.bf16.mxu1 %v10867_v27  ;;  %v10949_v25 = vld [vmem:[%s14793_s1 + $0x17e8] ss:$16 sps:$4 sm:$0xff]   ;;  %v10954_v27 = vld [vmem:[%s14793_s1 + $0x1804] ss:$16 sps:$4 sm:$0xff]  }
 0x2c5   :  { %7113 = vmatprep.mubr.bf16.mxu0 %v8507_v28  ;;  %7961 = vmatprep.mubr.bf16.mxu1 %v8507_v28  ;;  %v10957_v28 = vld [vmem:[%s14793_s1 + $0x180c] ss:$16 sps:$4 sm:$0xff]  }
 0x2c7   :  { %7127 = vmatpush1.bf16.msra.mxu0 %v10862_v29  ;;  %7975 = vmatpush1.bf16.msra.mxu1 %v10865_v30  ;;  %v8476_v29 = vcombine.low %v13714_v36, %v13719_v33  ;;  %v56_v30 = vld [vmem:[%s14794_s0 + $0x158] sm:$0xff]  ;;  %v10960_v36 = vld [vmem:[%s14793_s1 + $0x1824] ss:$16 sps:$4 sm:$0xff]  }
 0x2c8   :  { %7128 = vmatprep.subr.bf16.mxu0 %v10870_v31  ;;  %7976 = vmatprep.subr.bf16.mxu1 %v10873_v32  ;;  %v72_v31 = vld [vmem:[%s14794_s0 + $0x1d8] sm:$0xff]  ;;  %v10952_v32 = vld [vmem:[%s14793_s1 + $0x1800] ss:$16 sps:$4 sm:$0xff]  }
 0x2c9   :  { %v10963_v33 = vld [vmem:[%s14793_s1 + $0x182c] ss:$16 sps:$4 sm:$0xff]  }
 0x2ca   :  { %7114 = vmatmul.mubr.bf16.gmra.mrb[4].mxu0 %v8506_v34  ;;  %7962 = vmatmul.mubr.bf16.gmra.mrb[4].mxu1 %v8506_v34  ;;  %v10955_v34 = vld [vmem:[%s14793_s1 + $0x1808] ss:$16 sps:$4 sm:$0xff]  }
 0x2cb   :  { %7129 = vmatpush1.bf16.msra.mxu0 %v10868_v35  ;;  %7977 = vmatpush1.bf16.msra.mxu1 %v10871_v37  ;;  %v8509_v35 = vcombine.high %v56_v30, %v72_v31  ;;  %v10958_v37 = vld [vmem:[%s14793_s1 + $0x1820] ss:$16 sps:$4 sm:$0xff]  }
 0x2cc   :  { %7130 = vmatprep.subr.bf16.mxu0 %v10876_v38  ;;  %7978 = vmatprep.subr.bf16.mxu1 %v10879_v39  ;;  %v10961_v38 = vld [vmem:[%s14793_s1 + $0x1828] ss:$16 sps:$4 sm:$0xff]   ;;  %v10966_v39 = vld [vmem:[%s14793_s1 + $0x1844] ss:$16 sps:$4 sm:$0xff]  }
 0x2cd   :  { %7156 = vmatprep.mubr.bf16.mxu0 %v8477_v40  ;;  %8004 = vmatprep.mubr.bf16.mxu1 %v8477_v40  ;;  %v10969_v40 = vld [vmem:[%s14793_s1 + $0x184c] ss:$16 sps:$4 sm:$0xff]  }
 0x2cf   :  { %7131 = vmatpush1.bf16.msra.mxu0 %v10874_v42  ;;  %7979 = vmatpush1.bf16.msra.mxu1 %v10877_v44  ;;  %v8508_v42 = vcombine.low %v56_v30, %v72_v31  ;;  %v13926_v44 = vld [vmem:[%s14794_s0 + $0x60] sm:$0xff]  ;;  %v11039_v30 = vld [vmem:[%s14793_s1 + $0x19c8] ss:$16 sps:$4 sm:$0xff]  }
 0x2d0   :  { %7132 = vmatprep.subr.bf16.mxu0 %v10882_v41  ;;  %7980 = vmatprep.subr.bf16.mxu1 %v10885_v43  ;;  %v13931_v41 = vld [vmem:[%s14794_s0 + $0xe0] sm:$0xff] }
 0x2d1   :  { %v10964_v43 = vld [vmem:[%s14793_s1 + $0x1840] ss:$16 sps:$4 sm:$0xff]   ;;  %v11044_v31 = vld [vmem:[%s14793_s1 + $0x19e4] ss:$16 sps:$4 sm:$0xff]  }
 0x2d3   :  { %7133 = vmatpush1.bf16.msra.mxu0 %v10880_v45  ;;  %7981 = vmatpush1.bf16.msra.mxu1 %v10883_v46  ;;  %v10967_v45 = vld [vmem:[%s14793_s1 + $0x1848] ss:$16 sps:$4 sm:$0xff]   ;;  %v10972_v46 = vld [vmem:[%s14793_s1 + $0x1864] ss:$16 sps:$4 sm:$0xff]  }
 0x2d4   :  { %7134 = vmatprep.subr.bf16.mxu0 %v10888_v47  ;;  %7982 = vmatprep.subr.bf16.mxu1 %v10891_v48  ;;  %v10975_v47 = vld [vmem:[%s14793_s1 + $0x186c] ss:$16 sps:$4 sm:$0xff]   ;;  %v8479_v48 = vcombine.high %v13926_v44, %v13931_v41 }
 0x2d7   :  { %7135 = vmatpush1.bf16.msra.mxu0 %v10886_v51  ;;  %7983 = vmatpush1.bf16.msra.mxu1 %v10889_v52  ;;  %v10970_v51 = vld [vmem:[%s14793_s1 + $0x1860] ss:$16 sps:$4 sm:$0xff]   ;;  %v10973_v52 = vld [vmem:[%s14793_s1 + $0x1868] ss:$16 sps:$4 sm:$0xff]  }
 0x2d8   :  { %7136 = vmatprep.subr.bf16.mxu0 %v10894_v49  ;;  %7984 = vmatprep.subr.bf16.mxu1 %v10897_v50  ;;  %v10978_v49 = vld [vmem:[%s14793_s1 + $0x1884] ss:$16 sps:$4 sm:$0xff]   ;;  %v10981_v50 = vld [vmem:[%s14793_s1 + $0x188c] ss:$16 sps:$4 sm:$0xff]  }
 0x2db   :  { %7137 = vmatpush1.bf16.msra.mxu0 %v10892_v53  ;;  %7985 = vmatpush1.bf16.msra.mxu1 %v10895_v54  ;;  %v10976_v53 = vld [vmem:[%s14793_s1 + $0x1880] ss:$16 sps:$4 sm:$0xff]   ;;  %v10979_v54 = vld [vmem:[%s14793_s1 + $0x1888] ss:$16 sps:$4 sm:$0xff]  }
 0x2dc   :  { %7138 = vmatprep.subr.bf16.mxu0 %v10900_v55  ;;  %7986 = vmatprep.subr.bf16.mxu1 %v10903_v56  ;;  %v10984_v55 = vld [vmem:[%s14793_s1 + $0x18a4] ss:$16 sps:$4 sm:$0xff]   ;;  %v10987_v56 = vld [vmem:[%s14793_s1 + $0x18ac] ss:$16 sps:$4 sm:$0xff]  }
 0x2df   :  { %7139 = vmatpush1.bf16.msra.mxu0 %v10898_v59  ;;  %7987 = vmatpush1.bf16.msra.mxu1 %v10901_v60  ;;  %v10982_v59 = vld [vmem:[%s14793_s1 + $0x18a0] ss:$16 sps:$4 sm:$0xff]   ;;  %v10985_v60 = vld [vmem:[%s14793_s1 + $0x18a8] ss:$16 sps:$4 sm:$0xff]  }
 0x2e0   :  { %7140 = vmatprep.subr.bf16.mxu0 %v10906_v57  ;;  %7988 = vmatprep.subr.bf16.mxu1 %v10909_v58  ;;  %v10990_v57 = vld [vmem:[%s14793_s1 + $0x18c4] ss:$16 sps:$4 sm:$0xff]   ;;  %v10993_v58 = vld [vmem:[%s14793_s1 + $0x18cc] ss:$16 sps:$4 sm:$0xff]  }
 0x2e3   :  { %7141 = vmatpush1.bf16.msra.mxu0 %v10904_v61  ;;  %7989 = vmatpush1.bf16.msra.mxu1 %v10907_v62  ;;  %v10988_v61 = vld [vmem:[%s14793_s1 + $0x18c0] ss:$16 sps:$4 sm:$0xff]   ;;  %v10991_v62 = vld [vmem:[%s14793_s1 + $0x18c8] ss:$16 sps:$4 sm:$0xff]  }
 0x2e4   :  { %7142 = vmatprep.subr.bf16.mxu0 %v10912_v63  ;;  %7990 = vmatprep.subr.bf16.mxu1 %v10915_v0  ;;  %v10996_v63 = vld [vmem:[%s14793_s1 + $0x18e4] ss:$16 sps:$4 sm:$0xff]   ;;  %v10999_v0 = vld [vmem:[%s14793_s1 + $0x18ec] ss:$16 sps:$4 sm:$0xff]  }
 0x2e7   :  { %7143 = vmatpush1.bf16.msra.mxu0 %v10910_v3  ;;  %7991 = vmatpush1.bf16.msra.mxu1 %v10913_v4  ;;  %v10994_v3 = vld [vmem:[%s14793_s1 + $0x18e0] ss:$16 sps:$4 sm:$0xff]   ;;  %v10997_v4 = vld [vmem:[%s14793_s1 + $0x18e8] ss:$16 sps:$4 sm:$0xff]  }
 0x2e8   :  { %7144 = vmatprep.subr.bf16.mxu0 %v10918_v1  ;;  %7992 = vmatprep.subr.bf16.mxu1 %v10921_v2  ;;  %v11002_v1 = vld [vmem:[%s14793_s1 + $0x1904] ss:$16 sps:$4 sm:$0xff]   ;;  %v11005_v2 = vld [vmem:[%s14793_s1 + $0x190c] ss:$16 sps:$4 sm:$0xff]  }
 0x2eb   :  { %7145 = vmatpush1.bf16.msra.mxu0 %v10916_v5  ;;  %7993 = vmatpush1.bf16.msra.mxu1 %v10919_v6  ;;  %v11000_v5 = vld [vmem:[%s14793_s1 + $0x1900] ss:$16 sps:$4 sm:$0xff]   ;;  %v11003_v6 = vld [vmem:[%s14793_s1 + $0x1908] ss:$16 sps:$4 sm:$0xff]  }
 0x2ec   :  { %7146 = vmatprep.subr.bf16.mxu0 %v10924_v7  ;;  %7994 = vmatprep.subr.bf16.mxu1 %v10927_v8  ;;  %v11008_v7 = vld [vmem:[%s14793_s1 + $0x1924] ss:$16 sps:$4 sm:$0xff]   ;;  %v11011_v8 = vld [vmem:[%s14793_s1 + $0x192c] ss:$16 sps:$4 sm:$0xff]  }
 0x2ef   :  { %7147 = vmatpush1.bf16.msra.mxu0 %v10922_v11  ;;  %7995 = vmatpush1.bf16.msra.mxu1 %v10925_v12  ;;  %v11006_v11 = vld [vmem:[%s14793_s1 + $0x1920] ss:$16 sps:$4 sm:$0xff]   ;;  %v11009_v12 = vld [vmem:[%s14793_s1 + $0x1928] ss:$16 sps:$4 sm:$0xff]  }
 0x2f0   :  { %7148 = vmatprep.subr.bf16.mxu0 %v10930_v9  ;;  %7996 = vmatprep.subr.bf16.mxu1 %v10933_v10  ;;  %v11014_v9 = vld [vmem:[%s14793_s1 + $0x1944] ss:$16 sps:$4 sm:$0xff]   ;;  %v11017_v10 = vld [vmem:[%s14793_s1 + $0x194c] ss:$16 sps:$4 sm:$0xff]  }
 0x2f3   :  { %7149 = vmatpush1.bf16.msra.mxu0 %v10928_v13  ;;  %7997 = vmatpush1.bf16.msra.mxu1 %v10931_v14  ;;  %v11012_v13 = vld [vmem:[%s14793_s1 + $0x1940] ss:$16 sps:$4 sm:$0xff]   ;;  %v11015_v14 = vld [vmem:[%s14793_s1 + $0x1948] ss:$16 sps:$4 sm:$0xff]  }
 0x2f4   :  { %7150 = vmatprep.subr.bf16.mxu0 %v10936_v15  ;;  %7998 = vmatprep.subr.bf16.mxu1 %v10939_v16  ;;  %v11020_v15 = vld [vmem:[%s14793_s1 + $0x1964] ss:$16 sps:$4 sm:$0xff]   ;;  %v11023_v16 = vld [vmem:[%s14793_s1 + $0x196c] ss:$16 sps:$4 sm:$0xff]  }
 0x2f7   :  { %7151 = vmatpush1.bf16.msra.mxu0 %v10934_v19  ;;  %7999 = vmatpush1.bf16.msra.mxu1 %v10937_v17  ;;  %v11018_v19 = vld [vmem:[%s14793_s1 + $0x1960] ss:$16 sps:$4 sm:$0xff]   ;;  %v11021_v17 = vld [vmem:[%s14793_s1 + $0x1968] ss:$16 sps:$4 sm:$0xff]  }
 0x2f8   :  { %7152 = vmatprep.subr.bf16.mxu0 %v10942_v18  ;;  %8000 = vmatprep.subr.bf16.mxu1 %v10945_v20  ;;  %v11026_v18 = vld [vmem:[%s14793_s1 + $0x1984] ss:$16 sps:$4 sm:$0xff]   ;;  %v11029_v20 = vld [vmem:[%s14793_s1 + $0x198c] ss:$16 sps:$4 sm:$0xff]  }
 0x2fb   :  { %7153 = vmatpush1.bf16.msra.mxu0 %v10940_v21  ;;  %8001 = vmatpush1.bf16.msra.mxu1 %v10943_v22  ;;  %v11024_v21 = vld [vmem:[%s14793_s1 + $0x1980] ss:$16 sps:$4 sm:$0xff]   ;;  %v11027_v22 = vld [vmem:[%s14793_s1 + $0x1988] ss:$16 sps:$4 sm:$0xff]  }
 0x2fc   :  { %7154 = vmatprep.subr.bf16.mxu0 %v10948_v23  ;;  %8002 = vmatprep.subr.bf16.mxu1 %v10951_v24  ;;  %v11032_v23 = vld [vmem:[%s14793_s1 + $0x19a4] ss:$16 sps:$4 sm:$0xff]   ;;  %v11035_v24 = vld [vmem:[%s14793_s1 + $0x19ac] ss:$16 sps:$4 sm:$0xff]  }
 0x2ff   :  { %7155 = vmatpush1.bf16.msra.mxu0 %v10946_v26  ;;  %8003 = vmatpush1.bf16.msra.mxu1 %v10949_v25  ;;  %v11030_v26 = vld [vmem:[%s14793_s1 + $0x19a0] ss:$16 sps:$4 sm:$0xff]   ;;  %v11033_v25 = vld [vmem:[%s14793_s1 + $0x19a8] ss:$16 sps:$4 sm:$0xff]  }
 0x300   :  { %7177 = vmatprep.subr.bf16.mxu0 %v10954_v27  ;;  %8025 = vmatprep.subr.bf16.mxu1 %v10957_v28  ;;  %v11038_v27 = vld [vmem:[%s14793_s1 + $0x19c4] ss:$16 sps:$4 sm:$0xff]   ;;  %v11041_v28 = vld [vmem:[%s14793_s1 + $0x19cc] ss:$16 sps:$4 sm:$0xff]  }
 0x302   :  { %7157 = vmatmul.mubr.bf16.vlgmr.msra.gmra.mrb[0].mxu0 %v8476_v29  ;;  %8005 = vmatmul.mubr.bf16.vlgmr.msra.gmra.mrb[0].mxu1 %v8476_v29  ;;  %v11036_v29 = vld [vmem:[%s14793_s1 + $0x19c0] ss:$16 sps:$4 sm:$0xff]  }
 0x303   :  { %7178 = vmatpush1.bf16.msra.mxu0 %v10952_v32  ;;  %8026 = vmatpush1.bf16.msra.mxu1 %v10955_v34  ;;  %v11047_v32 = vld [vmem:[%s14793_s1 + $0x19ec] ss:$16 sps:$4 sm:$0xff]   ;;  %v11042_v34 = vld [vmem:[%s14793_s1 + $0x19e0] ss:$16 sps:$4 sm:$0xff]  }
 0x304   :  { %7179 = vmatprep.subr.bf16.mxu0 %v10960_v36  ;;  %8027 = vmatprep.subr.bf16.mxu1 %v10963_v33  ;;  %v11045_v36 = vld [vmem:[%s14793_s1 + $0x19e8] ss:$16 sps:$4 sm:$0xff]   ;;  %v11050_v33 = vld [vmem:[%s14793_s1 + $0x1a04] ss:$16 sps:$4 sm:$0xff]  }
 0x305   :  { %7166 = vmatprep.mubr.bf16.mxu0 %v8509_v35  ;;  %8014 = vmatprep.mubr.bf16.mxu1 %v8509_v35  ;;  %v11053_v35 = vld [vmem:[%s14793_s1 + $0x1a0c] ss:$16 sps:$4 sm:$0xff]  }
 0x307   :  { %7180 = vmatpush1.bf16.msra.mxu0 %v10958_v37  ;;  %8028 = vmatpush1.bf16.msra.mxu1 %v10961_v38  ;;  %v8478_v37 = vcombine.low %v13926_v44, %v13931_v41  ;;  %v57_v38 = vld [vmem:[%s14794_s0 + $0x160] sm:$0xff]  ;;  %v11059_v41 = vld [vmem:[%s14793_s1 + $0x1a2c] ss:$16 sps:$4 sm:$0xff]  }
 0x308   :  { %7181 = vmatprep.subr.bf16.mxu0 %v10966_v39  ;;  %8029 = vmatprep.subr.bf16.mxu1 %v10969_v40  ;;  %v73_v39 = vld [vmem:[%s14794_s0 + $0x1e0] sm:$0xff] }
 0x309   :  { %v11048_v40 = vld [vmem:[%s14793_s1 + $0x1a00] ss:$16 sps:$4 sm:$0xff]   ;;  %v11056_v44 = vld [vmem:[%s14793_s1 + $0x1a24] ss:$16 sps:$4 sm:$0xff]  }
 0x30a   :  { %7167 = vmatmul.mubr.bf16.gmra.mrb[4].mxu0 %v8508_v42  ;;  %8015 = vmatmul.mubr.bf16.gmra.mrb[4].mxu1 %v8508_v42  ;;  %v11051_v42 = vld [vmem:[%s14793_s1 + $0x1a08] ss:$16 sps:$4 sm:$0xff]  }
 0x30b   :  { %7182 = vmatpush1.bf16.msra.mxu0 %v10964_v43  ;;  %8030 = vmatpush1.bf16.msra.mxu1 %v10967_v45  ;;  %v8511_v43 = vcombine.high %v57_v38, %v73_v39  ;;  %v11054_v45 = vld [vmem:[%s14793_s1 + $0x1a20] ss:$16 sps:$4 sm:$0xff]  }
 0x30c   :  { %7183 = vmatprep.subr.bf16.mxu0 %v10972_v46  ;;  %8031 = vmatprep.subr.bf16.mxu1 %v10975_v47  ;;  %v11057_v46 = vld [vmem:[%s14793_s1 + $0x1a28] ss:$16 sps:$4 sm:$0xff]   ;;  %v11062_v47 = vld [vmem:[%s14793_s1 + $0x1a44] ss:$16 sps:$4 sm:$0xff]  }
 0x30d   :  { %7209 = vmatprep.mubr.bf16.mxu0 %v8479_v48  ;;  %8057 = vmatprep.mubr.bf16.mxu1 %v8479_v48  ;;  %v11065_v48 = vld [vmem:[%s14793_s1 + $0x1a4c] ss:$16 sps:$4 sm:$0xff]  }
 0x30f   :  { %7184 = vmatpush1.bf16.msra.mxu0 %v10970_v51  ;;  %8032 = vmatpush1.bf16.msra.mxu1 %v10973_v52  ;;  %v8510_v51 = vcombine.low %v57_v38, %v73_v39  ;;  %v14138_v52 = vld [vmem:[%s14794_s0 + $0x68] sm:$0xff]  ;;  %v11140_v39 = vld [vmem:[%s14793_s1 + $0x1be4] ss:$16 sps:$4 sm:$0xff]  }
 0x310   :  { %7185 = vmatprep.subr.bf16.mxu0 %v10978_v49  ;;  %8033 = vmatprep.subr.bf16.mxu1 %v10981_v50  ;;  %v14143_v49 = vld [vmem:[%s14794_s0 + $0xe8] sm:$0xff]  ;;  %v11060_v50 = vld [vmem:[%s14793_s1 + $0x1a40] ss:$16 sps:$4 sm:$0xff]  }
 0x311   :  { %v11135_v38 = vld [vmem:[%s14793_s1 + $0x1bc8] ss:$16 sps:$4 sm:$0xff]  }
 0x313   :  { %7186 = vmatpush1.bf16.msra.mxu0 %v10976_v53  ;;  %8034 = vmatpush1.bf16.msra.mxu1 %v10979_v54  ;;  %v11063_v53 = vld [vmem:[%s14793_s1 + $0x1a48] ss:$16 sps:$4 sm:$0xff]   ;;  %v11068_v54 = vld [vmem:[%s14793_s1 + $0x1a64] ss:$16 sps:$4 sm:$0xff]  }
 0x314   :  { %7187 = vmatprep.subr.bf16.mxu0 %v10984_v55  ;;  %8035 = vmatprep.subr.bf16.mxu1 %v10987_v56  ;;  %v11071_v55 = vld [vmem:[%s14793_s1 + $0x1a6c] ss:$16 sps:$4 sm:$0xff]   ;;  %v8481_v56 = vcombine.high %v14138_v52, %v14143_v49 }
 0x317   :  { %7188 = vmatpush1.bf16.msra.mxu0 %v10982_v59  ;;  %8036 = vmatpush1.bf16.msra.mxu1 %v10985_v60  ;;  %v11066_v59 = vld [vmem:[%s14793_s1 + $0x1a60] ss:$16 sps:$4 sm:$0xff]   ;;  %v11069_v60 = vld [vmem:[%s14793_s1 + $0x1a68] ss:$16 sps:$4 sm:$0xff]  }
 0x318   :  { %7189 = vmatprep.subr.bf16.mxu0 %v10990_v57  ;;  %8037 = vmatprep.subr.bf16.mxu1 %v10993_v58  ;;  %v11074_v57 = vld [vmem:[%s14793_s1 + $0x1a84] ss:$16 sps:$4 sm:$0xff]   ;;  %v11077_v58 = vld [vmem:[%s14793_s1 + $0x1a8c] ss:$16 sps:$4 sm:$0xff]  }
 0x31b   :  { %7190 = vmatpush1.bf16.msra.mxu0 %v10988_v61  ;;  %8038 = vmatpush1.bf16.msra.mxu1 %v10991_v62  ;;  %v11072_v61 = vld [vmem:[%s14793_s1 + $0x1a80] ss:$16 sps:$4 sm:$0xff]   ;;  %v11075_v62 = vld [vmem:[%s14793_s1 + $0x1a88] ss:$16 sps:$4 sm:$0xff]  }
 0x31c   :  { %7191 = vmatprep.subr.bf16.mxu0 %v10996_v63  ;;  %8039 = vmatprep.subr.bf16.mxu1 %v10999_v0  ;;  %v11080_v63 = vld [vmem:[%s14793_s1 + $0x1aa4] ss:$16 sps:$4 sm:$0xff]   ;;  %v11083_v0 = vld [vmem:[%s14793_s1 + $0x1aac] ss:$16 sps:$4 sm:$0xff]  }
 0x31f   :  { %7192 = vmatpush1.bf16.msra.mxu0 %v10994_v3  ;;  %8040 = vmatpush1.bf16.msra.mxu1 %v10997_v4  ;;  %v11078_v3 = vld [vmem:[%s14793_s1 + $0x1aa0] ss:$16 sps:$4 sm:$0xff]   ;;  %v11081_v4 = vld [vmem:[%s14793_s1 + $0x1aa8] ss:$16 sps:$4 sm:$0xff]  }
 0x320   :  { %7193 = vmatprep.subr.bf16.mxu0 %v11002_v1  ;;  %8041 = vmatprep.subr.bf16.mxu1 %v11005_v2  ;;  %v11086_v1 = vld [vmem:[%s14793_s1 + $0x1ac4] ss:$16 sps:$4 sm:$0xff]   ;;  %v11089_v2 = vld [vmem:[%s14793_s1 + $0x1acc] ss:$16 sps:$4 sm:$0xff]  }
 0x323   :  { %7194 = vmatpush1.bf16.msra.mxu0 %v11000_v5  ;;  %8042 = vmatpush1.bf16.msra.mxu1 %v11003_v6  ;;  %v11084_v5 = vld [vmem:[%s14793_s1 + $0x1ac0] ss:$16 sps:$4 sm:$0xff]   ;;  %v11087_v6 = vld [vmem:[%s14793_s1 + $0x1ac8] ss:$16 sps:$4 sm:$0xff]  }
 0x324   :  { %7195 = vmatprep.subr.bf16.mxu0 %v11008_v7  ;;  %8043 = vmatprep.subr.bf16.mxu1 %v11011_v8  ;;  %v11092_v7 = vld [vmem:[%s14793_s1 + $0x1ae4] ss:$16 sps:$4 sm:$0xff]   ;;  %v11095_v8 = vld [vmem:[%s14793_s1 + $0x1aec] ss:$16 sps:$4 sm:$0xff]  }
 0x327   :  { %7196 = vmatpush1.bf16.msra.mxu0 %v11006_v11  ;;  %8044 = vmatpush1.bf16.msra.mxu1 %v11009_v12  ;;  %v11090_v11 = vld [vmem:[%s14793_s1 + $0x1ae0] ss:$16 sps:$4 sm:$0xff]   ;;  %v11093_v12 = vld [vmem:[%s14793_s1 + $0x1ae8] ss:$16 sps:$4 sm:$0xff]  }
 0x328   :  { %7197 = vmatprep.subr.bf16.mxu0 %v11014_v9  ;;  %8045 = vmatprep.subr.bf16.mxu1 %v11017_v10  ;;  %v11098_v9 = vld [vmem:[%s14793_s1 + $0x1b04] ss:$16 sps:$4 sm:$0xff]   ;;  %v11101_v10 = vld [vmem:[%s14793_s1 + $0x1b0c] ss:$16 sps:$4 sm:$0xff]  }
 0x32b   :  { %7198 = vmatpush1.bf16.msra.mxu0 %v11012_v13  ;;  %8046 = vmatpush1.bf16.msra.mxu1 %v11015_v14  ;;  %v11096_v13 = vld [vmem:[%s14793_s1 + $0x1b00] ss:$16 sps:$4 sm:$0xff]   ;;  %v11099_v14 = vld [vmem:[%s14793_s1 + $0x1b08] ss:$16 sps:$4 sm:$0xff]  }
 0x32c   :  { %7199 = vmatprep.subr.bf16.mxu0 %v11020_v15  ;;  %8047 = vmatprep.subr.bf16.mxu1 %v11023_v16  ;;  %v11104_v15 = vld [vmem:[%s14793_s1 + $0x1b24] ss:$16 sps:$4 sm:$0xff]   ;;  %v11107_v16 = vld [vmem:[%s14793_s1 + $0x1b2c] ss:$16 sps:$4 sm:$0xff]  }
 0x32f   :  { %7200 = vmatpush1.bf16.msra.mxu0 %v11018_v19  ;;  %8048 = vmatpush1.bf16.msra.mxu1 %v11021_v17  ;;  %v11102_v19 = vld [vmem:[%s14793_s1 + $0x1b20] ss:$16 sps:$4 sm:$0xff]   ;;  %v11105_v17 = vld [vmem:[%s14793_s1 + $0x1b28] ss:$16 sps:$4 sm:$0xff]  }
 0x330   :  { %7201 = vmatprep.subr.bf16.mxu0 %v11026_v18  ;;  %8049 = vmatprep.subr.bf16.mxu1 %v11029_v20  ;;  %v11110_v18 = vld [vmem:[%s14793_s1 + $0x1b44] ss:$16 sps:$4 sm:$0xff]   ;;  %v11113_v20 = vld [vmem:[%s14793_s1 + $0x1b4c] ss:$16 sps:$4 sm:$0xff]  }
 0x333   :  { %7202 = vmatpush1.bf16.msra.mxu0 %v11024_v21  ;;  %8050 = vmatpush1.bf16.msra.mxu1 %v11027_v22  ;;  %v11108_v21 = vld [vmem:[%s14793_s1 + $0x1b40] ss:$16 sps:$4 sm:$0xff]   ;;  %v11111_v22 = vld [vmem:[%s14793_s1 + $0x1b48] ss:$16 sps:$4 sm:$0xff]  }
 0x334   :  { %7203 = vmatprep.subr.bf16.mxu0 %v11032_v23  ;;  %8051 = vmatprep.subr.bf16.mxu1 %v11035_v24  ;;  %v11116_v23 = vld [vmem:[%s14793_s1 + $0x1b64] ss:$16 sps:$4 sm:$0xff]   ;;  %v11119_v24 = vld [vmem:[%s14793_s1 + $0x1b6c] ss:$16 sps:$4 sm:$0xff]  }
 0x337   :  { %7204 = vmatpush1.bf16.msra.mxu0 %v11030_v26  ;;  %8052 = vmatpush1.bf16.msra.mxu1 %v11033_v25  ;;  %v11114_v26 = vld [vmem:[%s14793_s1 + $0x1b60] ss:$16 sps:$4 sm:$0xff]   ;;  %v11117_v25 = vld [vmem:[%s14793_s1 + $0x1b68] ss:$16 sps:$4 sm:$0xff]  }
 0x338   :  { %7205 = vmatprep.subr.bf16.mxu0 %v11038_v27  ;;  %8053 = vmatprep.subr.bf16.mxu1 %v11041_v28  ;;  %v11122_v27 = vld [vmem:[%s14793_s1 + $0x1b84] ss:$16 sps:$4 sm:$0xff]   ;;  %v11125_v28 = vld [vmem:[%s14793_s1 + $0x1b8c] ss:$16 sps:$4 sm:$0xff]  }
 0x33b   :  { %7206 = vmatpush1.bf16.msra.mxu0 %v11036_v29  ;;  %8054 = vmatpush1.bf16.msra.mxu1 %v11039_v30  ;;  %v11120_v29 = vld [vmem:[%s14793_s1 + $0x1b80] ss:$16 sps:$4 sm:$0xff]   ;;  %v11123_v30 = vld [vmem:[%s14793_s1 + $0x1b88] ss:$16 sps:$4 sm:$0xff]  }
 0x33c   :  { %7207 = vmatprep.subr.bf16.mxu0 %v11044_v31  ;;  %8055 = vmatprep.subr.bf16.mxu1 %v11047_v32  ;;  %v11128_v31 = vld [vmem:[%s14793_s1 + $0x1ba4] ss:$16 sps:$4 sm:$0xff]   ;;  %v11131_v32 = vld [vmem:[%s14793_s1 + $0x1bac] ss:$16 sps:$4 sm:$0xff]  }
 0x33f   :  { %7208 = vmatpush1.bf16.msra.mxu0 %v11042_v34  ;;  %8056 = vmatpush1.bf16.msra.mxu1 %v11045_v36  ;;  %v11126_v34 = vld [vmem:[%s14793_s1 + $0x1ba0] ss:$16 sps:$4 sm:$0xff]   ;;  %v11129_v36 = vld [vmem:[%s14793_s1 + $0x1ba8] ss:$16 sps:$4 sm:$0xff]  }
 0x340   :  { %7230 = vmatprep.subr.bf16.mxu0 %v11050_v33  ;;  %8078 = vmatprep.subr.bf16.mxu1 %v11053_v35  ;;  %v11134_v33 = vld [vmem:[%s14793_s1 + $0x1bc4] ss:$16 sps:$4 sm:$0xff]   ;;  %v11137_v35 = vld [vmem:[%s14793_s1 + $0x1bcc] ss:$16 sps:$4 sm:$0xff]  }
 0x342   :  { %7210 = vmatmul.mubr.bf16.vlgmr.msra.gmra.mrb[0].mxu0 %v8478_v37  ;;  %8058 = vmatmul.mubr.bf16.vlgmr.msra.gmra.mrb[0].mxu1 %v8478_v37  ;;  %v11132_v37 = vld [vmem:[%s14793_s1 + $0x1bc0] ss:$16 sps:$4 sm:$0xff]  }
 0x343   :  { %7231 = vmatpush1.bf16.msra.mxu0 %v11048_v40  ;;  %8079 = vmatpush1.bf16.msra.mxu1 %v11051_v42  ;;  %v11143_v40 = vld [vmem:[%s14793_s1 + $0x1bec] ss:$16 sps:$4 sm:$0xff]   ;;  %v11138_v42 = vld [vmem:[%s14793_s1 + $0x1be0] ss:$16 sps:$4 sm:$0xff]  }
 0x344   :  { %7232 = vmatprep.subr.bf16.mxu0 %v11056_v44  ;;  %8080 = vmatprep.subr.bf16.mxu1 %v11059_v41  ;;  %v11141_v44 = vld [vmem:[%s14793_s1 + $0x1be8] ss:$16 sps:$4 sm:$0xff]   ;;  %v11146_v41 = vld [vmem:[%s14793_s1 + $0x1c04] ss:$16 sps:$4 sm:$0xff]  }
 0x345   :  { %7219 = vmatprep.mubr.bf16.mxu0 %v8511_v43  ;;  %8067 = vmatprep.mubr.bf16.mxu1 %v8511_v43  ;;  %v11149_v43 = vld [vmem:[%s14793_s1 + $0x1c0c] ss:$16 sps:$4 sm:$0xff]  }
 0x347   :  { %7233 = vmatpush1.bf16.msra.mxu0 %v11054_v45  ;;  %8081 = vmatpush1.bf16.msra.mxu1 %v11057_v46  ;;  %v8480_v45 = vcombine.low %v14138_v52, %v14143_v49  ;;  %v58_v46 = vld [vmem:[%s14794_s0 + $0x168] sm:$0xff]  ;;  %v11152_v52 = vld [vmem:[%s14793_s1 + $0x1c24] ss:$16 sps:$4 sm:$0xff]  }
 0x348   :  { %7234 = vmatprep.subr.bf16.mxu0 %v11062_v47  ;;  %8082 = vmatprep.subr.bf16.mxu1 %v11065_v48  ;;  %v74_v47 = vld [vmem:[%s14794_s0 + $0x1e8] sm:$0xff]  ;;  %v11144_v48 = vld [vmem:[%s14793_s1 + $0x1c00] ss:$16 sps:$4 sm:$0xff]  }
 0x349   :  { %v11155_v49 = vld [vmem:[%s14793_s1 + $0x1c2c] ss:$16 sps:$4 sm:$0xff]  }
 0x34a   :  { %7220 = vmatmul.mubr.bf16.gmra.mrb[4].mxu0 %v8510_v51  ;;  %8068 = vmatmul.mubr.bf16.gmra.mrb[4].mxu1 %v8510_v51  ;;  %v11147_v51 = vld [vmem:[%s14793_s1 + $0x1c08] ss:$16 sps:$4 sm:$0xff]  }
 0x34b   :  { %7235 = vmatpush1.bf16.msra.mxu0 %v11060_v50  ;;  %8083 = vmatpush1.bf16.msra.mxu1 %v11063_v53  ;;  %v8513_v50 = vcombine.high %v58_v46, %v74_v47  ;;  %v11150_v53 = vld [vmem:[%s14793_s1 + $0x1c20] ss:$16 sps:$4 sm:$0xff]  }
 0x34c   :  { %7236 = vmatprep.subr.bf16.mxu0 %v11068_v54  ;;  %8084 = vmatprep.subr.bf16.mxu1 %v11071_v55  ;;  %v11153_v54 = vld [vmem:[%s14793_s1 + $0x1c28] ss:$16 sps:$4 sm:$0xff]   ;;  %v11158_v55 = vld [vmem:[%s14793_s1 + $0x1c44] ss:$16 sps:$4 sm:$0xff]  }
 0x34d   :  { %7262 = vmatprep.mubr.bf16.mxu0 %v8481_v56  ;;  %8110 = vmatprep.mubr.bf16.mxu1 %v8481_v56  ;;  %v11161_v56 = vld [vmem:[%s14793_s1 + $0x1c4c] ss:$16 sps:$4 sm:$0xff]  }
 0x34f   :  { %7237 = vmatpush1.bf16.msra.mxu0 %v11066_v59  ;;  %8085 = vmatpush1.bf16.msra.mxu1 %v11069_v60  ;;  %v8512_v59 = vcombine.low %v58_v46, %v74_v47  ;;  %v14350_v60 = vld [vmem:[%s14794_s0 + $0x70] sm:$0xff]  ;;  %v11231_v46 = vld [vmem:[%s14793_s1 + $0x1dc8] ss:$16 sps:$4 sm:$0xff]  }
 0x350   :  { %7238 = vmatprep.subr.bf16.mxu0 %v11074_v57  ;;  %8086 = vmatprep.subr.bf16.mxu1 %v11077_v58  ;;  %v14355_v57 = vld [vmem:[%s14794_s0 + $0xf0] sm:$0xff] }
 0x351   :  { %v11156_v58 = vld [vmem:[%s14793_s1 + $0x1c40] ss:$16 sps:$4 sm:$0xff]   ;;  %v11236_v47 = vld [vmem:[%s14793_s1 + $0x1de4] ss:$16 sps:$4 sm:$0xff]  }
 0x353   :  { %7239 = vmatpush1.bf16.msra.mxu0 %v11072_v61  ;;  %8087 = vmatpush1.bf16.msra.mxu1 %v11075_v62  ;;  %v11159_v61 = vld [vmem:[%s14793_s1 + $0x1c48] ss:$16 sps:$4 sm:$0xff]   ;;  %v11164_v62 = vld [vmem:[%s14793_s1 + $0x1c64] ss:$16 sps:$4 sm:$0xff]  }
 0x354   :  { %7240 = vmatprep.subr.bf16.mxu0 %v11080_v63  ;;  %8088 = vmatprep.subr.bf16.mxu1 %v11083_v0  ;;  %v11167_v63 = vld [vmem:[%s14793_s1 + $0x1c6c] ss:$16 sps:$4 sm:$0xff]   ;;  %v8483_v0 = vcombine.high %v14350_v60, %v14355_v57 }
 0x357   :  { %7241 = vmatpush1.bf16.msra.mxu0 %v11078_v3  ;;  %8089 = vmatpush1.bf16.msra.mxu1 %v11081_v4  ;;  %v11162_v3 = vld [vmem:[%s14793_s1 + $0x1c60] ss:$16 sps:$4 sm:$0xff]   ;;  %v11165_v4 = vld [vmem:[%s14793_s1 + $0x1c68] ss:$16 sps:$4 sm:$0xff]  }
 0x358   :  { %7242 = vmatprep.subr.bf16.mxu0 %v11086_v1  ;;  %8090 = vmatprep.subr.bf16.mxu1 %v11089_v2  ;;  %v11170_v1 = vld [vmem:[%s14793_s1 + $0x1c84] ss:$16 sps:$4 sm:$0xff]   ;;  %v11173_v2 = vld [vmem:[%s14793_s1 + $0x1c8c] ss:$16 sps:$4 sm:$0xff]  }
 0x35b   :  { %7243 = vmatpush1.bf16.msra.mxu0 %v11084_v5  ;;  %8091 = vmatpush1.bf16.msra.mxu1 %v11087_v6  ;;  %v11168_v5 = vld [vmem:[%s14793_s1 + $0x1c80] ss:$16 sps:$4 sm:$0xff]   ;;  %v11171_v6 = vld [vmem:[%s14793_s1 + $0x1c88] ss:$16 sps:$4 sm:$0xff]  }
 0x35c   :  { %7244 = vmatprep.subr.bf16.mxu0 %v11092_v7  ;;  %8092 = vmatprep.subr.bf16.mxu1 %v11095_v8  ;;  %v11176_v7 = vld [vmem:[%s14793_s1 + $0x1ca4] ss:$16 sps:$4 sm:$0xff]   ;;  %v11179_v8 = vld [vmem:[%s14793_s1 + $0x1cac] ss:$16 sps:$4 sm:$0xff]  }
 0x35f   :  { %7245 = vmatpush1.bf16.msra.mxu0 %v11090_v11  ;;  %8093 = vmatpush1.bf16.msra.mxu1 %v11093_v12  ;;  %v11174_v11 = vld [vmem:[%s14793_s1 + $0x1ca0] ss:$16 sps:$4 sm:$0xff]   ;;  %v11177_v12 = vld [vmem:[%s14793_s1 + $0x1ca8] ss:$16 sps:$4 sm:$0xff]  }
 0x360   :  { %7246 = vmatprep.subr.bf16.mxu0 %v11098_v9  ;;  %8094 = vmatprep.subr.bf16.mxu1 %v11101_v10  ;;  %v11182_v9 = vld [vmem:[%s14793_s1 + $0x1cc4] ss:$16 sps:$4 sm:$0xff]   ;;  %v11185_v10 = vld [vmem:[%s14793_s1 + $0x1ccc] ss:$16 sps:$4 sm:$0xff]  }
 0x363   :  { %7247 = vmatpush1.bf16.msra.mxu0 %v11096_v13  ;;  %8095 = vmatpush1.bf16.msra.mxu1 %v11099_v14  ;;  %v11180_v13 = vld [vmem:[%s14793_s1 + $0x1cc0] ss:$16 sps:$4 sm:$0xff]   ;;  %v11183_v14 = vld [vmem:[%s14793_s1 + $0x1cc8] ss:$16 sps:$4 sm:$0xff]  }
 0x364   :  { %7248 = vmatprep.subr.bf16.mxu0 %v11104_v15  ;;  %8096 = vmatprep.subr.bf16.mxu1 %v11107_v16  ;;  %v11188_v15 = vld [vmem:[%s14793_s1 + $0x1ce4] ss:$16 sps:$4 sm:$0xff]   ;;  %v11191_v16 = vld [vmem:[%s14793_s1 + $0x1cec] ss:$16 sps:$4 sm:$0xff]  }
 0x367   :  { %7249 = vmatpush1.bf16.msra.mxu0 %v11102_v19  ;;  %8097 = vmatpush1.bf16.msra.mxu1 %v11105_v17  ;;  %v11186_v19 = vld [vmem:[%s14793_s1 + $0x1ce0] ss:$16 sps:$4 sm:$0xff]   ;;  %v11189_v17 = vld [vmem:[%s14793_s1 + $0x1ce8] ss:$16 sps:$4 sm:$0xff]  }
 0x368   :  { %7250 = vmatprep.subr.bf16.mxu0 %v11110_v18  ;;  %8098 = vmatprep.subr.bf16.mxu1 %v11113_v20  ;;  %v11194_v18 = vld [vmem:[%s14793_s1 + $0x1d04] ss:$16 sps:$4 sm:$0xff]   ;;  %v11197_v20 = vld [vmem:[%s14793_s1 + $0x1d0c] ss:$16 sps:$4 sm:$0xff]  }
 0x36b   :  { %7251 = vmatpush1.bf16.msra.mxu0 %v11108_v21  ;;  %8099 = vmatpush1.bf16.msra.mxu1 %v11111_v22  ;;  %v11192_v21 = vld [vmem:[%s14793_s1 + $0x1d00] ss:$16 sps:$4 sm:$0xff]   ;;  %v11195_v22 = vld [vmem:[%s14793_s1 + $0x1d08] ss:$16 sps:$4 sm:$0xff]  }
 0x36c   :  { %7252 = vmatprep.subr.bf16.mxu0 %v11116_v23  ;;  %8100 = vmatprep.subr.bf16.mxu1 %v11119_v24  ;;  %v11200_v23 = vld [vmem:[%s14793_s1 + $0x1d24] ss:$16 sps:$4 sm:$0xff]   ;;  %v11203_v24 = vld [vmem:[%s14793_s1 + $0x1d2c] ss:$16 sps:$4 sm:$0xff]  }
 0x36f   :  { %7253 = vmatpush1.bf16.msra.mxu0 %v11114_v26  ;;  %8101 = vmatpush1.bf16.msra.mxu1 %v11117_v25  ;;  %v11198_v26 = vld [vmem:[%s14793_s1 + $0x1d20] ss:$16 sps:$4 sm:$0xff]   ;;  %v11201_v25 = vld [vmem:[%s14793_s1 + $0x1d28] ss:$16 sps:$4 sm:$0xff]  }
 0x370   :  { %7254 = vmatprep.subr.bf16.mxu0 %v11122_v27  ;;  %8102 = vmatprep.subr.bf16.mxu1 %v11125_v28  ;;  %v11206_v27 = vld [vmem:[%s14793_s1 + $0x1d44] ss:$16 sps:$4 sm:$0xff]   ;;  %v11209_v28 = vld [vmem:[%s14793_s1 + $0x1d4c] ss:$16 sps:$4 sm:$0xff]  }
 0x373   :  { %7255 = vmatpush1.bf16.msra.mxu0 %v11120_v29  ;;  %8103 = vmatpush1.bf16.msra.mxu1 %v11123_v30  ;;  %v11204_v29 = vld [vmem:[%s14793_s1 + $0x1d40] ss:$16 sps:$4 sm:$0xff]   ;;  %v11207_v30 = vld [vmem:[%s14793_s1 + $0x1d48] ss:$16 sps:$4 sm:$0xff]  }
 0x374   :  { %7256 = vmatprep.subr.bf16.mxu0 %v11128_v31  ;;  %8104 = vmatprep.subr.bf16.mxu1 %v11131_v32  ;;  %v11212_v31 = vld [vmem:[%s14793_s1 + $0x1d64] ss:$16 sps:$4 sm:$0xff]   ;;  %v11215_v32 = vld [vmem:[%s14793_s1 + $0x1d6c] ss:$16 sps:$4 sm:$0xff]  }
 0x377   :  { %7257 = vmatpush1.bf16.msra.mxu0 %v11126_v34  ;;  %8105 = vmatpush1.bf16.msra.mxu1 %v11129_v36  ;;  %v11210_v34 = vld [vmem:[%s14793_s1 + $0x1d60] ss:$16 sps:$4 sm:$0xff]   ;;  %v11213_v36 = vld [vmem:[%s14793_s1 + $0x1d68] ss:$16 sps:$4 sm:$0xff]  }
 0x378   :  { %7258 = vmatprep.subr.bf16.mxu0 %v11134_v33  ;;  %8106 = vmatprep.subr.bf16.mxu1 %v11137_v35  ;;  %v11218_v33 = vld [vmem:[%s14793_s1 + $0x1d84] ss:$16 sps:$4 sm:$0xff]   ;;  %v11221_v35 = vld [vmem:[%s14793_s1 + $0x1d8c] ss:$16 sps:$4 sm:$0xff]  }
 0x37b   :  { %7259 = vmatpush1.bf16.msra.mxu0 %v11132_v37  ;;  %8107 = vmatpush1.bf16.msra.mxu1 %v11135_v38  ;;  %v11216_v37 = vld [vmem:[%s14793_s1 + $0x1d80] ss:$16 sps:$4 sm:$0xff]   ;;  %v11219_v38 = vld [vmem:[%s14793_s1 + $0x1d88] ss:$16 sps:$4 sm:$0xff]  }
 0x37c   :  { %7260 = vmatprep.subr.bf16.mxu0 %v11140_v39  ;;  %8108 = vmatprep.subr.bf16.mxu1 %v11143_v40  ;;  %v11224_v39 = vld [vmem:[%s14793_s1 + $0x1da4] ss:$16 sps:$4 sm:$0xff]   ;;  %v11227_v40 = vld [vmem:[%s14793_s1 + $0x1dac] ss:$16 sps:$4 sm:$0xff]  }
 0x37f   :  { %7261 = vmatpush1.bf16.msra.mxu0 %v11138_v42  ;;  %8109 = vmatpush1.bf16.msra.mxu1 %v11141_v44  ;;  %v11222_v42 = vld [vmem:[%s14793_s1 + $0x1da0] ss:$16 sps:$4 sm:$0xff]   ;;  %v11225_v44 = vld [vmem:[%s14793_s1 + $0x1da8] ss:$16 sps:$4 sm:$0xff]  }
 0x380   :  { %7283 = vmatprep.subr.bf16.mxu0 %v11146_v41  ;;  %8131 = vmatprep.subr.bf16.mxu1 %v11149_v43  ;;  %v11230_v41 = vld [vmem:[%s14793_s1 + $0x1dc4] ss:$16 sps:$4 sm:$0xff]   ;;  %v11233_v43 = vld [vmem:[%s14793_s1 + $0x1dcc] ss:$16 sps:$4 sm:$0xff]  }
 0x382   :  { %7263 = vmatmul.mubr.bf16.vlgmr.msra.gmra.mrb[0].mxu0 %v8480_v45  ;;  %8111 = vmatmul.mubr.bf16.vlgmr.msra.gmra.mrb[0].mxu1 %v8480_v45  ;;  %v11228_v45 = vld [vmem:[%s14793_s1 + $0x1dc0] ss:$16 sps:$4 sm:$0xff]  }
 0x383   :  { %7284 = vmatpush1.bf16.msra.mxu0 %v11144_v48  ;;  %8132 = vmatpush1.bf16.msra.mxu1 %v11147_v51  ;;  %v11239_v48 = vld [vmem:[%s14793_s1 + $0x1dec] ss:$16 sps:$4 sm:$0xff]   ;;  %v11234_v51 = vld [vmem:[%s14793_s1 + $0x1de0] ss:$16 sps:$4 sm:$0xff]  }
 0x384   :  { %7285 = vmatprep.subr.bf16.mxu0 %v11152_v52  ;;  %8133 = vmatprep.subr.bf16.mxu1 %v11155_v49  ;;  %v11237_v52 = vld [vmem:[%s14793_s1 + $0x1de8] ss:$16 sps:$4 sm:$0xff]   ;;  %v11242_v49 = vld [vmem:[%s14793_s1 + $0x1e04] ss:$16 sps:$4 sm:$0xff]  }
 0x385   :  { %7272 = vmatprep.mubr.bf16.mxu0 %v8513_v50  ;;  %8120 = vmatprep.mubr.bf16.mxu1 %v8513_v50  ;;  %v11245_v50 = vld [vmem:[%s14793_s1 + $0x1e0c] ss:$16 sps:$4 sm:$0xff]  }
 0x387   :  { %7286 = vmatpush1.bf16.msra.mxu0 %v11150_v53  ;;  %8134 = vmatpush1.bf16.msra.mxu1 %v11153_v54  ;;  %v8482_v53 = vcombine.low %v14350_v60, %v14355_v57  ;;  %v59_v54 = vld [vmem:[%s14794_s0 + $0x170] sm:$0xff]  ;;  %v11251_v57 = vld [vmem:[%s14793_s1 + $0x1e2c] ss:$16 sps:$4 sm:$0xff]  }
 0x388   :  { %7287 = vmatprep.subr.bf16.mxu0 %v11158_v55  ;;  %8135 = vmatprep.subr.bf16.mxu1 %v11161_v56  ;;  %v75_v55 = vld [vmem:[%s14794_s0 + $0x1f0] sm:$0xff] }
 0x389   :  { %v11240_v56 = vld [vmem:[%s14793_s1 + $0x1e00] ss:$16 sps:$4 sm:$0xff]   ;;  %v11248_v60 = vld [vmem:[%s14793_s1 + $0x1e24] ss:$16 sps:$4 sm:$0xff]  }
 0x38a   :  { %7273 = vmatmul.mubr.bf16.gmra.mrb[4].mxu0 %v8512_v59  ;;  %8121 = vmatmul.mubr.bf16.gmra.mrb[4].mxu1 %v8512_v59  ;;  %v11243_v59 = vld [vmem:[%s14793_s1 + $0x1e08] ss:$16 sps:$4 sm:$0xff]  }
 0x38b   :  { %7288 = vmatpush1.bf16.msra.mxu0 %v11156_v58  ;;  %8136 = vmatpush1.bf16.msra.mxu1 %v11159_v61  ;;  %v8515_v58 = vcombine.high %v59_v54, %v75_v55  ;;  %v11246_v61 = vld [vmem:[%s14793_s1 + $0x1e20] ss:$16 sps:$4 sm:$0xff]  }
 0x38c   :  { %7289 = vmatprep.subr.bf16.mxu0 %v11164_v62  ;;  %8137 = vmatprep.subr.bf16.mxu1 %v11167_v63  ;;  %v11249_v62 = vld [vmem:[%s14793_s1 + $0x1e28] ss:$16 sps:$4 sm:$0xff]   ;;  %v11254_v63 = vld [vmem:[%s14793_s1 + $0x1e44] ss:$16 sps:$4 sm:$0xff]  }
 0x38d   :  { %7315 = vmatprep.mubr.bf16.mxu0 %v8483_v0  ;;  %8163 = vmatprep.mubr.bf16.mxu1 %v8483_v0  ;;  %v11257_v0 = vld [vmem:[%s14793_s1 + $0x1e4c] ss:$16 sps:$4 sm:$0xff]  }
 0x38f   :  { %7290 = vmatpush1.bf16.msra.mxu0 %v11162_v3  ;;  %8138 = vmatpush1.bf16.msra.mxu1 %v11165_v4  ;;  %v8514_v3 = vcombine.low %v59_v54, %v75_v55  ;;  %v14562_v4 = vld [vmem:[%s14794_s0 + $0x78] sm:$0xff]  ;;  %v11332_v55 = vld [vmem:[%s14793_s1 + $0x1fe4] ss:$16 sps:$4 sm:$0xff]  }
 0x390   :  { %7291 = vmatprep.subr.bf16.mxu0 %v11170_v1  ;;  %8139 = vmatprep.subr.bf16.mxu1 %v11173_v2  ;;  %v14567_v1 = vld [vmem:[%s14794_s0 + $0xf8] sm:$0xff]  ;;  %v11252_v2 = vld [vmem:[%s14793_s1 + $0x1e40] ss:$16 sps:$4 sm:$0xff]  }
 0x391   :  { %v11327_v54 = vld [vmem:[%s14793_s1 + $0x1fc8] ss:$16 sps:$4 sm:$0xff]  }
 0x393   :  { %7292 = vmatpush1.bf16.msra.mxu0 %v11168_v5  ;;  %8140 = vmatpush1.bf16.msra.mxu1 %v11171_v6  ;;  %v11255_v5 = vld [vmem:[%s14793_s1 + $0x1e48] ss:$16 sps:$4 sm:$0xff]   ;;  %v11260_v6 = vld [vmem:[%s14793_s1 + $0x1e64] ss:$16 sps:$4 sm:$0xff]  }
 0x394   :  { %7293 = vmatprep.subr.bf16.mxu0 %v11176_v7  ;;  %8141 = vmatprep.subr.bf16.mxu1 %v11179_v8  ;;  %v11263_v7 = vld [vmem:[%s14793_s1 + $0x1e6c] ss:$16 sps:$4 sm:$0xff]   ;;  %v8485_v8 = vcombine.high %v14562_v4, %v14567_v1 }
 0x397   :  { %7294 = vmatpush1.bf16.msra.mxu0 %v11174_v11  ;;  %8142 = vmatpush1.bf16.msra.mxu1 %v11177_v12  ;;  %v11258_v11 = vld [vmem:[%s14793_s1 + $0x1e60] ss:$16 sps:$4 sm:$0xff]   ;;  %v11261_v12 = vld [vmem:[%s14793_s1 + $0x1e68] ss:$16 sps:$4 sm:$0xff]  }
 0x398   :  { %7295 = vmatprep.subr.bf16.mxu0 %v11182_v9  ;;  %8143 = vmatprep.subr.bf16.mxu1 %v11185_v10  ;;  %v11266_v9 = vld [vmem:[%s14793_s1 + $0x1e84] ss:$16 sps:$4 sm:$0xff]   ;;  %v11269_v10 = vld [vmem:[%s14793_s1 + $0x1e8c] ss:$16 sps:$4 sm:$0xff]  }
 0x39b   :  { %7296 = vmatpush1.bf16.msra.mxu0 %v11180_v13  ;;  %8144 = vmatpush1.bf16.msra.mxu1 %v11183_v14  ;;  %v11264_v13 = vld [vmem:[%s14793_s1 + $0x1e80] ss:$16 sps:$4 sm:$0xff]   ;;  %v11267_v14 = vld [vmem:[%s14793_s1 + $0x1e88] ss:$16 sps:$4 sm:$0xff]  }
 0x39c   :  { %7297 = vmatprep.subr.bf16.mxu0 %v11188_v15  ;;  %8145 = vmatprep.subr.bf16.mxu1 %v11191_v16  ;;  %v11272_v15 = vld [vmem:[%s14793_s1 + $0x1ea4] ss:$16 sps:$4 sm:$0xff]   ;;  %v11275_v16 = vld [vmem:[%s14793_s1 + $0x1eac] ss:$16 sps:$4 sm:$0xff]  }
 0x39f   :  { %7298 = vmatpush1.bf16.msra.mxu0 %v11186_v19  ;;  %8146 = vmatpush1.bf16.msra.mxu1 %v11189_v17  ;;  %v11270_v19 = vld [vmem:[%s14793_s1 + $0x1ea0] ss:$16 sps:$4 sm:$0xff]   ;;  %v11273_v17 = vld [vmem:[%s14793_s1 + $0x1ea8] ss:$16 sps:$4 sm:$0xff]  }
 0x3a0   :  { %7299 = vmatprep.subr.bf16.mxu0 %v11194_v18  ;;  %8147 = vmatprep.subr.bf16.mxu1 %v11197_v20  ;;  %v11278_v18 = vld [vmem:[%s14793_s1 + $0x1ec4] ss:$16 sps:$4 sm:$0xff]   ;;  %v11281_v20 = vld [vmem:[%s14793_s1 + $0x1ecc] ss:$16 sps:$4 sm:$0xff]  }
 0x3a3   :  { %7300 = vmatpush1.bf16.msra.mxu0 %v11192_v21  ;;  %8148 = vmatpush1.bf16.msra.mxu1 %v11195_v22  ;;  %v11276_v21 = vld [vmem:[%s14793_s1 + $0x1ec0] ss:$16 sps:$4 sm:$0xff]   ;;  %v11279_v22 = vld [vmem:[%s14793_s1 + $0x1ec8] ss:$16 sps:$4 sm:$0xff]  }
 0x3a4   :  { %7301 = vmatprep.subr.bf16.mxu0 %v11200_v23  ;;  %8149 = vmatprep.subr.bf16.mxu1 %v11203_v24  ;;  %v11284_v23 = vld [vmem:[%s14793_s1 + $0x1ee4] ss:$16 sps:$4 sm:$0xff]   ;;  %v11287_v24 = vld [vmem:[%s14793_s1 + $0x1eec] ss:$16 sps:$4 sm:$0xff]  }
 0x3a7   :  { %7302 = vmatpush1.bf16.msra.mxu0 %v11198_v26  ;;  %8150 = vmatpush1.bf16.msra.mxu1 %v11201_v25  ;;  %v11282_v26 = vld [vmem:[%s14793_s1 + $0x1ee0] ss:$16 sps:$4 sm:$0xff]   ;;  %v11285_v25 = vld [vmem:[%s14793_s1 + $0x1ee8] ss:$16 sps:$4 sm:$0xff]  }
 0x3a8   :  { %7303 = vmatprep.subr.bf16.mxu0 %v11206_v27  ;;  %8151 = vmatprep.subr.bf16.mxu1 %v11209_v28  ;;  %v11290_v27 = vld [vmem:[%s14793_s1 + $0x1f04] ss:$16 sps:$4 sm:$0xff]   ;;  %v11293_v28 = vld [vmem:[%s14793_s1 + $0x1f0c] ss:$16 sps:$4 sm:$0xff]  }
 0x3ab   :  { %7304 = vmatpush1.bf16.msra.mxu0 %v11204_v29  ;;  %8152 = vmatpush1.bf16.msra.mxu1 %v11207_v30  ;;  %v11288_v29 = vld [vmem:[%s14793_s1 + $0x1f00] ss:$16 sps:$4 sm:$0xff]   ;;  %v11291_v30 = vld [vmem:[%s14793_s1 + $0x1f08] ss:$16 sps:$4 sm:$0xff]  }
 0x3ac   :  { %7305 = vmatprep.subr.bf16.mxu0 %v11212_v31  ;;  %8153 = vmatprep.subr.bf16.mxu1 %v11215_v32  ;;  %v11296_v31 = vld [vmem:[%s14793_s1 + $0x1f24] ss:$16 sps:$4 sm:$0xff]   ;;  %v11299_v32 = vld [vmem:[%s14793_s1 + $0x1f2c] ss:$16 sps:$4 sm:$0xff]  }
 0x3af   :  { %7306 = vmatpush1.bf16.msra.mxu0 %v11210_v34  ;;  %8154 = vmatpush1.bf16.msra.mxu1 %v11213_v36  ;;  %v11294_v34 = vld [vmem:[%s14793_s1 + $0x1f20] ss:$16 sps:$4 sm:$0xff]   ;;  %v11297_v36 = vld [vmem:[%s14793_s1 + $0x1f28] ss:$16 sps:$4 sm:$0xff]  }
 0x3b0   :  { %7307 = vmatprep.subr.bf16.mxu0 %v11218_v33  ;;  %8155 = vmatprep.subr.bf16.mxu1 %v11221_v35  ;;  %v11302_v33 = vld [vmem:[%s14793_s1 + $0x1f44] ss:$16 sps:$4 sm:$0xff]   ;;  %v11305_v35 = vld [vmem:[%s14793_s1 + $0x1f4c] ss:$16 sps:$4 sm:$0xff]  }
 0x3b3   :  { %7308 = vmatpush1.bf16.msra.mxu0 %v11216_v37  ;;  %8156 = vmatpush1.bf16.msra.mxu1 %v11219_v38  ;;  %v11300_v37 = vld [vmem:[%s14793_s1 + $0x1f40] ss:$16 sps:$4 sm:$0xff]   ;;  %v11303_v38 = vld [vmem:[%s14793_s1 + $0x1f48] ss:$16 sps:$4 sm:$0xff]  }
 0x3b4   :  { %7309 = vmatprep.subr.bf16.mxu0 %v11224_v39  ;;  %8157 = vmatprep.subr.bf16.mxu1 %v11227_v40  ;;  %v11308_v39 = vld [vmem:[%s14793_s1 + $0x1f64] ss:$16 sps:$4 sm:$0xff]   ;;  %v11311_v40 = vld [vmem:[%s14793_s1 + $0x1f6c] ss:$16 sps:$4 sm:$0xff]  }
 0x3b7   :  { %7310 = vmatpush1.bf16.msra.mxu0 %v11222_v42  ;;  %8158 = vmatpush1.bf16.msra.mxu1 %v11225_v44  ;;  %v11306_v42 = vld [vmem:[%s14793_s1 + $0x1f60] ss:$16 sps:$4 sm:$0xff]   ;;  %v11309_v44 = vld [vmem:[%s14793_s1 + $0x1f68] ss:$16 sps:$4 sm:$0xff]  }
 0x3b8   :  { %7311 = vmatprep.subr.bf16.mxu0 %v11230_v41  ;;  %8159 = vmatprep.subr.bf16.mxu1 %v11233_v43  ;;  %v11314_v41 = vld [vmem:[%s14793_s1 + $0x1f84] ss:$16 sps:$4 sm:$0xff]   ;;  %v11317_v43 = vld [vmem:[%s14793_s1 + $0x1f8c] ss:$16 sps:$4 sm:$0xff]  }
 0x3bb   :  { %7312 = vmatpush1.bf16.msra.mxu0 %v11228_v45  ;;  %8160 = vmatpush1.bf16.msra.mxu1 %v11231_v46  ;;  %v11312_v45 = vld [vmem:[%s14793_s1 + $0x1f80] ss:$16 sps:$4 sm:$0xff]   ;;  %v11315_v46 = vld [vmem:[%s14793_s1 + $0x1f88] ss:$16 sps:$4 sm:$0xff]  }
 0x3bc   :  { %7313 = vmatprep.subr.bf16.mxu0 %v11236_v47  ;;  %8161 = vmatprep.subr.bf16.mxu1 %v11239_v48  ;;  %v11320_v47 = vld [vmem:[%s14793_s1 + $0x1fa4] ss:$16 sps:$4 sm:$0xff]   ;;  %v11323_v48 = vld [vmem:[%s14793_s1 + $0x1fac] ss:$16 sps:$4 sm:$0xff]  }
 0x3bf   :  { %7314 = vmatpush1.bf16.msra.mxu0 %v11234_v51  ;;  %8162 = vmatpush1.bf16.msra.mxu1 %v11237_v52  ;;  %v11318_v51 = vld [vmem:[%s14793_s1 + $0x1fa0] ss:$16 sps:$4 sm:$0xff]   ;;  %v11321_v52 = vld [vmem:[%s14793_s1 + $0x1fa8] ss:$16 sps:$4 sm:$0xff]  }
 0x3c0   :  { %7336 = vmatprep.subr.bf16.mxu0 %v11242_v49  ;;  %8184 = vmatprep.subr.bf16.mxu1 %v11245_v50  ;;  %v11326_v49 = vld [vmem:[%s14793_s1 + $0x1fc4] ss:$16 sps:$4 sm:$0xff]   ;;  %v11329_v50 = vld [vmem:[%s14793_s1 + $0x1fcc] ss:$16 sps:$4 sm:$0xff]  }
 0x3c2   :  { %7316 = vmatmul.mubr.bf16.vlgmr.msra.gmra.mrb[0].mxu0 %v8482_v53  ;;  %8164 = vmatmul.mubr.bf16.vlgmr.msra.gmra.mrb[0].mxu1 %v8482_v53  ;;  %v11324_v53 = vld [vmem:[%s14793_s1 + $0x1fc0] ss:$16 sps:$4 sm:$0xff]  }
 0x3c3   :  { %7337 = vmatpush1.bf16.msra.mxu0 %v11240_v56  ;;  %8185 = vmatpush1.bf16.msra.mxu1 %v11243_v59  ;;  %v11335_v56 = vld [vmem:[%s14793_s1 + $0x1fec] ss:$16 sps:$4 sm:$0xff]   ;;  %v11330_v59 = vld [vmem:[%s14793_s1 + $0x1fe0] ss:$16 sps:$4 sm:$0xff]  }
 0x3c4   :  { %7338 = vmatprep.subr.bf16.mxu0 %v11248_v60  ;;  %8186 = vmatprep.subr.bf16.mxu1 %v11251_v57  ;;  %v11333_v60 = vld [vmem:[%s14793_s1 + $0x1fe8] ss:$16 sps:$4 sm:$0xff]  }
 0x3c5   :  { %7325 = vmatprep.mubr.bf16.mxu0 %v8515_v58  ;;  %8173 = vmatprep.mubr.bf16.mxu1 %v8515_v58  ;;  %v60_v57 = vld [vmem:[%s14794_s0 + $0x178] sm:$0xff] }
 0x3c6   :  { %v76_v58 = vld [vmem:[%s14794_s0 + $0x1f8] sm:$0xff] }
 0x3c7   :  { %7339 = vmatpush1.bf16.msra.mxu0 %v11246_v61  ;;  %8187 = vmatpush1.bf16.msra.mxu1 %v11249_v62  ;;  %v8484_v61 = vcombine.low %v14562_v4, %v14567_v1  ;;  %v8517_v62 = vcombine.high %v60_v57, %v76_v58 }
 0x3c8   :  { %7340 = vmatprep.subr.bf16.mxu0 %v11254_v63  ;;  %8188 = vmatprep.subr.bf16.mxu1 %v11257_v0  ;;  %v8516_v63 = vcombine.low %v60_v57, %v76_v58  ;;  %v11336_v0 = vmov 1966171168  }
 0x3ca   :  { %7326 = vmatmul.mubr.bf16.gmra.mrb[4].mxu0 %v8514_v3  ;;  %8174 = vmatmul.mubr.bf16.gmra.mrb[4].mxu1 %v8514_v3  ;;  %v8280_v3 = vunpack.c.l.s4 %v11336_v0 }
 0x3cb   :  { %7341 = vmatpush1.bf16.msra.mxu0 %v11252_v2  ;;  %8189 = vmatpush1.bf16.msra.mxu1 %v11255_v5  ;;  %v8282_v2 = vlaneseq }
 0x3cc   :  { %7342 = vmatprep.subr.bf16.mxu0 %v11260_v6  ;;  %8190 = vmatprep.subr.bf16.mxu1 %v11263_v7  ;;  %v8281_v4 = vunpack.c.0.s8 %v8280_v3 }
 0x3cd   :  { %7368 = vmatprep.mubr.bf16.mxu0 %v8485_v8  ;;  %8216 = vmatprep.mubr.bf16.mxu1 %v8485_v8  ;;  %v8283_v1 = vshrl.u32 %v8282_v2, 7  ;;  %vm8304_vm0 = vcmp.lt.s32.totalorder %v8282_v2, 512 }
 0x3cf   :  { %7343 = vmatpush1.bf16.msra.mxu0 %v11258_v11  ;;  %8191 = vmatpush1.bf16.msra.mxu1 %v11261_v12 }
 0x3d0   :  { %7344 = vmatprep.subr.bf16.mxu0 %v11266_v9  ;;  %8192 = vmatprep.subr.bf16.mxu1 %v11269_v10 }
 0x3d3   :  { %7345 = vmatpush1.bf16.msra.mxu0 %v11264_v13  ;;  %8193 = vmatpush1.bf16.msra.mxu1 %v11267_v14 }
 0x3d4   :  { %7346 = vmatprep.subr.bf16.mxu0 %v11272_v15  ;;  %8194 = vmatprep.subr.bf16.mxu1 %v11275_v16 }
 0x3d7   :  { %7347 = vmatpush1.bf16.msra.mxu0 %v11270_v19  ;;  %8195 = vmatpush1.bf16.msra.mxu1 %v11273_v17 }
 0x3d8   :  { %7348 = vmatprep.subr.bf16.mxu0 %v11278_v18  ;;  %8196 = vmatprep.subr.bf16.mxu1 %v11281_v20 }
 0x3db   :  { %7349 = vmatpush1.bf16.msra.mxu0 %v11276_v21  ;;  %8197 = vmatpush1.bf16.msra.mxu1 %v11279_v22 }
 0x3dc   :  { %7350 = vmatprep.subr.bf16.mxu0 %v11284_v23  ;;  %8198 = vmatprep.subr.bf16.mxu1 %v11287_v24 }
 0x3df   :  { %7351 = vmatpush1.bf16.msra.mxu0 %v11282_v26  ;;  %8199 = vmatpush1.bf16.msra.mxu1 %v11285_v25 }
 0x3e0   :  { %7352 = vmatprep.subr.bf16.mxu0 %v11290_v27  ;;  %8200 = vmatprep.subr.bf16.mxu1 %v11293_v28 }
 0x3e3   :  { %7353 = vmatpush1.bf16.msra.mxu0 %v11288_v29  ;;  %8201 = vmatpush1.bf16.msra.mxu1 %v11291_v30 }
 0x3e4   :  { %7354 = vmatprep.subr.bf16.mxu0 %v11296_v31  ;;  %8202 = vmatprep.subr.bf16.mxu1 %v11299_v32 }
 0x3e7   :  { %7355 = vmatpush1.bf16.msra.mxu0 %v11294_v34  ;;  %8203 = vmatpush1.bf16.msra.mxu1 %v11297_v36 }
 0x3e8   :  { %7356 = vmatprep.subr.bf16.mxu0 %v11302_v33  ;;  %8204 = vmatprep.subr.bf16.mxu1 %v11305_v35  ;;  %v14754_v33 = vsub.s32 %v8281_v4, %v8283_v1 }
 0x3eb   :  { %7357 = vmatpush1.bf16.msra.mxu0 %v11300_v37  ;;  %8205 = vmatpush1.bf16.msra.mxu1 %v11303_v38 }
 0x3ec   :  { %7358 = vmatprep.subr.bf16.mxu0 %v11308_v39  ;;  %8206 = vmatprep.subr.bf16.mxu1 %v11311_v40 }
 0x3ef   :  { %7359 = vmatpush1.bf16.msra.mxu0 %v11306_v42  ;;  %8207 = vmatpush1.bf16.msra.mxu1 %v11309_v44 }
 0x3f0   :  { %7360 = vmatprep.subr.bf16.mxu0 %v11314_v41  ;;  %8208 = vmatprep.subr.bf16.mxu1 %v11317_v43 }
 0x3f3   :  { %7361 = vmatpush1.bf16.msra.mxu0 %v11312_v45  ;;  %8209 = vmatpush1.bf16.msra.mxu1 %v11315_v46 }
 0x3f4   :  { %7362 = vmatprep.subr.bf16.mxu0 %v11320_v47  ;;  %8210 = vmatprep.subr.bf16.mxu1 %v11323_v48 }
 0x3f7   :  { %7363 = vmatpush1.bf16.msra.mxu0 %v11318_v51  ;;  %8211 = vmatpush1.bf16.msra.mxu1 %v11321_v52 }
 0x3f8   :  { %7364 = vmatprep.subr.bf16.mxu0 %v11326_v49  ;;  %8212 = vmatprep.subr.bf16.mxu1 %v11329_v50 }
 0x3fb   :  { %7365 = vmatpush1.bf16.msra.mxu0 %v11324_v53  ;;  %8213 = vmatpush1.bf16.msra.mxu1 %v11327_v54 }
 0x3fc   :  { %7366 = vmatprep.subr.bf16.mxu0 %v11332_v55  ;;  %8214 = vmatprep.subr.bf16.mxu1 %v11335_v56 }
 0x3ff   :  { %7367 = vmatpush1.bf16.msra.mxu0 %v11330_v59  ;;  %8215 = vmatpush1.bf16.msra.mxu1 %v11333_v60 }
 0x402   :  { %7369 = vmatmul.mubr.bf16.vlgmr.msra.gmra.mrb[0].mxu0 %v8484_v61  ;;  %8217 = vmatmul.mubr.bf16.vlgmr.msra.gmra.mrb[0].mxu1 %v8484_v61 }
 0x403   :  { %7378 = vmatprep.mubr.bf16.mxu0 %v8517_v62  ;;  %8226 = vmatprep.mubr.bf16.mxu1 %v8517_v62 }
 0x40a   :  { %7379 = vmatmul.mubr.bf16.gmra.mrb[4].mxu0 %v8516_v63  ;;  %8227 = vmatmul.mubr.bf16.gmra.mrb[4].mxu1 %v8516_v63 }
 0x4d5   :  { %v7370_v5 = vpop.f32.mrb[0].mxu0  ;;  %v8218_v6 = vpop.f32.mrb[0].mxu1 }
 0x4d6   :  { %v8307_v7 = vmul.f32 %v7370_v5, %v7370_v5  ;;  %v8309_v8 = vmul.f32 %v8218_v6, %v8218_v6  ;;  %v7372_v11 = vpop.f32.mrb[1].mxu0  ;;  %v8220_v12 = vpop.f32.mrb[1].mxu1 }
 0x4d7   :  { %v8308_v9 = vmul.f32 %v7372_v11, %v7372_v11  ;;  %v9551_v10 = vpack.c.bf16 %v7372_v11, %v7370_v5  ;;  %v8310_v13 = vmul.f32 %v8220_v12, %v8220_v12  ;;  %v9552_v14 = vpack.c.bf16 %v8220_v12, %v8218_v6  ;;  %v7374_v15 = vpop.f32.mrb[2].mxu0  ;;  %v8222_v16 = vpop.f32.mrb[2].mxu1 }
 0x4d8   :  { %v8237_v19 = vadd.f32 %v7374_v15, %v7370_v5  ;;  %v8311_v17 = vmul.f32 %v7374_v15, %v7374_v15  ;;  %v8255_v18 = vadd.f32 %v8222_v16, %v8218_v6  ;;  %v8313_v20 = vmul.f32 %v8222_v16, %v8222_v16  ;;  %v7376_v21 = vpop.f32.mrb[3].mxu0  ;;  %v8224_v22 = vpop.f32.mrb[3].mxu1 }
 0x4d9   :  { %8438 = vst [vmem:[%s14795_s2] sm:$0xff] %v9551_v10  ;;  %8439 = vst [vmem:[%s14795_s2 + $0x8] sm:$0xff] %v9552_v14  ;;  %v8246_v23 = vadd.f32 %v7376_v21, %v7372_v11  ;;  %v8312_v24 = vmul.f32 %v7376_v21, %v7376_v21  ;;  %v9553_v26 = vpack.c.bf16 %v7376_v21, %v7374_v15 }
 0x4da   :  { %v8264_v25 = vadd.f32 %v8224_v22, %v8220_v12  ;;  %v8323_v27 = vadd.f32 %v8311_v17, %v8307_v7  ;;  %v8341_v28 = vadd.f32 %v8313_v20, %v8309_v8  ;;  %v8314_v29 = vmul.f32 %v8224_v22, %v8224_v22 }
 0x4db   :  { %v9554_v30 = vpack.c.bf16 %v8224_v22, %v8222_v16  ;;  %v8332_v31 = vadd.f32 %v8312_v24, %v8308_v9  ;;  %8440 = vst [vmem:[%s14795_s2 + $0x10] sm:$0xff] %v9553_v26 }
 0x4dc   :  { %v8350_v32 = vadd.f32 %v8314_v29, %v8310_v13 }
 0x4dd   :  { %8441 = vst [vmem:[%s14795_s2 + $0x18] sm:$0xff] %v9554_v30  ;;  %v7380_v34 = vpop.f32.mrb[4].mxu0  ;;  %v8228_v36 = vpop.f32.mrb[4].mxu1 }
 0x4de   :  { %v8238_v35 = vadd.f32 %v8237_v19, %v7380_v34  ;;  %v8315_v37 = vmul.f32 %v7380_v34, %v7380_v34  ;;  %v8256_v38 = vadd.f32 %v8255_v18, %v8228_v36  ;;  %v8317_v39 = vmul.f32 %v8228_v36, %v8228_v36  ;;  %v7382_v40 = vpop.f32.mrb[5].mxu0  ;;  %v8230_v42 = vpop.f32.mrb[5].mxu1 }
 0x4df   :  { %v8247_v44 = vadd.f32 %v8246_v23, %v7382_v40  ;;  %v8316_v41 = vmul.f32 %v7382_v40, %v7382_v40  ;;  %v9555_v43 = vpack.c.bf16 %v7382_v40, %v7380_v34  ;;  %v8265_v45 = vadd.f32 %v8264_v25, %v8230_v42  ;;  %v7384_v46 = vpop.f32.mrb[6].mxu0  ;;  %v14756_v47 = vpop.f32.mrb[6].mxu1 }
 0x4e0   :  { %v8324_v48 = vadd.f32 %v8323_v27, %v8315_v37  ;;  %v8342_v51 = vadd.f32 %v8341_v28, %v8317_v39  ;;  %v8318_v52 = vmul.f32 %v8230_v42, %v8230_v42  ;;  %v9556_v49 = vpack.c.bf16 %v8230_v42, %v8228_v36  ;;  %v7386_v50 = vpop.f32.mrb[7].mxu0  ;;  %v14758_v53 = vpop.f32.mrb[7].mxu1 }
 0x4e1   :  { %v8333_v54 = vadd.f32 %v8332_v31, %v8316_v41  ;;  %8442 = vst [vmem:[%s14795_s2 + $0x20] sm:$0xff] %v9555_v43  ;;  %v8239_v55 = vadd.f32 %v8238_v35, %v7384_v46  ;;  %v8319_v56 = vmul.f32 %v7384_v46, %v7384_v46  ;;  %v8257_v59 = vadd.f32 %v8256_v38, %v14756_v47 }
 0x4e2   :  { %v8351_v60 = vadd.f32 %v8350_v32, %v8318_v52  ;;  %8443 = vst [vmem:[%s14795_s2 + $0x28] sm:$0xff] %v9556_v49  ;;  %v8321_v57 = vmul.f32 %v14756_v47, %v14756_v47  ;;  %v8248_v58 = vadd.f32 %v8247_v44, %v7386_v50  ;;  %v8320_v61 = vmul.f32 %v7386_v50, %v7386_v50 }
 0x4e3   :  { %v8240_v62 = vrot.slane %v8239_v55, 4  ;;  %v8325_v63 = vadd.f32 %v8324_v48, %v8319_v56  ;;  %v8258_v0 = vrot.slane %v8257_v59, 4  ;;  %v9557_v3 = vpack.c.bf16 %v7386_v50, %v7384_v46 }
 0x4e4   :  { %v8343_v5 = vadd.f32 %v8342_v51, %v8321_v57  ;;  %v8249_v6 = vrot.slane %v8248_v58, 4  ;;  %v8334_v7 = vadd.f32 %v8333_v54, %v8320_v61  ;;  %v8266_v8 = vadd.f32 %v8265_v45, %v14758_v53 }
 0x4e5   :  { %v8241_v11 = vadd.f32 %v8240_v62, %v8239_v55  ;;  %v8326_v12 = vrot.slane %v8325_v63, 4  ;;  %v8259_v4 = vadd.f32 %v8258_v0, %v8257_v59  ;;  %8444 = vst [vmem:[%s14795_s2 + $0x30] sm:$0xff] %v9557_v3  ;;  %v8322_v1 = vmul.f32 %v14758_v53, %v14758_v53 }
 0x4e6   :  { %v8344_v9 = vrot.slane %v8343_v5, 4  ;;  %v8250_v10 = vadd.f32 %v8249_v6, %v8248_v58  ;;  %v8335_v13 = vrot.slane %v8334_v7, 4  ;;  %v8267_v14 = vrot.slane %v8266_v8, 4 }
 0x4e7   :  { %v8242_v15 = vrot.slane %v8241_v11, 2  ;;  %v8327_v16 = vadd.f32 %v8326_v12, %v8325_v63  ;;  %v8260_v19 = vrot.slane %v8259_v4, 2  ;;  %v8352_v17 = vadd.f32 %v8351_v60, %v8322_v1 }
 0x4e8   :  { %v8345_v18 = vadd.f32 %v8344_v9, %v8343_v5  ;;  %v8251_v20 = vrot.slane %v8250_v10, 2  ;;  %v8336_v21 = vadd.f32 %v8335_v13, %v8334_v7  ;;  %v8268_v22 = vadd.f32 %v8267_v14, %v8266_v8 }
 0x4e9   :  { %v8243_v23 = vadd.f32 %v8242_v15, %v8241_v11  ;;  %v8328_v24 = vrot.slane %v8327_v16, 2  ;;  %v8261_v26 = vadd.f32 %v8260_v19, %v8259_v4  ;;  %v8353_v25 = vrot.slane %v8352_v17, 4 }
 0x4ea   :  { %v8346_v27 = vrot.slane %v8345_v18, 2  ;;  %v8252_v28 = vadd.f32 %v8251_v20, %v8250_v10  ;;  %v8337_v29 = vrot.slane %v8336_v21, 2  ;;  %v8269_v30 = vrot.slane %v8268_v22, 2 }
 0x4eb   :  { %v8244_v31 = vrot.slane %v8243_v23, 1  ;;  %v8329_v32 = vadd.f32 %v8328_v24, %v8327_v16  ;;  %v8262_v34 = vrot.slane %v8261_v26, 1  ;;  %v8354_v36 = vadd.f32 %v8353_v25, %v8352_v17 }
 0x4ec   :  { %v8347_v35 = vadd.f32 %v8346_v27, %v8345_v18  ;;  %v8253_v37 = vrot.slane %v8252_v28, 1  ;;  %v8338_v38 = vadd.f32 %v8337_v29, %v8336_v21  ;;  %v8270_v39 = vadd.f32 %v8269_v30, %v8268_v22 }
 0x4ed   :  { %v8245_v40 = vadd.f32 %v8244_v31, %v8243_v23  ;;  %v8330_v42 = vrot.slane %v8329_v32, 1  ;;  %v8263_v44 = vadd.f32 %v8262_v34, %v8261_v26  ;;  %v8355_v41 = vrot.slane %v8354_v36, 2 }
 0x4ee   :  { %v8348_v43 = vrot.slane %v8347_v35, 1  ;;  %v8254_v45 = vadd.f32 %v8253_v37, %v8252_v28  ;;  %v8339_v46 = vrot.slane %v8338_v38, 1  ;;  %v8271_v48 = vrot.slane %v8270_v39, 1 }
 0x4ef   :  { %v8331_v51 = vadd.f32 %v8330_v42, %v8329_v32  ;;  %v8356_v52 = vadd.f32 %v8355_v41, %v8354_v36  ;;  %v9558_v49 = vpack.c.bf16 %v14758_v53, %v14756_v47 }
 0x4f0   :  { %v8277_v50 = vcombine.low %v8245_v40, %v8254_v45  ;;  %v8340_v54 = vadd.f32 %v8339_v46, %v8338_v38  ;;  %v8272_v55 = vadd.f32 %v8271_v48, %v8270_v39  ;;  %v8349_v56 = vadd.f32 %v8348_v43, %v8347_v35 }
 0x4f1   :  { %v8357_v59 = vrot.slane %v8356_v52, 1  ;;  %8445 = vst [vmem:[%s14795_s2 + $0x38] sm:$0xff] %v9558_v49 }
 0x4f2   :  { %v8285_v60 = vrot.slane %v8277_v50, %v14754_v33  ;;  %v8363_v57 = vcombine.low %v8331_v51, %v8340_v54  ;;  %v8278_v58 = vcombine.low %v8263_v44, %v8272_v55 }
 0x4f3   :  { %v8358_v61 = vadd.f32 %v8357_v59, %v8356_v52 }
 0x4f4   :  { %v8292_v62 = vrot.slane %v8278_v58, %v14754_v33  ;;  %v8371_v63 = vrot.slane %v8363_v57, %v14754_v33 }
 0x4f5   :  { %v8364_v0 = vcombine.low %v8349_v56, %v8358_v61 }
 0x4f6   :  { %v8293_v47 = vcombine.low %v8285_v60, %v8292_v62 }
 0x4f7   :  { %v8378_v53 = vrot.slane %v8364_v0, %v14754_v33 }
 0x4f8   :  { %v8300_v3 = vrot.slane %v8293_v47, %v14754_v33 }
 0x4f9   :  { %v8379_v5 = vcombine.low %v8371_v63, %v8378_v53 }
 0x4fa   :  { %8306 = vst.msk [vmem:[%s14796_s3] ss:$2 sm:$0xf] %vm8304_vm0, %v8300_v3 }
 0x4fb   :  { %v8386_v6 = vrot.slane %v8379_v5, %v14754_v33 }
 0x4fd   :  { %9542 = vst.msk [vmem:[%s14796_s3 + $0x1] ss:$2 sm:$0xf] %vm8304_vm0, %v8386_v6 }

</bundles_post_ra>
